<compile_context>
chip_gen: v7x
topology: tpu7x:2x2x1
jax: 0.10.0
libtpu: 0.0.40
codegen_flags: <defaults>
</compile_context>

<pallas_src>
import math
from typing import NamedTuple, Tuple

import jax
import jax.numpy as jnp
from jax.experimental import pallas as pl
from jax.experimental.pallas import tpu as pltpu


class SirenPrepped(NamedTuple):
    """Kernel-ready SIREN parameters.

    `output_linear` is carried alongside the weights so that the constant-fold
    of omega into the last layer and the in-kernel final sin always agree.
    """
    layers: Tuple[Tuple[jax.Array, jax.Array], ...]   # ((W (out,in), b (out,1)), ...)
    output_linear: bool


def _siren_kernel_factory(n_linear, in_ch, output_linear, use_bf16_matmul,
                          in_ch_fma_max=8):
    """Kernel computing the full SIREN MLP in channel-major layout.

    refs = (x_ref, w0, b0, w1, b1, ..., w_last, b_last, o_ref)
      x_ref : (in_ch, tile_n)
      w_i   : (fan_out, fan_in)   (sin pre-scales already folded in)
      b_i   : (fan_out, 1)
      o_ref : (out_ch, tile_n)
    """
    mxu_dtype = jnp.bfloat16 if use_bf16_matmul else jnp.float32

    def kernel(*refs):
        x_ref = refs[0]
        o_ref = refs[-1]
        p = refs[1:-1]

        x = x_ref[...]                      # (in_ch, tile_n) f32
        w0 = p[0][...]                      # (hidden, in_ch)
        b0 = p[1][...]                      # (hidden, 1)

        # ---- layer 0: sin(W0 @ x + b0)  (scale folded into W0/b0) ----
        if in_ch <= in_ch_fma_max:
            # K is tiny: VPU broadcast-FMA (f32 — v5e has no bf16 VPU path),
            # skipping the MXU push/pop round-trip.
            h = w0[:, 0:1] * x[0:1, :]
            for k in range(1, in_ch):
                h = h + w0[:, k:k + 1] * x[k:k + 1, :]
            h = h + b0
        else:
            h = jnp.dot(w0, x, preferred_element_type=jnp.float32) + b0
        h = jnp.sin(h)

        # ---- hidden layers 1..n-2: sin(Wi @ h + bi)  (omega folded) ----
        for li in range(1, n_linear - 1):
            w = p[2 * li][...]
            b = p[2 * li + 1][...]
            hm = jnp.dot(w.astype(mxu_dtype), h.astype(mxu_dtype),
                         preferred_element_type=jnp.float32)
            h = jnp.sin(hm + b)             # bias + sin stay in f32

        # ---- output layer ----
        w = p[2 * (n_linear - 1)][...]
        b = p[2 * (n_linear - 1) + 1][...]
        h = jnp.dot(w.astype(mxu_dtype), h.astype(mxu_dtype),
                    preferred_element_type=jnp.float32) + b
        if not output_linear:
            h = jnp.sin(h)

        o_ref[...] = h.astype(o_ref.dtype)

    return kernel


def init_siren_params(key, in_channels, interm_channels, out_channels,
                      n_layers=4, omega=30.0):
    """Mirror SIREN.__init__ init; weights stored PyTorch-style (fan_out, fan_in)."""
    dims = [in_channels] + [interm_channels] * n_layers + [out_channels]
    params = []
    for i in range(len(dims) - 1):
        fan_in, fan_out = dims[i], dims[i + 1]
        key, kw, kb = jax.random.split(key, 3)
        if i == 0:
            bound_w = 1.0 / in_channels
        else:
            bound_w = math.sqrt(6.0 / interm_channels) / omega
        w = jax.random.uniform(kw, (fan_out, fan_in), jnp.float32,
                               minval=-bound_w, maxval=bound_w)
        # nn.Linear default bias init: U(-1/sqrt(fan_in), 1/sqrt(fan_in))
        bound_b = 1.0 / math.sqrt(fan_in)
        b = jax.random.uniform(kb, (fan_out,), jnp.float32,
                               minval=-bound_b, maxval=bound_b)
        params.append((w, b))
    return params


def prepare_siren_params(params, *, scale=100.0, omega=30.0,
                         output_linear=True) -> SirenPrepped:
    """One-time constant fold: sin(s*(W h + b)) == sin((sW) h + (sb)).

    Returns a SirenPrepped with the output_linear flag baked in, so the
    forward pass cannot be called with a mismatching flag.
    """
    n = len(params)
    prepped = []
    for i, (w, b) in enumerate(params):
        if i == 0:
            s = float(scale)
        elif i < n - 1:
            s = float(omega)
        else:
            s = float(omega) if not output_linear else 1.0
        w_f = jnp.asarray(w, jnp.float32) * s
        b_f = (jnp.asarray(b, jnp.float32) * s).reshape(-1, 1)
        prepped.append((w_f, b_f))
    return SirenPrepped(layers=tuple(prepped), output_linear=bool(output_linear))


def _choose_tile_n(N, tile_n):
    """Lane-dense tile size; keep >= 2 grid steps when N allows (v7x: 2 TCs)."""
    tile_n = max(128, (int(tile_n) // 128) * 128)
    # Smallest lane-multiple tile that still covers N in two steps.
    two_step_cap = max(128, ((pl.cdiv(N, 2) + 127) // 128) * 128)
    return min(tile_n, two_step_cap)


def siren_forward_pallas_cm(x_cn, prepped: SirenPrepped, *, tile_n=2048,
                            use_bf16_matmul=False):
    """Channel-major entry point: x_cn (in_ch, N) f32 -> (out_ch, N).

    No wrapper-side pad or transpose; prefer this when the caller can stay
    channel-major end-to-end.
    """
    in_ch, N = x_cn.shape
    layers = prepped.layers
    out_ch = layers[-1][0].shape[0]
    n_linear = len(layers)

    tile_n = _choose_tile_n(N, tile_n)
    n_tiles = pl.cdiv(N, tile_n)            # partial last block: stores are masked

    kernel = _siren_kernel_factory(n_linear, in_ch, prepped.output_linear,
                                   use_bf16_matmul)

    flat_args = []
    in_specs = [pl.BlockSpec((in_ch, tile_n), lambda i: (0, i))]
    flops = 0
    transcendentals = 0
    param_bytes = 0
    for li, (w, b) in enumerate(layers):
        fan_out, fan_in = w.shape
        flat_args.append(w)
        flat_args.append(b)
        # Constant index maps -> weights stay resident in VMEM across the grid
        # (the pipeliner skips re-DMA when the block index does not change).
        in_specs.append(pl.BlockSpec((fan_out, fan_in), lambda i: (0, 0)))
        in_specs.append(pl.BlockSpec((fan_out, 1), lambda i: (0, 0)))
        flops += (2 * fan_in + 1) * fan_out * N
        if li < n_linear - 1 or not prepped.output_linear:
            transcendentals += fan_out * N
        param_bytes += w.size * 4 + b.size * 4

    out_spec = pl.BlockSpec((out_ch, tile_n), lambda i: (0, i))

    cost = pl.CostEstimate(
        flops=int(flops),
        transcendentals=int(transcendentals),
        bytes_accessed=int(param_bytes + 4 * N * (in_ch + out_ch)),
    )

    # VMEM note: live state is ~a few * 32*tile_n*4 B plus double-buffered
    # (in_ch+out_ch)*tile_n*4 B I/O tiles — comfortably inside the scoped
    # default (16 MiB v5e / 32 MiB v6e+) for any reasonable tile_n; only set
    # vmem_limit_bytes if sweeping tile_n beyond ~8-16K.
    fn = pl.pallas_call(
        kernel,
        out_shape=jax.ShapeDtypeStruct((out_ch, N), x_cn.dtype),
        grid_spec=pltpu.PrefetchScalarGridSpec(
            num_scalar_prefetch=0,
            grid=(n_tiles,),
            in_specs=in_specs,
            out_specs=out_spec,
        ),
        compiler_params=pltpu.CompilerParams(
            dimension_semantics=("parallel",),
        ),
        cost_estimate=cost,
    )
    return fn(x_cn, *flat_args)              # (out_ch, N)


def siren_forward_pallas(x, prepped: SirenPrepped, *, tile_n=2048,
                         use_bf16_matmul=False):
    """PyTorch-layout wrapper: x (N, in_channels) f32 -> (N, out_channels)."""
    out_cn = siren_forward_pallas_cm(x.T, prepped, tile_n=tile_n,
                                     use_bf16_matmul=use_bf16_matmul)
    return out_cn.T


def siren_forward_ref(x, params, *, scale=100.0, omega=30.0, output_linear=True):
    """Pure-JAX reference, mirrors the PyTorch forward (x @ W^T + b)."""
    h = x
    n = len(params)
    for i in range(n - 1):
        w, b = params[i]
        s = scale if i == 0 else omega
        h = jnp.sin(s * (h @ w.T + b))
    w, b = params[-1]
    h = h @ w.T + b
    if not output_linear:
        h = jnp.sin(omega * h)
    return h


if __name__ == "__main__":
    key = jax.random.PRNGKey(0)

    # Small SIREN: 2-D coordinates -> 32 hidden (4 hidden layers) -> 3 outputs.
    in_channels, interm_channels, out_channels = 2, 32, 3
    n_layers = 4
    scale, omega = 100.0, 30.0
    output_linear = True
    # N deliberately NOT a multiple of the tile so the unpadded cdiv grid /
    # masked-tail-store path is exercised.  tile_n=2048 is capped internally
    # so the grid keeps 2 steps (both v7x TensorCores busy).
    N = 1000
    tile_n = 2048

    key, kx, kp = jax.random.split(key, 3)
    x = jax.random.uniform(kx, (N, in_channels), jnp.float32, minval=-1.0, maxval=1.0)
    params = init_siren_params(kp, in_channels, interm_channels, out_channels,
                               n_layers=n_layers, omega=omega)
    prepped = prepare_siren_params(params, scale=scale, omega=omega,
                                   output_linear=output_linear)

    # use_bf16_matmul=True is an optional v6e/v7x MXU-traffic win; kept off by
    # default so the 2e-3 tolerance vs the f32 reference holds on all chips.
    out = siren_forward_pallas(x, prepped, tile_n=tile_n, use_bf16_matmul=False)
    out = jax.block_until_ready(out)

    ref = siren_forward_ref(x, params, scale=scale, omega=omega,
                            output_linear=output_linear)
    assert out.shape == (N, out_channels)
    assert bool(jnp.all(jnp.isfinite(out)))
    max_err = float(jnp.max(jnp.abs(out - ref)))
    assert max_err < 2e-3, f"mismatch vs reference: max abs err = {max_err}"

    # forward returns {'output': h} in the PyTorch module
    result = {"output": out}
    print("KERNEL_OK")
</pallas_src>

<mosaic_0001>
module attributes {stable_mosaic.version = 11 : i64} {
  func.func @kernel(%arg0: i32, %arg1: memref<2x512xf32, #tpu.memory_space<vmem>>, %arg2: memref<32x2xf32, #tpu.memory_space<vmem>>, %arg3: memref<32x1xf32, #tpu.memory_space<vmem>>, %arg4: memref<32x32xf32, #tpu.memory_space<vmem>>, %arg5: memref<32x1xf32, #tpu.memory_space<vmem>>, %arg6: memref<32x32xf32, #tpu.memory_space<vmem>>, %arg7: memref<32x1xf32, #tpu.memory_space<vmem>>, %arg8: memref<32x32xf32, #tpu.memory_space<vmem>>, %arg9: memref<32x1xf32, #tpu.memory_space<vmem>>, %arg10: memref<3x32xf32, #tpu.memory_space<vmem>>, %arg11: memref<3x1xf32, #tpu.memory_space<vmem>>, %arg12: memref<3x512xf32, #tpu.memory_space<vmem>>) attributes {dimension_semantics = [#tpu.dimension_semantics<parallel>], iteration_bounds = array<i64: 2>, scalar_prefetch = 0 : i64, scratch_operands = 0 : i64, tpu.core_type = #tpu.core_type<tc>, window_params = [{transform_indices = @transform_0, window_bounds = array<i64: 2, 512>}, {pipeline_mode = #tpu.pipeline_mode<synchronous>, transform_indices = @transform_1, window_bounds = array<i64: 32, 2>}, {pipeline_mode = #tpu.pipeline_mode<synchronous>, transform_indices = @transform_2, window_bounds = array<i64: 32, 1>}, {pipeline_mode = #tpu.pipeline_mode<synchronous>, transform_indices = @transform_3, window_bounds = array<i64: 32, 32>}, {pipeline_mode = #tpu.pipeline_mode<synchronous>, transform_indices = @transform_4, window_bounds = array<i64: 32, 1>}, {pipeline_mode = #tpu.pipeline_mode<synchronous>, transform_indices = @transform_5, window_bounds = array<i64: 32, 32>}, {pipeline_mode = #tpu.pipeline_mode<synchronous>, transform_indices = @transform_6, window_bounds = array<i64: 32, 1>}, {pipeline_mode = #tpu.pipeline_mode<synchronous>, transform_indices = @transform_7, window_bounds = array<i64: 32, 32>}, {pipeline_mode = #tpu.pipeline_mode<synchronous>, transform_indices = @transform_8, window_bounds = array<i64: 32, 1>}, {pipeline_mode = #tpu.pipeline_mode<synchronous>, transform_indices = @transform_9, window_bounds = array<i64: 3, 32>}, {pipeline_mode = #tpu.pipeline_mode<synchronous>, transform_indices = @transform_10, window_bounds = array<i64: 3, 1>}, {transform_indices = @transform_11, window_bounds = array<i64: 3, 512>}]} {
    %c0 = arith.constant 0 : index
    %c0_0 = arith.constant 0 : index
    %0 = vector.load %arg1[%c0, %c0_0] : memref<2x512xf32, #tpu.memory_space<vmem>>, vector<2x512xf32>
    %c0_1 = arith.constant 0 : index
    %c0_2 = arith.constant 0 : index
    %1 = vector.load %arg2[%c0_1, %c0_2] : memref<32x2xf32, #tpu.memory_space<vmem>>, vector<32x2xf32>
    %c0_3 = arith.constant 0 : index
    %c0_4 = arith.constant 0 : index
    %2 = vector.load %arg3[%c0_3, %c0_4] : memref<32x1xf32, #tpu.memory_space<vmem>>, vector<32x1xf32>
    %3 = vector.extract_strided_slice %1 {offsets = [0, 0], sizes = [32, 1], strides = [1, 1]} : vector<32x2xf32> to vector<32x1xf32>
    %4 = vector.extract_strided_slice %0 {offsets = [0, 0], sizes = [1, 512], strides = [1, 1]} : vector<2x512xf32> to vector<1x512xf32>
    %5 = vector.broadcast %3 : vector<32x1xf32> to vector<32x512xf32>
    %6 = vector.broadcast %4 : vector<1x512xf32> to vector<32x512xf32>
    %7 = arith.mulf %5, %6 : vector<32x512xf32>
    %8 = vector.extract_strided_slice %1 {offsets = [0, 1], sizes = [32, 1], strides = [1, 1]} : vector<32x2xf32> to vector<32x1xf32>
    %9 = vector.extract_strided_slice %0 {offsets = [1, 0], sizes = [1, 512], strides = [1, 1]} : vector<2x512xf32> to vector<1x512xf32>
    %10 = vector.broadcast %8 : vector<32x1xf32> to vector<32x512xf32>
    %11 = vector.broadcast %9 : vector<1x512xf32> to vector<32x512xf32>
    %12 = arith.mulf %10, %11 : vector<32x512xf32>
    %13 = arith.addf %7, %12 : vector<32x512xf32>
    %14 = vector.broadcast %2 : vector<32x1xf32> to vector<32x512xf32>
    %15 = arith.addf %13, %14 : vector<32x512xf32>
    %16 = math.sin %15 : vector<32x512xf32>
    %c0_5 = arith.constant 0 : index
    %c0_6 = arith.constant 0 : index
    %17 = vector.load %arg4[%c0_5, %c0_6] : memref<32x32xf32, #tpu.memory_space<vmem>>, vector<32x32xf32>
    %c0_7 = arith.constant 0 : index
    %c0_8 = arith.constant 0 : index
    %18 = vector.load %arg5[%c0_7, %c0_8] : memref<32x1xf32, #tpu.memory_space<vmem>>, vector<32x1xf32>
    %cst = arith.constant dense<0.000000e+00> : vector<32x512xf32>
    %19 = tpu.matmul %17, %16, %cst {dimension_numbers = #tpu.dot_dimension_numbers<[1], [0], [0], [1], [0, 0, 1, 1], [], []>} : vector<32x32xf32>, vector<32x512xf32>, vector<32x512xf32> -> vector<32x512xf32>
    %20 = vector.broadcast %18 : vector<32x1xf32> to vector<32x512xf32>
    %21 = arith.addf %19, %20 : vector<32x512xf32>
    %22 = math.sin %21 : vector<32x512xf32>
    %c0_9 = arith.constant 0 : index
    %c0_10 = arith.constant 0 : index
    %23 = vector.load %arg6[%c0_9, %c0_10] : memref<32x32xf32, #tpu.memory_space<vmem>>, vector<32x32xf32>
    %c0_11 = arith.constant 0 : index
    %c0_12 = arith.constant 0 : index
    %24 = vector.load %arg7[%c0_11, %c0_12] : memref<32x1xf32, #tpu.memory_space<vmem>>, vector<32x1xf32>
    %cst_13 = arith.constant dense<0.000000e+00> : vector<32x512xf32>
    %25 = tpu.matmul %23, %22, %cst_13 {dimension_numbers = #tpu.dot_dimension_numbers<[1], [0], [0], [1], [0, 0, 1, 1], [], []>} : vector<32x32xf32>, vector<32x512xf32>, vector<32x512xf32> -> vector<32x512xf32>
    %26 = vector.broadcast %24 : vector<32x1xf32> to vector<32x512xf32>
    %27 = arith.addf %25, %26 : vector<32x512xf32>
    %28 = math.sin %27 : vector<32x512xf32>
    %c0_14 = arith.constant 0 : index
    %c0_15 = arith.constant 0 : index
    %29 = vector.load %arg8[%c0_14, %c0_15] : memref<32x32xf32, #tpu.memory_space<vmem>>, vector<32x32xf32>
    %c0_16 = arith.constant 0 : index
    %c0_17 = arith.constant 0 : index
    %30 = vector.load %arg9[%c0_16, %c0_17] : memref<32x1xf32, #tpu.memory_space<vmem>>, vector<32x1xf32>
    %cst_18 = arith.constant dense<0.000000e+00> : vector<32x512xf32>
    %31 = tpu.matmul %29, %28, %cst_18 {dimension_numbers = #tpu.dot_dimension_numbers<[1], [0], [0], [1], [0, 0, 1, 1], [], []>} : vector<32x32xf32>, vector<32x512xf32>, vector<32x512xf32> -> vector<32x512xf32>
    %32 = vector.broadcast %30 : vector<32x1xf32> to vector<32x512xf32>
    %33 = arith.addf %31, %32 : vector<32x512xf32>
    %34 = math.sin %33 : vector<32x512xf32>
    %c0_19 = arith.constant 0 : index
    %c0_20 = arith.constant 0 : index
    %35 = vector.load %arg10[%c0_19, %c0_20] : memref<3x32xf32, #tpu.memory_space<vmem>>, vector<3x32xf32>
    %c0_21 = arith.constant 0 : index
    %c0_22 = arith.constant 0 : index
    %36 = vector.load %arg11[%c0_21, %c0_22] : memref<3x1xf32, #tpu.memory_space<vmem>>, vector<3x1xf32>
    %cst_23 = arith.constant dense<0.000000e+00> : vector<3x512xf32>
    %37 = tpu.matmul %35, %34, %cst_23 {dimension_numbers = #tpu.dot_dimension_numbers<[1], [0], [0], [1], [0, 0, 1, 1], [], []>} : vector<3x32xf32>, vector<32x512xf32>, vector<3x512xf32> -> vector<3x512xf32>
    %38 = vector.broadcast %36 : vector<3x1xf32> to vector<3x512xf32>
    %39 = arith.addf %37, %38 : vector<3x512xf32>
    %c0_24 = arith.constant 0 : index
    %c0_25 = arith.constant 0 : index
    %40 = vector.load %arg12[%c0_24, %c0_25] : memref<3x512xf32, #tpu.memory_space<vmem>>, vector<3x512xf32>
    tpu.vector_store %arg12[%c0_24, %c0_25], %39 {strides = array<i32>} : memref<3x512xf32, #tpu.memory_space<vmem>>, vector<3x512xf32>,
    return
  }
  func.func @transform_0(%arg0: i32) -> (i32, i32) {
    %c0_i32 = arith.constant 0 : i32
    %c0_i32_0 = arith.constant 0 : i32
    return %c0_i32, %arg0 : i32, i32
  }
  func.func @transform_1(%arg0: i32) -> (i32, i32) {
    %c0_i32 = arith.constant 0 : i32
    %c0_i32_0 = arith.constant 0 : i32
    %c0_i32_1 = arith.constant 0 : i32
    return %c0_i32, %c0_i32_0 : i32, i32
  }
  func.func @transform_2(%arg0: i32) -> (i32, i32) {
    %c0_i32 = arith.constant 0 : i32
    %c0_i32_0 = arith.constant 0 : i32
    %c0_i32_1 = arith.constant 0 : i32
    return %c0_i32, %c0_i32_0 : i32, i32
  }
  func.func @transform_3(%arg0: i32) -> (i32, i32) {
    %c0_i32 = arith.constant 0 : i32
    %c0_i32_0 = arith.constant 0 : i32
    %c0_i32_1 = arith.constant 0 : i32
    return %c0_i32, %c0_i32_0 : i32, i32
  }
  func.func @transform_4(%arg0: i32) -> (i32, i32) {
    %c0_i32 = arith.constant 0 : i32
    %c0_i32_0 = arith.constant 0 : i32
    %c0_i32_1 = arith.constant 0 : i32
    return %c0_i32, %c0_i32_0 : i32, i32
  }
  func.func @transform_5(%arg0: i32) -> (i32, i32) {
    %c0_i32 = arith.constant 0 : i32
    %c0_i32_0 = arith.constant 0 : i32
    %c0_i32_1 = arith.constant 0 : i32
    return %c0_i32, %c0_i32_0 : i32, i32
  }
  func.func @transform_6(%arg0: i32) -> (i32, i32) {
    %c0_i32 = arith.constant 0 : i32
    %c0_i32_0 = arith.constant 0 : i32
    %c0_i32_1 = arith.constant 0 : i32
    return %c0_i32, %c0_i32_0 : i32, i32
  }
  func.func @transform_7(%arg0: i32) -> (i32, i32) {
    %c0_i32 = arith.constant 0 : i32
    %c0_i32_0 = arith.constant 0 : i32
    %c0_i32_1 = arith.constant 0 : i32
    return %c0_i32, %c0_i32_0 : i32, i32
  }
  func.func @transform_8(%arg0: i32) -> (i32, i32) {
    %c0_i32 = arith.constant 0 : i32
    %c0_i32_0 = arith.constant 0 : i32
    %c0_i32_1 = arith.constant 0 : i32
    return %c0_i32, %c0_i32_0 : i32, i32
  }
  func.func @transform_9(%arg0: i32) -> (i32, i32) {
    %c0_i32 = arith.constant 0 : i32
    %c0_i32_0 = arith.constant 0 : i32
    %c0_i32_1 = arith.constant 0 : i32
    return %c0_i32, %c0_i32_0 : i32, i32
  }
  func.func @transform_10(%arg0: i32) -> (i32, i32) {
    %c0_i32 = arith.constant 0 : i32
    %c0_i32_0 = arith.constant 0 : i32
    %c0_i32_1 = arith.constant 0 : i32
    return %c0_i32, %c0_i32_0 : i32, i32
  }
  func.func @transform_11(%arg0: i32) -> (i32, i32) {
    %c0_i32 = arith.constant 0 : i32
    %c0_i32_0 = arith.constant 0 : i32
    return %c0_i32, %arg0 : i32, i32
  }
}

</mosaic_0001>

<bundles_post_ra>
// kernel: tpu_custom_call.1
= control target key start
LH: loop header
LB: loop body
LE: loop exit
PB: predicated region body
PF: predicated region fallthrough
CT: control target
= control target key end

     0   :  { %s15877_s0 = inlined_call_operand.vmem [shape: f32[2,1000], index: 0, kind: input, shape index: {}]   ;;  %s15878_s1 = inlined_call_operand.vmem [shape: f32[32,2], index: 1, kind: input, shape index: {}]   ;;  %s15879_s2 = inlined_call_operand.vmem [shape: f32[32,1], index: 2, kind: input, shape index: {}]   ;;  %s15880_s3 = inlined_call_operand.vmem [shape: f32[32,32], index: 3, kind: input, shape index: {}]   ;;  %s15881_s4 = inlined_call_operand.vmem [shape: f32[32,1], index: 4, kind: input, shape index: {}]   ;;  %s15882_s5 = inlined_call_operand.vmem [shape: f32[32,32], index: 5, kind: input, shape index: {}]   ;;  %s15883_s6 = inlined_call_operand.vmem [shape: f32[32,1], index: 6, kind: input, shape index: {}]   ;;  %s15884_s7 = inlined_call_operand.vmem [shape: f32[32,32], index: 7, kind: input, shape index: {}]   ;;  %s15885_s8 = inlined_call_operand.vmem [shape: f32[32,1], index: 8, kind: input, shape index: {}]   ;;  %s15886_s9 = inlined_call_operand.vmem [shape: f32[3,32], index: 9, kind: input, shape index: {}]   ;;  %s15887_s10 = inlined_call_operand.vmem [shape: f32[3,1], index: 10, kind: input, shape index: {}]   ;;  %s15888_s11 = inlined_call_operand.hbm [shape: f32[3,1000], index: 11, kind: output, shape index: {}]  }
   0x1   :  { %16124 = sst [smem:[#allocation45_spill]] %s15877_s0 }
   0x2   :  { %16 = vsyncpa [#allocation3], 0 }
   0x3   :  { %18 = vsyncpa [#allocation3 + $0x1], 0  ;;  %s9196_s17 = smov 0   ;;  %s9198_s18 = smov 0  }
   0x4   :  { %s9200_s19 = smov 0   ;;  %s9202_s20 = smov 0  }
   0x5 LB: > { %s9217_s21 = sadd.s32 4294967295, %s9124_s20   ;;  %s8137_s22 = sadd.s32 4294967294, %s9124_s20   ;;  %s9124_s20 = sphi %s9202_s20, %s16684_s20   ;;  %s9120_s19 = sphi %s9200_s19, %s16683_s19   ;;  %s9116_s18 = sphi %s9198_s18, %s16682_s18   ;;  %s9112_s17 = sphi %s9196_s17, %s16681_s17  }
   0x6   : > { %s9221_s23 = sadd.s32 1, %s9124_s20   ;;  %s267_s24 = sadd.s32 1, %s9120_s19 }
   0x7   : > { %s264_s25 = ssub.s32 %s9124_s20, %s9221_s23  ;;  %p277_p0 = scmp.ne.s32.totalorder %s9120_s19, %s9116_s18 }
   0x8   : > { %p265_p1 = scmp.eq.s32.totalorder %s264_s25, 0  ;;  %p278_p2 = scmp.eq.s32.totalorder %s9217_s21, 1 }
   0x9   : > { %p283_p3 = scmp.ne.s32.totalorder %s9116_s18, %s9112_s17  ;;  %p284_p4 = scmp.eq.s32.totalorder %s8137_s22, 1 }
   0xa   : > { %s9232_s26 = scalar_select %p265_p1, %s9120_s19, %s267_s24  }
   0xb   : > { %p9234_p5 = por %p278_p2, %p277_p0  ;;  %p9238_p6 = por %p284_p4, %p283_p3 }
   0xc   : > { %p8140_p7 = scmp.ge.s32.totalorder %s9124_s20, 1  ;;  %p341_p8 = scmp.lt.s32.totalorder %s9124_s20, 3 }
   0xe   : > { %p342_p9 = pnand %p8140_p7, %p341_p8 }
  0x10   : > { %345 = sbr.rel (%p342_p9) target bundleno = 2672 (0xa70), region = 64 }
  0x17   : > { %v391_v0 = vld [vmem:[%s15878_s1 + $0x10] sm:$0xff]  ;;  %v389_v1 = vld [vmem:[%s15878_s1] sm:$0xff]  ;;  %v418_v2 = vlaneseq  ;;  %s8142_s14 = sshll.u32 %s9217_s21, 2  ;;  %v9126_v3 = vmov 1   ;;  %v390_v5 = vld [vmem:[%s15878_s1 + $0x8] sm:$0xff]  ;;  %v9127_v9 = vmov 0  }
  0x18   : > { %8802 = vset.pattern.permute.xlu0 %v9126_v3  ;;  %8800 = vset.pattern.permute.xlu1 %v9126_v3  ;;  %p382_p10 = scmp.lt.s32.totalorder %s8142_s14, 7  ;;  %s16127_s0 = sld [smem:[#allocation45_spill]]  ;;  %v392_v12 = vld [vmem:[%s15878_s1 + $0x18] sm:$0xff]  ;;  %v394_v21 = vld [vmem:[%s15879_s2 + $0x8] sm:$0xff]  ;;  %v393_v22 = vld [vmem:[%s15879_s2] sm:$0xff] }
  0x19   : > { %479 = vperm.xlu0 %8802, %v391_v0   ;;  %471 = vperm.xlu1 %8800, %v389_v1   ;;  %v9251_v4 = vshrl.u32 %v418_v2, 7  ;;  %v2258_v23 = vld [vmem:[%s15881_s4] sm:$0xff]  ;;  %v395_v24 = vld [vmem:[%s15879_s2 + $0x10] sm:$0xff]  ;;  %v396_v26 = vld [vmem:[%s15879_s2 + $0x18] sm:$0xff]  ;;  %s378_s13 = sand.u32 1, %s9116_s18   ;;  %s8431_s16 = sshll.u32 %s9217_s21, 8 }
  0x1a   : > { %s16686_s14 = smov (!%p382_p10, %s8142_s14), 7  ;;  %v2260_v25 = vld [vmem:[%s15881_s4 + $0x10] sm:$0xff]  ;;  %v4141_v27 = vld [vmem:[%s15883_s6] sm:$0xff]  ;;  %v2259_v28 = vld [vmem:[%s15881_s4 + $0x8] sm:$0xff]  ;;  %s8064_s30 = scalar_lea.sflag [#allocation3], %s378_s13 }
  0x1b   : > { %v9257_v6 = vsub.s32 1, %v9251_v4  ;;  %v496_v7 = vsub.s32 5, %v9251_v4  ;;  %s8143_s22 = sshll.u32 %s16686_s14, 1  ;;  %v9261_v8 = vsub.s32 0, %v9251_v4  ;;  %v428_v10 = vsub.s32 4, %v9251_v4  ;;  %v4143_v29 = vld [vmem:[%s15883_s6 + $0x10] sm:$0xff] }
  0x1c   : > { %v2261_v30 = vld [vmem:[%s15881_s4 + $0x18] sm:$0xff]  ;;  %v6023_v31 = vld [vmem:[%s15885_s8] sm:$0xff]  ;;  %v4142_v32 = vld [vmem:[%s15883_s6 + $0x8] sm:$0xff]  ;;  %v492_v38 = vsub.s32 3, %v9251_v4  ;;  %v500_v39 = vsub.s32 7, %v9251_v4  ;;  %v424_v48 = vsub.s32 2, %v9251_v4 }
  0x1d   : > { %8803 = vset.pattern.permute.xlu0 %v9127_v9  ;;  %475 = vperm.xlu1 %8800, %v390_v5   ;;  %v6025_v33 = vld [vmem:[%s15885_s8 + $0x10] sm:$0xff]  ;;  %v4144_v34 = vld [vmem:[%s15883_s6 + $0x18] sm:$0xff]  ;;  %v7902_v35 = vld [vmem:[%s15887_s10] sm:$0x7]  ;;  %v432_v49 = vsub.s32 6, %v9251_v4  ;;  %s8141_s14 = sshll.u32 %s378_s13, 4 }
  0x1e   : > { %s385_s29 = scalar_lea.vmem %s16127_s0, %s8143_s22  ;;  %399 = vperm.xlu0 %8803, %v389_v1   ;;  %v6024_v36 = vld [vmem:[%s15885_s8 + $0x8] sm:$0xff]  ;;  %v6026_v37 = vld [vmem:[%s15885_s8 + $0x18] sm:$0xff]  ;;  %s380_s15 = scalar_lea.vmem [#allocation2], %s8141_s14 }
  0x1f   : > { %v9267_v11 = vld [vmem:[%s385_s29] sm:$0xff]  ;;  %s8078_s22 = sshll.u32 %s380_s15, 4  ;;  %s15835_s29 = scalar_lea.hbm %s15888_s11, %s8431_s16  ;;  %s15837_s22 = int_to_ptr.vmem [resolvable:$true] %s8078_s22 }
  0x20   : > { %v489_v13 = vrot.slane %v9267_v11, %v9257_v6  ;;  %v497_v14 = vrot.slane %v9267_v11, %v496_v7  ;;  %v421_v15 = vrot.slane %v9267_v11, %v9261_v8  ;;  %v429_v16 = vrot.slane %v9267_v11, %v428_v10  ;;  %s9062_s12 = scalar_lea.vmem %s15837_s22, 256  ;;  %s9135_s21 = smov [#allocation2]  }
  0x21   : > { %8801 = vset.pattern.permute.xlu1 %v9127_v9  ;;  %v493_v40 = vrot.slane %v9267_v11, %v492_v38  ;;  %v501_v41 = vrot.slane %v9267_v11, %v500_v39  ;;  %v425_v58 = vrot.slane %v9267_v11, %v424_v48  ;;  %v433_v59 = vrot.slane %v9267_v11, %v432_v49  ;;  %p9063_p11 = scmp.ne.s32.totalorder %s15837_s22, %s9062_s12  ;;  %s9066_s14 = sshll.u32 %s9135_s21, 4  ;;  %s9067_s14 = int_to_ptr.vmem [resolvable:$false] %s9066_s14 }
  0x22   : > { %v9279_v17 = vrot.slane %v489_v13, %v9257_v6  ;;  %v9282_v18 = vrot.slane %v497_v14, %v9257_v6  ;;  %404 = vperm.xlu0 %8803, %v390_v5   ;;  %414 = vperm.xlu1 %8801, %v392_v12   ;;  %v9285_v19 = vrot.slane %v421_v15, %v9261_v8  ;;  %s9068_s0 = scalar_lea.vmem %s9067_s14, 512  ;;  %p9069_p0 = scmp.lt.s32.totalorder %s15837_s22, %s9067_s14 }
  0x23   : > { %v9288_v20 = vrot.slane %v429_v16, %v9261_v8  ;;  %v9348_v43 = vrot.slane %v493_v40, %v9257_v6  ;;  %v9351_v44 = vrot.slane %v501_v41, %v9257_v6  ;;  %v453_v1 = vrot.slane %v433_v59, %v9261_v8  ;;  %p9064_p12 = pnand %p9063_p11, %p9234_p5  ;;  %p9070_p1 = scmp.lt.s32.totalorder %s9068_s0, %s9062_s12 }
  0x25   : > { %p9065_p13 = pneg %p9064_p12  ;;  %p9071_p2 = por %p9070_p1, %p9069_p0 }
  0x26   : > { %409 = vperm.xlu0 %8803, %v391_v0   ;;  %8804 = vset.pattern.permute.xlu1 %v9126_v3  ;;  %v445_v0 = vrot.slane %v425_v58, %v9261_v8 }
  0x27   : > { %483 = vperm.xlu1 %8804, %v392_v12   ;;  %p9072_p3 = pnand %p9071_p2, %p9065_p13 }
  0x2a   : > { %561 = vperm.xlu0 %8803, %v394_v21  }
  0x2b   : > { %8805 = vset.pattern.permute.xlu1 %v9127_v9 }
  0x2c   : > { %556 = vperm.xlu1 %8805, %v393_v22  }
  0x2e   : > { %2264 = vperm.xlu0 %8803, %v2258_v23  }
  0x30   : > { %566 = vperm.xlu1 %8805, %v395_v24  }
  0x32   : > { %2274 = vperm.xlu0 %8803, %v2260_v25  }
  0x34   : > { %571 = vperm.xlu1 %8805, %v396_v26  }
  0x36   : > { %4147 = vperm.xlu0 %8803, %v4141_v27  }
  0x38   : > { %2269 = vperm.xlu1 %8805, %v2259_v28  }
  0x3a   : > { %4157 = vperm.xlu0 %8803, %v4143_v29  }
  0x3c   : > { %2279 = vperm.xlu1 %8805, %v2261_v30  }
  0x3e   : > { %6029 = vperm.xlu0 %8803, %v6023_v31  }
  0x40   : > { %4152 = vperm.xlu1 %8805, %v4142_v32  }
  0x42   : > { %6039 = vperm.xlu0 %8803, %v6025_v33  }
  0x44   : > { %4162 = vperm.xlu1 %8805, %v4144_v34  }
  0x46   : > { %7905 = vperm.xlu0 %8803, %v7902_v35  }
  0x48   : > { %6034 = vperm.xlu1 %8805, %v6024_v36  }
  0x4c   : > { %6044 = vperm.xlu1 %8805, %v6026_v37  }
  0x98   : > { %v9345_v42 = vpop.permute.xlu1 %471  ;;  %v480_v45 = vpop.permute.xlu0 %479 }
  0x99   : > { %v522_v46 = vmul.f32 %v9279_v17, %v9345_v42  ;;  %v524_v47 = vmul.f32 %v9282_v18, %v9345_v42  ;;  %v530_v50 = vmul.f32 %v9279_v17, %v480_v45  ;;  %v531_v51 = vmul.f32 %v9348_v43, %v480_v45 }
  0x9a   : > { %v532_v52 = vmul.f32 %v9282_v18, %v480_v45  ;;  %v533_v53 = vmul.f32 %v9351_v44, %v480_v45  ;;  %v523_v49 = vmul.f32 %v9348_v43, %v9345_v42 }
  0x9c   : > { %v476_v54 = vpop.permute.xlu1 %475 }
  0x9d   : > { %v526_v55 = vmul.f32 %v9279_v17, %v476_v54  ;;  %v528_v56 = vmul.f32 %v9282_v18, %v476_v54  ;;  %v400_v57 = vpop.permute.xlu0 %399  ;;  %v527_v37 = vmul.f32 %v9348_v43, %v476_v54  ;;  %v529_v39 = vmul.f32 %v9351_v44, %v476_v54 }
  0x9e   : > { %v454_v60 = vmul.f32 %v9285_v19, %v400_v57  ;;  %v456_v61 = vmul.f32 %v9288_v20, %v400_v57 }
  0xa0   : > { %v538_v62 = vadd.f32 %v522_v46, %v454_v60  ;;  %v540_v63 = vadd.f32 %v524_v47, %v456_v61  ;;  %v455_v46 = vmul.f32 %v445_v0, %v400_v57  ;;  %v457_v47 = vmul.f32 %v453_v1, %v400_v57 }
  0xa1   : > { %v405_v2 = vpop.permute.xlu0 %404  ;;  %v415_v3 = vpop.permute.xlu1 %414 }
  0xa2   : > { %v458_v4 = vmul.f32 %v9285_v19, %v405_v2  ;;  %v460_v5 = vmul.f32 %v9288_v20, %v405_v2  ;;  %v466_v6 = vmul.f32 %v9285_v19, %v415_v3  ;;  %v467_v7 = vmul.f32 %v445_v0, %v415_v3 }
  0xa3   : > { %v468_v9 = vmul.f32 %v9288_v20, %v415_v3  ;;  %v469_v10 = vmul.f32 %v453_v1, %v415_v3  ;;  %v461_v38 = vmul.f32 %v453_v1, %v405_v2  ;;  %v539_v54 = vadd.f32 %v523_v49, %v455_v46 }
  0xa4   : > { %v542_v11 = vadd.f32 %v526_v55, %v458_v4  ;;  %v544_v12 = vadd.f32 %v528_v56, %v460_v5 }
  0xa5   : > { %v410_v13 = vpop.permute.xlu0 %409  ;;  %v545_v41 = vadd.f32 %v529_v39, %v461_v38 }
  0xa6   : > { %v462_v14 = vmul.f32 %v9285_v19, %v410_v13  ;;  %v463_v15 = vmul.f32 %v445_v0, %v410_v13  ;;  %v464_v8 = vmul.f32 %v9288_v20, %v410_v13  ;;  %v465_v16 = vmul.f32 %v453_v1, %v410_v13  ;;  %v484_v21 = vpop.permute.xlu1 %483 }
  0xa7   : > { %v534_v22 = vmul.f32 %v9279_v17, %v484_v21  ;;  %v535_v23 = vmul.f32 %v9348_v43, %v484_v21  ;;  %v536_v24 = vmul.f32 %v9282_v18, %v484_v21  ;;  %v537_v25 = vmul.f32 %v9351_v44, %v484_v21 }
  0xa8   : > { %v546_v26 = vadd.f32 %v530_v50, %v462_v14  ;;  %v547_v27 = vadd.f32 %v531_v51, %v463_v15  ;;  %v548_v28 = vadd.f32 %v532_v52, %v464_v8  ;;  %v9381_v29 = vadd.f32 %v533_v53, %v465_v16 }
  0xa9   : > { %v562_v30 = vpop.permute.xlu0 %561  ;;  %v550_v19 = vadd.f32 %v534_v22, %v466_v6  ;;  %v9383_v31 = vadd.f32 %v535_v23, %v467_v7  ;;  %v552_v20 = vadd.f32 %v536_v24, %v468_v9  ;;  %v9385_v32 = vadd.f32 %v537_v25, %v469_v10 }
  0xaa   : > { %v9387_v33 = vadd.f32 %v562_v30, %v542_v11  ;;  %v9389_v17 = vadd.f32 %v562_v30, %v544_v12  ;;  %v459_v18 = vmul.f32 %v445_v0, %v405_v2  ;;  %v9399_v48 = vadd.f32 %v562_v30, %v545_v41 }
  0xab   : > { %v557_v34 = vpop.permute.xlu1 %556  ;;  %v525_v50 = vmul.f32 %v9351_v44, %v9345_v42 }
  0xac   : > { %16128 = vst [vmem:[#allocation5_spill] sm:$0xff] %v9389_v17  ;;  %v9391_v35 = vadd.f32 %v557_v34, %v538_v62  ;;  %v9393_v36 = vadd.f32 %v557_v34, %v540_v63  ;;  %v543_v40 = vadd.f32 %v527_v37, %v459_v18  ;;  %v1009_v51 = vand.u32 2139095040, %v9387_v33 }
  0xad   : > { %v541_v55 = vadd.f32 %v525_v50, %v457_v47  ;;  %v1217_v56 = vand.u32 2139095040, %v9389_v17  ;;  %v1321_v58 = vand.u32 2139095040, %v9399_v48  ;;  %v9409_v57 = vadd.f32 %v557_v34, %v539_v54 }
  0xae   : > { %16129 = vst [vmem:[#allocation6_spill] sm:$0xff] %v9393_v36  ;;  %v9397_v45 = vadd.f32 %v562_v30, %v543_v40  ;;  %v1010_v43 = vshrl.u32 %v1009_v51, 23  ;;  %v593_v1 = vand.u32 2139095040, %v9391_v35  ;;  %v801_v3 = vand.u32 2139095040, %v9393_v36 }
  0xaf   : > { %v567_v53 = vpop.permute.xlu1 %566  ;;  %v9411_v59 = vadd.f32 %v557_v34, %v541_v55  ;;  %v1218_v44 = vshrl.u32 %v1217_v56, 23  ;;  %v1322_v62 = vshrl.u32 %v1321_v58, 23  ;;  %v697_v2 = vand.u32 2139095040, %v9409_v57 }
  0xb0   : > { %v1113_v52 = vand.u32 2139095040, %v9397_v45  ;;  %v9413_v60 = vadd.f32 %v567_v53, %v546_v26  ;;  %v9415_v42 = vadd.f32 %v567_v53, %v547_v27  ;;  %v9417_v63 = vadd.f32 %v567_v53, %v548_v28 }
  0xb1   : > { %v905_v4 = vand.u32 2139095040, %v9411_v59  ;;  %v8160_v5 = vadd.s32 4294967169, %v1010_v43  ;;  %v8168_v11 = vadd.s32 4294967169, %v1218_v44  ;;  %v8172_v12 = vadd.s32 4294967169, %v1322_v62 }
  0xb2   : > { %16130 = vst [vmem:[#allocation7_spill] sm:$0xff] %v9413_v60  ;;  %v1114_v61 = vshrl.u32 %v1113_v52, 23  ;;  %16131 = vst [vmem:[#allocation8_spill] sm:$0xff] %v9415_v42  ;;  %v1425_v7 = vand.u32 2139095040, %v9413_v60  ;;  %v1529_v9 = vand.u32 2139095040, %v9415_v42  ;;  %v594_v14 = vshrl.u32 %v593_v1, 23 }
  0xb3   : > { %16132 = vst [vmem:[#allocation9_spill] sm:$0xff] %v9417_v63  ;;  %v9419_v0 = vpop.permute.xlu1 %571  ;;  %v698_v15 = vshrl.u32 %v697_v2, 23  ;;  %v1016_v21 = vadd.s32 1, %v8160_v5  ;;  %v802_v23 = vshrl.u32 %v801_v3, 23  ;;  %v906_v24 = vshrl.u32 %v905_v4, 23 }
  0xb4   : > { %v8164_v6 = vadd.s32 4294967169, %v1114_v61  ;;  %v9428_v10 = vadd.f32 %v9419_v0, %v550_v19  ;;  %v1426_v13 = vshrl.u32 %v1425_v7, 23  ;;  %v1530_v8 = vshrl.u32 %v1529_v9, 23 }
  0xb5   : > { %v9431_v16 = vadd.f32 %v9419_v0, %v552_v20  ;;  %v1633_v25 = vand.u32 2139095040, %v9417_v63  ;;  %v1224_v26 = vadd.s32 1, %v8168_v11  ;;  %v1328_v28 = vadd.s32 1, %v8172_v12 }
  0xb6   : > { %16133 = vst [vmem:[#allocation10_spill] sm:$0xff] %v9428_v10  ;;  %v1120_v22 = vadd.s32 1, %v8164_v6  ;;  %v8176_v27 = vadd.s32 4294967169, %v1426_v13  ;;  %v8144_v30 = vadd.s32 4294967169, %v594_v14  ;;  %v8148_v19 = vadd.s32 4294967169, %v698_v15 }
  0xb7   : > { %16134 = vst [vmem:[#allocation11_spill] sm:$0xff] %v9431_v16  ;;  %v8180_v34 = vadd.s32 4294967169, %v1530_v8  ;;  %vm1017_vm0 = vcmp.gt.s32.totalorder %v1016_v21, 0  ;;  %v8152_v18 = vadd.s32 4294967169, %v802_v23  ;;  %v8156_v37 = vadd.s32 4294967169, %v906_v24 }
  0xb8   : > { %vm1121_vm1 = vcmp.gt.s32.totalorder %v1120_v22, 0  ;;  %v9435_v38 = vadd.f32 %v567_v53, %v9381_v29  ;;  %v1634_v20 = vshrl.u32 %v1633_v25, 23  ;;  %vm1225_vm2 = vcmp.gt.s32.totalorder %v1224_v26, 0 }
  0xb9   : > { %v1432_v39 = vadd.s32 1, %v8176_v27  ;;  %v1018_v40 = vsel %vm1017_vm0, %v1016_v21, 0  ;;  %v1122_v41 = vsel %vm1121_vm1, %v1120_v22, 0  ;;  %vm1329_vm3 = vcmp.gt.s32.totalorder %v1328_v28, 0 }
  0xba   : > { %16135 = vst [vmem:[#allocation12_spill] sm:$0xff] %v9435_v38  ;;  %v1536_v46 = vadd.s32 1, %v8180_v34  ;;  %v600_v47 = vadd.s32 1, %v8144_v30  ;;  %v704_v49 = vadd.s32 1, %v8148_v19  ;;  %v808_v50 = vadd.s32 1, %v8152_v18 }
  0xbb   : > { %v912_v51 = vadd.s32 1, %v8156_v37  ;;  %v8184_v52 = vadd.s32 4294967169, %v1634_v20  ;;  %v1737_v54 = vand.u32 2139095040, %v9435_v38  ;;  %v1226_v55 = vsel %vm1225_vm2, %v1224_v26, 0 }
  0xbc   : > { %v1330_v56 = vsel %vm1329_vm3, %v1328_v28, 0  ;;  %vm1433_vm4 = vcmp.gt.s32.totalorder %v1432_v39, 0  ;;  %v9438_v58 = vshrl.u32 %v1018_v40, 5  ;;  %v9440_v29 = vand.u32 31, %v1018_v40 }
  0xbd   : > { %v9442_v53 = vshrl.u32 %v1122_v41, 5  ;;  %vm1537_vm5 = vcmp.gt.s32.totalorder %v1536_v46, 0  ;;  %vm601_vm6 = vcmp.gt.s32.totalorder %v600_v47, 0  ;;  %vm705_vm7 = vcmp.gt.s32.totalorder %v704_v49, 0 }
  0xbe   : > { %16136 = vst [vmem:[#allocation13_spill] sm:$0xff] %v9438_v58  ;;  %vm809_vm8 = vcmp.gt.s32.totalorder %v808_v50, 0  ;;  %vm913_vm9 = vcmp.gt.s32.totalorder %v912_v51, 0  ;;  %v1434_v43 = vsel %vm1433_vm4, %v1432_v39, 0  ;;  %v1640_v61 = vadd.s32 1, %v8184_v52 }
  0xbf   : > { %v1738_v44 = vshrl.u32 %v1737_v54, 23  ;;  %v9446_v62 = vadd.f32 %v9419_v0, %v9383_v31  ;;  %v9448_v1 = vand.u32 31, %v1122_v41  ;;  %v9450_v2 = vshrl.u32 %v1226_v55, 5 }
  0xc0   : > { %v9452_v3 = vand.u32 31, %v1226_v55  ;;  %v1538_v4 = vsel %vm1537_vm5, %v1536_v46, 0  ;;  %v9454_v5 = vshrl.u32 %v1330_v56, 5  ;;  %v9456_v6 = vand.u32 31, %v1330_v56 }
  0xc1   : > { %16137 = vst [vmem:[#allocation14_spill] sm:$0xff] %v9446_v62  ;;  %16138 = vst [vmem:[#allocation15_spill] sm:$0xff] %v9450_v2  ;;  %v602_v7 = vsel %vm601_vm6, %v600_v47, 0  ;;  %v706_v9 = vsel %vm705_vm7, %v704_v49, 0  ;;  %v810_v11 = vsel %vm809_vm8, %v808_v50, 0  ;;  %v914_v12 = vsel %vm913_vm9, %v912_v51, 0 }
  0xc2   : > { %16139 = vst [vmem:[#allocation16_spill] sm:$0xff] %v9452_v3  ;;  %v9458_v13 = vand.u32 31, %v1434_v43  ;;  %v1841_v31 = vand.u32 2139095040, %v9428_v10  ;;  %v9461_v14 = vand.u32 31, %v1538_v4  ;;  %vm1641_vm10 = vcmp.gt.s32.totalorder %v1640_v61, 0 }
  0xc3   : > { %v8188_v15 = vadd.s32 4294967169, %v1738_v44  ;;  %v1945_v8 = vand.u32 2139095040, %v9446_v62  ;;  %v9465_v21 = vsub.s32 32, %v9440_v29  ;;  %v9468_v22 = vsub.s32 32, %v9448_v1 }
  0xc4   : > { %16140 = vst [vmem:[#allocation17_spill] sm:$0xff] %v9458_v13  ;;  %16141 = vst [vmem:[#allocation18_spill] sm:$0xff] %v9461_v14  ;;  %v9470_v23 = vand.u32 31, %v602_v7  ;;  %v9472_v24 = vand.u32 31, %v706_v9  ;;  %v9475_v25 = vsub.s32 32, %v9452_v3  ;;  %v9478_v26 = vsub.s32 32, %v9456_v6 }
  0xc5   : > { %v9480_v27 = vand.u32 31, %v810_v11  ;;  %v9482_v28 = vand.u32 31, %v914_v12  ;;  %v9485_v30 = vsub.s32 32, %v9458_v13  ;;  %v1642_v19 = vsel %vm1641_vm10, %v1640_v61, 0 }
  0xc6   : > { %16142 = vst [vmem:[#allocation19_spill] sm:$0xff] %v9475_v25  ;;  %v9489_v34 = vadd.f32 %v9419_v0, %v9385_v32  ;;  %v1842_v18 = vshrl.u32 %v1841_v31, 23  ;;  %v9491_v37 = vshrl.u32 %v602_v7, 5  ;;  %v9494_v20 = vsub.s32 32, %v9461_v14 }
  0xc7   : > { %16143 = vst [vmem:[#allocation20_spill] sm:$0xff] %v9480_v27  ;;  %16144 = vst [vmem:[#allocation21_spill] sm:$0xff] %v9485_v30  ;;  %v1744_v39 = vadd.s32 1, %v8188_v15  ;;  %v1946_v40 = vshrl.u32 %v1945_v8, 23  ;;  %v9497_v41 = vsub.s32 32, %v9470_v23  ;;  %v9499_v46 = vshrl.u32 %v706_v9, 5 }
  0xc8   : > { %16145 = vst [vmem:[#allocation22_spill] sm:$0xff] %v9489_v34  ;;  %16146 = vst [vmem:[#allocation23_spill] sm:$0xff] %v9494_v20  ;;  %v9502_v47 = vsub.s32 32, %v9472_v24  ;;  %v9504_v49 = vshrl.u32 %v810_v11, 5  ;;  %v9507_v32 = vsub.s32 32, %v9480_v27  ;;  %v9509_v0 = vshrl.u32 %v914_v12, 5 }
  0xc9   : > { %v9511_v50 = vand.u32 31, %v1642_v19  ;;  %v2049_v51 = vand.u32 2139095040, %v9431_v16  ;;  %v9515_v52 = vsub.s32 32, %v9482_v28  ;;  %v15912_v54 = vmov 920167782  }
  0xca   : > { %16147 = vst [vmem:[#allocation24_spill] sm:$0xff] %v9504_v49  ;;  %16148 = vst [vmem:[#allocation25_spill] sm:$0xff] %v9507_v32  ;;  %v1449_v55 = vshrl.u32 %v15912_v54, %v9485_v30  ;;  %v8192_v56 = vadd.s32 4294967169, %v1842_v18  ;;  %v2153_v61 = vand.u32 2139095040, %v9489_v34  ;;  %v15899_v44 = vmov 1326507024  }
  0xcb   : > { %16149 = vst [vmem:[#allocation26_spill] sm:$0xff] %v9511_v50  ;;  %v1452_v7 = vshrl.u32 %v15899_v44, %v9485_v30  ;;  %v1553_v9 = vshrl.u32 %v15912_v54, %v9494_v20  ;;  %vm1745_vm11 = vcmp.gt.s32.totalorder %v1744_v39, 0  ;;  %v8196_v11 = vadd.s32 4294967169, %v1946_v40 }
  0xcc   : > { %v9524_v12 = vshrl.u32 %v1434_v43, 5  ;;  %v15905_v31 = vmov 2102212464   ;;  %v9528_v8 = vshrl.u32 %v1538_v4, 5  ;;  %v1556_v18 = vshrl.u32 %v15899_v44, %v9494_v20 }
  0xcd   : > { %v1448_v15 = vshll.u32 %v15905_v31, %v9458_v13  ;;  %v1451_v16 = vshll.u32 %v15912_v54, %v9458_v13  ;;  %v1552_v63 = vshll.u32 %v15905_v31, %v9461_v14  ;;  %v9537_v10 = vsub.s32 32, %v9511_v50 }
  0xce   : > { %16150 = vst [vmem:[#allocation27_spill] sm:$0xff] %v9524_v12  ;;  %16151 = vst [vmem:[#allocation28_spill] sm:$0xff] %v9528_v8  ;;  %v9539_v43 = vshrl.u32 %v2049_v51, 23  ;;  %v1555_v4 = vshll.u32 %v15912_v54, %v9461_v14  ;;  %v1746_v30 = vsel %vm1745_vm11, %v1744_v39, 0  ;;  %v9545_v60 = vshrl.u32 %v2153_v61, 23 }
  0xcf   : > { %16152 = vst [vmem:[#allocation29_spill] sm:$0xff] %v9537_v10  ;;  %v9541_v40 = vor.u32 %v1449_v55, %v1448_v15  ;;  %v1453_v44 = vor.u32 %v1452_v7, %v1451_v16  ;;  %v9547_v34 = vor.u32 %v1553_v9, %v1552_v63  ;;  %v9549_v13 = vadd.s32 1, %v8192_v56 }
  0xd0   : > { %v15916_v31 = vand.u32 2147483647, %v9409_v57  ;;  %vm1457_vm12 = vcmp.lt.s32.totalorder %v9524_v12, 4  ;;  %v1557_v38 = vor.u32 %v1556_v18, %v1555_v4  ;;  %vm1561_vm13 = vcmp.lt.s32.totalorder %v9528_v8, 4 }
  0xd1   : > { %16153 = vst [vmem:[#allocation30_spill] sm:$0xff] %v9541_v40  ;;  %16154 = vst [vmem:[#allocation31_spill] sm:$0xff] %v9547_v34  ;;  %v9554_v51 = vadd.s32 1, %v8196_v11  ;;  %v9556_v55 = vshrl.u32 %v1642_v19, 5  ;;  %v1657_v39 = vshrl.u32 %v15912_v54, %v9537_v10  ;;  %v16156_v16 = vmov 1326507024  }
  0xd2   : > { %v9562_v63 = vshrl.u32 %v16156_v16, %v9537_v10  ;;  %v9564_v56 = vand.u32 31, %v1746_v30  ;;  %v9569_v61 = vsel %vm1457_vm12, %v9541_v40, 920167782  ;;  %v16159_v7 = vmov 2102212464  }
  0xd3   : > { %16155 = vst [vmem:[#allocation32_spill] sm:$0xff] %v9556_v55  ;;  %16158 = vst [vmem:[#allocation34_spill] sm:$0xff] %v9569_v61  ;;  %v1656_v9 = vshll.u32 %v16159_v7, %v9511_v50  ;;  %v9575_v19 = vshll.u32 %v15912_v54, %v9511_v50  ;;  %v9577_v11 = vshrl.u32 %v1746_v30, 5  ;;  %v9581_v15 = vsel %vm1457_vm12, %v1453_v44, 1326507024 }
  0xd4   : > { %16157 = vst [vmem:[#allocation33_spill] sm:$0xff] %v9564_v56  ;;  %16160 = vst [vmem:[#allocation35_spill] sm:$0xff] %v9581_v15  ;;  %v9586_v18 = vsel %vm1561_vm13, %v9547_v34, 920167782  ;;  %v701_v4 = vand.u32 8388607, %v15916_v31 }
  0xd5   : > { %16161 = vst [vmem:[#allocation36_spill] sm:$0xff] %v9586_v18  ;;  %v15924_v10 = vmov 2475754826   ;;  %v9594_v30 = vsel %vm1561_vm13, %v1557_v38, 1326507024  ;;  %v9602_v31 = vor.u32 %v1657_v39, %v1656_v9  ;;  %v9607_v62 = vsub.s32 32, %v9564_v56 }
  0xd6   : > { %v712_v40 = vshrl.u32 %v15924_v10, %v9502_v47  ;;  %16162 = vst [vmem:[#allocation37_spill] sm:$0xff] %v9594_v30  ;;  %v15921_v54 = vmov 683565275   ;;  %v714_v50 = vshll.u32 %v15924_v10, %v9472_v24  ;;  %v15928_v15 = vmov 2131351028  }
  0xd7   : > { %v711_v44 = vshll.u32 %v15921_v54, %v9472_v24  ;;  %v715_v61 = vshrl.u32 %v15928_v15, %v9502_v47  ;;  %16163 = vst [vmem:[#allocation38_spill] sm:$0xff] %v9602_v31  ;;  %16164 = vst [vmem:[#allocation39_spill] sm:$0xff] %v9607_v62  ;;  %v9611_v38 = vshll.u32 %v16159_v7, %v9564_v56  ;;  %v16165_v39 = vmov 920167782  }
  0xd8   : > { %v717_v10 = vshll.u32 %v15928_v15, %v9472_v24  ;;  %v718_v30 = vshrl.u32 %v16159_v7, %v9502_v47  ;;  %v9619_v9 = vshll.u32 %v16165_v39, %v9564_v56  ;;  %v702_v12 = vor.u32 8388608, %v701_v4 }
  0xd9   : > { %v713_v54 = vor.u32 %v712_v40, %v711_v44  ;;  %v716_v34 = vor.u32 %v715_v61, %v714_v50  ;;  %v720_v18 = vshll.u32 %v16159_v7, %v9472_v24  ;;  %v721_v8 = vshrl.u32 %v16165_v39, %v9502_v47 }
  0xda   : > { %v16166_v40 = vmov 683565275   ;;  %v719_v61 = vor.u32 %v718_v30, %v717_v10  ;;  %v723_v44 = vshll.u32 %v16165_v39, %v9472_v24  ;;  %v724_v15 = vshrl.u32 %v16156_v16, %v9502_v47 }
  0xdb   : > { %v710_v50 = vshrl.u32 %v16166_v40, %v9502_v47  ;;  %v722_v14 = vor.u32 %v721_v8, %v720_v18  ;;  %vm726_vm14 = vcmp.lt.s32.totalorder %v9499_v46, 1  ;;  %vm728_vm15 = vcmp.lt.s32.totalorder %v9499_v46, 3 }
  0xdc   : > { %vm729_vm0 = vcmp.lt.s32.totalorder %v9499_v46, 4  ;;  %v725_v4 = vor.u32 %v724_v15, %v723_v44  ;;  %v734_v42 = vsel %vm726_vm14, %v713_v54, %v716_v34  ;;  %v9636_v10 = vshrl.u32 %v16165_v39, %v9607_v62 }
  0xdd   : > { %v730_v56 = vsel %vm726_vm14, %v710_v50, %v713_v54  ;;  %v731_v20 = vsel %vm729_vm0, %v719_v61, 2102212464  ;;  %v735_v30 = vsel %vm729_vm0, %v722_v14, 920167782  ;;  %v738_v47 = vsel %vm726_vm14, %v716_v34, %v719_v61 }
  0xde   : > { %v732_v24 = vsel %vm728_vm15, %v716_v34, %v731_v20  ;;  %vm727_vm1 = vcmp.lt.s32.totalorder %v9499_v46, 2  ;;  %v736_v8 = vsel %vm728_vm15, %v719_v61, %v735_v30  ;;  %v739_v18 = vsel %vm729_vm0, %v725_v4, 1326507024 }
  0xdf   : > { %v742_v2 = vshll.u32 %v702_v12, 8  ;;  %v733_v15 = vsel %vm727_vm1, %v730_v56, %v732_v24  ;;  %v737_v50 = vsel %vm727_vm1, %v734_v42, %v736_v8  ;;  %v740_v54 = vsel %vm728_vm15, %v722_v14, %v739_v18 }
  0xe0   : > { %v15942_v44 = vand.u32 2147483647, %v9397_v45  ;;  %v9648_v25 = vshrl.u32 %v16156_v16, %v9607_v62  ;;  %v741_v20 = vsel %vm727_vm1, %v738_v47, %v740_v54  ;;  %vm1849_vm2 = vcmp.gt.s32.totalorder %v9549_v13, 0 }
  0xe1   : > { %v9650_v34 = vmul.u32.u64.low %v742_v2, %v737_v50  ;;  %v9651_v3 = vmul.u32.u64.high %v742_v2, %v737_v50, %v9650_v34  ;;  %v9655_v61 = vmul.u32.u64.low %v742_v2, %v741_v20  ;;  %v9656_v12 = vmul.u32.u64.high %v742_v2, %v741_v20, %v9655_v61 }
  0xe2   : > { %v1117_v42 = vand.u32 8388607, %v15942_v44  ;;  %vm1953_vm3 = vcmp.gt.s32.totalorder %v9554_v51, 0  ;;  %v749_v14 = vmul.u32 %v742_v2, %v733_v15  ;;  %v1127_v46 = vshll.u32 %v16166_v40, %v9448_v1 }
  0xe3   : > { %v16167_v56 = vmov 2475754826   ;;  %v16168_v30 = vmov 2131351028   ;;  %v1134_v18 = vshrl.u32 %v16159_v7, %v9468_v22  ;;  %v752_v2 = vadd.s32 1, %v9651_v3 }
  0xe4   : > { %v1128_v4 = vshrl.u32 %v16167_v56, %v9468_v22  ;;  %v1130_v24 = vshll.u32 %v16167_v56, %v9448_v1  ;;  %v1131_v47 = vshrl.u32 %v16168_v30, %v9468_v22  ;;  %v1133_v8 = vshll.u32 %v16168_v30, %v9448_v1 }
  0xe5   : > { %v1136_v50 = vshll.u32 %v16159_v7, %v9448_v1  ;;  %v1137_v54 = vshrl.u32 %v16165_v39, %v9468_v22  ;;  %vm1665_vm4 = vcmp.lt.s32.totalorder %v9556_v55, 4  ;;  %vm751_vm5 = vc.u32 %v9656_v12, %v9650_v34 }
  0xe6   : > { %v1129_v15 = vor.u32 %v1128_v4, %v1127_v46  ;;  %v1118_v20 = vor.u32 8388608, %v1117_v42  ;;  %v1132_v61 = vor.u32 %v1131_v47, %v1130_v24  ;;  %v1135_v44 = vor.u32 %v1134_v18, %v1133_v8 }
  0xe7   : > { %v753_v62 = vsel %vm751_vm5, %v752_v2, %v9651_v3  ;;  %v1138_v17 = vor.u32 %v1137_v54, %v1136_v50  ;;  %v1139_v46 = vshll.u32 %v16165_v39, %v9448_v1  ;;  %v1140_v4 = vshrl.u32 %v16156_v16, %v9468_v22 }
  0xe8   : > { %v754_v49 = vadd.s32 %v753_v62, %v749_v14  ;;  %v1126_v32 = vshrl.u32 %v16166_v40, %v9468_v22  ;;  %vm1142_vm6 = vcmp.lt.s32.totalorder %v9442_v53, 1  ;;  %vm1143_vm7 = vcmp.lt.s32.totalorder %v9442_v53, 2 }
  0xe9   : > { %v1141_v42 = vor.u32 %v1140_v4, %v1139_v46  ;;  %vm1144_vm8 = vcmp.lt.s32.totalorder %v9442_v53, 3  ;;  %vm1145_vm9 = vcmp.lt.s32.totalorder %v9442_v53, 4  ;;  %v1150_v3 = vsel %vm1142_vm6, %v1129_v15, %v1132_v61 }
  0xea   : > { %vm1769_vm10 = vcmp.lt.s32.totalorder %v9577_v11, 4  ;;  %v755_v1 = vadd.s32 536870912, %v754_v49  ;;  %v1147_v24 = vsel %vm1145_vm9, %v1135_v44, 2102212464  ;;  %v1151_v47 = vsel %vm1145_vm9, %v1138_v17, 920167782 }
  0xeb   : > { %v1154_v8 = vsel %vm1142_vm6, %v1132_v61, %v1135_v44  ;;  %v1146_v62 = vsel %vm1142_vm6, %v1126_v32, %v1129_v15  ;;  %v1152_v14 = vsel %vm1144_vm8, %v1135_v44, %v1151_v47  ;;  %v1155_v18 = vsel %vm1145_vm9, %v1141_v42, 1326507024 }
  0xec   : > { %v1158_v22 = vshll.u32 %v1118_v20, 8  ;;  %v756_v2 = vshrl.u32 %v755_v1, 30  ;;  %v1148_v50 = vsel %vm1144_vm8, %v1132_v61, %v1147_v24  ;;  %v1153_v54 = vsel %vm1143_vm7, %v1150_v3, %v1152_v14 }
  0xed   : > { %v1156_v46 = vsel %vm1144_vm8, %v1138_v17, %v1155_v18  ;;  %v1850_v4 = vsel %vm1849_vm2, %v9549_v13, 0  ;;  %v1954_v32 = vsel %vm1953_vm3, %v9554_v51, 0  ;;  %v9713_v17 = vsel %vm1665_vm4, %v9602_v31, 920167782 }
  0xee   : > { %v1157_v27 = vsel %vm1143_vm7, %v1154_v8, %v1156_v46  ;;  %v9700_v36 = vmul.u32.u64.low %v1158_v22, %v1153_v54  ;;  %v9701_v58 = vmul.u32.u64.high %v1158_v22, %v1153_v54, %v9700_v36  ;;  %v757_v44 = vshll.u32 %v756_v2, 30  ;;  %16169 = vst [vmem:[#allocation40_spill] sm:$0xff] %v9713_v17 }
  0xef   : > { %v9707_v15 = vmul.u32.u64.low %v1158_v22, %v1157_v27  ;;  %v9708_v20 = vmul.u32.u64.high %v1158_v22, %v1157_v27, %v9707_v15  ;;  %v16170_v13 = vor.u32 %v9562_v63, %v9575_v19  ;;  %v9724_v42 = vor.u32 %v9636_v10, %v9611_v38 }
  0xf0   : > { %v1149_v27 = vsel %vm1143_vm7, %v1146_v62, %v1148_v50  ;;  %v1765_v51 = vor.u32 %v9648_v25, %v9619_v9  ;;  %v9730_v3 = vshrl.u32 %v1850_v4, 5  ;;  %v9732_v1 = vand.u32 31, %v1850_v4 }
  0xf1   : > { %v9720_v61 = vsel %vm1665_vm4, %v16170_v13, 1326507024  ;;  %v9734_v24 = vsub.s32 %v754_v49, %v757_v44  ;;  %v9736_v63 = vshrl.u32 %v1954_v32, 5  ;;  %v9738_v19 = vand.u32 31, %v1954_v32 }
  0xf2   : > { %16171 = vst [vmem:[#allocation41_spill] sm:$0xff] %v9720_v61  ;;  %16172 = vst [vmem:[#allocation42_spill] sm:$0xff] %v9730_v3  ;;  %v780_v47 = vsub.s32 4, %v756_v2  ;;  %v1168_v38 = vadd.s32 1, %v9701_v58  ;;  %v1165_v53 = vmul.u32 %v1158_v22, %v1149_v27  ;;  %vm1167_vm11 = vc.u32 %v9708_v20, %v9700_v36 }
  0xf3   : > { %16173 = vst [vmem:[#allocation43_spill] sm:$0xff] %v9732_v1  ;;  %v760_v10 = vsub.s32 0, %v9734_v24  ;;  %v15954_v25 = vand.u32 2147483647, %v9411_v59  ;;  %v9748_v49 = vsel %vm1769_vm10, %v9724_v42, 920167782  ;;  %v918_v32 = vshrl.u32 %v16166_v40, %v9515_v52 }
  0xf4   : > { %v9751_v9 = vadd.s32 4294967169, %v9539_v43  ;;  %v9754_v8 = vadd.s32 4294967169, %v9545_v60  ;;  %v1169_v62 = vsel %vm1167_vm11, %v1168_v38, %v9701_v58  ;;  %v9759_v14 = vsel %vm1769_vm10, %v1765_v51, 1326507024 }
  0xf5   : > { %vm696_vm14 = vcmp.lt.s32.totalorder %v9409_v57, 0  ;;  %v8149_v18 = vmin.u32 %v760_v10, %v9734_v24  ;;  %v1170_v22 = vadd.s32 %v1169_v62, %v1165_v53  ;;  %v16174_v50 = vand.u32 2147483647, %v9409_v57 }
  0xf6   : > { %v750_v60 = vadd.s32 %v9650_v34, %v9656_v12  ;;  %v781_v58 = vsel %vm696_vm14, %v780_v47, %v756_v2  ;;  %v929_v43 = vshrl.u32 %v16165_v39, %v9515_v52  ;;  %v909_v4 = vand.u32 8388607, %v15954_v25 }
  0xf7   : > { %vm9765_vm15 = vcmp.le.f32.partialorder %v16174_v50, 0.7853982  ;;  %v762_v46 = vclz %v8149_v18  ;;  %v920_v44 = vshrl.u32 %v16167_v56, %v9515_v52  ;;  %v1171_v15 = vadd.s32 536870912, %v1170_v22 }
  0xf8   : > { %v923_v34 = vshrl.u32 %v16168_v30, %v9515_v52  ;;  %v926_v12 = vshrl.u32 %v16159_v7, %v9515_v52  ;;  %v928_v2 = vshll.u32 %v16159_v7, %v9482_v28  ;;  %v783_v27 = vsel %vm9765_vm15, 0, %v781_v58 }
  0xf9   : > { %v8150_v13 = vadd.s32 4294967294, %v762_v46  ;;  %v919_v51 = vshll.u32 %v16166_v40, %v9482_v28  ;;  %v932_v47 = vshrl.u32 %v16156_v16, %v9515_v52  ;;  %v1172_v38 = vshrl.u32 %v1171_v15, 30 }
  0xfa   : > { %v922_v10 = vshll.u32 %v16167_v56, %v9482_v28  ;;  %v925_v53 = vshll.u32 %v16168_v30, %v9482_v28  ;;  %v930_v62 = vor.u32 %v929_v43, %v928_v2  ;;  %vm1112_vm1 = vcmp.lt.s32.totalorder %v9397_v45, 0 }
  0xfb   : > { %vm8151_vm0 = vcmp.lt.s32.totalorder %v8150_v13, 0  ;;  %v910_v18 = vor.u32 8388608, %v909_v4  ;;  %v921_v50 = vor.u32 %v920_v44, %v919_v51  ;;  %v931_v58 = vshll.u32 %v16165_v39, %v9482_v28 }
  0xfc   : > { %v765_v46 = vsel %vm8151_vm0, 0, %v8150_v13  ;;  %v1173_v25 = vshll.u32 %v1172_v38, 30  ;;  %v924_v17 = vor.u32 %v923_v34, %v922_v10  ;;  %v927_v52 = vor.u32 %v926_v12, %v925_v53 }
  0xfd   : > { %v766_v15 = vsub.s32 32, %v765_v46  ;;  %v770_v31 = vsub.s32 4294967266, %v765_v46  ;;  %v933_v61 = vor.u32 %v932_v47, %v931_v58  ;;  %vm937_vm2 = vcmp.lt.s32.totalorder %v9509_v0, 4 }
  0xfe   : > { %v9801_v55 = vsub.s32 %v1170_v22, %v1173_v25  ;;  %vm934_vm3 = vcmp.lt.s32.totalorder %v9509_v0, 1  ;;  %vm936_vm5 = vcmp.lt.s32.totalorder %v9509_v0, 3  ;;  %v943_v43 = vsel %vm937_vm2, %v930_v62, 920167782 }
  0xff   : > { %v767_v28 = vshll.u32 %v9734_v24, %v765_v46  ;;  %v768_v4 = vshrl.u32 %v750_v60, %v766_v15  ;;  %v771_v44 = vadd.s32 127, %v770_v31  ;;  %v1196_v34 = vsub.s32 4, %v1172_v38 }
 0x100   : > { %v1176_v12 = vsub.s32 0, %v9801_v55  ;;  %v942_v2 = vsel %vm934_vm3, %v921_v50, %v924_v17  ;;  %v944_v25 = vsel %vm936_vm5, %v927_v52, %v943_v43  ;;  %v946_v22 = vsel %vm934_vm3, %v924_v17, %v927_v52 }
 0x101   : > { %v769_v13 = vor.u32 %v768_v4, %v767_v28  ;;  %v772_v51 = vshll.u32 %v771_v44, 23  ;;  %v939_v47 = vsel %vm937_vm2, %v927_v52, 2102212464  ;;  %v947_v31 = vsel %vm937_vm2, %v933_v61, 1326507024 }
 0x102   : > { %v787_v24 = vadd.s32 3, %v783_v27  ;;  %v8165_v60 = vmin.u32 %v1176_v12, %v9801_v55  ;;  %vm935_vm6 = vcmp.lt.s32.totalorder %v9509_v0, 2  ;;  %v948_v10 = vsel %vm936_vm5, %v930_v62, %v947_v31 }
 0x103   : > { %v773_v53 = vor.u32 4788187, %v772_v51  ;;  %v945_v58 = vsel %vm935_vm6, %v942_v2, %v944_v25  ;;  %v949_v46 = vsel %vm935_vm6, %v946_v22, %v948_v10  ;;  %v950_v15 = vshll.u32 %v910_v18, 8 }
 0x104   : > { %v1178_v52 = vclz %v8165_v60  ;;  %v1197_v61 = vsel %vm1112_vm1, %v1196_v34, %v1172_v38  ;;  %v938_v27 = vsel %vm934_vm3, %v918_v32, %v921_v50  ;;  %v940_v43 = vsel %vm936_vm5, %v924_v17, %v939_v47 }
 0x105   : > { %v774_v28 = vand.u32 2147483647, %v773_v53  ;;  %v776_v62 = vcvt.s32.f32 %v769_v13  ;;  %v9833_v4 = vmul.u32.u64.low %v950_v15, %v949_v46  ;;  %v9834_v44 = vmul.u32.u64.high %v950_v15, %v949_v46, %v9833_v4 }
 0x106   : > { %v16177_v12 = vand.u32 2147483647, %v9397_v45  ;;  %v8166_v18 = vadd.s32 4294967294, %v1178_v52  ;;  %v9842_v25 = vmul.u32.u64.low %v950_v15, %v945_v58  ;;  %v9843_v38 = vmul.u32.u64.high %v950_v15, %v945_v58, %v9842_v25 }
 0x107   : > { %v9847_v32 = vsub.s32 32, %v9732_v1  ;;  %v777_v17 = vmul.f32 %v776_v62, %v774_v28  ;;  %v1318_v34 = vand.u32 2147483647, %v9399_v48  ;;  %v9854_v22 = vshll.u32 %v16159_v7, %v9732_v1 }
 0x108   : > { %vm9838_vm7 = vcmp.le.f32.partialorder %v16177_v12, 0.7853982  ;;  %v1166_v13 = vadd.s32 %v9700_v36, %v9708_v20  ;;  %vm8167_vm8 = vcmp.lt.s32.totalorder %v8166_v18, 0  ;;  %v941_v51 = vsel %vm935_vm6, %v938_v27, %v940_v43 }
 0x109   : > { %16180 = vst [vmem:[#allocation44_spill] sm:$0xff] %v9847_v32  ;;  %v1199_v50 = vsel %vm9838_vm7, 0, %v1197_v61  ;;  %v778_v47 = vxor.u32 2147483648, %v777_v17  ;;  %v9860_v31 = vand.u32 3, %v787_v24  ;;  %v1181_v60 = vsel %vm8167_vm8, 0, %v8166_v18 }
 0x10a   : > { %vm959_vm9 = vc.u32 %v9834_v44, %v9842_v25  ;;  %v1182_v10 = vsub.s32 32, %v1181_v60  ;;  %v1186_v53 = vsub.s32 4294967266, %v1181_v60  ;;  %v1203_v58 = vadd.s32 3, %v1199_v50 }
 0x10b   : > { %v960_v46 = vadd.s32 1, %v9843_v38  ;;  %v779_v52 = vsel %vm696_vm14, %v778_v47, %v777_v17  ;;  %v1183_v36 = vshll.u32 %v9801_v55, %v1181_v60  ;;  %v957_v20 = vmul.u32 %v950_v15, %v941_v51 }
 0x10c   : > { %v9870_v0 = vand.u32 8388607, %v1318_v34  ;;  %v782_v24 = vsel %vm9765_vm15, %v9409_v57, %v779_v52  ;;  %v1184_v61 = vshrl.u32 %v1166_v13, %v1182_v10  ;;  %v1187_v27 = vadd.s32 127, %v1186_v53 }
 0x10d   : > { %v961_v43 = vsel %vm959_vm9, %v960_v46, %v9843_v38  ;;  %8806 = vcosq.f32 %v782_v24  ;;  %v1336_v62 = vshrl.u32 %v16167_v56, %v9478_v26  ;;  %v1339_v55 = vshrl.u32 %v16168_v30, %v9478_v26 }
 0x10e   : > { %v962_v28 = vadd.s32 %v961_v43, %v957_v20  ;;  %8808 = vsinq.f32 %v782_v24  ;;  %v1185_v15 = vor.u32 %v1184_v61, %v1183_v36  ;;  %v1188_v4 = vshll.u32 %v1187_v27, 23 }
 0x10f   : > { %v1342_v12 = vshrl.u32 %v16159_v7, %v9478_v26  ;;  %v1335_v18 = vshll.u32 %v16166_v40, %v9456_v6  ;;  %v1344_v38 = vshll.u32 %v16159_v7, %v9456_v6  ;;  %v1345_v17 = vshrl.u32 %v16165_v39, %v9478_v26 }
 0x110   : > { %v963_v54 = vadd.s32 536870912, %v962_v28  ;;  %v1189_v50 = vor.u32 4788187, %v1188_v4  ;;  %v1338_v13 = vshll.u32 %v16167_v56, %v9456_v6  ;;  %v1341_v51 = vshll.u32 %v16168_v30, %v9456_v6 }
 0x111   : > { %v1348_v47 = vshrl.u32 %v16156_v16, %v9478_v26  ;;  %v1337_v10 = vor.u32 %v1336_v62, %v1335_v18  ;;  %v1346_v53 = vor.u32 %v1345_v17, %v1344_v38  ;;  %v1347_v46 = vshll.u32 %v16165_v39, %v9456_v6 }
 0x112   : > { %v964_v60 = vshrl.u32 %v963_v54, 30  ;;  %vm790_vm11 = vcmp.eq.s32.totalorder %v9860_v31, 0  ;;  %vm793_vm14 = vcmp.eq.s32.totalorder %v9860_v31, 2  ;;  %v1190_v52 = vand.u32 2147483647, %v1189_v50 }
 0x113   : > { %v1192_v36 = vcvt.s32.f32 %v1185_v15  ;;  %v1340_v20 = vor.u32 %v1339_v55, %v1338_v13  ;;  %v1343_v24 = vor.u32 %v1342_v12, %v1341_v51  ;;  %v9898_v61 = vand.u32 3, %v1203_v58 }
 0x114   : > { %vm904_vm15 = vcmp.lt.s32.totalorder %v9411_v59, 0  ;;  %v965_v27 = vshll.u32 %v964_v60, 30  ;;  %v1349_v43 = vor.u32 %v1348_v47, %v1347_v46  ;;  %vm1353_vm0 = vcmp.lt.s32.totalorder %v9454_v5, 4 }
 0x115   : > { %v1193_v62 = vmul.f32 %v1192_v36, %v1190_v52  ;;  %v1326_v4 = vor.u32 8388608, %v9870_v0  ;;  %v1334_v6 = vshrl.u32 %v16166_v40, %v9478_v26  ;;  %v1359_v54 = vsel %vm1353_vm0, %v1346_v53, 920167782 }
 0x116   : > { %v9907_v15 = vsub.s32 %v962_v28, %v965_v27  ;;  %vm1350_vm2 = vcmp.lt.s32.totalorder %v9454_v5, 1  ;;  %vm1351_vm3 = vcmp.lt.s32.totalorder %v9454_v5, 2  ;;  %vm1352_vm5 = vcmp.lt.s32.totalorder %v9454_v5, 3 }
 0x117   : > { %v1194_v58 = vxor.u32 2147483648, %v1193_v62  ;;  %v988_v55 = vsub.s32 4, %v964_v60  ;;  %v1355_v12 = vsel %vm1353_vm0, %v1343_v24, 2102212464  ;;  %v1358_v0 = vsel %vm1350_vm2, %v1337_v10, %v1340_v20  ;;  %v8807_v18 = vpop.eup %8806 }
 0x118   : > { %v968_v26 = vsub.s32 0, %v9907_v15  ;;  %v1360_v38 = vsel %vm1352_vm5, %v1343_v24, %v1359_v54  ;;  %v1362_v28 = vsel %vm1350_vm2, %v1340_v20, %v1343_v24  ;;  %v1363_v17 = vsel %vm1353_vm0, %v1349_v43, 1326507024  ;;  %v8809_v50 = vpop.eup %8808 }
 0x119   : > { %v794_v13 = vxor.u32 2147483648, %v8807_v18  ;;  %v1195_v51 = vsel %vm1112_vm1, %v1194_v58, %v1193_v62  ;;  %v1354_v47 = vsel %vm1350_vm2, %v1334_v6, %v1337_v10  ;;  %v1364_v46 = vsel %vm1352_vm5, %v1346_v53, %v1363_v17 }
 0x11a   : > { %v791_v52 = vxor.u32 2147483648, %v8809_v50  ;;  %v1198_v36 = vsel %vm9838_vm7, %v9397_v45, %v1195_v51  ;;  %v8157_v27 = vmin.u32 %v968_v26, %v9907_v15  ;;  %v1356_v24 = vsel %vm1352_vm5, %v1340_v20, %v1355_v12 }
 0x11b   : > { %8810 = vcosq.f32 %v1198_v36  ;;  %v1361_v43 = vsel %vm1351_vm3, %v1358_v0, %v1360_v38  ;;  %v1365_v10 = vsel %vm1351_vm3, %v1362_v28, %v1364_v46  ;;  %v1366_v62 = vshll.u32 %v1326_v4, 8 }
 0x11c   : > { %v792_v53 = vsel %vm790_vm11, %v8807_v18, %v791_v52  ;;  %v795_v2 = vsel %vm793_vm14, %v794_v13, %v8809_v50  ;;  %8812 = vsinq.f32 %v1198_v36  ;;  %v970_v6 = vclz %v8157_v27 }
 0x11d   : > { %v9939_v54 = vshll.u32 %v16165_v39, %v9732_v1  ;;  %v9942_v20 = vsub.s32 32, %v9738_v19  ;;  %vm789_vm1 = vcmp.lt.s32.totalorder %v9860_v31, 2  ;;  %v9947_v4 = vsel %vm904_vm15, %v988_v55, %v964_v60 }
 0x11e   : > { %v8158_v58 = vadd.s32 4294967294, %v970_v6  ;;  %v1357_v12 = vsel %vm1351_vm3, %v1354_v47, %v1356_v24  ;;  %v9951_v0 = vmul.u32.u64.low %v1366_v62, %v1365_v10  ;;  %v9952_v18 = vmul.u32.u64.high %v1366_v62, %v1365_v10, %v9951_v0 }
 0x11f   : > { %v796_v26 = vsel %vm789_vm1, %v792_v53, %v795_v2  ;;  %v9954_v38 = vmul.u32.u64.low %v1366_v62, %v1361_v43  ;;  %v9955_v28 = vmul.u32.u64.high %v1366_v62, %v1361_v43, %v9954_v38  ;;  %v15958_v17 = vand.u32 2147483647, %v9391_v35 }
 0x120   : > { %vm786_vm6 = vweird.f32 %v9409_v57  ;;  %vm1206_vm7 = vcmp.eq.s32.totalorder %v9898_v61, 0  ;;  %v16181_v31 = vand.u32 2147483647, %v9411_v59  ;;  %vm8159_vm9 = vcmp.lt.s32.totalorder %v8158_v58, 0 }
 0x121   : > { %vm1205_vm11 = vcmp.lt.s32.totalorder %v9898_v61, 2  ;;  %vm1209_vm14 = vcmp.eq.s32.totalorder %v9898_v61, 2  ;;  %v958_v5 = vadd.s32 %v9842_v25, %v9834_v44  ;;  %v973_v55 = vsel %vm8159_vm9, 0, %v8158_v58 }
 0x122   : > { %vm9963_vm8 = vcmp.le.f32.partialorder %v16181_v31, 0.7853982  ;;  %v797_v50 = vsel %vm786_vm6, nan, %v796_v26  ;;  %vm1202_vm0 = vweird.f32 %v9397_v45  ;;  %v974_v13 = vsub.s32 32, %v973_v55 }
 0x123   : > { %v991_v57 = vsel %vm9963_vm8, 0, %v9947_v4  ;;  %v978_v51 = vsub.s32 4294967266, %v973_v55  ;;  %v1373_v47 = vmul.u32 %v1366_v62, %v1357_v12  ;;  %vm1375_vm2 = vc.u32 %v9952_v18, %v9954_v38 }
 0x124   : > { %v1376_v46 = vadd.s32 1, %v9955_v28  ;;  %v597_v52 = vand.u32 8388607, %v15958_v17  ;;  %v608_v44 = vshrl.u32 %v16167_v56, %v9497_v41  ;;  %v975_v25 = vshll.u32 %v9907_v15, %v973_v55 }
 0x125   : > { %v976_v36 = vshrl.u32 %v958_v5, %v974_v13  ;;  %v979_v27 = vadd.s32 127, %v978_v51  ;;  %v607_v24 = vshll.u32 %v16166_v40, %v9470_v23  ;;  %v8811_v43 = vpop.eup %8810  ;;  %v610_v62 = vshll.u32 %v16167_v56, %v9470_v23 }
 0x126   : > { %v1377_v10 = vsel %vm1375_vm2, %v1376_v46, %v9955_v28  ;;  %v611_v53 = vshrl.u32 %v16168_v30, %v9497_v41  ;;  %v617_v2 = vshrl.u32 %v16165_v39, %v9497_v41  ;;  %v8813_v6 = vpop.eup %8812  ;;  %v1210_v4 = vxor.u32 2147483648, %v8811_v43 }
 0x127   : > { %v977_v15 = vor.u32 %v976_v36, %v975_v25  ;;  %v980_v58 = vshll.u32 %v979_v27, 23  ;;  %v1378_v12 = vadd.s32 %v1377_v10, %v1373_v47  ;;  %v1207_v0 = vxor.u32 2147483648, %v8813_v6 }
 0x128   : > { %v609_v26 = vor.u32 %v608_v44, %v607_v24  ;;  %v614_v31 = vshrl.u32 %v16159_v7, %v9497_v41  ;;  %v616_v28 = vshll.u32 %v16159_v7, %v9470_v23  ;;  %v1211_v5 = vsel %vm1209_vm14, %v1210_v4, %v8813_v6 }
 0x129   : > { %v981_v55 = vor.u32 4788187, %v980_v58  ;;  %v1379_v13 = vadd.s32 536870912, %v1378_v12  ;;  %v613_v51 = vshll.u32 %v16168_v30, %v9470_v23  ;;  %v1208_v46 = vsel %vm1206_vm7, %v8811_v43, %v1207_v0 }
 0x12a   : > { %v618_v47 = vor.u32 %v617_v2, %v616_v28  ;;  %v619_v44 = vshll.u32 %v16165_v39, %v9470_v23  ;;  %v620_v25 = vshrl.u32 %v16156_v16, %v9497_v41  ;;  %v1212_v36 = vsel %vm1205_vm11, %v1208_v46, %v1211_v5 }
 0x12b   : > { %v982_v27 = vand.u32 2147483647, %v981_v55  ;;  %v984_v24 = vcvt.s32.f32 %v977_v15  ;;  %vm1320_vm3 = vcmp.lt.s32.totalorder %v9399_v48, 0  ;;  %v1380_v10 = vshrl.u32 %v1379_v13, 30 }
 0x12c   : > { %v1213_v6 = vsel %vm1202_vm0, nan, %v1212_v36  ;;  %v612_v4 = vor.u32 %v611_v53, %v610_v62  ;;  %v615_v43 = vor.u32 %v614_v31, %v613_v51  ;;  %v621_v2 = vor.u32 %v620_v25, %v619_v44 }
 0x12d   : > { %v8432_v58 = vpack.c.bf16 %v1213_v6, %v797_v50  ;;  %v985_v0 = vmul.f32 %v984_v24, %v982_v27  ;;  %v1381_v23 = vshll.u32 %v1380_v10, 30  ;;  %vm625_vm5 = vcmp.lt.s32.totalorder %v9491_v37, 4 }
 0x12e   : > { %v995_v28 = vadd.s32 3, %v991_v57  ;;  %v598_v17 = vor.u32 8388608, %v597_v52  ;;  %vm622_vm1 = vcmp.lt.s32.totalorder %v9491_v37, 1  ;;  %v631_v61 = vsel %vm625_vm5, %v618_v47, 920167782 }
 0x12f   : > { %8433 = vmatprep.subr.bf16.mxu0 %v8432_v58  ;;  %v986_v15 = vxor.u32 2147483648, %v985_v0  ;;  %v10015_v5 = vsub.s32 %v1378_v12, %v1381_v23  ;;  %v1404_v45 = vsub.s32 4, %v1380_v10  ;;  %vm624_vm6 = vcmp.lt.s32.totalorder %v9491_v37, 3 }
 0x130   : > { %v630_v50 = vsel %vm622_vm1, %v609_v26, %v612_v4  ;;  %v632_v62 = vsel %vm624_vm6, %v615_v43, %v631_v61  ;;  %v634_v57 = vsel %vm622_vm1, %v612_v4, %v615_v43  ;;  %v635_v52 = vsel %vm625_vm5, %v621_v2, 1326507024 }
 0x131   : > { %v987_v53 = vsel %vm904_vm15, %v986_v15, %v985_v0  ;;  %v1384_v12 = vsub.s32 0, %v10015_v5  ;;  %v606_v31 = vshrl.u32 %v16166_v40, %v9497_v41  ;;  %vm623_vm7 = vcmp.lt.s32.totalorder %v9491_v37, 2 }
 0x132   : > { %v990_v55 = vsel %vm9963_vm8, %v9411_v59, %v987_v53  ;;  %v627_v13 = vsel %vm625_vm5, %v615_v43, 2102212464  ;;  %v636_v51 = vsel %vm624_vm6, %v618_v47, %v635_v52  ;;  %v638_v46 = vshll.u32 %v598_v17, 8 }
 0x133   : > { %8814 = vcosq.f32 %v990_v55  ;;  %v8173_v44 = vmin.u32 %v1384_v12, %v10015_v5  ;;  %v633_v25 = vsel %vm623_vm7, %v630_v50, %v632_v62  ;;  %v637_v41 = vsel %vm623_vm7, %v634_v57, %v636_v51 }
 0x134   : > { %v10046_v60 = vshll.u32 %v16159_v7, %v9738_v19  ;;  %v1405_v36 = vsel %vm1320_vm3, %v1404_v45, %v1380_v10  ;;  %v10050_v27 = vmul.u32.u64.low %v638_v46, %v637_v41  ;;  %v10051_v24 = vmul.u32.u64.high %v638_v46, %v637_v41, %v10050_v27 }
 0x135   : > { %v10055_v17 = vshrl.u32 %v16165_v39, %v9847_v32  ;;  %v1386_v47 = vclz %v8173_v44  ;;  %v626_v6 = vsel %vm622_vm1, %v606_v31, %v609_v26  ;;  %v628_v43 = vsel %vm624_vm6, %v612_v4, %v627_v13 }
 0x136   : > { %v10063_v2 = vshrl.u32 %v16156_v16, %v9847_v32  ;;  %vm10067_vm15 = vcmp.le.f32.partialorder %v1318_v34, 0.7853982  ;;  %v10071_v58 = vmul.u32.u64.low %v638_v46, %v633_v25  ;;  %v10072_v0 = vmul.u32.u64.high %v638_v46, %v633_v25, %v10071_v58 }
 0x137   : > { %8816 = vsinq.f32 %v990_v55  ;;  %v10075_v23 = vand.u32 3, %v995_v28  ;;  %v8174_v26 = vadd.s32 4294967294, %v1386_v47  ;;  %v1407_v4 = vsel %vm10067_vm15, 0, %v1405_v36 }
 0x138   : > { %v10081_v61 = vshrl.u32 %v16165_v39, %v9942_v20  ;;  %v10085_v34 = vshll.u32 %v16165_v39, %v9738_v19  ;;  %v629_v15 = vsel %vm623_vm7, %v626_v6, %v628_v43  ;;  %v15959_v45 = vand.u32 2147483647, %v9387_v33 }
 0x139   : > { %v10092_v28 = vshrl.u32 %v16156_v16, %v9942_v20  ;;  %v10095_v50 = vadd.s32 1, %v9751_v9  ;;  %vm8175_vm8 = vcmp.lt.s32.totalorder %v8174_v26, 0  ;;  %vm647_vm9 = vc.u32 %v10051_v24, %v10071_v58 }
 0x13a   : > { %v1374_v62 = vadd.s32 %v9954_v38, %v9952_v18  ;;  %v1389_v57 = vsel %vm8175_vm8, 0, %v8174_v26  ;;  %v1411_v52 = vadd.s32 3, %v1407_v4  ;;  %v648_v37 = vadd.s32 1, %v10072_v0 }
 0x13b   : > { %vm1001_vm11 = vcmp.eq.s32.totalorder %v10075_v23, 2  ;;  %v1390_v53 = vsub.s32 32, %v1389_v57  ;;  %v1394_v12 = vsub.s32 4294967266, %v1389_v57  ;;  %v645_v31 = vmul.u32 %v638_v46, %v629_v15 }
 0x13c   : > { %v1023_v9 = vshll.u32 %v16166_v40, %v9440_v29  ;;  %v649_v55 = vsel %vm647_vm9, %v648_v37, %v10072_v0  ;;  %v1013_v13 = vand.u32 8388607, %v15959_v45  ;;  %v1024_v18 = vshrl.u32 %v16167_v56, %v9465_v21 }
 0x13d   : > { %v1033_v38 = vshrl.u32 %v16165_v39, %v9465_v21  ;;  %v8815_v51 = vpop.eup %8814  ;;  %v1391_v44 = vshll.u32 %v10015_v5, %v1389_v57  ;;  %v1392_v25 = vshrl.u32 %v1374_v62, %v1390_v53  ;;  %v1395_v41 = vadd.s32 127, %v1394_v12 }
 0x13e   : > { %v650_v46 = vadd.s32 %v649_v55, %v645_v31  ;;  %v1027_v36 = vshrl.u32 %v16168_v30, %v9465_v21  ;;  %v1030_v27 = vshrl.u32 %v16159_v7, %v9465_v21  ;;  %v1032_v47 = vshll.u32 %v16159_v7, %v9440_v29 }
 0x13f   : > { %v1036_v6 = vshrl.u32 %v16156_v16, %v9465_v21  ;;  %vm998_vm14 = vcmp.eq.s32.totalorder %v10075_v23, 0  ;;  %v1393_v43 = vor.u32 %v1392_v25, %v1391_v44  ;;  %v1396_v0 = vshll.u32 %v1395_v41, 23 }
 0x140   : > { %v651_v5 = vadd.s32 536870912, %v650_v46  ;;  %v1026_v26 = vshll.u32 %v16167_v56, %v9440_v29  ;;  %v1002_v4 = vxor.u32 2147483648, %v8815_v51  ;;  %v1029_v15 = vshll.u32 %v16168_v30, %v9440_v29 }
 0x141   : > { %v1034_v62 = vor.u32 %v1033_v38, %v1032_v47  ;;  %v1035_v57 = vshll.u32 %v16165_v39, %v9440_v29  ;;  %v8817_v37 = vpop.eup %8816  ;;  %v1397_v53 = vor.u32 4788187, %v1396_v0  ;;  %v10128_v12 = vand.u32 3, %v1411_v52  ;;  %v16186_v47 = vld [vmem:[#allocation13_spill] sm:$0xff] }
 0x142   : > { %v652_v31 = vshrl.u32 %v651_v5, 30  ;;  %v1022_v55 = vshrl.u32 %v16166_v40, %v9465_v21  ;;  %vm997_vm0 = vcmp.lt.s32.totalorder %v10075_v23, 2  ;;  %v1025_v44 = vor.u32 %v1024_v18, %v1023_v9 }
 0x143   : > { %v1028_v25 = vor.u32 %v1027_v36, %v1026_v26  ;;  %v1031_v41 = vor.u32 %v1030_v27, %v1029_v15  ;;  %v1037_v45 = vor.u32 %v1036_v6, %v1035_v57  ;;  %v1398_v1 = vand.u32 2147483647, %v1397_v53 }
 0x144   : > { %v1400_v32 = vcvt.s32.f32 %v1393_v43  ;;  %v653_v38 = vshll.u32 %v652_v31, 30  ;;  %vm1041_vm2 = vcmp.lt.s32.totalorder %v16186_v47, 4  ;;  %v999_v29 = vxor.u32 2147483648, %v8817_v37 }
 0x145   : > { %v1003_v52 = vsel %vm1001_vm11, %v1002_v4, %v8817_v37  ;;  %v1014_v0 = vor.u32 8388608, %v1013_v13  ;;  %v1047_v5 = vsel %vm1041_vm2, %v1034_v62, 920167782  ;;  %vm1038_vm5 = vcmp.lt.s32.totalorder %v16186_v47, 1 }
 0x146   : > { %v1401_v21 = vmul.f32 %v1400_v32, %v1398_v1  ;;  %v10138_v3 = vsub.s32 %v650_v46, %v653_v38  ;;  %vm1040_vm1 = vcmp.lt.s32.totalorder %v16186_v47, 3  ;;  %v1046_v9 = vsel %vm1038_vm5, %v1025_v44, %v1028_v25 }
 0x147   : > { %v1048_v18 = vsel %vm1040_vm1, %v1031_v41, %v1047_v5  ;;  %v1050_v36 = vsel %vm1038_vm5, %v1028_v25, %v1031_v41  ;;  %v1051_v27 = vsel %vm1041_vm2, %v1037_v45, 1326507024  ;;  %vm1039_vm6 = vcmp.lt.s32.totalorder %v16186_v47, 2 }
 0x148   : > { %v1402_v6 = vxor.u32 2147483648, %v1401_v21  ;;  %v656_v13 = vsub.s32 0, %v10138_v3  ;;  %v1043_v1 = vsel %vm1041_vm2, %v1031_v41, 2102212464  ;;  %v1000_v32 = vsel %vm998_vm14, %v8815_v51, %v999_v29 }
 0x149   : > { %v1042_v46 = vsel %vm1038_vm5, %v1022_v55, %v1025_v44  ;;  %v1052_v43 = vsel %vm1040_vm1, %v1034_v62, %v1051_v27  ;;  %v1054_v26 = vshll.u32 %v1014_v0, 8  ;;  %v1049_v15 = vsel %vm1039_vm6, %v1046_v9, %v1048_v18  ;;  %v16187_v0 = vld [vmem:[#allocation6_spill] sm:$0xff]  ;;  %v16189_v27 = vld [vmem:[#allocation25_spill] sm:$0xff] }
 0x14a   : > { %v1403_v4 = vsel %vm1320_vm3, %v1402_v6, %v1401_v21  ;;  %v8145_v45 = vmin.u32 %v656_v13, %v10138_v3  ;;  %v1053_v57 = vsel %vm1039_vm6, %v1050_v36, %v1052_v43  ;;  %v1044_v37 = vsel %vm1040_vm1, %v1028_v25, %v1043_v1  ;;  %v16188_v36 = vld [vmem:[#allocation20_spill] sm:$0xff] }
 0x14b   : > { %v1406_v51 = vsel %vm10067_vm15, %v9399_v48, %v1403_v4  ;;  %v10166_v62 = vmul.u32.u64.low %v1054_v26, %v1053_v57  ;;  %v10167_v53 = vmul.u32.u64.high %v1054_v26, %v1053_v57, %v10166_v62  ;;  %v1004_v55 = vsel %vm997_vm0, %v1000_v32, %v1003_v52 }
 0x14c   : > { %8818 = vcosq.f32 %v1406_v51  ;;  %v658_v44 = vclz %v8145_v45  ;;  %v676_v41 = vsub.s32 4, %v652_v31  ;;  %v15966_v10 = vand.u32 2147483647, %v16187_v0 }
 0x14d   : > { %8820 = vsinq.f32 %v1406_v51  ;;  %v10171_v38 = vmul.u32.u64.low %v1054_v26, %v1049_v15  ;;  %v10172_v29 = vmul.u32.u64.high %v1054_v26, %v1049_v15, %v10171_v38  ;;  %v10178_v5 = vor.u32 %v10055_v17, %v9854_v22 }
 0x14e   : > { %v10181_v25 = vadd.s32 1, %v9754_v8  ;;  %v8146_v21 = vadd.s32 4294967294, %v658_v44  ;;  %v1045_v23 = vsel %vm1039_vm6, %v1042_v46, %v1044_v37  ;;  %vm994_vm3 = vweird.f32 %v9411_v59 }
 0x14f   : > { %vm592_vm7 = vcmp.lt.s32.totalorder %v9391_v35, 0  ;;  %v646_v9 = vadd.s32 %v10071_v58, %v10051_v24  ;;  %v10191_v18 = vsel %vm994_vm3, nan, %v1004_v55  ;;  %vm1417_vm15 = vcmp.eq.s32.totalorder %v10128_v12, 2 }
 0x150   : > { %vm8147_vm8 = vcmp.lt.s32.totalorder %v8146_v21, 0  ;;  %v10196_v8 = vsel %vm592_vm7, %v676_v41, %v652_v31  ;;  %vm1063_vm9 = vc.u32 %v10167_v53, %v10171_v38  ;;  %vm1414_vm11 = vcmp.eq.s32.totalorder %v10128_v12, 0 }
 0x151   : > { %v661_v59 = vsel %vm8147_vm8, 0, %v8146_v21  ;;  %v1061_v22 = vmul.u32 %v1054_v26, %v1045_v23  ;;  %v1064_v17 = vadd.s32 1, %v10172_v29  ;;  %v805_v24 = vand.u32 8388607, %v15966_v10  ;;  %v16200_v10 = vld [vmem:[#allocation15_spill] sm:$0xff] }
 0x152   : > { %vm1413_vm14 = vcmp.lt.s32.totalorder %v10128_v12, 2  ;;  %v662_v58 = vsub.s32 32, %v661_v59  ;;  %v666_v47 = vsub.s32 4294967266, %v661_v59  ;;  %v815_v31 = vshll.u32 %v16166_v40, %v16188_v36 }
 0x153   : > { %v816_v6 = vshrl.u32 %v16167_v56, %v16189_v27  ;;  %vm1410_vm0 = vweird.f32 %v9399_v48  ;;  %v663_v13 = vshll.u32 %v10138_v3, %v661_v59  ;;  %v1065_v1 = vsel %vm1063_vm9, %v1064_v17, %v10172_v29 }
 0x154   : > { %v819_v32 = vshrl.u32 %v16168_v30, %v16189_v27  ;;  %v822_v46 = vshrl.u32 %v16159_v7, %v16189_v27  ;;  %v664_v43 = vshrl.u32 %v646_v9, %v662_v58  ;;  %v667_v26 = vadd.s32 127, %v666_v47 }
 0x155   : > { %v1066_v4 = vadd.s32 %v1065_v1, %v1061_v22  ;;  %v825_v45 = vshrl.u32 %v16165_v39, %v16189_v27  ;;  %v806_v15 = vor.u32 8388608, %v805_v24  ;;  %v818_v57 = vshll.u32 %v16167_v56, %v16188_v36 }
 0x156   : > { %v821_v3 = vshll.u32 %v16168_v30, %v16188_v36  ;;  %v824_v51 = vshll.u32 %v16159_v7, %v16188_v36  ;;  %v8819_v37 = vpop.eup %8818  ;;  %v665_v62 = vor.u32 %v664_v43, %v663_v13  ;;  %v668_v55 = vshll.u32 %v667_v26, 23 }
 0x157   : > { %v1067_v44 = vadd.s32 536870912, %v1066_v4  ;;  %v817_v41 = vor.u32 %v816_v6, %v815_v31  ;;  %v8821_v29 = vpop.eup %8820  ;;  %v1418_v21 = vxor.u32 2147483648, %v8819_v37  ;;  %v820_v23 = vor.u32 %v819_v32, %v818_v57  ;;  %v16193_v32 = vld [vmem:[#allocation24_spill] sm:$0xff] }
 0x158   : > { %v826_v9 = vor.u32 %v825_v45, %v824_v51  ;;  %v828_v59 = vshrl.u32 %v16156_v16, %v16189_v27  ;;  %v1415_v22 = vxor.u32 2147483648, %v8821_v29  ;;  %v669_v17 = vor.u32 4788187, %v668_v55 }
 0x159   : > { %v1068_v24 = vshrl.u32 %v1067_v44, 30  ;;  %v823_v58 = vor.u32 %v822_v46, %v821_v3  ;;  %v1419_v47 = vsel %vm1417_vm15, %v1418_v21, %v8821_v29  ;;  %v16190_v1 = vand.u32 2147483647, %v9391_v35 }
 0x15a   : > { %v672_v31 = vcvt.s32.f32 %v665_v62  ;;  %v827_v6 = vshll.u32 %v16165_v39, %v16188_v36  ;;  %vm830_vm5 = vcmp.lt.s32.totalorder %v16193_v32, 1  ;;  %v1416_v43 = vsel %vm1414_vm11, %v8819_v37, %v1415_v22 }
 0x15b   : > { %vm10230_vm2 = vcmp.le.f32.partialorder %v16190_v1, 0.7853982  ;;  %v670_v26 = vand.u32 2147483647, %v669_v17  ;;  %v1069_v46 = vshll.u32 %v1068_v24, 30  ;;  %vm833_vm1 = vcmp.lt.s32.totalorder %v16193_v32, 4 }
 0x15c   : > { %v1420_v45 = vsel %vm1413_vm14, %v1416_v43, %v1419_v47  ;;  %v829_v57 = vor.u32 %v828_v59, %v827_v6  ;;  %vm832_vm6 = vcmp.lt.s32.totalorder %v16193_v32, 3  ;;  %v839_v3 = vsel %vm833_vm1, %v826_v9, 920167782 }
 0x15d   : > { %v1421_v36 = vsel %vm1410_vm0, nan, %v1420_v45  ;;  %v673_v51 = vmul.f32 %v672_v31, %v670_v26  ;;  %v10247_v62 = vsub.s32 %v1066_v4, %v1069_v46  ;;  %v838_v37 = vsel %vm830_vm5, %v817_v41, %v820_v23 }
 0x15e   : > { %v8440_v55 = vpack.c.bf16 %v1421_v36, %v10191_v18  ;;  %v814_v12 = vshrl.u32 %v16166_v40, %v16189_v27  ;;  %vm831_vm3 = vcmp.lt.s32.totalorder %v16193_v32, 2  ;;  %v840_v44 = vsel %vm832_vm6, %v823_v58, %v839_v3 }
 0x15f   : > { %v674_v29 = vxor.u32 2147483648, %v673_v51  ;;  %v1072_v48 = vsub.s32 0, %v10247_v62  ;;  %v835_v4 = vsel %vm833_vm1, %v823_v58, 2102212464  ;;  %v842_v21 = vsel %vm830_vm5, %v820_v23, %v823_v58 }
 0x160   : > { %8441 = vmatprep.subr.bf16.mxu1 %v8440_v55  ;;  %v834_v18 = vsel %vm830_vm5, %v814_v12, %v817_v41  ;;  %v841_v27 = vsel %vm831_vm3, %v838_v37, %v840_v44  ;;  %v843_v59 = vsel %vm833_vm1, %v829_v57, 1326507024  ;;  %v846_v22 = vshll.u32 %v806_v15, 8 }
 0x161   : > { %v675_v17 = vsel %vm592_vm7, %v674_v29, %v673_v51  ;;  %v8161_v47 = vmin.u32 %v1072_v48, %v10247_v62  ;;  %v1092_v1 = vsub.s32 4, %v1068_v24  ;;  %v844_v58 = vsel %vm832_vm6, %v826_v9, %v843_v59 }
 0x162   : > { %v836_v31 = vsel %vm832_vm6, %v820_v23, %v835_v4  ;;  %v845_v41 = vsel %vm831_vm3, %v842_v21, %v844_v58  ;;  %v10277_v6 = vmul.u32.u64.low %v846_v22, %v841_v27  ;;  %v10278_v43 = vmul.u32.u64.high %v846_v22, %v841_v27, %v10277_v6  ;;  %v16199_v58 = vld [vmem:[#allocation19_spill] sm:$0xff] }
 0x163   : > { %v10283_v15 = vor.u32 %v10081_v61, %v10046_v60  ;;  %v678_v26 = vsel %vm10230_vm2, %v9391_v35, %v675_v17  ;;  %v679_v9 = vsel %vm10230_vm2, 0, %v10196_v8  ;;  %v1074_v23 = vclz %v8161_v47 }
 0x164   : > { %vm2057_vm7 = vcmp.gt.s32.totalorder %v10095_v50, 0  ;;  %vm1008_vm15 = vcmp.lt.s32.totalorder %v9387_v33, 0  ;;  %v10293_v46 = vmul.u32.u64.low %v846_v22, %v845_v41  ;;  %v10294_v45 = vmul.u32.u64.high %v846_v22, %v845_v41, %v10293_v46 }
 0x165   : > { %v1973_v60 = vor.u32 %v10092_v28, %v10085_v34  ;;  %v8162_v61 = vadd.s32 4294967294, %v1074_v23  ;;  %v1093_v57 = vsel %vm1008_vm15, %v1092_v1, %v1068_v24  ;;  %v837_v3 = vsel %vm831_vm3, %v834_v18, %v836_v31  ;;  %v16197_v18 = vld [vmem:[#allocation5_spill] sm:$0xff] }
 0x166   : > { %vm2161_vm8 = vcmp.gt.s32.totalorder %v10181_v25, 0  ;;  %8822 = vcosq.f32 %v678_v26  ;;  %v683_v8 = vadd.s32 3, %v679_v9  ;;  %v856_v13 = vadd.s32 1, %v10278_v43 }
 0x167   : > { %v10305_v36 = vsel %vm2057_vm7, %v10095_v50, 0  ;;  %8824 = vsinq.f32 %v678_v26  ;;  %v16194_v51 = vand.u32 2147483647, %v9387_v33  ;;  %vm8163_vm11 = vcmp.lt.s32.totalorder %v8162_v61, 0 }
 0x168   : > { %v1077_v24 = vsel %vm8163_vm11, 0, %v8162_v61  ;;  %v853_v55 = vmul.u32 %v846_v22, %v837_v3  ;;  %vm855_vm14 = vc.u32 %v10294_v45, %v10277_v6  ;;  %v1062_v50 = vadd.s32 %v10171_v38, %v10167_v53  ;;  %v16198_v38 = vld [vmem:[#allocation16_spill] sm:$0xff] }
 0x169   : > { %vm10309_vm9 = vcmp.le.f32.partialorder %v16194_v51, 0.7853982  ;;  %v1078_v12 = vsub.s32 32, %v1077_v24  ;;  %v1082_v44 = vsub.s32 4294967266, %v1077_v24  ;;  %v857_v29 = vsel %vm855_vm14, %v856_v13, %v10278_v43 }
 0x16a   : > { %v1095_v32 = vsel %vm10309_vm9, 0, %v1093_v57  ;;  %v10323_v48 = vsel %vm2161_vm8, %v10181_v25, 0  ;;  %v10325_v4 = vand.u32 3, %v683_v8  ;;  %v858_v21 = vadd.s32 %v857_v29, %v853_v55 }
 0x16b   : > { %v15965_v27 = vand.u32 2147483647, %v16197_v18  ;;  %v1079_v59 = vshll.u32 %v10247_v62, %v1077_v24  ;;  %v1080_v22 = vshrl.u32 %v1062_v50, %v1078_v12  ;;  %v1083_v17 = vadd.s32 127, %v1082_v44 }
 0x16c   : > { %v1099_v47 = vadd.s32 3, %v1095_v32  ;;  %v859_v53 = vadd.s32 536870912, %v858_v21  ;;  %v1231_v1 = vshll.u32 %v16166_v40, %v16198_v38  ;;  %v1232_v31 = vshrl.u32 %v16167_v56, %v16199_v58 }
 0x16d   : > { %v1238_v25 = vshrl.u32 %v16159_v7, %v16199_v58  ;;  %v1081_v41 = vor.u32 %v1080_v22, %v1079_v59  ;;  %v1084_v43 = vshll.u32 %v1083_v17, 23  ;;  %v1235_v26 = vshrl.u32 %v16168_v30, %v16199_v58 }
 0x16e   : > { %v1241_v62 = vshrl.u32 %v16165_v39, %v16199_v58  ;;  %v10339_v9 = vshrl.u32 %v859_v53, 30  ;;  %v1221_v23 = vand.u32 8388607, %v15965_v27  ;;  %v1237_v46 = vshll.u32 %v16168_v30, %v16198_v38 }
 0x16f   : > { %v1244_v61 = vshrl.u32 %v16156_v16, %v16199_v58  ;;  %v1085_v57 = vor.u32 4788187, %v1084_v43  ;;  %v10347_v3 = vand.u32 3, %v1099_v47  ;;  %v1234_v8 = vshll.u32 %v16167_v56, %v16198_v38 }
 0x170   : > { %v1240_v13 = vshll.u32 %v16159_v7, %v16198_v38  ;;  %v8823_v51 = vpop.eup %8822  ;;  %vm686_vm0 = vcmp.eq.s32.totalorder %v10325_v4, 0  ;;  %vm689_vm2 = vcmp.eq.s32.totalorder %v10325_v4, 2  ;;  %v861_v24 = vshll.u32 %v10339_v9, 30 }
 0x171   : > { %v1233_v32 = vor.u32 %v1232_v31, %v1231_v1  ;;  %v1239_v55 = vor.u32 %v1238_v25, %v1237_v46  ;;  %v1243_v50 = vshll.u32 %v16165_v39, %v16198_v38  ;;  %v8825_v12 = vpop.eup %8824  ;;  %v1086_v44 = vand.u32 2147483647, %v1085_v57 }
 0x172   : > { %v1088_v29 = vcvt.s32.f32 %v1081_v41  ;;  %v1236_v59 = vor.u32 %v1235_v26, %v1234_v8  ;;  %v1242_v22 = vor.u32 %v1241_v62, %v1240_v13  ;;  %v10358_v17 = vsub.s32 %v858_v21, %v861_v24 }
 0x173   : > { %v1222_v47 = vor.u32 8388608, %v1221_v23  ;;  %v1230_v53 = vshrl.u32 %v16166_v40, %v16199_v58  ;;  %v1245_v43 = vor.u32 %v1244_v61, %v1243_v50  ;;  %v690_v52 = vxor.u32 2147483648, %v8823_v51 }
 0x174   : > { %v1089_v27 = vmul.f32 %v1088_v29, %v1086_v44  ;;  %vm1246_vm5 = vcmp.lt.s32.totalorder %v16200_v10, 1  ;;  %vm1249_vm1 = vcmp.lt.s32.totalorder %v16200_v10, 4  ;;  %v687_v1 = vxor.u32 2147483648, %v8825_v12 }
 0x175   : > { %v864_v38 = vsub.s32 0, %v10358_v17  ;;  %vm1247_vm6 = vcmp.lt.s32.totalorder %v16200_v10, 2  ;;  %v1251_v31 = vsel %vm1249_vm1, %v1239_v55, 2102212464  ;;  %vm1248_vm3 = vcmp.lt.s32.totalorder %v16200_v10, 3 }
 0x176   : > { %v1090_v25 = vxor.u32 2147483648, %v1089_v27  ;;  %v1254_v21 = vsel %vm1246_vm5, %v1233_v32, %v1236_v59  ;;  %v1255_v41 = vsel %vm1249_vm1, %v1242_v22, 920167782  ;;  %v1258_v62 = vsel %vm1246_vm5, %v1236_v59, %v1239_v55 }
 0x177   : > { %v8153_v58 = vmin.u32 %v864_v38, %v10358_v17  ;;  %v1256_v26 = vsel %vm1248_vm3, %v1239_v55, %v1255_v41  ;;  %v1259_v23 = vsel %vm1249_vm1, %v1245_v43, 1326507024  ;;  %v1250_v61 = vsel %vm1246_vm5, %v1230_v53, %v1233_v32  ;;  %v16202_v38 = vld [vmem:[#allocation23_spill] sm:$0xff] }
 0x178   : > { %v1091_v46 = vsel %vm1008_vm15, %v1090_v25, %v1089_v27  ;;  %v1252_v57 = vsel %vm1248_vm3, %v1236_v59, %v1251_v31  ;;  %v1260_v8 = vsel %vm1248_vm3, %v1242_v22, %v1259_v23  ;;  %v1257_v50 = vsel %vm1247_vm6, %v1254_v21, %v1256_v26 }
 0x179   : > { %v1094_v13 = vsel %vm10309_vm9, %v9387_v33, %v1091_v46  ;;  %v866_v24 = vclz %v8153_v58  ;;  %v1262_v44 = vshll.u32 %v1222_v47, 8  ;;  %v688_v29 = vsel %vm686_vm0, %v8823_v51, %v687_v1  ;;  %v16201_v51 = vld [vmem:[#allocation8_spill] sm:$0xff]  ;;  %v16203_v58 = vld [vmem:[#allocation18_spill] sm:$0xff] }
 0x17a   : > { %v691_v55 = vsel %vm689_vm2, %v690_v52, %v8825_v12  ;;  %8826 = vcosq.f32 %v1094_v13  ;;  %v1261_v27 = vsel %vm1247_vm6, %v1258_v62, %v1260_v8  ;;  %v1253_v22 = vsel %vm1247_vm6, %v1250_v61, %v1252_v57 }
 0x17b   : > { %8828 = vsinq.f32 %v1094_v13  ;;  %v8154_v32 = vadd.s32 4294967294, %v866_v24  ;;  %v10381_v59 = vmul.u32.u64.low %v1262_v44, %v1261_v27  ;;  %v10382_v37 = vmul.u32.u64.high %v1262_v44, %v1261_v27, %v10381_v59 }
 0x17c   : > { %v10386_v53 = vmul.u32.u64.low %v1262_v44, %v1257_v50  ;;  %v10387_v47 = vmul.u32.u64.high %v1262_v44, %v1257_v50, %v10386_v53  ;;  %v1526_v43 = vand.u32 2147483647, %v16201_v51  ;;  %vm682_vm7 = vweird.f32 %v9391_v35 }
 0x17d   : > { %vm685_vm15 = vcmp.lt.s32.totalorder %v10325_v4, 2  ;;  %v854_v52 = vadd.s32 %v10277_v6, %v10294_v45  ;;  %vm8155_vm8 = vcmp.lt.s32.totalorder %v8154_v32, 0  ;;  %vm1105_vm9 = vcmp.eq.s32.totalorder %v10347_v3, 2 }
 0x17e   : > { %v692_v12 = vsel %vm685_vm15, %v688_v29, %v691_v55  ;;  %v869_v1 = vsel %vm8155_vm8, 0, %v8154_v32  ;;  %v884_v10 = vsub.s32 4, %v10339_v9  ;;  %v1544_v31 = vshrl.u32 %v16167_v56, %v16202_v38 }
 0x17f   : > { %vm1102_vm11 = vcmp.eq.s32.totalorder %v10347_v3, 0  ;;  %v870_v25 = vsub.s32 32, %v869_v1  ;;  %v874_v21 = vsub.s32 4294967266, %v869_v1  ;;  %v1269_v41 = vmul.u32 %v1262_v44, %v1253_v22  ;;  %v16204_v22 = vld [vmem:[#allocation28_spill] sm:$0xff] }
 0x180   : > { %v1543_v4 = vshll.u32 %v16166_v40, %v16203_v58  ;;  %vm1101_vm14 = vcmp.lt.s32.totalorder %v10347_v3, 2  ;;  %v871_v6 = vshll.u32 %v10358_v17, %v869_v1  ;;  %vm1271_vm0 = vc.u32 %v10382_v37, %v10386_v53 }
 0x181   : > { %v1272_v45 = vadd.s32 1, %v10387_v47  ;;  %v1533_v26 = vand.u32 8388607, %v1526_v43  ;;  %vm1098_vm2 = vweird.f32 %v9387_v33  ;;  %v872_v62 = vshrl.u32 %v854_v52, %v870_v25 }
 0x182   : > { %v875_v23 = vadd.s32 127, %v874_v21  ;;  %v1546_v46 = vshll.u32 %v16167_v56, %v16203_v58  ;;  %v1547_v61 = vshrl.u32 %v16168_v30, %v16202_v38  ;;  %v1545_v57 = vor.u32 %v1544_v31, %v1543_v4 }
 0x183   : > { %v1273_v17 = vsel %vm1271_vm0, %v1272_v45, %v10387_v47  ;;  %v1549_v8 = vshll.u32 %v16168_v30, %v16203_v58  ;;  %v1550_v13 = vshrl.u32 %v16159_v7, %v16202_v38  ;;  %v873_v24 = vor.u32 %v872_v62, %v871_v6 }
 0x184   : > { %v876_v50 = vshll.u32 %v875_v23, 23  ;;  %v1274_v44 = vadd.s32 %v1273_v17, %v1269_v41  ;;  %v1548_v29 = vor.u32 %v1547_v61, %v1546_v46  ;;  %v8827_v55 = vpop.eup %8826  ;;  %vm1977_vm5 = vcmp.lt.s32.totalorder %v9736_v63, 4  ;;  %v16205_v41 = vld [vmem:[#allocation36_spill] sm:$0xff] }
 0x185   : > { %v693_v27 = vsel %vm682_vm7, nan, %v692_v12  ;;  %v1534_v32 = vor.u32 8388608, %v1533_v26  ;;  %v1551_v59 = vor.u32 %v1550_v13, %v1549_v8  ;;  %vm1558_vm1 = vcmp.lt.s32.totalorder %v16204_v22, 1  ;;  %v8829_v47 = vpop.eup %8828 }
 0x186   : > { %v1106_v52 = vxor.u32 2147483648, %v8827_v55  ;;  %v877_v1 = vor.u32 4788187, %v876_v50  ;;  %v1275_v31 = vadd.s32 536870912, %v1274_v44  ;;  %vm1560_vm6 = vcmp.lt.s32.totalorder %v16204_v22, 3 }
 0x187   : > { %v1103_v25 = vxor.u32 2147483648, %v8829_v47  ;;  %vm1559_vm3 = vcmp.lt.s32.totalorder %v16204_v22, 2  ;;  %v1566_v21 = vsel %vm1558_vm1, %v1545_v57, %v1548_v29  ;;  %v1568_v35 = vsel %vm1560_vm6, %v1551_v59, %v16205_v41 }
 0x188   : > { %v1107_v12 = vsel %vm1105_vm9, %v1106_v52, %v8829_v47  ;;  %v878_v58 = vand.u32 2147483647, %v877_v1  ;;  %v880_v4 = vcvt.s32.f32 %v873_v24  ;;  %v1276_v6 = vshrl.u32 %v1275_v31, 30  ;;  %v16207_v24 = vld [vmem:[#allocation31_spill] sm:$0xff] }
 0x189   : > { %v1104_v45 = vsel %vm1102_vm11, %v8827_v55, %v1103_v25  ;;  %v1542_v26 = vshrl.u32 %v16166_v40, %v16202_v38  ;;  %v1563_v62 = vsel %vm1561_vm13, %v1551_v59, 2102212464  ;;  %v1569_v23 = vsel %vm1559_vm3, %v1566_v21, %v1568_v35  ;;  %v16206_v38 = vld [vmem:[#allocation37_spill] sm:$0xff] }
 0x18a   : > { %v1108_v46 = vsel %vm1101_vm14, %v1104_v45, %v1107_v12  ;;  %v881_v61 = vmul.f32 %v880_v4, %v878_v58  ;;  %v1277_v17 = vshll.u32 %v1276_v6, 30  ;;  %v1570_v8 = vsel %vm1558_vm1, %v1548_v29, %v1551_v59 }
 0x18b   : > { %v1109_v13 = vsel %vm1098_vm2, nan, %v1108_v46  ;;  %vm800_vm7 = vcmp.lt.s32.totalorder %v16187_v0, 0  ;;  %v1572_v50 = vsel %vm1560_vm6, %v16207_v24, %v16206_v38  ;;  %v1574_v55 = vshll.u32 %v1534_v32, 8  ;;  %v16214_v38 = vld [vmem:[#allocation14_spill] sm:$0xff] }
 0x18c   : > { %v8434_v47 = vpack.c.bf16 %v1109_v13, %v693_v27  ;;  %v882_v52 = vxor.u32 2147483648, %v881_v61  ;;  %v10451_v3 = vsub.s32 %v1274_v44, %v1277_v17  ;;  %v1562_v1 = vsel %vm1558_vm1, %v1542_v26, %v1545_v57 }
 0x18d   : > { %v1564_v59 = vsel %vm1560_vm6, %v1548_v29, %v1563_v62  ;;  %v1573_v33 = vsel %vm1559_vm3, %v1570_v8, %v1572_v50  ;;  %v10459_v31 = vmul.u32.u64.low %v1574_v55, %v1569_v23  ;;  %v10460_v25 = vmul.u32.u64.high %v1574_v55, %v1569_v23, %v10459_v31 }
 0x18e   : > { %v10466_v27 = vsel %vm1977_vm5, %v10283_v15, 920167782  ;;  %v10469_v44 = vand.u32 31, %v10323_v48  ;;  %8435 = vmatpush1.bf16.msra.mxu0 %v8434_v47  ;;  %v885_v57 = vsel %vm800_vm7, %v884_v10, %v10339_v9  ;;  %v1280_v29 = vsub.s32 0, %v10451_v3 }
 0x18f   : > { %v883_v32 = vsel %vm800_vm7, %v882_v52, %v881_v61  ;;  %v1300_v21 = vsub.s32 4, %v1276_v6  ;;  %v10475_v41 = vmul.u32.u64.low %v1574_v55, %v1573_v33  ;;  %v10476_v35 = vmul.u32.u64.high %v1574_v55, %v1573_v33, %v10475_v41 }
 0x190   : > { %v10483_v12 = vsel %vm1977_vm5, %v1973_v60, 1326507024  ;;  %v16208_v58 = vand.u32 2147483647, %v16187_v0  ;;  %v8169_v9 = vmin.u32 %v1280_v29, %v10451_v3  ;;  %v1565_v10 = vsel %vm1559_vm3, %v1562_v1, %v1564_v59 }
 0x191   : > { %v10495_v45 = vand.u32 31, %v10305_v36  ;;  %v10498_v34 = vshrl.u32 %v10323_v48, 5  ;;  %v1584_v60 = vadd.s32 1, %v10460_v25  ;;  %v10504_v26 = vsub.s32 32, %v10469_v44 }
 0x192   : > { %vm10487_vm13 = vcmp.le.f32.partialorder %v16208_v58, 0.7853982  ;;  %vm1216_vm15 = vcmp.lt.s32.totalorder %v16197_v18, 0  ;;  %v1282_v22 = vclz %v8169_v9  ;;  %v16211_v23 = vand.u32 2147483647, %v16197_v18 }
 0x193   : > { %v887_v28 = vsel %vm10487_vm13, 0, %v885_v57  ;;  %v886_v62 = vsel %vm10487_vm13, %v16187_v0, %v883_v32  ;;  %v1301_v46 = vsel %vm1216_vm15, %v1300_v21, %v1276_v6  ;;  %v1581_v61 = vmul.u32 %v1574_v55, %v1565_v10 }
 0x194   : > { %vm10512_vm8 = vcmp.le.f32.partialorder %v16211_v23, 0.7853982  ;;  %vm1583_vm9 = vc.u32 %v10476_v35, %v10459_v31  ;;  %v891_v17 = vadd.s32 3, %v887_v28  ;;  %v8170_v8 = vadd.s32 4294967294, %v1282_v22 }
 0x195   : > { %v1585_v13 = vsel %vm1583_vm9, %v1584_v60, %v10460_v25  ;;  %v1942_v24 = vand.u32 2147483647, %v16214_v38  ;;  %8830 = vcosq.f32 %v886_v62  ;;  %v1960_v47 = vshrl.u32 %v16167_v56, %v9942_v20 }
 0x196   : > { %v1586_v50 = vadd.s32 %v1585_v13, %v1581_v61  ;;  %v1963_v52 = vshrl.u32 %v16168_v30, %v9942_v20  ;;  %v1270_v6 = vadd.s32 %v10386_v53, %v10382_v37  ;;  %vm8171_vm11 = vcmp.lt.s32.totalorder %v8170_v8, 0 }
 0x197   : > { %v1303_v55 = vsel %vm10512_vm8, 0, %v1301_v46  ;;  %v1966_v1 = vshrl.u32 %v16159_v7, %v9942_v20  ;;  %v1285_v59 = vsel %vm8171_vm11, 0, %v8170_v8  ;;  %v1959_v25 = vshll.u32 %v16166_v40, %v9738_v19 }
 0x198   : > { %v1587_v33 = vadd.s32 536870912, %v1586_v50  ;;  %v1962_v57 = vshll.u32 %v16167_v56, %v9738_v19  ;;  %v1286_v29 = vsub.s32 32, %v1285_v59  ;;  %v1290_v32 = vsub.s32 4294967266, %v1285_v59 }
 0x199   : > { %v1949_v37 = vand.u32 8388607, %v1942_v24  ;;  %v1965_v53 = vshll.u32 %v16168_v30, %v9738_v19  ;;  %8832 = vsinq.f32 %v886_v62  ;;  %v1961_v41 = vor.u32 %v1960_v47, %v1959_v25 }
 0x19a   : > { %v10540_v21 = vshrl.u32 %v1587_v33, 30  ;;  %v1964_v58 = vor.u32 %v1963_v52, %v1962_v57  ;;  %v1287_v4 = vshll.u32 %v10451_v3, %v1285_v59  ;;  %v1288_v9 = vshrl.u32 %v1270_v6, %v1286_v29 }
 0x19b   : > { %v1291_v10 = vadd.s32 127, %v1290_v32  ;;  %v1967_v28 = vor.u32 %v1966_v1, %v1965_v53  ;;  %v2176_v60 = vshll.u32 %v16159_v7, %v10469_v44  ;;  %v2177_v22 = vshrl.u32 %v16165_v39, %v10504_v26 }
 0x19c   : > { %v10547_v23 = vand.u32 3, %v891_v17  ;;  %v1589_v19 = vshll.u32 %v10540_v21, 30  ;;  %v1289_v62 = vor.u32 %v1288_v9, %v1287_v4  ;;  %v1307_v61 = vadd.s32 3, %v1303_v55 }
 0x19d   : > { %v1292_v46 = vshll.u32 %v1291_v10, 23  ;;  %v1950_v8 = vor.u32 8388608, %v1949_v37  ;;  %v1958_v3 = vshrl.u32 %v16166_v40, %v9942_v20  ;;  %vm1974_vm14 = vcmp.lt.s32.totalorder %v9736_v63, 1 }
 0x19e   : > { %v10550_v13 = vsub.s32 %v1586_v50, %v1589_v19  ;;  %vm1976_vm0 = vcmp.lt.s32.totalorder %v9736_v63, 3  ;;  %v1979_v17 = vsel %vm1977_vm5, %v1967_v28, 2102212464  ;;  %v1982_v52 = vsel %vm1974_vm14, %v1961_v41, %v1964_v58 }
 0x19f   : > { %v1293_v47 = vor.u32 4788187, %v1292_v46  ;;  %v1984_v6 = vsel %vm1976_vm0, %v1967_v28, %v10466_v27  ;;  %v10559_v1 = vpop.eup %8830  ;;  %vm1975_vm2 = vcmp.lt.s32.totalorder %v9736_v63, 2  ;;  %v1978_v50 = vsel %vm1974_vm14, %v1958_v3, %v1961_v41 }
 0x1a0   : > { %v1592_v55 = vsub.s32 0, %v10550_v13  ;;  %v1986_v59 = vsel %vm1974_vm14, %v1964_v58, %v1967_v28  ;;  %v1296_v33 = vcvt.s32.f32 %v1289_v62  ;;  %v1988_v25 = vsel %vm1976_vm0, %v10283_v15, %v10483_v12 }
 0x1a1   : > { %v1294_v20 = vand.u32 2147483647, %v1293_v47  ;;  %v1990_v57 = vshll.u32 %v1950_v8, 8  ;;  %v1980_v32 = vsel %vm1976_vm0, %v1964_v58, %v1979_v17  ;;  %v1985_v27 = vsel %vm1975_vm2, %v1982_v52, %v1984_v6  ;;  %v16215_v6 = vld [vmem:[#allocation12_spill] sm:$0xff] }
 0x1a2   : > { %v8181_v29 = vmin.u32 %v1592_v55, %v10550_v13  ;;  %v1989_v37 = vsel %vm1975_vm2, %v1986_v59, %v1988_v25  ;;  %v898_v53 = vxor.u32 2147483648, %v10559_v1  ;;  %v10574_v28 = vor.u32 %v2177_v22, %v2176_v60  ;;  %v16217_v25 = vld [vmem:[#allocation33_spill] sm:$0xff] }
 0x1a3   : > { %v1297_v4 = vmul.f32 %v1296_v33, %v1294_v20  ;;  %v10571_v41 = vmul.u32.u64.low %v1990_v57, %v1989_v37  ;;  %v10572_v9 = vmul.u32.u64.high %v1990_v57, %v1989_v37, %v10571_v41  ;;  %v8833_v10 = vpop.eup %8832  ;;  %v10578_v15 = vshll.u32 %v16165_v39, %v10469_v44 }
 0x1a4   : > { %v10582_v12 = vshrl.u32 %v16156_v16, %v10504_v26  ;;  %v1594_v58 = vclz %v8181_v29  ;;  %vm894_vm5 = vcmp.eq.s32.totalorder %v10547_v23, 0  ;;  %v1981_v62 = vsel %vm1975_vm2, %v1978_v50, %v1980_v32  ;;  %v16216_v50 = vld [vmem:[#allocation39_spill] sm:$0xff] }
 0x1a5   : > { %v1298_v19 = vxor.u32 2147483648, %v1297_v4  ;;  %v10587_v46 = vmul.u32.u64.low %v1990_v57, %v1985_v27  ;;  %v10588_v8 = vmul.u32.u64.high %v1990_v57, %v1985_v27, %v10587_v46  ;;  %vm897_vm1 = vcmp.eq.s32.totalorder %v10547_v23, 2 }
 0x1a6   : > { %v10592_v60 = vand.u32 3, %v1307_v61  ;;  %v1582_v22 = vadd.s32 %v10459_v31, %v10476_v35  ;;  %v8182_v3 = vadd.s32 4294967294, %v1594_v58  ;;  %v895_v47 = vxor.u32 2147483648, %v8833_v10 }
 0x1a7   : > { %v899_v17 = vsel %vm897_vm1, %v898_v53, %v8833_v10  ;;  %v1299_v52 = vsel %vm1216_vm15, %v1298_v19, %v1297_v4  ;;  %v1734_v63 = vand.u32 2147483647, %v16215_v6  ;;  %vm893_vm6 = vcmp.lt.s32.totalorder %v10547_v23, 2 }
 0x1a8   : > { %v1302_v55 = vsel %vm10512_vm8, %v16197_v18, %v1299_v52  ;;  %vm8183_vm3 = vcmp.lt.s32.totalorder %v8182_v3, 0  ;;  %v1997_v61 = vmul.u32 %v1990_v57, %v1981_v62  ;;  %vm1999_vm7 = vc.u32 %v10572_v9, %v10587_v46 }
 0x1a9   : > { %8834 = vcosq.f32 %v1302_v55  ;;  %v1597_v31 = vsel %vm8183_vm3, 0, %v8182_v3  ;;  %v2000_v35 = vadd.s32 1, %v10588_v8  ;;  %v1752_v59 = vshrl.u32 %v16167_v56, %v16216_v50 }
 0x1aa   : > { %8836 = vsinq.f32 %v1302_v55  ;;  %v1598_v20 = vsub.s32 32, %v1597_v31  ;;  %v1602_v33 = vsub.s32 4294967266, %v1597_v31  ;;  %v1751_v29 = vshll.u32 %v16166_v40, %v16217_v25 }
 0x1ab   : > { %v2001_v48 = vsel %vm1999_vm7, %v2000_v35, %v10588_v8  ;;  %v1741_v57 = vand.u32 8388607, %v1734_v63  ;;  %v1754_v32 = vshll.u32 %v16167_v56, %v16217_v25  ;;  %v1755_v27 = vshrl.u32 %v16168_v30, %v16216_v50 }
 0x1ac   : > { %v1599_v37 = vshll.u32 %v10550_v13, %v1597_v31  ;;  %v1600_v53 = vshrl.u32 %v1582_v22, %v1598_v20  ;;  %v1603_v4 = vadd.s32 127, %v1602_v33  ;;  %v2002_v41 = vadd.s32 %v2001_v48, %v1997_v61 }
 0x1ad   : > { %vm1313_vm13 = vcmp.eq.s32.totalorder %v10592_v60, 2  ;;  %v1753_v10 = vor.u32 %v1752_v59, %v1751_v29  ;;  %v1756_v58 = vor.u32 %v1755_v27, %v1754_v32  ;;  %v1757_v19 = vshll.u32 %v16168_v30, %v16217_v25 }
 0x1ae   : > { %v1758_v62 = vshrl.u32 %v16159_v7, %v16216_v50  ;;  %vm890_vm15 = vweird.f32 %v16187_v0  ;;  %v896_v8 = vsel %vm894_vm5, %v10559_v1, %v895_v47  ;;  %vm1310_vm8 = vcmp.eq.s32.totalorder %v10592_v60, 0 }
 0x1af   : > { %v1601_v13 = vor.u32 %v1600_v53, %v1599_v37  ;;  %v1604_v22 = vshll.u32 %v1603_v4, 23  ;;  %v2003_v3 = vadd.s32 536870912, %v2002_v41  ;;  %vm1309_vm9 = vcmp.lt.s32.totalorder %v10592_v60, 2 }
 0x1b0   : > { %vm1528_vm11 = vcmp.lt.s32.totalorder %v16201_v51, 0  ;;  %v1612_v52 = vsub.s32 4, %v10540_v21  ;;  %v1742_v55 = vor.u32 8388608, %v1741_v57  ;;  %v1759_v61 = vor.u32 %v1758_v62, %v1757_v19 }
 0x1b1   : > { %vm1768_vm14 = vcmp.lt.s32.totalorder %v9577_v11, 3  ;;  %vm1306_vm0 = vweird.f32 %v16197_v18  ;;  %v1605_v31 = vor.u32 4788187, %v1604_v22  ;;  %v2004_v35 = vshrl.u32 %v2003_v3, 30 }
 0x1b2   : > { %vm1766_vm2 = vcmp.lt.s32.totalorder %v9577_v11, 1  ;;  %v1780_v1 = vsel %vm1768_vm14, %v9724_v42, %v9759_v14  ;;  %v900_v47 = vsel %vm893_vm6, %v896_v8, %v899_v17  ;;  %v1776_v20 = vsel %vm1768_vm14, %v1759_v61, %v9748_v49 }
 0x1b3   : > { %v1774_v59 = vsel %vm1766_vm2, %v1753_v10, %v1756_v58  ;;  %v1778_v33 = vsel %vm1766_vm2, %v1756_v58, %v1759_v61  ;;  %v1606_v25 = vand.u32 2147483647, %v1605_v31  ;;  %v1608_v29 = vcvt.s32.f32 %v1601_v13  ;;  %v8835_v57 = vpop.eup %8834 }
 0x1b4   : > { %v2005_v48 = vshll.u32 %v2004_v35, 30  ;;  %vm1767_vm5 = vcmp.lt.s32.totalorder %v9577_v11, 2  ;;  %v1750_v42 = vshrl.u32 %v16166_v40, %v16216_v50  ;;  %v1771_v14 = vsel %vm1769_vm10, %v1759_v61, 2102212464  ;;  %v8837_v49 = vpop.eup %8836 }
 0x1b5   : > { %v1781_v23 = vsel %vm1767_vm5, %v1778_v33, %v1780_v1  ;;  %v1782_v17 = vshll.u32 %v1742_v55, 8  ;;  %v1314_v32 = vxor.u32 2147483648, %v8835_v57  ;;  %v1609_v27 = vmul.f32 %v1608_v29, %v1606_v25 }
 0x1b6   : > { %v10654_v37 = vsub.s32 %v2002_v41, %v2005_v48  ;;  %v1777_v53 = vsel %vm1767_vm5, %v1774_v59, %v1776_v20  ;;  %v1311_v4 = vxor.u32 2147483648, %v8837_v49  ;;  %v1770_v19 = vsel %vm1766_vm2, %v1750_v42, %v1753_v10 }
 0x1b7   : > { %v10660_v50 = vmul.u32.u64.low %v1782_v17, %v1781_v23  ;;  %v10661_v62 = vmul.u32.u64.high %v1782_v17, %v1781_v23, %v10660_v50  ;;  %v1315_v8 = vsel %vm1313_vm13, %v1314_v32, %v8837_v49  ;;  %v1610_v13 = vxor.u32 2147483648, %v1609_v27 }
 0x1b8   : > { %v2008_v22 = vsub.s32 0, %v10654_v37  ;;  %v1772_v41 = vsel %vm1768_vm14, %v1756_v58, %v1771_v14  ;;  %v901_v3 = vsel %vm890_vm15, nan, %v900_v47  ;;  %v1312_v55 = vsel %vm1310_vm8, %v8835_v57, %v1311_v4 }
 0x1b9   : > { %v10672_v61 = vmul.u32.u64.low %v1782_v17, %v1777_v53  ;;  %v10673_v10 = vmul.u32.u64.high %v1782_v17, %v1777_v53, %v10672_v61  ;;  %v1316_v31 = vsel %vm1309_vm9, %v1312_v55, %v1315_v8  ;;  %vm10680_vm10 = vcmp.le.f32.partialorder %v1526_v43, 0.7853982 }
 0x1ba   : > { %v1611_v0 = vsel %vm1528_vm11, %v1610_v13, %v1609_v27  ;;  %v8197_v58 = vmin.u32 %v2008_v22, %v10654_v37  ;;  %v1317_v47 = vsel %vm1306_vm0, nan, %v1316_v31  ;;  %v1613_v59 = vsel %vm1528_vm11, %v1612_v52, %v10540_v21  ;;  %v16220_v52 = vld [vmem:[#allocation22_spill] sm:$0xff] }
 0x1bb   : > { %v2028_v60 = vsub.s32 4, %v2004_v35  ;;  %v1773_v20 = vsel %vm1767_vm5, %v1770_v19, %v1772_v41  ;;  %v8442_v43 = vpack.c.bf16 %v1317_v47, %v901_v3  ;;  %v1614_v33 = vsel %vm10680_vm10, %v16201_v51, %v1611_v0 }
 0x1bc   : > { %v2010_v25 = vclz %v8197_v58  ;;  %vm1791_vm1 = vc.u32 %v10661_v62, %v10672_v61  ;;  %v2181_v18 = vor.u32 %v10582_v12, %v10578_v15  ;;  %vm2185_vm6 = vcmp.lt.s32.totalorder %v10498_v34, 4 }
 0x1bd   : > { %v1792_v21 = vadd.s32 1, %v10673_v10  ;;  %v2150_v29 = vand.u32 2147483647, %v16220_v52  ;;  %v2191_v11 = vsel %vm2185_vm6, %v10574_v28, 920167782  ;;  %8443 = vmatpush1.bf16.msra.mxu1 %v8442_v43  ;;  %vm1944_vm3 = vcmp.lt.s32.totalorder %v16214_v38, 0 }
 0x1be   : > { %v8198_v48 = vadd.s32 4294967294, %v2010_v25  ;;  %v1789_v57 = vmul.u32 %v1782_v17, %v1773_v20  ;;  %v1615_v42 = vsel %vm10680_vm10, 0, %v1613_v59  ;;  %8838 = vcosq.f32 %v1614_v33 }
 0x1bf   : > { %v1998_v15 = vadd.s32 %v10587_v46, %v10572_v9  ;;  %v1793_v12 = vsel %vm1791_vm1, %v1792_v21, %v10673_v10  ;;  %8840 = vsinq.f32 %v1614_v33  ;;  %v2029_v14 = vsel %vm1944_vm3, %v2028_v60, %v2004_v35 }
 0x1c0   : > { %vm8199_vm7 = vcmp.lt.s32.totalorder %v8198_v48, 0  ;;  %v1794_v23 = vadd.s32 %v1793_v12, %v1789_v57  ;;  %v2157_v32 = vand.u32 8388607, %v2150_v29  ;;  %v2168_v17 = vshrl.u32 %v16167_v56, %v10504_v26 }
 0x1c1   : > { %v2013_v49 = vsel %vm8199_vm7, 0, %v8198_v48  ;;  %v2171_v27 = vshrl.u32 %v16168_v30, %v10504_v26  ;;  %v2170_v4 = vshll.u32 %v16167_v56, %v10469_v44  ;;  %v2167_v35 = vshll.u32 %v16166_v40, %v10469_v44 }
 0x1c2   : > { %v2014_v53 = vsub.s32 32, %v2013_v49  ;;  %v2018_v9 = vsub.s32 4294967266, %v2013_v49  ;;  %v1795_v46 = vadd.s32 536870912, %v1794_v23  ;;  %v2015_v19 = vshll.u32 %v10654_v37, %v2013_v49 }
 0x1c3   : > { %v2173_v50 = vshll.u32 %v16168_v30, %v10469_v44  ;;  %v2174_v8 = vshrl.u32 %v16159_v7, %v10504_v26  ;;  %v2172_v3 = vor.u32 %v2171_v27, %v2170_v4  ;;  %v2195_v55 = vsel %vm2185_vm6, %v2181_v18, 1326507024 }
 0x1c4   : > { %v2016_v13 = vshrl.u32 %v1998_v15, %v2014_v53  ;;  %v2019_v22 = vadd.s32 127, %v2018_v9  ;;  %v10730_v41 = vshrl.u32 %v1795_v46, 30  ;;  %vm10736_vm13 = vcmp.le.f32.partialorder %v1942_v24, 0.7853982  ;;  %v16223_v46 = vld [vmem:[#allocation7_spill] sm:$0xff] }
 0x1c5   : > { %v2169_v10 = vor.u32 %v2168_v17, %v2167_v35  ;;  %v2175_v31 = vor.u32 %v2174_v8, %v2173_v50  ;;  %v1619_v44 = vadd.s32 3, %v1615_v42  ;;  %v2031_v47 = vsel %vm10736_vm13, 0, %v2029_v14 }
 0x1c6   : > { %v2017_v1 = vor.u32 %v2016_v13, %v2015_v19  ;;  %v2020_v0 = vshll.u32 %v2019_v22, 23  ;;  %v1797_v58 = vshll.u32 %v10730_v41, 30  ;;  %v2158_v59 = vor.u32 8388608, %v2157_v32 }
 0x1c7   : > { %vm2182_vm15 = vcmp.lt.s32.totalorder %v10498_v34, 1  ;;  %vm2184_vm8 = vcmp.lt.s32.totalorder %v10498_v34, 3  ;;  %v2166_v25 = vshrl.u32 %v16166_v40, %v10504_v26  ;;  %vm2183_vm9 = vcmp.lt.s32.totalorder %v10498_v34, 2 }
 0x1c8   : > { %v2021_v60 = vor.u32 4788187, %v2020_v0  ;;  %v10745_v24 = vsub.s32 %v1794_v23, %v1797_v58  ;;  %v2194_v20 = vsel %vm2182_vm15, %v2172_v3, %v2175_v31  ;;  %v2196_v43 = vsel %vm2184_vm8, %v10574_v28, %v2195_v55  ;;  %v8839_v33 = vpop.eup %8838 }
 0x1c9   : > { %v2187_v18 = vsel %vm2185_vm6, %v2175_v31, 2102212464  ;;  %v2190_v21 = vsel %vm2182_vm15, %v2169_v10, %v2172_v3  ;;  %v8841_v48 = vpop.eup %8840  ;;  %v2024_v42 = vcvt.s32.f32 %v2017_v1  ;;  %v2192_v28 = vsel %vm2184_vm8, %v2175_v31, %v2191_v11 }
 0x1ca   : > { %v2022_v57 = vand.u32 2147483647, %v2021_v60  ;;  %v1800_v15 = vsub.s32 0, %v10745_v24  ;;  %v1620_v12 = vand.u32 3, %v1619_v44  ;;  %v2035_v14 = vadd.s32 3, %v2031_v47  ;;  %v16224_v60 = vld [vmem:[#allocation17_spill] sm:$0xff] }
 0x1cb   : > { %v2186_v26 = vsel %vm2182_vm15, %v2166_v25, %v2169_v10  ;;  %v2197_v23 = vsel %vm2183_vm9, %v2194_v20, %v2196_v43  ;;  %v2188_v17 = vsel %vm2184_vm8, %v2172_v3, %v2187_v18  ;;  %v2198_v27 = vshll.u32 %v2158_v59, 8 }
 0x1cc   : > { %v2025_v49 = vmul.f32 %v2024_v42, %v2022_v57  ;;  %v8189_v32 = vmin.u32 %v1800_v15, %v10745_v24  ;;  %v1623_v53 = vxor.u32 2147483648, %v8841_v48  ;;  %v1626_v9 = vxor.u32 2147483648, %v8839_v33 }
 0x1cd   : > { %v2193_v11 = vsel %vm2183_vm9, %v2190_v21, %v2192_v28  ;;  %v1422_v4 = vand.u32 2147483647, %v16223_v46  ;;  %v10772_v50 = vmul.u32.u64.low %v2198_v27, %v2197_v23  ;;  %v10773_v8 = vmul.u32.u64.high %v2198_v27, %v2197_v23, %v10772_v50 }
 0x1ce   : > { %v2026_v19 = vxor.u32 2147483648, %v2025_v49  ;;  %v1802_v35 = vclz %v8189_v32  ;;  %vm1622_vm11 = vcmp.eq.s32.totalorder %v1620_v12, 0  ;;  %vm1625_vm14 = vcmp.eq.s32.totalorder %v1620_v12, 2 }
 0x1cf   : > { %v10775_v13 = vand.u32 3, %v2035_v14  ;;  %v2189_v22 = vsel %vm2183_vm9, %v2186_v26, %v2188_v17  ;;  %vm1621_vm0 = vcmp.lt.s32.totalorder %v1620_v12, 2  ;;  %v1624_v44 = vsel %vm1622_vm11, %v8839_v33, %v1623_v53 }
 0x1d0   : > { %v2027_v3 = vsel %vm1944_vm3, %v2026_v19, %v2025_v49  ;;  %v8190_v55 = vadd.s32 4294967294, %v1802_v35  ;;  %v10781_v10 = vmul.u32.u64.low %v2198_v27, %v2193_v11  ;;  %v10782_v31 = vmul.u32.u64.high %v2198_v27, %v2193_v11, %v10781_v10  ;;  %v16226_v19 = vld [vmem:[#allocation27_spill] sm:$0xff]  ;;  %v16227_v35 = vld [vmem:[#allocation42_spill] sm:$0xff] }
 0x1d1   : > { %v1627_v1 = vsel %vm1625_vm14, %v1626_v9, %v8841_v48  ;;  %v2030_v0 = vsel %vm10736_vm13, %v16214_v38, %v2027_v3  ;;  %v1790_v58 = vadd.s32 %v10672_v61, %v10661_v62  ;;  %v2205_v34 = vmul.u32 %v2198_v27, %v2189_v22  ;;  %v16225_v61 = vld [vmem:[#allocation21_spill] sm:$0xff] }
 0x1d2   : > { %8842 = vcosq.f32 %v2030_v0  ;;  %vm8191_vm2 = vcmp.lt.s32.totalorder %v8190_v55, 0  ;;  %v1429_v47 = vand.u32 8388607, %v1422_v4  ;;  %vm2207_vm5 = vc.u32 %v10773_v8, %v10781_v10 }
 0x1d3   : > { %8844 = vsinq.f32 %v2030_v0  ;;  %v1805_v59 = vsel %vm8191_vm2, 0, %v8190_v55  ;;  %v1439_v20 = vshll.u32 %v16166_v40, %v16224_v60  ;;  %v2208_v62 = vadd.s32 1, %v10782_v31  ;;  %v16229_v0 = vld [vmem:[#allocation35_spill] sm:$0xff] }
 0x1d4   : > { %v1806_v43 = vsub.s32 32, %v1805_v59  ;;  %v1807_v37 = vshll.u32 %v10745_v24, %v1805_v59  ;;  %v1810_v33 = vsub.s32 4294967266, %v1805_v59  ;;  %v1440_v25 = vshrl.u32 %v16167_v56, %v16225_v61 }
 0x1d5   : > { %v1442_v18 = vshll.u32 %v16167_v56, %v16224_v60  ;;  %v1443_v21 = vshrl.u32 %v16168_v30, %v16225_v61  ;;  %v1445_v48 = vshll.u32 %v16168_v30, %v16224_v60  ;;  %v2209_v15 = vsel %vm2207_vm5, %v2208_v62, %v10782_v31 }
 0x1d6   : > { %v1808_v57 = vshrl.u32 %v1790_v58, %v1806_v43  ;;  %v1811_v42 = vadd.s32 127, %v1810_v33  ;;  %v1446_v24 = vshrl.u32 %v16159_v7, %v16225_v61  ;;  %vm2038_vm10 = vcmp.eq.s32.totalorder %v10775_v13, 0  ;;  %v16230_v58 = vld [vmem:[#allocation30_spill] sm:$0xff] }
 0x1d7   : > { %vm1736_vm1 = vcmp.lt.s32.totalorder %v16215_v6, 0  ;;  %v2210_v28 = vadd.s32 %v2209_v15, %v2205_v34  ;;  %v1441_v14 = vor.u32 %v1440_v25, %v1439_v20  ;;  %v1444_v26 = vor.u32 %v1443_v21, %v1442_v18 }
 0x1d8   : > { %v1809_v23 = vor.u32 %v1808_v57, %v1807_v37  ;;  %v1812_v49 = vshll.u32 %v1811_v42, 23  ;;  %v1430_v32 = vor.u32 8388608, %v1429_v47  ;;  %v1447_v17 = vor.u32 %v1446_v24, %v1445_v48 }
 0x1d9   : > { %vm1618_vm6 = vweird.f32 %v16201_v51  ;;  %v1628_v27 = vsel %vm1621_vm0, %v1624_v44, %v1627_v1  ;;  %vm2034_vm3 = vweird.f32 %v16214_v38  ;;  %vm2041_vm7 = vcmp.eq.s32.totalorder %v10775_v13, 2  ;;  %v16228_v44 = vld [vmem:[#allocation34_spill] sm:$0xff] }
 0x1da   : > { %v1820_v53 = vsub.s32 4, %v10730_v41  ;;  %v2211_v9 = vadd.s32 536870912, %v2210_v28  ;;  %v1813_v11 = vor.u32 4788187, %v1812_v49  ;;  %vm1454_vm13 = vcmp.lt.s32.totalorder %v16226_v19, 1 }
 0x1db   : > { %vm1455_vm15 = vcmp.lt.s32.totalorder %v16226_v19, 2  ;;  %vm1456_vm8 = vcmp.lt.s32.totalorder %v16226_v19, 3  ;;  %vm1873_vm9 = vcmp.lt.s32.totalorder %v16227_v35, 4  ;;  %v1816_v50 = vcvt.s32.f32 %v1809_v23 }
 0x1dc   : > { %v2212_v22 = vshrl.u32 %v2211_v9, 30  ;;  %v1462_v12 = vsel %vm1454_vm13, %v1441_v14, %v1444_v26  ;;  %v1466_v3 = vsel %vm1454_vm13, %v1444_v26, %v1447_v17  ;;  %v8843_v55 = vpop.eup %8842  ;;  %v1814_v31 = vand.u32 2147483647, %v1813_v11 }
 0x1dd   : > { %v1464_v1 = vsel %vm1456_vm8, %v1447_v17, %v16228_v44  ;;  %v1468_v34 = vsel %vm1456_vm8, %v16230_v58, %v16229_v0  ;;  %v1470_v47 = vshll.u32 %v1430_v32, 8  ;;  %v8845_v59 = vpop.eup %8844  ;;  %v2042_v60 = vxor.u32 2147483648, %v8843_v55  ;;  %v16234_v58 = vld [vmem:[#allocation10_spill] sm:$0xff] }
 0x1de   : > { %v2213_v20 = vshll.u32 %v2212_v22, 30  ;;  %v1459_v43 = vsel %vm1457_vm12, %v1447_v17, 2102212464  ;;  %v1469_v37 = vsel %vm1455_vm15, %v1466_v3, %v1468_v34  ;;  %v2039_v33 = vxor.u32 2147483648, %v8845_v59 }
 0x1df   : > { %v1817_v62 = vmul.f32 %v1816_v50, %v1814_v31  ;;  %v10835_v25 = vmul.u32.u64.low %v1470_v47, %v1469_v37  ;;  %v10836_v18 = vmul.u32.u64.high %v1470_v47, %v1469_v37, %v10835_v25  ;;  %v2043_v21 = vsel %vm2041_vm7, %v2042_v60, %v8845_v59  ;;  %v16235_v59 = vld [vmem:[#allocation44_spill] sm:$0xff]  ;;  %v16236_v37 = vld [vmem:[#allocation43_spill] sm:$0xff] }
 0x1e0   : > { %v10840_v48 = vsub.s32 %v2210_v28, %v2213_v20  ;;  %v1438_v57 = vshrl.u32 %v16166_v40, %v16225_v61  ;;  %v1465_v42 = vsel %vm1455_vm15, %v1462_v12, %v1464_v1  ;;  %vm2037_vm12 = vcmp.lt.s32.totalorder %v10775_v13, 2 }
 0x1e1   : > { %v2040_v15 = vsel %vm2038_vm10, %v8843_v55, %v2039_v33  ;;  %v1818_v24 = vxor.u32 2147483648, %v1817_v62  ;;  %v1821_v23 = vsel %vm1736_vm1, %v1820_v53, %v10730_v41  ;;  %v1460_v61 = vsel %vm1456_vm8, %v1444_v26, %v1459_v43 }
 0x1e2   : > { %v2044_v49 = vsel %vm2037_vm12, %v2040_v15, %v2043_v21  ;;  %v2216_v28 = vsub.s32 0, %v10840_v48  ;;  %v1458_v32 = vsel %vm1454_vm13, %v1438_v57, %v1441_v14  ;;  %v1629_v17 = vsel %vm1618_vm6, nan, %v1628_v27 }
 0x1e3   : > { %v2045_v13 = vsel %vm2034_vm3, nan, %v2044_v49  ;;  %v10861_v9 = vmul.u32.u64.low %v1470_v47, %v1465_v42  ;;  %v10862_v11 = vmul.u32.u64.high %v1470_v47, %v1465_v42, %v10861_v9  ;;  %v1819_v53 = vsel %vm1736_vm1, %v1818_v24, %v1817_v62 }
 0x1e4   : > { %v8436_v41 = vpack.c.bf16 %v2045_v13, %v1629_v17  ;;  %v8205_v50 = vmin.u32 %v2216_v28, %v10840_v48  ;;  %v2236_v14 = vsub.s32 4, %v2212_v22  ;;  %v1879_v26 = vsel %vm1873_vm9, %v10178_v5, 920167782 }
 0x1e5   : > { %v16231_v51 = vor.u32 %v10063_v2, %v9939_v54  ;;  %v10877_v27 = vshrl.u32 %v10305_v36, 5  ;;  %v1461_v12 = vsel %vm1455_vm15, %v1458_v32, %v1460_v61  ;;  %v10882_v3 = vsub.s32 32, %v10495_v45 }
 0x1e6   : > { %8437 = vmatprep.subr.bf16.mxu0 %v8436_v41  ;;  %vm10886_vm11 = vcmp.le.f32.partialorder %v1734_v63, 0.7853982  ;;  %v2218_v54 = vclz %v8205_v50  ;;  %vm1479_vm14 = vc.u32 %v10836_v18, %v10861_v9  ;;  %vm2152_vm0 = vcmp.lt.s32.totalorder %v16220_v52, 0 }
 0x1e7   : > { %v1883_v38 = vsel %vm1873_vm9, %v16231_v51, 1326507024  ;;  %v1822_v2 = vsel %vm10886_vm11, %v16215_v6, %v1819_v53  ;;  %v1823_v36 = vsel %vm10886_vm11, 0, %v1821_v23  ;;  %v1480_v19 = vadd.s32 1, %v10862_v11 }
 0x1e8   : > { %v2206_v63 = vadd.s32 %v10781_v10, %v10773_v8  ;;  %v8206_v31 = vadd.s32 4294967294, %v2218_v54  ;;  %v2237_v44 = vsel %vm2152_vm0, %v2236_v14, %v2212_v22  ;;  %v1477_v1 = vmul.u32 %v1470_v47, %v1461_v12 }
 0x1e9   : > { %v1481_v0 = vsel %vm1479_vm14, %v1480_v19, %v10862_v11  ;;  %v1838_v34 = vand.u32 2147483647, %v16234_v58  ;;  %v1856_v60 = vshrl.u32 %v16167_v56, %v16235_v59  ;;  %v1859_v20 = vshrl.u32 %v16168_v30, %v16235_v59 }
 0x1ea   : > { %8846 = vcosq.f32 %v1822_v2  ;;  %vm8207_vm2 = vcmp.lt.s32.totalorder %v8206_v31, 0  ;;  %v1482_v43 = vadd.s32 %v1481_v0, %v1477_v1  ;;  %v1855_v8 = vshll.u32 %v16166_v40, %v16236_v37 }
 0x1eb   : > { %v2221_v10 = vsel %vm8207_vm2, 0, %v8206_v31  ;;  %v1858_v22 = vshll.u32 %v16167_v56, %v16236_v37  ;;  %v1861_v47 = vshll.u32 %v16168_v30, %v16236_v37  ;;  %v1862_v33 = vshrl.u32 %v16159_v7, %v16235_v59 }
 0x1ec   : > { %8848 = vsinq.f32 %v1822_v2  ;;  %v2222_v62 = vsub.s32 32, %v2221_v10  ;;  %v2226_v25 = vsub.s32 4294967266, %v2221_v10  ;;  %v1483_v21 = vadd.s32 536870912, %v1482_v43 }
 0x1ed   : > { %v1845_v57 = vand.u32 8388607, %v1838_v34  ;;  %v1857_v42 = vor.u32 %v1856_v60, %v1855_v8  ;;  %v1860_v15 = vor.u32 %v1859_v20, %v1858_v22  ;;  %v1863_v24 = vor.u32 %v1862_v33, %v1861_v47 }
 0x1ee   : > { %v2223_v23 = vshll.u32 %v10840_v48, %v2221_v10  ;;  %v2224_v49 = vshrl.u32 %v2206_v63, %v2222_v62  ;;  %v2227_v28 = vadd.s32 127, %v2226_v25  ;;  %v10920_v32 = vshrl.u32 %v1483_v21, 30 }
 0x1ef   : > { %v10924_v61 = vshll.u32 %v16159_v7, %v10495_v45  ;;  %v1827_v17 = vadd.s32 3, %v1823_v36  ;;  %vm10928_vm5 = vcmp.le.f32.partialorder %v2150_v29, 0.7853982  ;;  %vm1870_vm10 = vcmp.lt.s32.totalorder %v16227_v35, 1 }
 0x1f0   : > { %v2225_v11 = vor.u32 %v2224_v49, %v2223_v23  ;;  %v2228_v41 = vshll.u32 %v2227_v28, 23  ;;  %v1485_v48 = vshll.u32 %v10920_v32, 30  ;;  %vm1872_vm1 = vcmp.lt.s32.totalorder %v16227_v35, 3 }
 0x1f1   : > { %v2239_v53 = vsel %vm10928_vm5, 0, %v2237_v44  ;;  %v1846_v50 = vor.u32 8388608, %v1845_v57  ;;  %v1882_v14 = vsel %vm1870_vm10, %v1860_v15, %v1863_v24  ;;  %v1884_v29 = vsel %vm1872_vm1, %v10178_v5, %v1883_v38 }
 0x1f2   : > { %v2229_v51 = vor.u32 4788187, %v2228_v41  ;;  %v10942_v12 = vsub.s32 %v1482_v43, %v1485_v48  ;;  %v1878_v55 = vsel %vm1870_vm10, %v1857_v42, %v1860_v15  ;;  %v1880_v54 = vsel %vm1872_vm1, %v1863_v24, %v1879_v26 }
 0x1f3   : > { %v10950_v2 = vshrl.u32 %v16156_v16, %v10882_v3  ;;  %v1854_v36 = vshrl.u32 %v16166_v40, %v16235_v59  ;;  %vm1871_vm6 = vcmp.lt.s32.totalorder %v16227_v35, 2  ;;  %v1875_v5 = vsel %vm1873_vm9, %v1863_v24, 2102212464  ;;  %v16239_v24 = vld [vmem:[#allocation9_spill] sm:$0xff] }
 0x1f4   : > { %v10957_v38 = vpop.eup %8846  ;;  %v2230_v19 = vand.u32 2147483647, %v2229_v51  ;;  %v2232_v63 = vcvt.s32.f32 %v2225_v11  ;;  %v1488_v31 = vsub.s32 0, %v10942_v12  ;;  %v1885_v26 = vsel %vm1871_vm6, %v1882_v14, %v1884_v29 }
 0x1f5   : > { %v10962_v44 = vand.u32 3, %v1827_v17  ;;  %v2243_v1 = vadd.s32 3, %v2239_v53  ;;  %v1881_v0 = vsel %vm1871_vm6, %v1878_v55, %v1880_v54  ;;  %v1886_v59 = vshll.u32 %v1846_v50, 8  ;;  %v16241_v54 = vld [vmem:[#allocation26_spill] sm:$0xff] }
 0x1f6   : > { %v8849_v60 = vpop.eup %8848  ;;  %v2233_v20 = vmul.f32 %v2232_v63, %v2230_v19  ;;  %v8177_v43 = vmin.u32 %v1488_v31, %v10942_v12  ;;  %v1874_v37 = vsel %vm1870_vm10, %v1854_v36, %v1857_v42  ;;  %v1876_v8 = vsel %vm1872_vm1, %v1860_v15, %v1875_v5 }
 0x1f7   : > { %v10973_v10 = vshrl.u32 %v16165_v39, %v10882_v3  ;;  %v10977_v22 = vshll.u32 %v16165_v39, %v10495_v45  ;;  %v10979_v47 = vmul.u32.u64.low %v1886_v59, %v1885_v26  ;;  %v10980_v33 = vmul.u32.u64.high %v1886_v59, %v1885_v26, %v10979_v47 }
 0x1f8   : > { %v2234_v62 = vxor.u32 2147483648, %v2233_v20  ;;  %v1490_v25 = vclz %v8177_v43  ;;  %v10982_v21 = vmul.u32.u64.low %v1886_v59, %v1881_v0  ;;  %v10983_v57 = vmul.u32.u64.high %v1886_v59, %v1881_v0, %v10982_v21 }
 0x1f9   : > { %v2077_v42 = vor.u32 %v10950_v2, %v10977_v22  ;;  %vm1833_vm3 = vcmp.eq.s32.totalorder %v10962_v44, 2  ;;  %v1877_v15 = vsel %vm1871_vm6, %v1874_v37, %v1876_v8  ;;  %v1630_v23 = vand.u32 2147483647, %v16239_v24 }
 0x1fa   : > { %vm1830_vm7 = vcmp.eq.s32.totalorder %v10962_v44, 0  ;;  %v2235_v49 = vsel %vm2152_vm0, %v2234_v62, %v2233_v20  ;;  %v10995_v28 = vand.u32 3, %v2243_v1  ;;  %v1478_v17 = vadd.s32 %v10861_v9, %v10836_v18  ;;  %v16240_v9 = vld [vmem:[#allocation29_spill] sm:$0xff] }
 0x1fb   : > { %v8178_v11 = vadd.s32 4294967294, %v1490_v25  ;;  %v1831_v41 = vxor.u32 2147483648, %v8849_v60  ;;  %v1834_v48 = vxor.u32 2147483648, %v10957_v38  ;;  %v2238_v35 = vsel %vm10928_vm5, %v16220_v52, %v2235_v49  ;;  %v16242_v49 = vld [vmem:[#allocation32_spill] sm:$0xff] }
 0x1fc   : > { %vm1895_vm13 = vc.u32 %v10980_v33, %v10982_v21  ;;  %8850 = vcosq.f32 %v2238_v35  ;;  %v1893_v53 = vmul.u32 %v1886_v59, %v1877_v15  ;;  %v1896_v50 = vadd.s32 1, %v10983_v57 }
 0x1fd   : > { %vm8179_vm15 = vcmp.lt.s32.totalorder %v8178_v11, 0  ;;  %8852 = vsinq.f32 %v2238_v35  ;;  %v1637_v18 = vand.u32 8388607, %v1630_v23  ;;  %v1648_v29 = vshrl.u32 %v16167_v56, %v16240_v9 }
 0x1fe   : > { %v1493_v14 = vsel %vm8179_vm15, 0, %v8178_v11  ;;  %vm1829_vm8 = vcmp.lt.s32.totalorder %v10962_v44, 2  ;;  %v1897_v55 = vsel %vm1895_vm13, %v1896_v50, %v10983_v57  ;;  %v1647_v36 = vshll.u32 %v16166_v40, %v16241_v54 }
 0x1ff   : > { %v1494_v13 = vsub.s32 32, %v1493_v14  ;;  %v1498_v51 = vsub.s32 4294967266, %v1493_v14  ;;  %v1495_v5 = vshll.u32 %v10942_v12, %v1493_v14  ;;  %v1898_v19 = vadd.s32 %v1897_v55, %v1893_v53 }
 0x200   : > { %v1650_v63 = vshll.u32 %v16167_v56, %v16241_v54  ;;  %v1651_v31 = vshrl.u32 %v16168_v30, %v16240_v9  ;;  %v1653_v0 = vshll.u32 %v16168_v30, %v16241_v54  ;;  %v1654_v59 = vshrl.u32 %v16159_v7, %v16240_v9 }
 0x201   : > { %v1496_v26 = vshrl.u32 %v1478_v17, %v1494_v13  ;;  %v1499_v1 = vadd.s32 127, %v1498_v51  ;;  %vm2246_vm9 = vcmp.eq.s32.totalorder %v10995_v28, 0  ;;  %vm2249_vm12 = vcmp.eq.s32.totalorder %v10995_v28, 2 }
 0x202   : > { %v1899_v12 = vadd.s32 536870912, %v1898_v19  ;;  %v1649_v20 = vor.u32 %v1648_v29, %v1647_v36  ;;  %v1652_v43 = vor.u32 %v1651_v31, %v1650_v63  ;;  %v1835_v37 = vsel %vm1833_vm3, %v1834_v48, %v8849_v60  ;;  %v16243_v60 = vld [vmem:[#allocation41_spill] sm:$0xff]  ;;  %v16244_v48 = vld [vmem:[#allocation38_spill] sm:$0xff] }
 0x203   : > { %vm2245_vm11 = vcmp.lt.s32.totalorder %v10995_v28, 2  ;;  %v1497_v8 = vor.u32 %v1496_v26, %v1495_v5  ;;  %v1500_v47 = vshll.u32 %v1499_v1, 23  ;;  %v1655_v62 = vor.u32 %v1654_v59, %v1653_v0 }
 0x204   : > { %v1832_v25 = vsel %vm1830_vm7, %v10957_v38, %v1831_v41  ;;  %v11031_v57 = vshrl.u32 %v1899_v12, 30  ;;  %v1646_v15 = vshrl.u32 %v16166_v40, %v16240_v9  ;;  %vm1664_vm14 = vcmp.lt.s32.totalorder %v16242_v49, 3  ;;  %v16245_v9 = vld [vmem:[#allocation40_spill] sm:$0xff] }
 0x205   : > { %v1501_v17 = vor.u32 4788187, %v1500_v47  ;;  %v1638_v11 = vor.u32 8388608, %v1637_v18  ;;  %vm1662_vm0 = vcmp.lt.s32.totalorder %v16242_v49, 1  ;;  %v1676_v35 = vsel %vm1664_vm14, %v16244_v48, %v16243_v60 }
 0x206   : > { %v1504_v53 = vcvt.s32.f32 %v1497_v8  ;;  %v1901_v50 = vshll.u32 %v11031_v57, 30  ;;  %vm1663_vm2 = vcmp.lt.s32.totalorder %v16242_v49, 2  ;;  %v1670_v38 = vsel %vm1662_vm0, %v1649_v20, %v1652_v43  ;;  %v8851_v41 = vpop.eup %8850  ;;  %v16246_v49 = vld [vmem:[#allocation11_spill] sm:$0xff] }
 0x207   : > { %v1502_v14 = vand.u32 2147483647, %v1501_v17  ;;  %v1667_v18 = vsel %vm1665_vm4, %v1655_v62, 2102212464  ;;  %v1672_v29 = vsel %vm1664_vm14, %v1655_v62, %v16245_v9  ;;  %v1674_v13 = vsel %vm1662_vm0, %v1652_v43, %v1655_v62  ;;  %v8853_v51 = vpop.eup %8852 }
 0x208   : > { %v1836_v55 = vsel %vm1829_vm8, %v1832_v25, %v1835_v37  ;;  %v2250_v54 = vxor.u32 2147483648, %v8851_v41  ;;  %v11054_v36 = vsub.s32 %v1898_v19, %v1901_v50  ;;  %v1677_v5 = vsel %vm1663_vm2, %v1674_v13, %v1676_v35 }
 0x209   : > { %v2247_v63 = vxor.u32 2147483648, %v8853_v51  ;;  %v1505_v31 = vmul.f32 %v1504_v53, %v1502_v14  ;;  %v1666_v26 = vsel %vm1662_vm0, %v1646_v15, %v1649_v20  ;;  %v1678_v1 = vshll.u32 %v1638_v11, 8 }
 0x20a   : > { %v2251_v0 = vsel %vm2249_vm12, %v2250_v54, %v8853_v51  ;;  %v1904_v59 = vsub.s32 0, %v11054_v36  ;;  %v1668_v44 = vsel %vm1664_vm14, %v1652_v43, %v1667_v18  ;;  %v1673_v19 = vsel %vm1663_vm2, %v1670_v38, %v1672_v29 }
 0x20b   : > { %v2248_v12 = vsel %vm2246_vm9, %v8851_v41, %v2247_v63  ;;  %v1506_v37 = vxor.u32 2147483648, %v1505_v31  ;;  %v11069_v8 = vmul.u32.u64.low %v1678_v1, %v1677_v5  ;;  %v11070_v47 = vmul.u32.u64.high %v1678_v1, %v1677_v5, %v11069_v8 }
 0x20c   : > { %vm1826_vm4 = vweird.f32 %v16215_v6  ;;  %vm2242_vm5 = vweird.f32 %v16220_v52  ;;  %v2252_v20 = vsel %vm2245_vm11, %v2248_v12, %v2251_v0  ;;  %v8193_v62 = vmin.u32 %v1904_v59, %v11054_v36 }
 0x20d   : > { %v1837_v43 = vsel %vm1826_vm4, nan, %v1836_v55  ;;  %v2253_v25 = vsel %vm2242_vm5, nan, %v2252_v20  ;;  %v11077_v15 = vmul.u32.u64.low %v1678_v1, %v1673_v19  ;;  %v11078_v17 = vmul.u32.u64.high %v1678_v1, %v1673_v19, %v11077_v15 }
 0x20e   : > { %v8444_v11 = vpack.c.bf16 %v2253_v25, %v1837_v43  ;;  %vm1424_vm10 = vcmp.lt.s32.totalorder %v16223_v46, 0  ;;  %v1906_v60 = vclz %v8193_v62  ;;  %v1669_v6 = vsel %vm1663_vm2, %v1666_v26, %v1668_v44 }
 0x20f   : > { %v2074_v52 = vor.u32 %v10973_v10, %v10924_v61  ;;  %vm2081_vm1 = vcmp.lt.s32.totalorder %v10877_v27, 4  ;;  %v1507_v28 = vsel %vm1424_vm10, %v1506_v37, %v1505_v31  ;;  %vm1687_vm6 = vc.u32 %v11070_v47, %v11077_v15 }
 0x210   : > { %v2091_v48 = vsel %vm2081_vm1, %v2077_v42, 1326507024  ;;  %8445 = vmatprep.subr.bf16.mxu1 %v8444_v11  ;;  %v8194_v35 = vadd.s32 4294967294, %v1906_v60  ;;  %v2046_v53 = vand.u32 2147483647, %v16246_v49  ;;  %v1894_v10 = vadd.s32 %v10982_v21, %v10980_v33 }
 0x211   : > { %vm11099_vm3 = vcmp.le.f32.partialorder %v1422_v4, 0.7853982  ;;  %v1685_v2 = vmul.u32 %v1678_v1, %v1669_v6  ;;  %v1688_v22 = vadd.s32 1, %v11078_v17  ;;  %v2064_v50 = vshrl.u32 %v16167_v56, %v10882_v3 }
 0x212   : > { %v1510_v42 = vsel %vm11099_vm3, %v16223_v46, %v1507_v28  ;;  %vm8195_vm7 = vcmp.lt.s32.totalorder %v8194_v35, 0  ;;  %v2067_v4 = vshrl.u32 %v16168_v30, %v10882_v3  ;;  %v2063_v33 = vshll.u32 %v16166_v40, %v10495_v45 }
 0x213   : > { %v1909_v38 = vsel %vm8195_vm7, 0, %v8194_v35  ;;  %v1689_v41 = vsel %vm1687_vm6, %v1688_v22, %v11078_v17  ;;  %v2066_v21 = vshll.u32 %v16167_v56, %v10495_v45  ;;  %v2053_v29 = vand.u32 8388607, %v2046_v53 }
 0x214   : > { %v1910_v14 = vsub.s32 32, %v1909_v38  ;;  %v1914_v18 = vsub.s32 4294967266, %v1909_v38  ;;  %v1690_v9 = vadd.s32 %v1689_v41, %v1685_v2  ;;  %v2065_v13 = vor.u32 %v2064_v50, %v2063_v33 }
 0x215   : > { %v2068_v51 = vor.u32 %v2067_v4, %v2066_v21  ;;  %v2069_v55 = vshll.u32 %v16168_v30, %v10495_v45  ;;  %v2070_v54 = vshrl.u32 %v16159_v7, %v10882_v3  ;;  %v1911_v5 = vshll.u32 %v11054_v36, %v1909_v38 }
 0x216   : > { %v1912_v63 = vshrl.u32 %v1894_v10, %v1910_v14  ;;  %v1915_v31 = vadd.s32 127, %v1914_v18  ;;  %v1691_v26 = vadd.s32 536870912, %v1690_v9  ;;  %v2087_v1 = vsel %vm2081_vm1, %v2074_v52, 920167782 }
 0x217   : > { %v1508_v0 = vsub.s32 4, %v10920_v32  ;;  %v2071_v59 = vor.u32 %v2070_v54, %v2069_v55  ;;  %vm2078_vm13 = vcmp.lt.s32.totalorder %v10877_v27, 1  ;;  %vm2080_vm15 = vcmp.lt.s32.totalorder %v10877_v27, 3 }
 0x218   : > { %v1913_v44 = vor.u32 %v1912_v63, %v1911_v5  ;;  %v1916_v19 = vshll.u32 %v1915_v31, 23  ;;  %v11129_v12 = vshrl.u32 %v1691_v26, 30  ;;  %8854 = vcosq.f32 %v1510_v42 }
 0x219   : > { %v2054_v45 = vor.u32 8388608, %v2053_v29  ;;  %v2086_v36 = vsel %vm2078_vm13, %v2065_v13, %v2068_v51  ;;  %v2092_v37 = vsel %vm2080_vm15, %v2074_v52, %v2091_v48  ;;  %v2088_v62 = vsel %vm2080_vm15, %v2071_v59, %v2087_v1 }
 0x21a   : > { %v1917_v8 = vor.u32 4788187, %v1916_v19  ;;  %v1693_v20 = vshll.u32 %v11129_v12, 30  ;;  %v2090_v43 = vsel %vm2078_vm13, %v2068_v51, %v2071_v59  ;;  %v1509_v25 = vsel %vm1424_vm10, %v1508_v0, %v10920_v32 }
 0x21b   : > { %8856 = vsinq.f32 %v1510_v42  ;;  %vm2079_vm8 = vcmp.lt.s32.totalorder %v10877_v27, 2  ;;  %v1920_v11 = vcvt.s32.f32 %v1913_v44  ;;  %v2083_v6 = vsel %vm2081_vm1, %v2071_v59, 2102212464 }
 0x21c   : > { %v1918_v17 = vand.u32 2147483647, %v1917_v8  ;;  %v11145_v60 = vsub.s32 %v1690_v9, %v1693_v20  ;;  %v2062_v52 = vshrl.u32 %v16166_v40, %v10882_v3  ;;  %v2089_v28 = vsel %vm2079_vm8, %v2086_v36, %v2088_v62 }
 0x21d   : > { %v2093_v48 = vsel %vm2079_vm8, %v2090_v43, %v2092_v37  ;;  %v2094_v32 = vshll.u32 %v2054_v45, 8  ;;  %v1511_v35 = vsel %vm11099_vm3, 0, %v1509_v25  ;;  %v1924_v2 = vsub.s32 4, %v11031_v57 }
 0x21e   : > { %v1921_v10 = vmul.f32 %v1920_v11, %v1918_v17  ;;  %v1696_v22 = vsub.s32 0, %v11145_v60  ;;  %v2082_v42 = vsel %vm2078_vm13, %v2062_v52, %v2065_v13  ;;  %v2084_v3 = vsel %vm2080_vm15, %v2068_v51, %v2083_v6 }
 0x21f   : > { %v11163_v50 = vmul.u32.u64.low %v2094_v32, %v2093_v48  ;;  %v11164_v4 = vmul.u32.u64.high %v2094_v32, %v2093_v48, %v11163_v50  ;;  %v11167_v33 = vmul.u32.u64.low %v2094_v32, %v2089_v28  ;;  %v11168_v61 = vmul.u32.u64.high %v2094_v32, %v2089_v28, %v11167_v33 }
 0x220   : > { %v1922_v38 = vxor.u32 2147483648, %v1921_v10  ;;  %v8185_v41 = vmin.u32 %v1696_v22, %v11145_v60  ;;  %vm1840_vm9 = vcmp.lt.s32.totalorder %v16234_v58, 0  ;;  %vm11174_vm12 = vcmp.le.f32.partialorder %v1838_v34, 0.7853982 }
 0x221   : > { %v1925_v18 = vsel %vm1840_vm9, %v1924_v2, %v11031_v57  ;;  %v15967_v29 = vmov 0.0   ;;  %v1515_v51 = vadd.s32 3, %v1511_v35  ;;  %v2085_v34 = vsel %vm2079_vm8, %v2082_v42, %v2084_v3 }
 0x222   : > { %v1923_v14 = vsel %vm1840_vm9, %v1922_v38, %v1921_v10  ;;  %v1698_v9 = vclz %v8185_v41  ;;  %2359 = vmatprep.mubr.f32.mxu0 %v15967_v29  ;;  %2448 = vmatprep.mubr.f32.mxu1 %v15967_v29  ;;  %v8855_v13 = vpop.eup %8854  ;;  %vm2103_vm11 = vc.u32 %v11164_v4, %v11167_v33  ;;  %v1927_v5 = vsel %vm11174_vm12, 0, %v1925_v18 }
 0x223   : > { %v1926_v55 = vsel %vm11174_vm12, %v16234_v58, %v1923_v14  ;;  %v2104_v63 = vadd.s32 1, %v11168_v61  ;;  %v2101_v31 = vmul.u32 %v2094_v32, %v2085_v34  ;;  %v1516_v26 = vand.u32 3, %v1515_v51  ;;  %v11203_v51 = vld [vmem:[%s15880_s3] sm:$0xff] }
 0x224   : > { %8858 = vcosq.f32 %v1926_v55  ;;  %v8186_v54 = vadd.s32 4294967294, %v1698_v9  ;;  %v1931_v27 = vadd.s32 3, %v1927_v5  ;;  %v1522_v45 = vxor.u32 2147483648, %v8855_v13 }
 0x225   : > { %v8857_v57 = vpop.eup %8856  ;;  %8860 = vsinq.f32 %v1926_v55  ;;  %v2105_v0 = vsel %vm2103_vm11, %v2104_v63, %v11168_v61  ;;  %v1686_v37 = vadd.s32 %v11077_v15, %v11070_v47  ;;  %vm1521_vm0 = vcmp.eq.s32.totalorder %v1516_v26, 2 }
 0x226   : > { %vm8187_vm14 = vcmp.lt.s32.totalorder %v8186_v54, 0  ;;  %v2106_v19 = vadd.s32 %v2105_v0, %v2101_v31  ;;  %v1519_v36 = vxor.u32 2147483648, %v8857_v57  ;;  %v1932_v62 = vand.u32 3, %v1931_v27  ;;  %v11224_v0 = vld [vmem:[%s15880_s3 + $0x10] sm:$0xff] }
 0x227   : > { %v1701_v1 = vsel %vm8187_vm14, 0, %v8186_v54  ;;  %vm1518_vm2 = vcmp.eq.s32.totalorder %v1516_v26, 0  ;;  %v1523_v11 = vsel %vm1521_vm0, %v1522_v45, %v8857_v57  ;;  %vm1517_vm4 = vcmp.lt.s32.totalorder %v1516_v26, 2 }
 0x228   : > { %v1702_v59 = vsub.s32 32, %v1701_v1  ;;  %v1706_v44 = vsub.s32 4294967266, %v1701_v1  ;;  %v2107_v20 = vadd.s32 536870912, %v2106_v19  ;;  %v1520_v52 = vsel %vm1518_vm2, %v8855_v13, %v1519_v36 }
 0x229   : > { %v1703_v28 = vshll.u32 %v11145_v60, %v1701_v1  ;;  %vm1937_vm5 = vcmp.eq.s32.totalorder %v1932_v62, 2  ;;  %v1524_v22 = vsel %vm1517_vm4, %v1520_v52, %v1523_v11  ;;  %vm1934_vm10 = vcmp.eq.s32.totalorder %v1932_v62, 0 }
 0x22a   : > { %v1707_v8 = vadd.s32 127, %v1706_v44  ;;  %v1704_v43 = vshrl.u32 %v1686_v37, %v1702_v59  ;;  %v11194_v17 = vshrl.u32 %v2107_v20, 30  ;;  %vm1933_vm1 = vcmp.lt.s32.totalorder %v1932_v62, 2 }
 0x22b   : > { %vm1514_vm6 = vweird.f32 %v16223_v46  ;;  %vm1930_vm3 = vweird.f32 %v16234_v58  ;;  %vm15992_vm7 = vcmask 261120   ;;  %v11211_v58 = vld [vmem:[%s15880_s3 + $0x8] sm:$0xff]  ;;  %v2102_v54 = vadd.s32 %v11167_v33, %v11164_v4 }
 0x22c   : > { %v1708_v25 = vshll.u32 %v1707_v8, 23  ;;  %v2109_v32 = vshll.u32 %v11194_v17, 30  ;;  %v1705_v10 = vor.u32 %v1704_v43, %v1703_v28  ;;  %v1525_v41 = vsel %vm1514_vm6, nan, %v1524_v22 }
 0x22d   : > { %vm1632_vm15 = vcmp.lt.s32.totalorder %v16239_v24, 0  ;;  %vm11228_vm8 = vcmp.le.f32.partialorder %v1630_v23, 0.7853982  ;;  %v2257_v23 = vld [vmem:[%s15880_s3 + $0x18] sm:$0xff]  ;;  %v2132_v8 = vsub.s32 4, %v11194_v17  ;;  %vm2048_vm9 = vcmp.lt.s32.totalorder %v16246_v49, 0 }
 0x22e   : > { %v8859_v6 = vpop.eup %8858  ;;  %v1709_v48 = vor.u32 4788187, %v1708_v25  ;;  %v2110_v2 = vsub.s32 %v2106_v19, %v2109_v32  ;;  %v1712_v21 = vcvt.s32.f32 %v1705_v10  ;;  %v1716_v19 = vsub.s32 4, %v11129_v12 }
 0x22f   : > { %v8861_v35 = vpop.eup %8860  ;;  %v1938_v47 = vxor.u32 2147483648, %v8859_v6  ;;  %vm2047_vm12 = vcmp.le.f32.partialorder %v2046_v53, 0.7853982  ;;  %v2133_v11 = vsel %vm2048_vm9, %v2132_v8, %v11194_v17 }
 0x230   : > { %v1935_v15 = vxor.u32 2147483648, %v8861_v35  ;;  %v1710_v50 = vand.u32 2147483647, %v1709_v48  ;;  %v2112_v38 = vsub.s32 0, %v2110_v2  ;;  %v1717_v20 = vsel %vm1632_vm15, %v1716_v19, %v11129_v12 }
 0x231   : > { %v1939_v42 = vsel %vm1937_vm5, %v1938_v47, %v8861_v35  ;;  %v1719_v43 = vsel %vm11228_vm8, 0, %v1717_v20  ;;  %v2135_v28 = vsel %vm2047_vm12, 0, %v2133_v11 }
 0x232   : > { %v1936_v3 = vsel %vm1934_vm10, %v8859_v6, %v1935_v15  ;;  %v8201_v14 = vmin.u32 %v2112_v38, %v2110_v2  ;;  %v1713_v9 = vmul.f32 %v1712_v21, %v1710_v50  ;;  %v1723_v52 = vadd.s32 3, %v1719_v43 }
 0x233   : > { %v1940_v60 = vsel %vm1933_vm1, %v1936_v3, %v1939_v42  ;;  %v2139_v32 = vadd.s32 3, %v2135_v28  ;;  %vm1722_vm10 = vweird.f32 %v16239_v24  ;;  %vm2138_vm1 = vweird.f32 %v16246_v49 }
 0x234   : > { %v1941_v61 = vsel %vm1930_vm3, nan, %v1940_v60  ;;  %v2114_v13 = vclz %v8201_v14  ;;  %v1714_v34 = vxor.u32 2147483648, %v1713_v9  ;;  %v1724_v35 = vand.u32 3, %v1723_v52 }
 0x235   : > { %v8438_v18 = vpack.c.bf16 %v1941_v61, %v1525_v41  ;;  %v2140_v10 = vand.u32 3, %v2139_v32 }
 0x236   : > { %v8202_v55 = vadd.s32 4294967294, %v2114_v13  ;;  %v1715_v63 = vsel %vm1632_vm15, %v1714_v34, %v1713_v9  ;;  %vm1726_vm11 = vcmp.eq.s32.totalorder %v1724_v35, 0  ;;  %vm1729_vm14 = vcmp.eq.s32.totalorder %v1724_v35, 2 }
 0x237   : > { %8439 = vmatpush1.bf16.msra.mxu0 %v8438_v18  ;;  %v1718_v59 = vsel %vm11228_vm8, %v16239_v24, %v1715_v63  ;;  %vm1725_vm0 = vcmp.lt.s32.totalorder %v1724_v35, 2  ;;  %vm2145_vm2 = vcmp.eq.s32.totalorder %v2140_v10, 2  ;;  %vm2142_vm4 = vcmp.eq.s32.totalorder %v2140_v10, 0  ;;  %v11268_v24 = vpop.permute.xlu0 %2264 }
 0x238   : > { %vm8203_vm13 = vcmp.lt.s32.totalorder %v8202_v55, 0  ;;  %8862 = vcosq.f32 %v1718_v59  ;;  %vm2141_vm5 = vcmp.lt.s32.totalorder %v2140_v10, 2 }
 0x239   : > { %v2117_v46 = vsel %vm8203_vm13, 0, %v8202_v55  ;;  %8864 = vsinq.f32 %v1718_v59 }
 0x23a   : > { %8208 = vmatmul.mubr.msk.f32.vlgmr.msra.gmra.mrb[0].mxu0 %vm15992_vm7, %v11203_v51  ;;  %v2118_v57 = vsub.s32 32, %v2117_v46  ;;  %v2122_v5 = vsub.s32 4294967266, %v2117_v46  ;;  %v2119_v31 = vshll.u32 %v2110_v2, %v2117_v46 }
 0x23b   : > { %2365 = vmatprep.mubr.f32.mxu0 %v15967_v29 }
 0x23c   : > { %v2120_v26 = vshrl.u32 %v2102_v54, %v2118_v57  ;;  %v2123_v1 = vadd.s32 127, %v2122_v5 }
 0x23e   : > { %8209 = vmatmul.mubr.msk.f32.gmra.mrb[2].mxu0 %vm15992_vm7, %v11211_v58  ;;  %v2121_v33 = vor.u32 %v2120_v26, %v2119_v31  ;;  %v2124_v27 = vshll.u32 %v2123_v1, 23 }
 0x23f   : > { %2371 = vmatprep.mubr.f32.mxu0 %v15967_v29 }
 0x240   : > { %v2125_v44 = vor.u32 4788187, %v2124_v27  ;;  %v2128_v36 = vcvt.s32.f32 %v2121_v33 }
 0x242   : > { %8210 = vmatmul.mubr.msk.f32.gmra.mrb[4].mxu0 %vm15992_vm7, %v11224_v0  ;;  %v2126_v45 = vand.u32 2147483647, %v2125_v44  ;;  %v8863_v12 = vpop.eup %8862 }
 0x243   : > { %2377 = vmatprep.mubr.f32.mxu0 %v15967_v29  ;;  %v8865_v48 = vpop.eup %8864  ;;  %v1730_v15 = vxor.u32 2147483648, %v8863_v12 }
 0x244   : > { %v2129_v37 = vmul.f32 %v2128_v36, %v2126_v45  ;;  %v1727_v47 = vxor.u32 2147483648, %v8865_v48 }
 0x245   : > { %v1731_v22 = vsel %vm1729_vm14, %v1730_v15, %v8865_v48 }
 0x246   : > { %8211 = vmatmul.mubr.msk.f32.gmra.mrb[6].mxu0 %vm15992_vm7, %v2257_v23  ;;  %v2130_v62 = vxor.u32 2147483648, %v2129_v37  ;;  %v1728_v53 = vsel %vm1726_vm11, %v8863_v12, %v1727_v47 }
 0x247   : > { %4241 = vmatprep.mubr.f32.mxu0 %v15967_v29  ;;  %v1732_v50 = vsel %vm1725_vm0, %v1728_v53, %v1731_v22 }
 0x248   : > { %v2131_v25 = vsel %vm2048_vm9, %v2130_v62, %v2129_v37  ;;  %v1733_v61 = vsel %vm1722_vm10, nan, %v1732_v50 }
 0x249   : > { %v2134_v6 = vsel %vm2047_vm12, %v16246_v49, %v2131_v25 }
 0x24a   : > { %8866 = vcosq.f32 %v2134_v6 }
 0x24b   : > { %8868 = vsinq.f32 %v2134_v6 }
 0x254   : > { %v8867_v2 = vpop.eup %8866 }
 0x255   : > { %v8869_v42 = vpop.eup %8868  ;;  %v2146_v17 = vxor.u32 2147483648, %v8867_v2 }
 0x256   : > { %v2143_v3 = vxor.u32 2147483648, %v8869_v42 }
 0x257   : > { %v2147_v38 = vsel %vm2145_vm2, %v2146_v17, %v8869_v42 }
 0x258   : > { %v2144_v60 = vsel %vm2142_vm4, %v8867_v2, %v2143_v3 }
 0x259   : > { %v2148_v41 = vsel %vm2141_vm5, %v2144_v60, %v2147_v38 }
 0x25a   : > { %v2149_v21 = vsel %vm2138_vm1, nan, %v2148_v41 }
 0x25b   : > { %v8446_v14 = vpack.c.bf16 %v2149_v21, %v1733_v61 }
 0x25d   : > { %8447 = vmatpush1.bf16.msra.mxu1 %v8446_v14 }
 0x260   : > { %8212 = vmatmul.mubr.msk.f32.vlgmr.msra.gmra.mrb[0].mxu1 %vm15992_vm7, %v11203_v51 }
 0x261   : > { %2454 = vmatprep.mubr.f32.mxu1 %v15967_v29 }
 0x264   : > { %8213 = vmatmul.mubr.msk.f32.gmra.mrb[2].mxu1 %vm15992_vm7, %v11211_v58 }
 0x265   : > { %2460 = vmatprep.mubr.f32.mxu1 %v15967_v29 }
 0x268   : > { %8214 = vmatmul.mubr.msk.f32.gmra.mrb[4].mxu1 %vm15992_vm7, %v11224_v0  ;;  %v11286_v0 = vpop.permute.xlu1 %2269 }
 0x269   : > { %2466 = vmatprep.mubr.f32.mxu1 %v15967_v29 }
 0x26c   : > { %8215 = vmatmul.mubr.msk.f32.gmra.mrb[6].mxu1 %vm15992_vm7, %v2257_v23 }
 0x26d   : > { %4330 = vmatprep.mubr.f32.mxu1 %v15967_v29 }
 0x30d   : > { %v2361_v49 = vpop.f32.mrb[0].mxu0 }
 0x30e   : > { %v11271_v18 = vadd.f32 %v2361_v49, %v11268_v24  ;;  %v2363_v9 = vpop.f32.mrb[1].mxu0 }
 0x30f   : > { %v11274_v13 = vadd.f32 %v2363_v9, %v11268_v24 }
 0x310   : > { %16253 = vst [vmem:[#allocation13_spill] sm:$0xff] %v11271_v18  ;;  %v2473_v51 = vand.u32 2147483647, %v11271_v18  ;;  %v2476_v55 = vand.u32 2139095040, %v11271_v18  ;;  %vm2475_vm10 = vcmp.lt.s32.totalorder %v11271_v18, 0 }
 0x311   : > { %v15971_v34 = vand.u32 2147483647, %v11274_v13  ;;  %v2580_v46 = vand.u32 2139095040, %v11274_v13  ;;  %v2367_v58 = vpop.f32.mrb[2].mxu0 }
 0x312   : > { %v2477_v54 = vshrl.u32 %v2476_v55, 23  ;;  %v11280_v57 = vpop.f32.mrb[3].mxu0  ;;  %v2480_v5 = vand.u32 8388607, %v2473_v51  ;;  %v11289_v44 = vadd.f32 %v2367_v58, %v11286_v0 }
 0x313   : > { %v2581_v63 = vshrl.u32 %v2580_v46, 23  ;;  %v2584_v31 = vand.u32 8388607, %v15971_v34 }
 0x314   : > { %v8216_v26 = vadd.s32 4294967169, %v2477_v54  ;;  %v2481_v33 = vor.u32 8388608, %v2480_v5  ;;  %16254 = vst [vmem:[#allocation6_spill] sm:$0xff] %v11289_v44  ;;  %v2892_v20 = vand.u32 2139095040, %v11289_v44 }
 0x315   : > { %v8220_v1 = vadd.s32 4294967169, %v2581_v63  ;;  %v2585_v27 = vor.u32 8388608, %v2584_v31  ;;  %v11312_v61 = vpop.f32.mrb[4].mxu0 }
 0x316   : > { %v2483_v4 = vadd.s32 1, %v8216_v26  ;;  %v11291_v37 = vshll.u32 %v2481_v33, 8 }
 0x317   : > { %v2587_v59 = vadd.s32 1, %v8220_v1  ;;  %v11293_v8 = vshll.u32 %v2585_v27, 8 }
 0x318   : > { %vm2484_vm6 = vcmp.gt.s32.totalorder %v2483_v4, 0 }
 0x319   : > { %v2485_v19 = vsel %vm2484_vm6, %v2483_v4, 0  ;;  %vm2588_vm3 = vcmp.gt.s32.totalorder %v2587_v59, 0 }
 0x31a   : > { %v2486_v23 = vshrl.u32 %v2485_v19, 5  ;;  %v2487_v45 = vand.u32 31, %v2485_v19  ;;  %v2589_v36 = vsel %vm2588_vm3, %v2587_v59, 0 }
 0x31b   : > { %v11297_v25 = vshrl.u32 %v2589_v36, 5  ;;  %v2591_v11 = vand.u32 31, %v2589_v36 }
 0x31c   : > { %v2488_v62 = vsub.s32 32, %v2487_v45  ;;  %v2490_v43 = vshll.u32 %v16166_v40, %v2487_v45  ;;  %v2493_v6 = vshll.u32 %v16167_v56, %v2487_v45  ;;  %v2496_v52 = vshll.u32 %v16168_v30, %v2487_v45 }
 0x31d   : > { %v2499_v28 = vshll.u32 %v16159_v7, %v2487_v45  ;;  %v2502_v12 = vshll.u32 %v16165_v39, %v2487_v45  ;;  %vm2505_vm13 = vcmp.lt.s32.totalorder %v2486_v23, 1  ;;  %vm2506_vm15 = vcmp.lt.s32.totalorder %v2486_v23, 2 }
 0x31e   : > { %v2491_v48 = vshrl.u32 %v16167_v56, %v2488_v62  ;;  %v2494_v32 = vshrl.u32 %v16168_v30, %v2488_v62  ;;  %v2497_v35 = vshrl.u32 %v16159_v7, %v2488_v62  ;;  %v2489_v47 = vshrl.u32 %v16166_v40, %v2488_v62 }
 0x31f   : > { %v2500_v15 = vshrl.u32 %v16165_v39, %v2488_v62  ;;  %v2503_v10 = vshrl.u32 %v16156_v16, %v2488_v62  ;;  %v2592_v42 = vsub.s32 32, %v2591_v11  ;;  %vm2507_vm8 = vcmp.lt.s32.totalorder %v2486_v23, 3 }
 0x320   : > { %v2492_v2 = vor.u32 %v2491_v48, %v2490_v43  ;;  %v2495_v53 = vor.u32 %v2494_v32, %v2493_v6  ;;  %v2498_v22 = vor.u32 %v2497_v35, %v2496_v52  ;;  %vm2508_vm9 = vcmp.lt.s32.totalorder %v2486_v23, 4 }
 0x321   : > { %v2501_v17 = vor.u32 %v2500_v15, %v2499_v28  ;;  %v2504_v3 = vor.u32 %v2503_v10, %v2502_v12  ;;  %v2594_v9 = vshll.u32 %v16166_v40, %v2591_v11  ;;  %v2595_v58 = vshrl.u32 %v16167_v56, %v2592_v42 }
 0x322   : > { %v2509_v50 = vsel %vm2505_vm13, %v2489_v47, %v2492_v2  ;;  %v2510_v38 = vsel %vm2508_vm9, %v2498_v22, 2102212464  ;;  %v2513_v60 = vsel %vm2505_vm13, %v2492_v2, %v2495_v53  ;;  %v2517_v41 = vsel %vm2505_vm13, %v2495_v53, %v2498_v22 }
 0x323   : > { %v2511_v21 = vsel %vm2507_vm8, %v2495_v53, %v2510_v38  ;;  %v2514_v14 = vsel %vm2508_vm9, %v2501_v17, 920167782  ;;  %v2518_v49 = vsel %vm2508_vm9, %v2504_v3, 1326507024  ;;  %v2597_v54 = vshll.u32 %v16167_v56, %v2591_v11 }
 0x324   : > { %v2515_v55 = vsel %vm2507_vm8, %v2498_v22, %v2514_v14  ;;  %v2519_v46 = vsel %vm2507_vm8, %v2501_v17, %v2518_v49  ;;  %v2512_v5 = vsel %vm2506_vm15, %v2509_v50, %v2511_v21  ;;  %v2598_v26 = vshrl.u32 %v16168_v30, %v2592_v42 }
 0x325   : > { %v2516_v63 = vsel %vm2506_vm15, %v2513_v60, %v2515_v55  ;;  %v2520_v31 = vsel %vm2506_vm15, %v2517_v41, %v2519_v46  ;;  %v2596_v59 = vor.u32 %v2595_v58, %v2594_v9  ;;  %v2600_v45 = vshll.u32 %v16168_v30, %v2591_v11 }
 0x326   : > { %v11322_v1 = vmul.u32.u64.low %v11291_v37, %v2520_v31  ;;  %v11323_v4 = vmul.u32.u64.high %v11291_v37, %v2520_v31, %v11322_v1  ;;  %v11326_v33 = vmul.u32.u64.low %v11291_v37, %v2516_v63  ;;  %v11327_v27 = vmul.u32.u64.high %v11291_v37, %v2516_v63, %v11326_v33 }
 0x327   : > { %v2599_v19 = vor.u32 %v2598_v26, %v2597_v54  ;;  %v2601_v36 = vshrl.u32 %v16159_v7, %v2592_v42  ;;  %v2603_v23 = vshll.u32 %v16159_v7, %v2591_v11  ;;  %v2604_v62 = vshrl.u32 %v16165_v39, %v2592_v42 }
 0x328   : > { %v2607_v43 = vshrl.u32 %v16156_v16, %v2592_v42  ;;  %v2893_v6 = vshrl.u32 %v2892_v20, 23  ;;  %v2528_v52 = vmul.u32 %v11291_v37, %v2512_v5  ;;  %v2593_v28 = vshrl.u32 %v16166_v40, %v2592_v42 }
 0x329   : > { %v2602_v12 = vor.u32 %v2601_v36, %v2600_v45  ;;  %v2606_v48 = vshll.u32 %v16165_v39, %v2591_v11  ;;  %vm2530_vm12 = vc.u32 %v11323_v4, %v11326_v33  ;;  %v2531_v32 = vadd.s32 1, %v11327_v27 }
 0x32a   : > { %v2605_v35 = vor.u32 %v2604_v62, %v2603_v23  ;;  %vm2609_vm11 = vcmp.lt.s32.totalorder %v11297_v25, 1  ;;  %vm2611_vm14 = vcmp.lt.s32.totalorder %v11297_v25, 3  ;;  %vm2612_vm0 = vcmp.lt.s32.totalorder %v11297_v25, 4 }
 0x32b   : > { %v2608_v47 = vor.u32 %v2607_v43, %v2606_v48  ;;  %v2617_v20 = vsel %vm2609_vm11, %v2596_v59, %v2599_v19  ;;  %v2532_v37 = vsel %vm2530_vm12, %v2531_v32, %v11327_v27  ;;  %v2614_v15 = vsel %vm2612_vm0, %v2602_v12, 2102212464 }
 0x32c   : > { %v2618_v10 = vsel %vm2612_vm0, %v2605_v35, 920167782  ;;  %v2621_v2 = vsel %vm2609_vm11, %v2599_v19, %v2602_v12  ;;  %v2533_v11 = vadd.s32 %v2532_v37, %v2528_v52  ;;  %vm2610_vm2 = vcmp.lt.s32.totalorder %v11297_v25, 2 }
 0x32d   : > { %v2619_v53 = vsel %vm2611_vm14, %v2602_v12, %v2618_v10  ;;  %v2622_v22 = vsel %vm2612_vm0, %v2608_v47, 1326507024  ;;  %v2613_v42 = vsel %vm2609_vm11, %v2593_v28, %v2596_v59  ;;  %v2615_v17 = vsel %vm2611_vm14, %v2599_v19, %v2614_v15 }
 0x32e   : > { %v2620_v3 = vsel %vm2610_vm2, %v2617_v20, %v2619_v53  ;;  %v2623_v50 = vsel %vm2611_vm14, %v2605_v35, %v2622_v22  ;;  %v2534_v38 = vadd.s32 536870912, %v2533_v11  ;;  %v8232_v9 = vadd.s32 4294967169, %v2893_v6 }
 0x32f   : > { %v2624_v60 = vsel %vm2610_vm2, %v2621_v2, %v2623_v50  ;;  %v11347_v41 = vmul.u32.u64.low %v11293_v8, %v2620_v3  ;;  %v11348_v21 = vmul.u32.u64.high %v11293_v8, %v2620_v3, %v11347_v41  ;;  %v2616_v25 = vsel %vm2610_vm2, %v2613_v42, %v2615_v17 }
 0x330   : > { %v11352_v14 = vmul.u32.u64.low %v11293_v8, %v2624_v60  ;;  %v11353_v49 = vmul.u32.u64.high %v11293_v8, %v2624_v60, %v11352_v14  ;;  %v11355_v55 = vshrl.u32 %v2534_v38, 30  ;;  %v15970_v46 = vand.u32 2147483647, %v11289_v44 }
 0x331   : > { %v2635_v54 = vadd.s32 1, %v11348_v21  ;;  %v2632_v5 = vmul.u32 %v11293_v8, %v2616_v25  ;;  %v2899_v63 = vadd.s32 1, %v8232_v9  ;;  %v11368_v27 = vadd.f32 %v11280_v57, %v11286_v0 }
 0x332   : > { %v2536_v58 = vshll.u32 %v11355_v55, 30  ;;  %vm2634_vm4 = vc.u32 %v11353_v49, %v11347_v41  ;;  %v2896_v8 = vand.u32 8388607, %v15970_v46  ;;  %v2559_v14 = vsub.s32 4, %v11355_v55 }
 0x333   : > { %v2450_v26 = vpop.f32.mrb[0].mxu1  ;;  %v2636_v1 = vsel %vm2634_vm4, %v2635_v54, %v11348_v21  ;;  %vm2900_vm5 = vcmp.gt.s32.totalorder %v2899_v63, 0  ;;  %v2996_v12 = vand.u32 2139095040, %v11368_v27  ;;  %v11407_v21 = vadd.s32 %v11326_v33, %v11323_v4 }
 0x334   : > { %v11363_v31 = vsub.s32 %v2533_v11, %v2536_v58  ;;  %v11371_v59 = vadd.f32 %v2450_v26, %v11268_v24  ;;  %v2637_v19 = vadd.s32 %v2636_v1, %v2632_v5  ;;  %v2452_v45 = vpop.f32.mrb[1].mxu1  ;;  %v2897_v35 = vor.u32 8388608, %v2896_v8 }
 0x335   : > { %v11377_v23 = vadd.f32 %v2452_v45, %v11268_v24  ;;  %v15969_v24 = vand.u32 2147483647, %v11368_v27  ;;  %v2901_v15 = vsel %vm2900_vm5, %v2899_v63, 0  ;;  %v2997_v42 = vshrl.u32 %v2996_v12, 23 }
 0x336   : > { %16255 = vst [vmem:[#allocation20_spill] sm:$0xff] %v11371_v59  ;;  %v2539_v36 = vsub.s32 0, %v11363_v31  ;;  %v15973_v62 = vand.u32 2147483647, %v11371_v59  ;;  %v2684_v43 = vand.u32 2139095040, %v11371_v59  ;;  %v2638_v6 = vadd.s32 536870912, %v2637_v19 }
 0x337   : > { %v2788_v52 = vand.u32 2139095040, %v11377_v23  ;;  %v11383_v28 = vpop.f32.mrb[2].mxu1  ;;  %v11397_v50 = vand.u32 31, %v2901_v15  ;;  %v11399_v38 = vshll.u32 %v2897_v35, 8  ;;  %v11403_v60 = vand.u32 8388607, %v15969_v24 }
 0x338   : > { %v8217_v57 = vmin.u32 %v2539_v36, %v11363_v31  ;;  %v2685_v48 = vshrl.u32 %v2684_v43, 23  ;;  %v11386_v32 = vshrl.u32 %v2638_v6, 30  ;;  %v2688_v20 = vand.u32 8388607, %v15973_v62  ;;  %v11391_v10 = vpop.f32.mrb[3].mxu1 }
 0x339   : > { %v2789_v37 = vshrl.u32 %v2788_v52, 23  ;;  %v11414_v54 = vshrl.u32 %v2901_v15, 5  ;;  %v11417_v1 = vadd.s32 4294967169, %v2997_v42  ;;  %v11421_v4 = vadd.s32 %v11347_v41, %v11353_v49 }
 0x33a   : > { %16256 = vst [vmem:[#allocation25_spill] sm:$0xff] %v11386_v32  ;;  %v2541_v47 = vclz %v8217_v57  ;;  %v8224_v2 = vadd.s32 4294967169, %v2685_v48  ;;  %v2640_v11 = vshll.u32 %v11386_v32, 30  ;;  %v2689_v9 = vor.u32 8388608, %v2688_v20 }
 0x33b   : > { %v8228_v22 = vadd.s32 4294967169, %v2789_v37  ;;  %v11395_v17 = vpop.f32.mrb[4].mxu1  ;;  %v11424_v33 = vsub.s32 32, %v11397_v50  ;;  %v15972_v43 = vand.u32 2147483647, %v11377_v23  ;;  %v2906_v6 = vshll.u32 %v16166_v40, %v11397_v50 }
 0x33c   : > { %v8218_v53 = vadd.s32 4294967294, %v2541_v47  ;;  %v2691_v3 = vadd.s32 1, %v8224_v2  ;;  %v11412_v58 = vsub.s32 %v2637_v19, %v2640_v11  ;;  %v11430_v19 = vsel %vm2475_vm10, %v2559_v14, %v11355_v55 }
 0x33d   : > { %v2795_v26 = vadd.s32 1, %v8228_v22  ;;  %v11432_v36 = vshll.u32 %v2689_v9, 8  ;;  %vm11452_vm13 = vcmp.le.f32.partialorder %v2473_v51, 0.7853982  ;;  %v2907_v46 = vshrl.u32 %v16167_v56, %v11424_v33 }
 0x33e   : > { %vm8219_vm1 = vcmp.lt.s32.totalorder %v8218_v53, 0  ;;  %vm2692_vm6 = vcmp.gt.s32.totalorder %v2691_v3, 0  ;;  %v2643_v52 = vsub.s32 0, %v11412_v58 }
 0x33f   : > { %v11410_v25 = vsel %vm8219_vm1, 0, %v8218_v53  ;;  %v2693_v63 = vsel %vm2692_vm6, %v2691_v3, 0  ;;  %vm2796_vm3 = vcmp.gt.s32.totalorder %v2795_v26, 0  ;;  %vm2924_vm1 = vcmp.lt.s32.totalorder %v11414_v54, 4 }
 0x340   : > { %v2549_v5 = vsub.s32 4294967266, %v11410_v25  ;;  %v2695_v45 = vand.u32 31, %v2693_v63  ;;  %v2545_v41 = vsub.s32 32, %v11410_v25  ;;  %v2694_v49 = vshrl.u32 %v2693_v63, 5 }
 0x341   : > { %v8221_v14 = vmin.u32 %v2643_v52, %v11412_v58  ;;  %v2797_v29 = vsel %vm2796_vm3, %v2795_v26, 0  ;;  %vm2921_vm6 = vcmp.lt.s32.totalorder %v11414_v54, 1 }
 0x342   : > { %v2696_v57 = vsub.s32 32, %v2695_v45  ;;  %v2550_v12 = vadd.s32 127, %v2549_v5  ;;  %v2698_v48 = vshll.u32 %v16166_v40, %v2695_v45  ;;  %v2701_v35 = vshll.u32 %v16167_v56, %v2695_v45 }
 0x343   : > { %v2704_v20 = vshll.u32 %v16168_v30, %v2695_v45  ;;  %v2707_v15 = vshll.u32 %v16159_v7, %v2695_v45  ;;  %v2710_v11 = vshll.u32 %v16165_v39, %v2695_v45  ;;  %vm2713_vm15 = vcmp.lt.s32.totalorder %v2694_v49, 1 }
 0x344   : > { %v2699_v55 = vshrl.u32 %v16167_v56, %v2696_v57  ;;  %v2702_v47 = vshrl.u32 %v16168_v30, %v2696_v57  ;;  %v2705_v37 = vshrl.u32 %v16159_v7, %v2696_v57  ;;  %v2708_v2 = vshrl.u32 %v16165_v39, %v2696_v57 }
 0x345   : > { %v2711_v53 = vshrl.u32 %v16156_v16, %v2696_v57  ;;  %v2551_v24 = vshll.u32 %v2550_v12, 23  ;;  %v2697_v45 = vshrl.u32 %v16166_v40, %v2696_v57  ;;  %vm2716_vm8 = vcmp.lt.s32.totalorder %v2694_v49, 4 }
 0x346   : > { %v2700_v22 = vor.u32 %v2699_v55, %v2698_v48  ;;  %v2703_v42 = vor.u32 %v2702_v47, %v2701_v35  ;;  %v2706_v3 = vor.u32 %v2705_v37, %v2704_v20  ;;  %v2709_v5 = vor.u32 %v2708_v2, %v2707_v15  ;;  %v11458_v35 = vpop.f32.mrb[5].mxu0 }
 0x347   : > { %v2712_v63 = vor.u32 %v2711_v53, %v2710_v11  ;;  %16259 = vst [vmem:[#allocation24_spill] sm:$0xff] %v11458_v35  ;;  %vm2715_vm9 = vcmp.lt.s32.totalorder %v2694_v49, 3  ;;  %vm2714_vm12 = vcmp.lt.s32.totalorder %v2694_v49, 2  ;;  %v2645_v37 = vclz %v8221_v14 }
 0x348   : > { %v2721_v48 = vsel %vm2713_vm15, %v2700_v22, %v2703_v42  ;;  %v2718_v52 = vsel %vm2716_vm8, %v2706_v3, 2102212464  ;;  %v2722_v55 = vsel %vm2716_vm8, %v2709_v5, 920167782  ;;  %v2725_v47 = vsel %vm2713_vm15, %v2703_v42, %v2706_v3 }
 0x349   : > { %v2723_v51 = vsel %vm2715_vm9, %v2706_v3, %v2722_v55  ;;  %v2726_v20 = vsel %vm2716_vm8, %v2712_v63, 1326507024  ;;  %v2717_v15 = vsel %vm2713_vm15, %v2697_v45, %v2700_v22  ;;  %v2719_v2 = vsel %vm2715_vm9, %v2703_v42, %v2718_v52 }
 0x34a   : > { %v2724_v11 = vsel %vm2714_vm12, %v2721_v48, %v2723_v51  ;;  %v2727_v53 = vsel %vm2715_vm9, %v2709_v5, %v2726_v20  ;;  %v8222_v49 = vadd.s32 4294967294, %v2645_v37  ;;  %v2792_v22 = vand.u32 8388607, %v15972_v43 }
 0x34b   : > { %v2728_v26 = vsel %vm2714_vm12, %v2725_v47, %v2727_v53  ;;  %v11461_v12 = vmul.u32.u64.low %v11432_v36, %v2724_v11  ;;  %v11462_v57 = vmul.u32.u64.high %v11432_v36, %v2724_v11, %v11461_v12  ;;  %v2720_v42 = vsel %vm2714_vm12, %v2717_v15, %v2719_v2 }
 0x34c   : > { %v11468_v8 = vmul.u32.u64.low %v11432_v36, %v2728_v26  ;;  %v11469_v34 = vmul.u32.u64.high %v11432_v36, %v2728_v26, %v11468_v8  ;;  %v2799_v3 = vand.u32 31, %v2797_v29  ;;  %v2909_v14 = vshll.u32 %v16167_v56, %v11397_v50 }
 0x34d   : > { %v2910_v5 = vshrl.u32 %v16168_v30, %v11424_v33  ;;  %v2547_v63 = vshrl.u32 %v11407_v21, %v2545_v41  ;;  %v2552_v45 = vor.u32 4788187, %v2551_v24  ;;  %vm8223_vm11 = vcmp.lt.s32.totalorder %v8222_v49, 0 }
 0x34e   : > { %v11480_v48 = vshrl.u32 %v16166_v40, %v11424_v33  ;;  %v2739_v52 = vadd.s32 1, %v11462_v57  ;;  %v2800_v55 = vsub.s32 32, %v2799_v3  ;;  %v11486_v47 = vor.u32 %v2907_v46, %v2906_v6 }
 0x34f   : > { %v2546_v51 = vshll.u32 %v11363_v31, %v11410_v25  ;;  %v2736_v21 = vmul.u32 %v11432_v36, %v2720_v42  ;;  %vm2738_vm14 = vc.u32 %v11469_v34, %v11461_v12  ;;  %v2793_v24 = vor.u32 8388608, %v2792_v22 }
 0x350   : > { %v2740_v41 = vsel %vm2738_vm14, %v2739_v52, %v11462_v57  ;;  %v11494_v20 = vsel %vm8223_vm11, 0, %v8222_v49  ;;  %v11496_v37 = vor.u32 %v2910_v5, %v2909_v14  ;;  %v2912_v15 = vshll.u32 %v16168_v30, %v11397_v50 }
 0x351   : > { %v2548_v46 = vor.u32 %v2547_v63, %v2546_v51  ;;  %v2553_v6 = vand.u32 2147483647, %v2552_v45  ;;  %v2741_v2 = vadd.s32 %v2740_v41, %v2736_v21  ;;  %v2803_v31 = vshrl.u32 %v16167_v56, %v2800_v55 }
 0x352   : > { %v2802_v25 = vshll.u32 %v16166_v40, %v2799_v3  ;;  %v2805_v36 = vshll.u32 %v16167_v56, %v2799_v3  ;;  %v2806_v11 = vshrl.u32 %v16168_v30, %v2800_v55  ;;  %v2809_v53 = vshrl.u32 %v16159_v7, %v2800_v55 }
 0x353   : > { %v2742_v26 = vadd.s32 536870912, %v2741_v2  ;;  %v2653_v57 = vsub.s32 4294967266, %v11494_v20  ;;  %v2798_v49 = vshrl.u32 %v2797_v29, 5  ;;  %v2808_v22 = vshll.u32 %v16168_v30, %v2799_v3 }
 0x354   : > { %v2804_v42 = vor.u32 %v2803_v31, %v2802_v25  ;;  %v2807_v14 = vor.u32 %v2806_v11, %v2805_v36  ;;  %v2811_v5 = vshll.u32 %v16159_v7, %v2799_v3  ;;  %v2812_v63 = vshrl.u32 %v16165_v39, %v2800_v55  ;;  %v11517_v31 = vpop.f32.mrb[5].mxu1 }
 0x355   : > { %v11509_v45 = vshrl.u32 %v2742_v26, 30  ;;  %v2810_v52 = vor.u32 %v2809_v53, %v2808_v22  ;;  %v2815_v51 = vshrl.u32 %v16156_v16, %v2800_v55  ;;  %v11512_v21 = vshll.u32 %v2793_v24, 8  ;;  %16260 = vst [vmem:[#allocation5_spill] sm:$0xff] %v11517_v31 }
 0x356   : > { %v2555_v41 = vcvt.s32.f32 %v2548_v46  ;;  %v2813_v43 = vor.u32 %v2812_v63, %v2811_v5  ;;  %v2814_v8 = vshll.u32 %v16165_v39, %v2799_v3  ;;  %v2913_v29 = vshrl.u32 %v16159_v7, %v11424_v33 }
 0x357   : > { %v2744_v25 = vshll.u32 %v11509_v45, 30  ;;  %v2654_v36 = vadd.s32 127, %v2653_v57  ;;  %vm2817_vm0 = vcmp.lt.s32.totalorder %v2798_v49, 1  ;;  %v2915_v11 = vshll.u32 %v16159_v7, %v11397_v50 }
 0x358   : > { %v11522_v53 = vmul.f32 %v2555_v41, %v2553_v6  ;;  %v2816_v24 = vor.u32 %v2815_v51, %v2814_v8  ;;  %vm2820_vm2 = vcmp.lt.s32.totalorder %v2798_v49, 4  ;;  %v2825_v46 = vsel %vm2817_vm0, %v2804_v42, %v2807_v14 }
 0x359   : > { %v11525_v26 = vsub.s32 %v2741_v2, %v2744_v25  ;;  %vm2819_vm4 = vcmp.lt.s32.totalorder %v2798_v49, 3  ;;  %v2822_v3 = vsel %vm2820_vm2, %v2810_v52, 2102212464  ;;  %v2826_v22 = vsel %vm2820_vm2, %v2813_v43, 920167782 }
 0x35a   : > { %v2801_v5 = vshrl.u32 %v16166_v40, %v2800_v55  ;;  %vm2818_vm5 = vcmp.lt.s32.totalorder %v2798_v49, 2  ;;  %v2827_v57 = vsel %vm2819_vm4, %v2810_v52, %v2826_v22  ;;  %v2916_v6 = vshrl.u32 %v16165_v39, %v11424_v33 }
 0x35b   : > { %v2747_v8 = vsub.s32 0, %v11525_v26  ;;  %v2649_v63 = vsub.s32 32, %v11494_v20  ;;  %v2655_v51 = vshll.u32 %v2654_v36, 23  ;;  %v2828_v2 = vsel %vm2818_vm5, %v2825_v46, %v2827_v57 }
 0x35c   : > { %v2821_v41 = vsel %vm2817_vm0, %v2801_v5, %v2804_v42  ;;  %v2823_v25 = vsel %vm2819_vm4, %v2807_v14, %v2822_v3  ;;  %v2829_v62 = vsel %vm2817_vm0, %v2807_v14, %v2810_v52  ;;  %v2830_v55 = vsel %vm2820_vm2, %v2816_v24, 1326507024 }
 0x35d   : > { %v8225_v22 = vmin.u32 %v2747_v8, %v11525_v26  ;;  %v2831_v32 = vsel %vm2819_vm4, %v2813_v43, %v2830_v55  ;;  %v11543_v31 = vmul.u32.u64.low %v11512_v21, %v2828_v2  ;;  %v11544_v35 = vmul.u32.u64.high %v11512_v21, %v2828_v2, %v11543_v31 }
 0x35e   : > { %v2832_v36 = vsel %vm2818_vm5, %v2829_v62, %v2831_v32  ;;  %v2914_v46 = vor.u32 %v2913_v29, %v2912_v15  ;;  %v2917_v57 = vor.u32 %v2916_v6, %v2915_v11  ;;  %v2919_v42 = vshrl.u32 %v16156_v16, %v11424_v33 }
 0x35f   : > { %v2749_v3 = vclz %v8225_v22  ;;  %v2824_v14 = vsel %vm2818_vm5, %v2821_v41, %v2823_v25  ;;  %v11552_v52 = vmul.u32.u64.low %v11512_v21, %v2832_v36  ;;  %v11553_v24 = vmul.u32.u64.high %v11512_v21, %v2832_v36, %v11552_v52 }
 0x360   : > { %v2557_v43 = vxor.u32 2147483648, %v11522_v53  ;;  %v2650_v5 = vshll.u32 %v11412_v58, %v11494_v20  ;;  %v2651_v8 = vshrl.u32 %v11421_v4, %v2649_v63  ;;  %v2918_v62 = vshll.u32 %v16165_v39, %v11397_v50 }
 0x361   : > { %v8226_v32 = vadd.s32 4294967294, %v2749_v3  ;;  %v2656_v15 = vor.u32 4788187, %v2655_v51  ;;  %v2843_v33 = vadd.s32 1, %v11544_v35  ;;  %v2840_v49 = vmul.u32 %v11512_v21, %v2824_v14 }
 0x362   : > { %v2920_v29 = vor.u32 %v2919_v42, %v2918_v62  ;;  %v2930_v11 = vsel %vm2924_vm1, %v2917_v57, 920167782  ;;  %vm2842_vm15 = vc.u32 %v11553_v24, %v11543_v31  ;;  %vm2923_vm8 = vcmp.lt.s32.totalorder %v11414_v54, 3 }
 0x363   : > { %vm8227_vm3 = vcmp.lt.s32.totalorder %v8226_v32, 0  ;;  %v2929_v50 = vsel %vm2921_vm6, %v11486_v47, %v11496_v37  ;;  %v2844_v4 = vsel %vm2842_vm15, %v2843_v33, %v11544_v35  ;;  %v2926_v20 = vsel %vm2924_vm1, %v2914_v46, 2102212464 }
 0x364   : > { %v11574_v58 = vsel %vm8227_vm3, 0, %v8226_v32  ;;  %v2931_v21 = vsel %vm2923_vm8, %v2914_v46, %v2930_v11  ;;  %v2652_v63 = vor.u32 %v2651_v8, %v2650_v5  ;;  %v2845_v51 = vadd.s32 %v2844_v4, %v2840_v49 }
 0x365   : > { %v2757_v6 = vsub.s32 4294967266, %v11574_v58  ;;  %vm2922_vm9 = vcmp.lt.s32.totalorder %v11414_v54, 2  ;;  %v2657_v2 = vand.u32 2147483647, %v2656_v15  ;;  %v2933_v35 = vsel %vm2921_vm6, %v11496_v37, %v2914_v46 }
 0x366   : > { %v2932_v41 = vsel %vm2922_vm9, %v2929_v50, %v2931_v21  ;;  %v2934_v25 = vsel %vm2924_vm1, %v2920_v29, 1326507024  ;;  %v2846_v55 = vadd.s32 536870912, %v2845_v51  ;;  %v2925_v22 = vsel %vm2921_vm6, %v11480_v48, %v11486_v47 }
 0x367   : > { %v2927_v36 = vsel %vm2923_vm8, %v11496_v37, %v2926_v20  ;;  %v2935_v42 = vsel %vm2923_vm8, %v2917_v57, %v2934_v25  ;;  %v11602_v46 = vmul.u32.u64.low %v11399_v38, %v2932_v41  ;;  %v11603_v14 = vmul.u32.u64.high %v11399_v38, %v2932_v41, %v11602_v46 }
 0x368   : > { %v2936_v3 = vsel %vm2922_vm9, %v2933_v35, %v2935_v42  ;;  %v11608_v52 = vadd.f32 %v11383_v28, %v11286_v0  ;;  %vm2683_vm12 = vcmp.lt.s32.totalorder %v11371_v59, 0  ;;  %v2758_v48 = vadd.s32 127, %v2757_v6 }
 0x369   : > { %v2659_v47 = vcvt.s32.f32 %v2652_v63  ;;  %v11611_v37 = vshrl.u32 %v2846_v55, 30  ;;  %v2753_v57 = vsub.s32 32, %v11574_v58  ;;  %v2767_v5 = vsub.s32 4, %v11509_v45 }
 0x36a   : > { %16261 = vst [vmem:[#allocation16_spill] sm:$0xff] %v11608_v52  ;;  %v11616_v8 = vmul.u32.u64.low %v11399_v38, %v2936_v3  ;;  %v11617_v62 = vmul.u32.u64.high %v11399_v38, %v2936_v3, %v11616_v8  ;;  %v16262_v32 = vand.u32 2147483647, %v11371_v59  ;;  %vm2579_vm14 = vcmp.lt.s32.totalorder %v11274_v13, 0 }
 0x36b   : > { %v2848_v28 = vshll.u32 %v11611_v37, 30  ;;  %v2928_v33 = vsel %vm2922_vm9, %v2925_v22, %v2927_v36  ;;  %v3100_v49 = vand.u32 2139095040, %v11608_v52  ;;  %v2558_v29 = vsel %vm2475_vm10, %v2557_v43, %v11522_v53 }
 0x36c   : > { %vm11621_vm11 = vcmp.le.f32.partialorder %v16262_v32, 0.7853982  ;;  %v2737_v11 = vadd.s32 %v11461_v12, %v11469_v34  ;;  %v2660_v50 = vmul.f32 %v2659_v47, %v2657_v2  ;;  %v2947_v4 = vadd.s32 1, %v11603_v14  ;;  %v11680_v32 = vpop.f32.mrb[6].mxu0 }
 0x36d   : > { %v2759_v20 = vshll.u32 %v2758_v48, 23  ;;  %v11636_v21 = vsub.s32 %v2845_v51, %v2848_v28  ;;  %v15976_v6 = vand.u32 2147483647, %v11608_v52  ;;  %v3101_v63 = vshrl.u32 %v3100_v49, 23 }
 0x36e   : > { %v2755_v54 = vshrl.u32 %v2737_v11, %v2753_v57  ;;  %v2768_v41 = vsel %vm2683_vm12, %v2767_v5, %v11509_v45  ;;  %v16265_v35 = vand.u32 2147483647, %v11274_v13  ;;  %v2944_v34 = vmul.u32 %v11399_v38, %v2928_v33  ;;  %v11659_v38 = vpop.permute.xlu0 %2274 }
 0x36f   : > { %vm2946_vm0 = vc.u32 %v11617_v62, %v11602_v46  ;;  %v2851_v12 = vsub.s32 0, %v11636_v21  ;;  %v8240_v51 = vadd.s32 4294967169, %v3101_v63  ;;  %v3003_v2 = vadd.s32 1, %v11417_v1 }
 0x370   : > { %vm11644_vm10 = vcmp.le.f32.partialorder %v16265_v35, 0.7853982  ;;  %v2948_v43 = vsel %vm2946_vm0, %v2947_v4, %v11603_v14  ;;  %v2561_v45 = vsel %vm11452_vm13, %v11271_v18, %v2558_v29  ;;  %v2754_v25 = vshll.u32 %v11525_v26, %v11574_v58  ;;  %v16301_v18 = vld [vmem:[#allocation5_spill] sm:$0xff] }
 0x371   : > { %v2661_v55 = vxor.u32 2147483648, %v2660_v50  ;;  %v2949_v22 = vadd.s32 %v2948_v43, %v2944_v34  ;;  %v2760_v36 = vor.u32 4788187, %v2759_v20  ;;  %v8229_v42 = vmin.u32 %v2851_v12, %v11636_v21 }
 0x372   : > { %v3104_v3 = vand.u32 8388607, %v15976_v6  ;;  %v3107_v14 = vadd.s32 1, %v8240_v51  ;;  %v16268_v1 = vsel %vm11452_vm13, 0, %v11430_v19  ;;  %v2770_v26 = vsel %vm11621_vm11, 0, %v2768_v41 }
 0x373   : > { %v11668_v48 = vadd.s32 3, %v16268_v1  ;;  %v2950_v58 = vadd.s32 536870912, %v2949_v22  ;;  %v11674_v47 = vadd.f32 %v11312_v61, %v11659_v38  ;;  %v2756_v57 = vor.u32 %v2755_v54, %v2754_v25 }
 0x374   : > { %v2853_v5 = vclz %v8229_v42  ;;  %vm3108_vm2 = vcmp.gt.s32.totalorder %v3107_v14, 0  ;;  %vm3004_vm4 = vcmp.gt.s32.totalorder %v3003_v2, 0  ;;  %8870 = vcosq.f32 %v2561_v45 }
 0x375   : > { %16269 = vst [vmem:[#allocation19_spill] sm:$0xff] %v11668_v48  ;;  %16270 = vst [vmem:[#allocation15_spill] sm:$0xff] %v11674_v47  ;;  %v2662_v9 = vsel %vm2579_vm14, %v2661_v55, %v2660_v50  ;;  %v11678_v8 = vshrl.u32 %v2950_v58, 30  ;;  %v3109_v19 = vsel %vm3108_vm2, %v3107_v14, 0  ;;  %v2761_v28 = vand.u32 2147483647, %v2760_v36 }
 0x376   : > { %v8230_v33 = vadd.s32 4294967294, %v2853_v5  ;;  %v3105_v49 = vor.u32 8388608, %v3104_v3  ;;  %v3111_v29 = vand.u32 31, %v3109_v19  ;;  %8872 = vsinq.f32 %v2561_v45 }
 0x377   : > { %v11682_v61 = vadd.s32 3, %v2770_v26  ;;  %v2952_v11 = vshll.u32 %v11678_v8, 30  ;;  %v3005_v4 = vsel %vm3004_vm4, %v3003_v2, 0  ;;  %v2763_v20 = vcvt.s32.f32 %v2756_v57 }
 0x378   : > { %v11688_v50 = vsel %vm11644_vm10, %v11274_v13, %v2662_v9  ;;  %vm8231_vm13 = vcmp.lt.s32.totalorder %v8230_v33, 0  ;;  %v3112_v63 = vsub.s32 32, %v3111_v29  ;;  %v2841_v54 = vadd.s32 %v11543_v31, %v11553_v24 }
 0x379   : > { %16271 = vst [vmem:[#allocation8_spill] sm:$0xff] %v11682_v61  ;;  %v2856_v41 = vsel %vm8231_vm13, 0, %v8230_v33  ;;  %v11694_v35 = vadd.s32 %v11602_v46, %v11617_v62  ;;  %v11696_v34 = vsub.s32 %v2949_v22, %v2952_v11  ;;  %v11698_v12 = vmul.f32 %v2763_v20, %v2761_v28 }
 0x37a   : > { %v11700_v43 = vshll.u32 %v3105_v49, 8  ;;  %v11702_v51 = vshrl.u32 %v3005_v4, 5  ;;  %v11704_v2 = vand.u32 31, %v3005_v4  ;;  %v2861_v45 = vsub.s32 4294967266, %v2856_v41 }
 0x37b   : > { %v2955_v25 = vsub.s32 0, %v11696_v34  ;;  %v3114_v31 = vshll.u32 %v16166_v40, %v3111_v29  ;;  %v3115_v24 = vshrl.u32 %v16167_v56, %v3112_v63  ;;  %v2857_v55 = vsub.s32 32, %v2856_v41 }
 0x37c   : > { %v3117_v46 = vshll.u32 %v16167_v56, %v3111_v29  ;;  %v3118_v62 = vshrl.u32 %v16168_v30, %v3112_v63  ;;  %v3121_v22 = vshrl.u32 %v16159_v7, %v3112_v63  ;;  %v3110_v42 = vshrl.u32 %v3109_v19, 5 }
 0x37d   : > { %v8233_v36 = vmin.u32 %v2955_v25, %v11696_v34  ;;  %v3123_v3 = vshll.u32 %v16159_v7, %v3111_v29  ;;  %v3124_v14 = vshrl.u32 %v16165_v39, %v3112_v63  ;;  %v3116_v26 = vor.u32 %v3115_v24, %v3114_v31 }
 0x37e   : > { %v3119_v58 = vor.u32 %v3118_v62, %v3117_v46  ;;  %v3120_v57 = vshll.u32 %v16168_v30, %v3111_v29  ;;  %v11717_v5 = vpop.eup %8870  ;;  %v2862_v9 = vadd.s32 127, %v2861_v45  ;;  %v3127_v49 = vshrl.u32 %v16156_v16, %v3112_v63 }
 0x37f   : > { %16272 = vst [vmem:[#allocation23_spill] sm:$0xff] %v11717_v5  ;;  %v2957_v28 = vclz %v8233_v36  ;;  %v3125_v33 = vor.u32 %v3124_v14, %v3123_v3  ;;  %v2859_v11 = vshrl.u32 %v2841_v54, %v2857_v55  ;;  %v3126_v19 = vshll.u32 %v16165_v39, %v3111_v29 }
 0x380   : > { %v3122_v4 = vor.u32 %v3121_v22, %v3120_v57  ;;  %v11722_v20 = vsub.s32 32, %v11704_v2  ;;  %v11724_v25 = vpop.eup %8872  ;;  %v2858_v31 = vshll.u32 %v11636_v21, %v2856_v41  ;;  %vm3129_vm5 = vcmp.lt.s32.totalorder %v3110_v42, 1  ;;  %v11732_v22 = vpop.f32.mrb[6].mxu1 }
 0x381   : > { %16273 = vst [vmem:[#allocation18_spill] sm:$0xff] %v11724_v25  ;;  %v8234_v24 = vadd.s32 4294967294, %v2957_v28  ;;  %v3010_v45 = vshll.u32 %v16166_v40, %v11704_v2  ;;  %v3113_v46 = vshrl.u32 %v16166_v40, %v3112_v63  ;;  %v3128_v62 = vor.u32 %v3127_v49, %v3126_v19 }
 0x382   : > { %vm3132_vm1 = vcmp.lt.s32.totalorder %v3110_v42, 4  ;;  %v3137_v54 = vsel %vm3129_vm5, %v3116_v26, %v3119_v58  ;;  %v2863_v55 = vshll.u32 %v2862_v9, 23  ;;  %vm3131_vm3 = vcmp.lt.s32.totalorder %v3110_v42, 3 }
 0x383   : > { %vm8235_vm6 = vcmp.lt.s32.totalorder %v8234_v24, 0  ;;  %v3138_v29 = vsel %vm3132_vm1, %v3125_v33, 920167782  ;;  %v2860_v36 = vor.u32 %v2859_v11, %v2858_v31  ;;  %vm3130_vm15 = vcmp.lt.s32.totalorder %v3110_v42, 2 }
 0x384   : > { %v2960_v21 = vsel %vm8235_vm6, 0, %v8234_v24  ;;  %v3139_v41 = vsel %vm3131_vm3, %v3122_v4, %v3138_v29  ;;  %v3134_v14 = vsel %vm3132_vm1, %v3122_v4, 2102212464  ;;  %v3141_v57 = vsel %vm3129_vm5, %v3119_v58, %v3122_v4 }
 0x385   : > { %v2965_v3 = vsub.s32 4294967266, %v2960_v21  ;;  %v3140_v63 = vsel %vm3130_vm15, %v3137_v54, %v3139_v41  ;;  %v2961_v28 = vsub.s32 32, %v2960_v21  ;;  %v3142_v9 = vsel %vm3132_vm1, %v3128_v62, 1326507024 }
 0x386   : > { %v11740_v49 = vmul.u32.u64.low %v11700_v43, %v3140_v63  ;;  %v11741_v19 = vmul.u32.u64.high %v11700_v43, %v3140_v63, %v11740_v49  ;;  %v2864_v11 = vor.u32 4788187, %v2863_v55  ;;  %v3143_v24 = vsel %vm3131_vm3, %v3125_v33, %v3142_v9 }
 0x387   : > { %v2966_v31 = vadd.s32 127, %v2965_v3  ;;  %v3013_v29 = vshll.u32 %v16167_v56, %v11704_v2  ;;  %v3133_v6 = vsel %vm3129_vm5, %v3113_v46, %v3116_v26  ;;  %v3135_v54 = vsel %vm3131_vm3, %v3119_v58, %v3134_v14 }
 0x388   : > { %v3144_v4 = vsel %vm3130_vm15, %v3141_v57, %v3143_v24  ;;  %v3011_v62 = vshrl.u32 %v16167_v56, %v11722_v20  ;;  %vm3025_vm8 = vcmp.lt.s32.totalorder %v11702_v51, 1  ;;  %v3014_v55 = vshrl.u32 %v16168_v30, %v11722_v20 }
 0x389   : > { %v2967_v41 = vshll.u32 %v2966_v31, 23  ;;  %v3016_v33 = vshll.u32 %v16168_v30, %v11704_v2  ;;  %v3017_v3 = vshrl.u32 %v16159_v7, %v11722_v20  ;;  %v2867_v26 = vcvt.s32.f32 %v2860_v36 }
 0x38a   : > { %v2963_v58 = vshrl.u32 %v11694_v35, %v2961_v28  ;;  %v11761_v46 = vmul.u32.u64.low %v11700_v43, %v3144_v4  ;;  %v11762_v14 = vmul.u32.u64.high %v11700_v43, %v3144_v4, %v11761_v46  ;;  %v2865_v63 = vand.u32 2147483647, %v2864_v11 }
 0x38b   : > { %v2962_v57 = vshll.u32 %v11696_v34, %v2960_v21  ;;  %v3136_v9 = vsel %vm3130_vm15, %v3133_v6, %v3135_v54  ;;  %v3155_v31 = vadd.s32 1, %v11741_v19  ;;  %v2968_v24 = vor.u32 4788187, %v2967_v41 }
 0x38c   : > { %v3012_v1 = vor.u32 %v3011_v62, %v3010_v45  ;;  %v3019_v61 = vshll.u32 %v16159_v7, %v11704_v2  ;;  %v3020_v36 = vshrl.u32 %v16165_v39, %v11722_v20  ;;  %v3015_v35 = vor.u32 %v3014_v55, %v3013_v29 }
 0x38d   : > { %v3018_v28 = vor.u32 %v3017_v3, %v3016_v33  ;;  %v3022_v4 = vshll.u32 %v16165_v39, %v11704_v2  ;;  %v3023_v34 = vshrl.u32 %v16156_v16, %v11722_v20  ;;  %v2964_v42 = vor.u32 %v2963_v58, %v2962_v57 }
 0x38e   : > { %v3152_v6 = vmul.u32 %v11700_v43, %v3136_v9  ;;  %vm3154_vm9 = vc.u32 %v11762_v14, %v11740_v49  ;;  %v3021_v45 = vor.u32 %v3020_v36, %v3019_v61  ;;  %vm3026_vm0 = vcmp.lt.s32.totalorder %v11702_v51, 2 }
 0x38f   : > { %v3156_v21 = vsel %vm3154_vm9, %v3155_v31, %v11741_v19  ;;  %v3024_v11 = vor.u32 %v3023_v34, %v3022_v4  ;;  %vm3028_vm2 = vcmp.lt.s32.totalorder %v11702_v51, 4  ;;  %vm16014_vm4 = vcmp.lt.s32.totalorder %v11377_v23, 0 }
 0x390   : > { %v2868_v2 = vmul.f32 %v2867_v26, %v2865_v63  ;;  %v3157_v29 = vadd.s32 %v3156_v21, %v3152_v6  ;;  %vm3027_vm13 = vcmp.lt.s32.totalorder %v11702_v51, 3  ;;  %v3034_v54 = vsel %vm3028_vm2, %v3021_v45, 920167782 }
 0x391   : > { %v2969_v62 = vand.u32 2147483647, %v2968_v24  ;;  %v3033_v43 = vsel %vm3025_vm8, %v3012_v1, %v3015_v35  ;;  %v3035_v61 = vsel %vm3027_vm13, %v3018_v28, %v3034_v54  ;;  %v3037_v19 = vsel %vm3025_vm8, %v3015_v35, %v3018_v28 }
 0x392   : > { %v16274_v41 = vxor.u32 2147483648, %v11698_v12  ;;  %v2971_v33 = vcvt.s32.f32 %v2964_v42  ;;  %v3158_v3 = vadd.s32 536870912, %v3157_v29  ;;  %v3038_v26 = vsel %vm3028_vm2, %v3024_v11, 1326507024 }
 0x393   : > { %vm2891_vm5 = vcmp.lt.s32.totalorder %v11289_v44, 0  ;;  %v3030_v58 = vsel %vm3028_vm2, %v3018_v28, 2102212464  ;;  %v3039_v46 = vsel %vm3027_vm13, %v3021_v45, %v3038_v26  ;;  %v16275_v63 = vor.u32 8388608, %v11403_v60 }
 0x394   : > { %v2766_v55 = vsel %vm2683_vm12, %v16274_v41, %v11698_v12  ;;  %v11801_v9 = vadd.f32 %v11391_v10, %v11286_v0  ;;  %v16276_v31 = vand.u32 2147483647, %v11377_v23  ;;  %v11809_v24 = vshrl.u32 %v3158_v3, 30 }
 0x395   : > { %v3041_v57 = vshll.u32 %v16275_v63, 8  ;;  %v3009_v36 = vshrl.u32 %v16166_v40, %v11722_v20  ;;  %v3036_v28 = vsel %vm3026_vm0, %v3033_v43, %v3035_v61  ;;  %v3040_v60 = vsel %vm3026_vm0, %v3037_v19, %v3039_v46  ;;  %v11863_v63 = vpop.f32.mrb[7].mxu0 }
 0x396   : > { %vm11805_vm1 = vcmp.le.f32.partialorder %v16276_v31, 0.7853982  ;;  %v2869_v4 = vxor.u32 2147483648, %v2868_v2  ;;  %v2972_v0 = vmul.f32 %v2971_v33, %v2969_v62  ;;  %v16279_v42 = vand.u32 2147483647, %v11289_v44 }
 0x397   : > { %v11817_v10 = vmul.u32.u64.low %v3041_v57, %v3040_v60  ;;  %v11818_v34 = vmul.u32.u64.high %v3041_v57, %v3040_v60, %v11817_v10  ;;  %v3160_v45 = vshll.u32 %v11809_v24, 30  ;;  %v3029_v20 = vsel %vm3025_vm8, %v3009_v36, %v3012_v1 }
 0x398   : > { %vm11822_vm12 = vcmp.le.f32.partialorder %v16279_v42, 0.7853982  ;;  %v3031_v21 = vsel %vm3027_vm13, %v3015_v35, %v3030_v58  ;;  %v15977_v11 = vand.u32 2147483647, %v11801_v9  ;;  %8874 = vcosq.f32 %v11688_v50 }
 0x399   : > { %v11833_v54 = vmul.u32.u64.low %v3041_v57, %v3036_v28  ;;  %v11834_v62 = vmul.u32.u64.high %v3041_v57, %v3036_v28, %v11833_v54  ;;  %v3204_v43 = vand.u32 2139095040, %v11801_v9  ;;  %v2769_v61 = vsel %vm11621_vm11, %v11371_v59, %v2766_v55 }
 0x39a   : > { %8876 = vsinq.f32 %v11688_v50  ;;  %v2975_v1 = vsub.s32 4, %v11678_v8  ;;  %v11843_v19 = vsub.s32 %v3157_v29, %v3160_v45  ;;  %v2870_v35 = vsel %vm16014_vm4, %v2869_v4, %v2868_v2 }
 0x39b   : > { %v2973_v41 = vxor.u32 2147483648, %v2972_v0  ;;  %v3032_v33 = vsel %vm3026_vm0, %v3029_v20, %v3031_v21  ;;  %v3205_v3 = vshrl.u32 %v3204_v43, 23  ;;  %vm3050_vm6 = vc.u32 %v11818_v34, %v11833_v54 }
 0x39c   : > { %v3163_v26 = vsub.s32 0, %v11843_v19  ;;  %v3208_v15 = vand.u32 8388607, %v15977_v11  ;;  %v15978_v50 = vand.u32 2147483647, %v11674_v47  ;;  %8878 = vcosq.f32 %v2769_v61 }
 0x39d   : > { %v3051_v29 = vadd.s32 1, %v11834_v62  ;;  %v8244_v55 = vadd.s32 4294967169, %v3205_v3  ;;  %v3308_v2 = vand.u32 2139095040, %v11674_v47  ;;  %8880 = vsinq.f32 %v2769_v61 }
 0x39e   : > { %v11860_v51 = vsel %vm2891_vm5, %v2975_v1, %v11678_v8  ;;  %v8241_v58 = vmin.u32 %v3163_v26, %v11843_v19  ;;  %v3048_v46 = vmul.u32 %v3041_v57, %v3032_v33  ;;  %v11868_v31 = vsel %vm11805_vm1, %v11377_v23, %v2870_v35 }
 0x39f   : > { %v2974_v36 = vsel %vm2891_vm5, %v2973_v41, %v2972_v0  ;;  %v3052_v28 = vsel %vm3050_vm6, %v3051_v29, %v11834_v62  ;;  %v3211_v60 = vadd.s32 1, %v8244_v55  ;;  %v3209_v8 = vor.u32 8388608, %v3208_v15 }
 0x3a0   : > { %v3165_v4 = vclz %v8241_v58  ;;  %v3053_v10 = vadd.s32 %v3052_v28, %v3048_v46  ;;  %v11875_v42 = vand.u32 8388607, %v15978_v50  ;;  %v3309_v45 = vshrl.u32 %v3308_v2, 23 }
 0x3a1   : > { %vm3212_vm11 = vcmp.gt.s32.totalorder %v3211_v60, 0  ;;  %v11882_v20 = vadd.f32 %v11395_v17, %v11659_v38  ;;  %8882 = vcosq.f32 %v11868_v31  ;;  %v11890_v61 = vsel %vm11822_vm12, %v11289_v44, %v2974_v36 }
 0x3a2   : > { %v8242_v0 = vadd.s32 4294967294, %v3165_v4  ;;  %v3054_v21 = vadd.s32 536870912, %v3053_v10  ;;  %v3213_v62 = vsel %vm3212_vm11, %v3211_v60, 0  ;;  %v11885_v43 = vpop.eup %8874  ;;  %v3153_v1 = vadd.s32 %v11740_v49, %v11762_v14 }
 0x3a3   : > { %16282 = vst [vmem:[#allocation28_spill] sm:$0xff] %v11882_v20  ;;  %v3215_v41 = vand.u32 31, %v3213_v62  ;;  %v11899_v3 = vshll.u32 %v3209_v8, 8  ;;  %v8248_v55 = vadd.s32 4294967169, %v3309_v45  ;;  %v3214_v14 = vshrl.u32 %v3213_v62, 5 }
 0x3a4   : > { %v11895_v17 = vpop.eup %8876  ;;  %vm8243_vm3 = vcmp.lt.s32.totalorder %v8242_v0, 0  ;;  %v11897_v33 = vshrl.u32 %v3054_v21, 30  ;;  %vm3099_vm6 = vcmp.lt.s32.totalorder %v11608_v52, 0  ;;  %8884 = vsinq.f32 %v11868_v31 }
 0x3a5   : > { %v3168_v15 = vsel %vm8243_vm3, 0, %v8242_v0  ;;  %v3216_v29 = vsub.s32 32, %v3215_v41  ;;  %v3218_v28 = vshll.u32 %v16166_v40, %v3215_v41  ;;  %v3224_v8 = vshll.u32 %v16168_v30, %v3215_v41 }
 0x3a6   : > { %v3169_v58 = vsub.s32 32, %v3168_v15  ;;  %v3173_v46 = vsub.s32 4294967266, %v3168_v15  ;;  %v3056_v49 = vshll.u32 %v11897_v33, 30  ;;  %v11904_v36 = vpop.eup %8878  ;;  %v3170_v62 = vshll.u32 %v11843_v19, %v3168_v15 }
 0x3a7   : > { %16283 = vst [vmem:[#allocation36_spill] sm:$0xff] %v11904_v36  ;;  %v3219_v60 = vshrl.u32 %v16167_v56, %v3216_v29  ;;  %v3222_v4 = vshrl.u32 %v16168_v30, %v3216_v29  ;;  %v11910_v0 = vpop.eup %8880  ;;  %v3225_v50 = vshrl.u32 %v16159_v7, %v3216_v29  ;;  %v3221_v57 = vshll.u32 %v16167_v56, %v3215_v41 }
 0x3a8   : > { %16284 = vst [vmem:[#allocation37_spill] sm:$0xff] %v11910_v0  ;;  %v3171_v45 = vshrl.u32 %v3153_v1, %v3169_v58  ;;  %v3174_v21 = vadd.s32 127, %v3173_v46  ;;  %v11912_v11 = vsub.s32 %v3053_v10, %v3056_v49  ;;  %v3227_v35 = vshll.u32 %v16159_v7, %v3215_v41 }
 0x3a9   : > { %v3228_v2 = vshrl.u32 %v16165_v39, %v3216_v29  ;;  %v3220_v36 = vor.u32 %v3219_v60, %v3218_v28  ;;  %v3226_v44 = vor.u32 %v3225_v50, %v3224_v8  ;;  %v3223_v0 = vor.u32 %v3222_v4, %v3221_v57 }
 0x3aa   : > { %v3175_v26 = vshll.u32 %v3174_v21, 23  ;;  %v3059_v59 = vsub.s32 0, %v11912_v11  ;;  %v3230_v10 = vshll.u32 %v16165_v39, %v3215_v41  ;;  %v3231_v58 = vshrl.u32 %v16156_v16, %v3216_v29 }
 0x3ab   : > { %v3229_v1 = vor.u32 %v3228_v2, %v3227_v35  ;;  %v11922_v46 = vpop.eup %8882  ;;  %v3172_v19 = vor.u32 %v3171_v45, %v3170_v62  ;;  %v3315_v5 = vadd.s32 1, %v8248_v55  ;;  %v3217_v25 = vshrl.u32 %v16166_v40, %v3216_v29  ;;  %v11926_v29 = vpop.f32.mrb[7].mxu1 }
 0x3ac   : > { %16285 = vst [vmem:[#allocation31_spill] sm:$0xff] %v11922_v46  ;;  %v3176_v15 = vor.u32 4788187, %v3175_v26  ;;  %v8237_v49 = vmin.u32 %v3059_v59, %v11912_v11  ;;  %v3232_v21 = vor.u32 %v3231_v58, %v3230_v10  ;;  %vm3233_vm15 = vcmp.lt.s32.totalorder %v3214_v14, 1 }
 0x3ad   : > { %vm3236_vm8 = vcmp.lt.s32.totalorder %v3214_v14, 4  ;;  %vm3235_vm9 = vcmp.lt.s32.totalorder %v3214_v14, 3  ;;  %v3241_v35 = vsel %vm3233_vm15, %v3220_v36, %v3223_v0  ;;  %v3245_v2 = vsel %vm3233_vm15, %v3223_v0, %v3226_v44 }
 0x3ae   : > { %v3177_v28 = vand.u32 2147483647, %v3176_v15  ;;  %v3061_v50 = vclz %v8237_v49  ;;  %v3238_v57 = vsel %vm3236_vm8, %v3226_v44, 2102212464  ;;  %v3242_v41 = vsel %vm3236_vm8, %v3229_v1, 920167782 }
 0x3af   : > { %v3246_v60 = vsel %vm3236_vm8, %v3232_v21, 1326507024  ;;  %v3179_v4 = vcvt.s32.f32 %v3172_v19  ;;  %vm3234_vm0 = vcmp.lt.s32.totalorder %v3214_v14, 2  ;;  %v3243_v26 = vsel %vm3235_vm9, %v3226_v44, %v3242_v41 }
 0x3b0   : > { %v8238_v8 = vadd.s32 4294967294, %v3061_v50  ;;  %v3237_v45 = vsel %vm3233_vm15, %v3217_v25, %v3220_v36  ;;  %v3239_v59 = vsel %vm3235_vm9, %v3223_v0, %v3238_v57  ;;  %v3247_v55 = vsel %vm3235_vm9, %v3229_v1, %v3246_v60 }
 0x3b1   : > { %vm3316_vm2 = vcmp.gt.s32.totalorder %v3315_v5, 0  ;;  %v3244_v62 = vsel %vm3234_vm0, %v3241_v35, %v3243_v26  ;;  %v3248_v10 = vsel %vm3234_vm0, %v3245_v2, %v3247_v55  ;;  %v11930_v15 = vmul.f32 %v3179_v4, %v3177_v28 }
 0x3b2   : > { %vm8239_vm13 = vcmp.lt.s32.totalorder %v8238_v8, 0  ;;  %v3317_v58 = vsel %vm3316_vm2, %v3315_v5, 0  ;;  %v11933_v19 = vmul.u32.u64.low %v11899_v3, %v3248_v10  ;;  %v11934_v21 = vmul.u32.u64.high %v11899_v3, %v3248_v10, %v11933_v19 }
 0x3b3   : > { %v3064_v49 = vsel %vm8239_vm13, 0, %v8238_v8  ;;  %v3049_v44 = vadd.s32 %v11833_v54, %v11818_v34  ;;  %v3240_v0 = vsel %vm3234_vm0, %v3237_v45, %v3239_v59  ;;  %v3319_v5 = vand.u32 31, %v3317_v58 }
 0x3b4   : > { %v3065_v25 = vsub.s32 32, %v3064_v49  ;;  %v3069_v36 = vsub.s32 4294967266, %v3064_v49  ;;  %v11940_v1 = vmul.u32.u64.low %v11899_v3, %v3244_v62  ;;  %v11941_v50 = vmul.u32.u64.high %v11899_v3, %v3244_v62, %v11940_v1 }
 0x3b5   : > { %v16286_v41 = vor.u32 8388608, %v11875_v42  ;;  %v16287_v34 = vand.u32 2139095040, %v11882_v20  ;;  %v3181_v14 = vxor.u32 2147483648, %v11930_v15  ;;  %v3256_v60 = vmul.u32 %v11899_v3, %v3240_v0 }
 0x3b6   : > { %v3067_v57 = vshrl.u32 %v3049_v44, %v3065_v25  ;;  %v3070_v35 = vadd.s32 127, %v3069_v36  ;;  %v3318_v4 = vshrl.u32 %v3317_v58, 5  ;;  %v3320_v8 = vsub.s32 32, %v3319_v5 }
 0x3b7   : > { %v11947_v2 = vshll.u32 %v16286_v41, 8  ;;  %v11951_v54 = vshrl.u32 %v16287_v34, 23  ;;  %v3066_v26 = vshll.u32 %v11912_v11, %v3064_v49  ;;  %vm3258_vm5 = vc.u32 %v11934_v21, %v11940_v1 }
 0x3b8   : > { %v3071_v45 = vshll.u32 %v3070_v35, 23  ;;  %v3322_v42 = vshll.u32 %v16166_v40, %v3319_v5  ;;  %v3259_v59 = vadd.s32 1, %v11941_v50  ;;  %v3323_v55 = vshrl.u32 %v16167_v56, %v3320_v8 }
 0x3b9   : > { %v3325_v62 = vshll.u32 %v16167_v56, %v3319_v5  ;;  %v3326_v10 = vshrl.u32 %v16168_v30, %v3320_v8  ;;  %v3068_v19 = vor.u32 %v3067_v57, %v3066_v26  ;;  %v3328_v58 = vshll.u32 %v16168_v30, %v3319_v5 }
 0x3ba   : > { %v3072_v3 = vor.u32 4788187, %v3071_v45  ;;  %v3329_v11 = vshrl.u32 %v16159_v7, %v3320_v8  ;;  %v3260_v49 = vsel %vm3258_vm5, %v3259_v59, %v11941_v50  ;;  %v3324_v44 = vor.u32 %v3323_v55, %v3322_v42 }
 0x3bb   : > { %v3327_v25 = vor.u32 %v3326_v10, %v3325_v62  ;;  %v3331_v36 = vshll.u32 %v16159_v7, %v3319_v5  ;;  %v3261_v35 = vadd.s32 %v3260_v49, %v3256_v60  ;;  %v3332_v34 = vshrl.u32 %v16165_v39, %v3320_v8 }
 0x3bc   : > { %v3073_v0 = vand.u32 2147483647, %v3072_v3  ;;  %v3330_v41 = vor.u32 %v3329_v11, %v3328_v58  ;;  %v3321_v57 = vshrl.u32 %v16166_v40, %v3320_v8  ;;  %v3334_v26 = vshll.u32 %v16165_v39, %v3319_v5 }
 0x3bd   : > { %v3335_v45 = vshrl.u32 %v16156_v16, %v3320_v8  ;;  %vm3337_vm11 = vcmp.lt.s32.totalorder %v3318_v4, 1  ;;  %v16288_v28 = vand.u32 2147483647, %v11608_v52  ;;  %v3075_v42 = vcvt.s32.f32 %v3068_v19 }
 0x3be   : > { %v3262_v59 = vadd.s32 536870912, %v3261_v35  ;;  %v3333_v55 = vor.u32 %v3332_v34, %v3331_v36  ;;  %vm3340_vm15 = vcmp.lt.s32.totalorder %v3318_v4, 4  ;;  %vm3338_vm8 = vcmp.lt.s32.totalorder %v3318_v4, 2 }
 0x3bf   : > { %vm11974_vm3 = vcmp.le.f32.partialorder %v16288_v28, 0.7853982  ;;  %v3336_v60 = vor.u32 %v3335_v45, %v3334_v26  ;;  %v3342_v62 = vsel %vm3340_vm15, %v3330_v41, 2102212464  ;;  %v3345_v10 = vsel %vm3337_vm11, %v3324_v44, %v3327_v25 }
 0x3c0   : > { %vm2995_vm9 = vcmp.lt.s32.totalorder %v11368_v27, 0  ;;  %v3076_v5 = vmul.f32 %v3075_v42, %v3073_v0  ;;  %v11980_v8 = vshrl.u32 %v3262_v59, 30  ;;  %vm3339_vm0 = vcmp.lt.s32.totalorder %v3318_v4, 3  ;;  %v16291_v59 = vld [vmem:[#allocation24_spill] sm:$0xff] }
 0x3c1   : > { %v3346_v3 = vsel %vm3340_vm15, %v3333_v55, 920167782  ;;  %v3341_v28 = vsel %vm3337_vm11, %v3321_v57, %v3324_v44  ;;  %v3349_v19 = vsel %vm3337_vm11, %v3327_v25, %v3330_v41  ;;  %v3350_v11 = vsel %vm3340_vm15, %v3336_v60, 1326507024 }
 0x3c2   : > { %v3347_v58 = vsel %vm3339_vm0, %v3330_v41, %v3346_v3  ;;  %v3264_v49 = vshll.u32 %v11980_v8, 30  ;;  %v3343_v36 = vsel %vm3339_vm0, %v3327_v25, %v3342_v62  ;;  %v3351_v26 = vsel %vm3339_vm0, %v3333_v55, %v3350_v11 }
 0x3c3   : > { %v3348_v34 = vsel %vm3338_vm8, %v3345_v10, %v3347_v58  ;;  %v3352_v45 = vsel %vm3338_vm8, %v3349_v19, %v3351_v26  ;;  %v11994_v44 = vadd.f32 %v16291_v59, %v11659_v38  ;;  %v16292_v41 = vsub.s32 4, %v11809_v24 }
 0x3c4   : > { %v11988_v0 = vmul.u32.u64.low %v11947_v2, %v3348_v34  ;;  %v11989_v42 = vmul.u32.u64.high %v11947_v2, %v3348_v34, %v11988_v0  ;;  %v16293_v57 = vand.u32 2147483647, %v11368_v27  ;;  %v12007_v60 = vsub.s32 %v3261_v35, %v3264_v49 }
 0x3c5   : > { %v3184_v25 = vsel %vm3099_vm6, %v16292_v41, %v11809_v24  ;;  %v12010_v62 = vmul.u32.u64.low %v11947_v2, %v3352_v45  ;;  %v12011_v10 = vmul.u32.u64.high %v11947_v2, %v3352_v45, %v12010_v62  ;;  %v3077_v3 = vxor.u32 2147483648, %v3076_v5 }
 0x3c6   : > { %vm12003_vm2 = vcmp.le.f32.partialorder %v16293_v57, 0.7853982  ;;  %v3344_v58 = vsel %vm3338_vm8, %v3341_v28, %v3343_v36  ;;  %v8256_v19 = vadd.s32 4294967169, %v11951_v54  ;;  %8886 = vcosq.f32 %v11890_v61 }
 0x3c7   : > { %v3182_v24 = vsel %vm3099_vm6, %v3181_v14, %v11930_v15  ;;  %v3267_v35 = vsub.s32 0, %v12007_v60  ;;  %v16296_v11 = vand.u32 2147483647, %v11882_v20  ;;  %v3186_v31 = vsel %vm11974_vm3, 0, %v3184_v25 }
 0x3c8   : > { %v3363_v4 = vadd.s32 1, %v11989_v42  ;;  %v3523_v28 = vadd.s32 1, %v8256_v19  ;;  %v3412_v54 = vand.u32 2139095040, %v11994_v44  ;;  %v3360_v34 = vmul.u32 %v11947_v2, %v3344_v58 }
 0x3c9   : > { %v3520_v49 = vand.u32 8388607, %v16296_v11  ;;  %v8245_v36 = vmin.u32 %v3267_v35, %v12007_v60  ;;  %vm3362_vm13 = vc.u32 %v12011_v10, %v11988_v0  ;;  %v15986_v15 = vand.u32 2147483647, %v11994_v44  ;;  %v12064_v11 = vpop.eup %8884 }
 0x3ca   : > { %v3185_v14 = vsel %vm11974_vm3, %v11608_v52, %v3182_v24  ;;  %v3078_v26 = vsel %vm2995_vm9, %v3077_v3, %v3076_v5  ;;  %v3364_v45 = vsel %vm3362_vm13, %v3363_v4, %v11989_v42  ;;  %vm3524_vm5 = vcmp.gt.s32.totalorder %v3523_v28, 0 }
 0x3cb   : > { %v3269_v59 = vclz %v8245_v36  ;;  %v3365_v41 = vadd.s32 %v3364_v45, %v3360_v34  ;;  %v3521_v25 = vor.u32 8388608, %v3520_v49  ;;  %v3525_v57 = vsel %vm3524_vm5, %v3523_v28, 0 }
 0x3cc   : > { %8888 = vsinq.f32 %v11890_v61  ;;  %v16297_v2 = vsel %vm11822_vm12, 0, %v11860_v51  ;;  %v3527_v50 = vand.u32 31, %v3525_v57  ;;  %v3413_v58 = vshrl.u32 %v3412_v54, 23 }
 0x3cd   : > { %v12045_v62 = vadd.s32 3, %v16297_v2  ;;  %8890 = vcosq.f32 %v3185_v14  ;;  %v12047_v19 = vadd.s32 3, %v3186_v31  ;;  %v8246_v5 = vadd.s32 4294967294, %v3269_v59 }
 0x3ce   : > { %v3366_v42 = vadd.s32 536870912, %v3365_v41  ;;  %8892 = vsinq.f32 %v3185_v14  ;;  %v12052_v3 = vsel %vm12003_vm2, %v11368_v27, %v3078_v26  ;;  %v3257_v6 = vadd.s32 %v11940_v1, %v11934_v21 }
 0x3cf   : > { %16298 = vst [vmem:[#allocation14_spill] sm:$0xff] %v12045_v62  ;;  %16299 = vst [vmem:[#allocation12_spill] sm:$0xff] %v12047_v19  ;;  %v3528_v61 = vsub.s32 32, %v3527_v50  ;;  %vm8247_vm12 = vcmp.lt.s32.totalorder %v8246_v5, 0  ;;  %v12058_v24 = vshll.u32 %v3521_v25, 8  ;;  %v8252_v28 = vadd.s32 4294967169, %v3413_v58 }
 0x3d0   : > { %v12056_v51 = vshrl.u32 %v3366_v42, 30  ;;  %v12062_v35 = vand.u32 8388607, %v15986_v15  ;;  %v3272_v49 = vsel %vm8247_vm12, 0, %v8246_v5  ;;  %v12068_v54 = vpop.eup %8886  ;;  %v3526_v36 = vshrl.u32 %v3525_v57, 5 }
 0x3d1   : > { %v3531_v31 = vshrl.u32 %v16167_v56, %v3528_v61  ;;  %v3534_v4 = vshrl.u32 %v16168_v30, %v3528_v61  ;;  %16300 = vst [vmem:[#allocation39_spill] sm:$0xff] %v12068_v54  ;;  %v3277_v21 = vsub.s32 4294967266, %v3272_v49  ;;  %v3530_v34 = vshll.u32 %v16166_v40, %v3527_v50 }
 0x3d2   : > { %v3368_v1 = vshll.u32 %v12056_v51, 30  ;;  %v3533_v14 = vshll.u32 %v16167_v56, %v3527_v50  ;;  %v3536_v26 = vshll.u32 %v16168_v30, %v3527_v50  ;;  %v3537_v45 = vshrl.u32 %v16159_v7, %v3528_v61 }
 0x3d3   : > { %v3539_v59 = vshll.u32 %v16159_v7, %v3527_v50  ;;  %v3278_v25 = vadd.s32 127, %v3277_v21  ;;  %v3540_v58 = vshrl.u32 %v16165_v39, %v3528_v61  ;;  %v3542_v5 = vshll.u32 %v16165_v39, %v3527_v50 }
 0x3d4   : > { %v12076_v2 = vsub.s32 %v3365_v41, %v3368_v1  ;;  %v3273_v42 = vsub.s32 32, %v3272_v49  ;;  %v3532_v15 = vor.u32 %v3531_v31, %v3530_v34  ;;  %v3535_v57 = vor.u32 %v3534_v4, %v3533_v14 }
 0x3d5   : > { %v3543_v52 = vshrl.u32 %v16156_v16, %v3528_v61  ;;  %v3538_v54 = vor.u32 %v3537_v45, %v3536_v26  ;;  %v3417_v62 = vor.u32 8388608, %v12062_v35  ;;  %v12085_v48 = vadd.f32 %v16301_v18, %v11659_v38 }
 0x3d6   : > { %v3371_v19 = vsub.s32 0, %v12076_v2  ;;  %v12087_v41 = vpop.eup %8888  ;;  %v3529_v21 = vshrl.u32 %v16166_v40, %v3528_v61  ;;  %v3541_v1 = vor.u32 %v3540_v58, %v3539_v59  ;;  %v3419_v46 = vadd.s32 1, %v8252_v28 }
 0x3d7   : > { %16302 = vst [vmem:[#allocation33_spill] sm:$0xff] %v12087_v41  ;;  %v3544_v50 = vor.u32 %v3543_v52, %v3542_v5  ;;  %v12090_v31 = vpop.eup %8890  ;;  %v3274_v4 = vshll.u32 %v12007_v60, %v3272_v49  ;;  %v3279_v34 = vshll.u32 %v3278_v25, 23  ;;  %vm3545_vm6 = vcmp.lt.s32.totalorder %v3526_v36, 1 }
 0x3d8   : > { %16303 = vst [vmem:[#allocation22_spill] sm:$0xff] %v12090_v31  ;;  %v8249_v14 = vmin.u32 %v3371_v19, %v12076_v2  ;;  %v12094_v35 = vpop.eup %8892  ;;  %v3275_v26 = vshrl.u32 %v3257_v6, %v3273_v42  ;;  %vm3546_vm11 = vcmp.lt.s32.totalorder %v3526_v36, 2  ;;  %vm3548_vm3 = vcmp.lt.s32.totalorder %v3526_v36, 4 }
 0x3d9   : > { %16304 = vst [vmem:[#allocation7_spill] sm:$0xff] %v12094_v35  ;;  %v3553_v18 = vsel %vm3545_vm6, %v3532_v15, %v3535_v57  ;;  %vm3547_vm15 = vcmp.lt.s32.totalorder %v3526_v36, 3  ;;  %v3550_v61 = vsel %vm3548_vm3, %v3538_v54, 2102212464  ;;  %v3554_v52 = vsel %vm3548_vm3, %v3541_v1, 920167782 }
 0x3da   : > { %v3373_v38 = vclz %v8249_v14  ;;  %v3555_v28 = vsel %vm3547_vm15, %v3538_v54, %v3554_v52  ;;  %v3557_v45 = vsel %vm3545_vm6, %v3535_v57, %v3538_v54  ;;  %v3558_v59 = vsel %vm3548_vm3, %v3544_v50, 1326507024 }
 0x3db   : > { %vm3420_vm8 = vcmp.gt.s32.totalorder %v3419_v46, 0  ;;  %v3280_v60 = vor.u32 4788187, %v3279_v34  ;;  %v3549_v19 = vsel %vm3545_vm6, %v3529_v21, %v3532_v15  ;;  %v3556_v25 = vsel %vm3546_vm11, %v3553_v18, %v3555_v28 }
 0x3dc   : > { %v8250_v49 = vadd.s32 4294967294, %v3373_v38  ;;  %v3551_v6 = vsel %vm3547_vm15, %v3535_v57, %v3550_v61  ;;  %v3559_v58 = vsel %vm3547_vm15, %v3541_v1, %v3558_v59  ;;  %v3276_v14 = vor.u32 %v3275_v26, %v3274_v4 }
 0x3dd   : > { %v12101_v5 = vmul.u32.u64.low %v12058_v24, %v3556_v25  ;;  %v12102_v42 = vmul.u32.u64.high %v12058_v24, %v3556_v25, %v12101_v5  ;;  %v3560_v52 = vsel %vm3546_vm11, %v3557_v45, %v3559_v58  ;;  %v3421_v54 = vsel %vm3420_vm8, %v3419_v46, 0 }
 0x3de   : > { %vm8251_vm0 = vcmp.lt.s32.totalorder %v8250_v49, 0  ;;  %v3361_v50 = vadd.s32 %v11988_v0, %v12011_v10  ;;  %v12109_v15 = vmul.u32.u64.low %v12058_v24, %v3560_v52  ;;  %v12110_v21 = vmul.u32.u64.high %v12058_v24, %v3560_v52, %v12109_v15 }
 0x3df   : > { %v3376_v34 = vsel %vm8251_vm0, 0, %v8250_v49  ;;  %v3281_v57 = vand.u32 2147483647, %v3280_v60  ;;  %v3552_v38 = vsel %vm3546_vm11, %v3549_v19, %v3551_v6  ;;  %8894 = vcosq.f32 %v12052_v3 }
 0x3e0   : > { %v3377_v1 = vsub.s32 32, %v3376_v34  ;;  %v3381_v18 = vsub.s32 4294967266, %v3376_v34  ;;  %v3571_v4 = vadd.s32 1, %v12102_v42  ;;  %v3423_v26 = vand.u32 31, %v3421_v54 }
 0x3e1   : > { %v12115_v61 = vshll.u32 %v3417_v62, 8  ;;  %v3283_v46 = vcvt.s32.f32 %v3276_v14  ;;  %v15993_v10 = vand.u32 2147483647, %v12085_v48  ;;  %v3391_v45 = vsub.s32 4, %v12056_v51 }
 0x3e2   : > { %v3379_v28 = vshrl.u32 %v3361_v50, %v3377_v1  ;;  %v3382_v0 = vadd.s32 127, %v3381_v18  ;;  %v3568_v59 = vmul.u32 %v12058_v24, %v3552_v38  ;;  %vm3570_vm13 = vc.u32 %v12110_v21, %v12101_v5 }
 0x3e3   : > { %v3424_v36 = vsub.s32 32, %v3423_v26  ;;  %v3284_v60 = vmul.f32 %v3283_v46, %v3281_v57  ;;  %v3378_v49 = vshll.u32 %v12076_v2, %v3376_v34  ;;  %v3572_v62 = vsel %vm3570_vm13, %v3571_v4, %v12102_v42 }
 0x3e4   : > { %v3383_v19 = vshll.u32 %v3382_v0, 23  ;;  %vm16011_vm5 = vcmp.lt.s32.totalorder %v11801_v9, 0  ;;  %vm3307_vm12 = vcmp.lt.s32.totalorder %v11674_v47, 0  ;;  %v3573_v25 = vadd.s32 %v3572_v62, %v3568_v59 }
 0x3e5   : > { %v12126_v6 = vshrl.u32 %v3421_v54, 5  ;;  %v3426_v58 = vshll.u32 %v16166_v40, %v3423_v26  ;;  %v3427_v24 = vshrl.u32 %v16167_v56, %v3424_v36  ;;  %v3380_v14 = vor.u32 %v3379_v28, %v3378_v49 }
 0x3e6   : > { %v3384_v52 = vor.u32 4788187, %v3383_v19  ;;  %v3429_v50 = vshll.u32 %v16167_v56, %v3423_v26  ;;  %v3430_v2 = vshrl.u32 %v16168_v30, %v3424_v36  ;;  %v3574_v34 = vadd.s32 536870912, %v3573_v25 }
 0x3e7   : > { %v3428_v15 = vor.u32 %v3427_v24, %v3426_v58  ;;  %v3432_v42 = vshll.u32 %v16168_v30, %v3423_v26  ;;  %v3433_v57 = vshrl.u32 %v16159_v7, %v3424_v36  ;;  %v16305_v1 = vand.u32 2147483647, %v11674_v47 }
 0x3e8   : > { %v3385_v18 = vand.u32 2147483647, %v3384_v52  ;;  %v3431_v38 = vor.u32 %v3430_v2, %v3429_v50  ;;  %v3435_v4 = vshll.u32 %v16159_v7, %v3423_v26  ;;  %v3436_v46 = vshrl.u32 %v16165_v39, %v3424_v36 }
 0x3e9   : > { %vm12136_vm6 = vcmp.le.f32.partialorder %v16305_v1, 0.7853982  ;;  %v16308_v28 = vand.u32 2147483647, %v11801_v9  ;;  %v16309_v0 = vmov 0  ;;  %v3575_v59 = vshrl.u32 %v3574_v34, 30  ;;  %v12152_v52 = vpop.eup %8894 }
 0x3ea   : > { %v3434_v49 = vor.u32 %v3433_v57, %v3432_v42  ;;  %v3438_v19 = vshll.u32 %v16165_v39, %v3423_v26  ;;  %v3439_v62 = vshrl.u32 %v16156_v16, %v3424_v36  ;;  %v3285_v58 = vxor.u32 2147483648, %v3284_v60 }
 0x3eb   : > { %vm12144_vm11 = vcmp.le.f32.partialorder %v16308_v28, 0.7853982  ;;  %v3437_v24 = vor.u32 %v3436_v46, %v3435_v4  ;;  %vm3441_vm3 = vcmp.lt.s32.totalorder %v12126_v6, 1  ;;  %vm3442_vm15 = vcmp.lt.s32.totalorder %v12126_v6, 2 }
 0x3ec   : > { %v16310_v0 = vsel %vm12144_vm11, 4294967295, %v16309_v0  ;;  %v3387_v50 = vcvt.s32.f32 %v3380_v14  ;;  %vm3515_vm8 = vcmp.lt.s32.totalorder %v11882_v20, 0  ;;  %v3576_v2 = vshll.u32 %v3575_v59, 30 }
 0x3ed   : > { %16311 = vst [vmem:[#allocation17_spill] sm:$0xff] %v16310_v0  ;;  %v3440_v1 = vor.u32 %v3439_v62, %v3438_v19  ;;  %vm3444_vm0 = vcmp.lt.s32.totalorder %v12126_v6, 4  ;;  %v3425_v34 = vshrl.u32 %v16166_v40, %v3424_v36  ;;  %vm3443_vm13 = vcmp.lt.s32.totalorder %v12126_v6, 3 }
 0x3ee   : > { %v3449_v26 = vsel %vm3441_vm3, %v3428_v15, %v3431_v38  ;;  %v3450_v42 = vsel %vm3444_vm0, %v3437_v24, 920167782  ;;  %v3388_v57 = vmul.f32 %v3387_v50, %v3385_v18  ;;  %v12162_v4 = vsub.s32 %v3573_v25, %v3576_v2 }
 0x3ef   : > { %v3446_v14 = vsel %vm3444_vm0, %v3434_v49, 2102212464  ;;  %v3451_v46 = vsel %vm3443_vm13, %v3434_v49, %v3450_v42  ;;  %v3286_v36 = vsel %vm16011_vm5, %v3285_v58, %v3284_v60  ;;  %v3392_v28 = vsel %vm3307_vm12, %v3391_v45, %v12056_v51 }
 0x3f0   : > { %v16312_v19 = vand.u32 2147483647, %v11882_v20  ;;  %v3452_v25 = vsel %vm3442_vm15, %v3449_v26, %v3451_v46  ;;  %v3453_v18 = vsel %vm3441_vm3, %v3431_v38, %v3434_v49  ;;  %v3579_v50 = vsub.s32 0, %v12162_v4 }
 0x3f1   : > { %v3599_v2 = vsub.s32 4, %v3575_v59  ;;  %v3445_v60 = vsel %vm3441_vm3, %v3425_v34, %v3428_v15  ;;  %v3454_v51 = vsel %vm3444_vm0, %v3440_v1, 1326507024  ;;  %v3447_v45 = vsel %vm3443_vm13, %v3431_v38, %v3446_v14  ;;  %v12202_v34 = vpop.permute.xlu1 %2279 }
 0x3f2   : > { %vm12175_vm7 = vcmp.le.f32.partialorder %v16312_v19, 0.7853982  ;;  %v3455_v58 = vsel %vm3443_vm13, %v3437_v24, %v3454_v51  ;;  %v12193_v26 = vmul.u32.u64.low %v12115_v61, %v3452_v25  ;;  %v12194_v42 = vmul.u32.u64.high %v12115_v61, %v3452_v25, %v12193_v26 }
 0x3f3   : > { %v3389_v49 = vxor.u32 2147483648, %v3388_v57  ;;  %v3394_v46 = vsel %vm12136_vm6, 0, %v3392_v28  ;;  %v8257_v15 = vmin.u32 %v3579_v50, %v12162_v4  ;;  %v3456_v1 = vsel %vm3442_vm15, %v3453_v18, %v3455_v58 }
 0x3f4   : > { %v3289_v38 = vsel %vm12144_vm11, %v11801_v9, %v3286_v36  ;;  %v12208_v24 = vmul.u32.u64.low %v12115_v61, %v3456_v1  ;;  %v12209_v14 = vmul.u32.u64.high %v12115_v61, %v3456_v1, %v12208_v24  ;;  %v3620_v19 = vand.u32 2139095040, %v12085_v48 }
 0x3f5   : > { %8896 = vsinq.f32 %v12052_v3  ;;  %v3581_v28 = vclz %v8257_v15  ;;  %v3448_v25 = vsel %vm3442_vm15, %v3445_v60, %v3447_v45  ;;  %v12217_v18 = vadd.f32 %v11680_v32, %v12202_v34 }
 0x3f6   : > { %v12219_v50 = vadd.s32 3, %v3394_v46  ;;  %v3600_v36 = vsel %vm3515_vm8, %v3599_v2, %v3575_v59  ;;  %v3467_v51 = vadd.s32 1, %v12194_v42  ;;  %v3621_v58 = vshrl.u32 %v3620_v19, 23 }
 0x3f7   : > { %8898 = vcosq.f32 %v3289_v38  ;;  %v3390_v3 = vsel %vm3307_vm12, %v3389_v49, %v3388_v57  ;;  %v8258_v15 = vadd.s32 4294967294, %v3581_v28  ;;  %v3624_v6 = vand.u32 8388607, %v15993_v10 }
 0x3f8   : > { %16315 = vst [vmem:[#allocation21_spill] sm:$0xff] %v12219_v50  ;;  %v3464_v60 = vmul.u32 %v12115_v61, %v3448_v25  ;;  %vm3466_vm3 = vc.u32 %v12209_v14, %v12193_v26  ;;  %v8260_v32 = vadd.s32 4294967169, %v3621_v58  ;;  %v3724_v45 = vand.u32 2139095040, %v12217_v18 }
 0x3f9   : > { %v3569_v59 = vadd.s32 %v12101_v5, %v12110_v21  ;;  %vm8259_vm15 = vcmp.lt.s32.totalorder %v8258_v15, 0  ;;  %v3602_v2 = vsel %vm12175_vm7, 0, %v3600_v36  ;;  %v3468_v57 = vsel %vm3466_vm3, %v3467_v51, %v12194_v42 }
 0x3fa   : > { %v12240_v49 = vsel %vm12136_vm6, %v11674_v47, %v3390_v3  ;;  %v3584_v61 = vsel %vm8259_vm15, 0, %v8258_v15  ;;  %v3469_v46 = vadd.s32 %v3468_v57, %v3464_v60  ;;  %v3627_v1 = vadd.s32 1, %v8260_v32 }
 0x3fb   : > { %v3585_v24 = vsub.s32 32, %v3584_v61  ;;  %v3589_v19 = vsub.s32 4294967266, %v3584_v61  ;;  %v3625_v28 = vor.u32 8388608, %v3624_v6  ;;  %v3725_v25 = vshrl.u32 %v3724_v45, 23 }
 0x3fc   : > { %8900 = vsinq.f32 %v3289_v38  ;;  %v12242_v5 = vadd.s32 3, %v3602_v2  ;;  %v3470_v21 = vadd.s32 536870912, %v3469_v46  ;;  %vm3628_vm12 = vcmp.gt.s32.totalorder %v3627_v1, 0 }
 0x3fd   : > { %8902 = vcosq.f32 %v12240_v49  ;;  %v3587_v42 = vshrl.u32 %v3569_v59, %v3585_v24  ;;  %v3590_v36 = vadd.s32 127, %v3589_v19  ;;  %v3629_v51 = vsel %vm3628_vm12, %v3627_v1, 0 }
 0x3fe   : > { %16316 = vst [vmem:[#allocation27_spill] sm:$0xff] %v12242_v5  ;;  %v3586_v54 = vshll.u32 %v12162_v4, %v3584_v61  ;;  %v12246_v58 = vshrl.u32 %v3470_v21, 30  ;;  %v3631_v3 = vand.u32 31, %v3629_v51  ;;  %v12250_v15 = vadd.f32 %v11732_v22, %v12202_v34 }
 0x3ff   : > { %v12252_v6 = vpop.eup %8896  ;;  %v3591_v38 = vshll.u32 %v3590_v36, 23  ;;  %v12254_v60 = vshll.u32 %v3625_v28, 8  ;;  %v8264_v45 = vadd.s32 4294967169, %v3725_v25  ;;  %v3630_v57 = vshrl.u32 %v3629_v51, 5 }
 0x400   : > { %16317 = vst [vmem:[#allocation42_spill] sm:$0xff] %v12246_v58  ;;  %v3588_v59 = vor.u32 %v3587_v42, %v3586_v54  ;;  %v3472_v2 = vshll.u32 %v12246_v58, 30  ;;  %v3632_v4 = vsub.s32 32, %v3631_v3  ;;  %v3634_v24 = vshll.u32 %v16166_v40, %v3631_v3 }
 0x401   : > { %v12258_v61 = vpop.eup %8898  ;;  %v3592_v1 = vor.u32 4788187, %v3591_v38  ;;  %v3637_v22 = vshll.u32 %v16167_v56, %v3631_v3  ;;  %v3640_v19 = vshll.u32 %v16168_v30, %v3631_v3  ;;  %v3643_v42 = vshll.u32 %v16159_v7, %v3631_v3 }
 0x402   : > { %16318 = vst [vmem:[#allocation34_spill] sm:$0xff] %v12258_v61  ;;  %v12263_v21 = vsub.s32 %v3469_v46, %v3472_v2  ;;  %v3635_v28 = vshrl.u32 %v16167_v56, %v3632_v4  ;;  %v3638_v25 = vshrl.u32 %v16168_v30, %v3632_v4  ;;  %v3641_v51 = vshrl.u32 %v16159_v7, %v3632_v4 }
 0x403   : > { %v3593_v36 = vand.u32 2147483647, %v3592_v1  ;;  %v3644_v54 = vshrl.u32 %v16165_v39, %v3632_v4  ;;  %v3646_v38 = vshll.u32 %v16165_v39, %v3631_v3  ;;  %v3647_v46 = vshrl.u32 %v16156_v16, %v3632_v4 }
 0x404   : > { %v3475_v10 = vsub.s32 0, %v12263_v21  ;;  %v3636_v32 = vor.u32 %v3635_v28, %v3634_v24  ;;  %v3639_v5 = vor.u32 %v3638_v25, %v3637_v22  ;;  %v3595_v2 = vcvt.s32.f32 %v3588_v59 }
 0x405   : > { %v3642_v47 = vor.u32 %v3641_v51, %v3640_v19  ;;  %v3645_v50 = vor.u32 %v3644_v54, %v3643_v42  ;;  %v16319_v58 = vand.u32 2147483647, %v12217_v18  ;;  %v3648_v41 = vor.u32 %v3647_v46, %v3646_v38 }
 0x406   : > { %v12275_v35 = vpop.eup %8900  ;;  %v8253_v1 = vmin.u32 %v3475_v10, %v12263_v21  ;;  %vm3649_vm6 = vcmp.lt.s32.totalorder %v3630_v57, 1  ;;  %v3731_v61 = vadd.s32 1, %v8264_v45  ;;  %v3596_v0 = vmul.f32 %v3595_v2, %v3593_v36 }
 0x407   : > { %v3728_v31 = vand.u32 8388607, %v16319_v58  ;;  %v12278_v3 = vpop.eup %8902  ;;  %v3633_v24 = vshrl.u32 %v16166_v40, %v3632_v4  ;;  %vm3652_vm0 = vcmp.lt.s32.totalorder %v3630_v57, 4  ;;  %v3657_v59 = vsel %vm3649_vm6, %v3636_v32, %v3639_v5 }
 0x408   : > { %16320 = vst [vmem:[#allocation35_spill] sm:$0xff] %v12278_v3  ;;  %v3477_v22 = vclz %v8253_v1  ;;  %vm3651_vm13 = vcmp.lt.s32.totalorder %v3630_v57, 3  ;;  %v3654_v19 = vsel %vm3652_vm0, %v3642_v47, 2102212464  ;;  %v3658_v28 = vsel %vm3652_vm0, %v3645_v50, 920167782 }
 0x409   : > { %vm3650_vm3 = vcmp.lt.s32.totalorder %v3630_v57, 2  ;;  %v3659_v58 = vsel %vm3651_vm13, %v3642_v47, %v3658_v28  ;;  %v3661_v25 = vsel %vm3649_vm6, %v3639_v5, %v3642_v47  ;;  %v3662_v10 = vsel %vm3652_vm0, %v3648_v41, 1326507024 }
 0x40a   : > { %v3465_v45 = vadd.s32 %v12193_v26, %v12209_v14  ;;  %v8254_v42 = vadd.s32 4294967294, %v3477_v22  ;;  %v3653_v36 = vsel %vm3649_vm6, %v3633_v24, %v3636_v32  ;;  %v3660_v4 = vsel %vm3650_vm3, %v3657_v59, %v3659_v58 }
 0x40b   : > { %v3655_v51 = vsel %vm3651_vm13, %v3639_v5, %v3654_v19  ;;  %v3663_v54 = vsel %vm3651_vm13, %v3645_v50, %v3662_v10  ;;  %v12288_v38 = vmul.u32.u64.low %v12254_v60, %v3660_v4  ;;  %v12289_v46 = vmul.u32.u64.high %v12254_v60, %v3660_v4, %v12288_v38 }
 0x40c   : > { %v3597_v2 = vxor.u32 2147483648, %v3596_v0  ;;  %vm8255_vm15 = vcmp.lt.s32.totalorder %v8254_v42, 0  ;;  %v3664_v47 = vsel %vm3650_vm3, %v3661_v25, %v3663_v54  ;;  %v3729_v41 = vor.u32 8388608, %v3728_v31 }
 0x40d   : > { %v3480_v1 = vsel %vm8255_vm15, 0, %v8254_v42  ;;  %v12294_v26 = vmul.u32.u64.low %v12254_v60, %v3664_v47  ;;  %v12295_v14 = vmul.u32.u64.high %v12254_v60, %v3664_v47, %v12294_v26  ;;  %vm3732_vm12 = vcmp.gt.s32.totalorder %v3731_v61, 0 }
 0x40e   : > { %v3481_v32 = vsub.s32 32, %v3480_v1  ;;  %v3485_v24 = vsub.s32 4294967266, %v3480_v1  ;;  %v3656_v50 = vsel %vm3650_vm3, %v3653_v36, %v3655_v51  ;;  %v3733_v5 = vsel %vm3732_vm12, %v3731_v61, 0 }
 0x40f   : > { %v3675_v59 = vadd.s32 1, %v12289_v46  ;;  %v3735_v22 = vand.u32 31, %v3733_v5  ;;  %v12302_v28 = vadd.f32 %v11863_v63, %v12202_v34  ;;  %v3482_v31 = vshll.u32 %v12263_v21, %v3480_v1 }
 0x410   : > { %v3483_v58 = vshrl.u32 %v3465_v45, %v3481_v32  ;;  %v3486_v25 = vadd.s32 127, %v3485_v24  ;;  %v12305_v10 = vshll.u32 %v3729_v41, 8  ;;  %v3598_v57 = vsel %vm3515_vm8, %v3597_v2, %v3596_v0 }
 0x411   : > { %v3672_v61 = vmul.u32 %v12254_v60, %v3656_v50  ;;  %vm3674_vm6 = vc.u32 %v12295_v14, %v12288_v38  ;;  %v3736_v42 = vsub.s32 32, %v3735_v22  ;;  %v3738_v51 = vshll.u32 %v16166_v40, %v3735_v22 }
 0x412   : > { %v3484_v36 = vor.u32 %v3483_v58, %v3482_v31  ;;  %v3487_v4 = vshll.u32 %v3486_v25, 23  ;;  %v3676_v63 = vsel %vm3674_vm6, %v3675_v59, %v12289_v46  ;;  %v3741_v54 = vshll.u32 %v16167_v56, %v3735_v22 }
 0x413   : > { %v3677_v21 = vadd.s32 %v3676_v63, %v3672_v61  ;;  %v3739_v45 = vshrl.u32 %v16167_v56, %v3736_v42  ;;  %v3742_v47 = vshrl.u32 %v16168_v30, %v3736_v42  ;;  %v3734_v2 = vshrl.u32 %v3733_v5, 5 }
 0x414   : > { %v3488_v0 = vor.u32 4788187, %v3487_v4  ;;  %v3744_v60 = vshll.u32 %v16168_v30, %v3735_v22  ;;  %v3745_v41 = vshrl.u32 %v16159_v7, %v3736_v42  ;;  %vm16010_vm8 = vcmp.lt.s32.totalorder %v11994_v44, 0 }
 0x415   : > { %v3491_v1 = vcvt.s32.f32 %v3484_v36  ;;  %v3678_v26 = vadd.s32 536870912, %v3677_v21  ;;  %v3740_v46 = vor.u32 %v3739_v45, %v3738_v51  ;;  %v3743_v32 = vor.u32 %v3742_v47, %v3741_v54 }
 0x416   : > { %v3489_v24 = vand.u32 2147483647, %v3488_v0  ;;  %v3746_v50 = vor.u32 %v3745_v41, %v3744_v60  ;;  %v3747_v59 = vshll.u32 %v16159_v7, %v3735_v22  ;;  %v3748_v31 = vshrl.u32 %v16165_v39, %v3736_v42 }
 0x417   : > { %v12322_v58 = vshrl.u32 %v3678_v26, 30  ;;  %v3750_v5 = vshll.u32 %v16165_v39, %v3735_v22  ;;  %v3751_v25 = vshrl.u32 %v16156_v16, %v3736_v42  ;;  %v3932_v61 = vand.u32 2139095040, %v12250_v15 }
 0x418   : > { %v16322_v4 = vand.u32 2147483647, %v11994_v44  ;;  %v3492_v63 = vmul.f32 %v3491_v1, %v3489_v24  ;;  %v3737_v51 = vshrl.u32 %v16166_v40, %v3736_v42  ;;  %v3749_v45 = vor.u32 %v3748_v31, %v3747_v59 }
 0x419   : > { %16321 = vst [vmem:[#allocation30_spill] sm:$0xff] %v12322_v58  ;;  %vm3753_vm13 = vcmp.lt.s32.totalorder %v3734_v2, 1  ;;  %v3680_v54 = vshll.u32 %v12322_v58, 30  ;;  %v3752_v47 = vor.u32 %v3751_v25, %v3750_v5  ;;  %vm3755_vm3 = vcmp.lt.s32.totalorder %v3734_v2, 3 }
 0x41a   : > { %vm12329_vm0 = vcmp.le.f32.partialorder %v16322_v4, 0.7853982  ;;  %vm3756_vm15 = vcmp.lt.s32.totalorder %v3734_v2, 4  ;;  %v3493_v22 = vxor.u32 2147483648, %v3492_v63  ;;  %v3761_v60 = vsel %vm3753_vm13, %v3740_v46, %v3743_v32 }
 0x41b   : > { %v3758_v0 = vsel %vm3756_vm15, %v3746_v50, 2102212464  ;;  %v3762_v41 = vsel %vm3756_vm15, %v3749_v45, 920167782  ;;  %v12335_v26 = vsub.s32 %v3677_v21, %v3680_v54  ;;  %vm3754_vm12 = vcmp.lt.s32.totalorder %v3734_v2, 2 }
 0x41c   : > { %v3763_v4 = vsel %vm3755_vm3, %v3746_v50, %v3762_v41  ;;  %v3765_v19 = vsel %vm3753_vm13, %v3743_v32, %v3746_v50  ;;  %v3601_v42 = vsel %vm12175_vm7, %v11882_v20, %v3598_v57  ;;  %v3757_v1 = vsel %vm3753_vm13, %v3737_v51, %v3740_v46 }
 0x41d   : > { %v3764_v24 = vsel %vm3754_vm12, %v3761_v60, %v3763_v4  ;;  %v3766_v59 = vsel %vm3756_vm15, %v3752_v47, 1326507024  ;;  %v3683_v31 = vsub.s32 0, %v12335_v26  ;;  %v3759_v5 = vsel %vm3755_vm3, %v3743_v32, %v3758_v0 }
 0x41e   : > { %v3767_v25 = vsel %vm3755_vm3, %v3749_v45, %v3766_v59  ;;  %v3933_v21 = vshrl.u32 %v3932_v61, 23  ;;  %v3494_v54 = vsel %vm16010_vm8, %v3493_v22, %v3492_v63  ;;  %v16325_v32 = vand.u32 2147483647, %v12250_v15 }
 0x41f   : > { %v3768_v50 = vsel %vm3754_vm12, %v3765_v19, %v3767_v25  ;;  %v12349_v41 = vmul.u32.u64.low %v12305_v10, %v3764_v24  ;;  %v12350_v62 = vmul.u32.u64.high %v12305_v10, %v3764_v24, %v12349_v41  ;;  %v8261_v57 = vmin.u32 %v3683_v31, %v12335_v26 }
 0x420   : > { %v12355_v46 = vmul.u32.u64.low %v12305_v10, %v3768_v50  ;;  %v12356_v51 = vmul.u32.u64.high %v12305_v10, %v3768_v50, %v12355_v46  ;;  %v3936_v45 = vand.u32 8388607, %v16325_v32  ;;  %8904 = vsinq.f32 %v12240_v49 }
 0x421   : > { %v3760_v61 = vsel %vm3754_vm12, %v3757_v1, %v3759_v5  ;;  %v8272_v63 = vadd.s32 4294967169, %v3933_v21  ;;  %v12364_v19 = vadd.f32 %v11926_v29, %v12202_v34  ;;  %8906 = vcosq.f32 %v3601_v42 }
 0x422   : > { %v3497_v47 = vsel %vm12329_vm0, %v11994_v44, %v3494_v54  ;;  %v3685_v22 = vclz %v8261_v57  ;;  %v3828_v0 = vand.u32 2139095040, %v12302_v28  ;;  %8908 = vsinq.f32 %v3601_v42 }
 0x423   : > { %v3673_v60 = vadd.s32 %v12288_v38, %v12295_v14  ;;  %v3779_v49 = vadd.s32 1, %v12350_v62  ;;  %v3939_v2 = vadd.s32 1, %v8272_v63  ;;  %v3776_v1 = vmul.u32 %v12305_v10, %v3760_v61 }
 0x424   : > { %v8262_v4 = vadd.s32 4294967294, %v3685_v22  ;;  %vm3778_vm7 = vc.u32 %v12356_v51, %v12349_v41  ;;  %v3937_v29 = vor.u32 8388608, %v3936_v45  ;;  %8910 = vcosq.f32 %v3497_v47 }
 0x425   : > { %v3780_v34 = vsel %vm3778_vm7, %v3779_v49, %v12350_v62  ;;  %vm3940_vm6 = vcmp.gt.s32.totalorder %v3939_v2, 0  ;;  %v3829_v24 = vshrl.u32 %v3828_v0, 23  ;;  %8912 = vsinq.f32 %v3497_v47 }
 0x426   : > { %vm8263_vm13 = vcmp.lt.s32.totalorder %v8262_v4, 0  ;;  %v3781_v42 = vadd.s32 %v3780_v34, %v3776_v1  ;;  %v3941_v59 = vsel %vm3940_vm6, %v3939_v2, 0  ;;  %vm3723_vm3 = vcmp.lt.s32.totalorder %v12217_v18, 0 }
 0x427   : > { %v3688_v38 = vsel %vm8263_vm13, 0, %v8262_v4  ;;  %v3943_v14 = vand.u32 31, %v3941_v59  ;;  %v12380_v54 = vshll.u32 %v3937_v29, 8  ;;  %v12383_v62 = vshrl.u32 %v3941_v59, 5 }
 0x428   : > { %v3689_v5 = vsub.s32 32, %v3688_v38  ;;  %v3693_v25 = vsub.s32 4294967266, %v3688_v38  ;;  %v3782_v21 = vadd.s32 536870912, %v3781_v42  ;;  %v3690_v50 = vshll.u32 %v12335_v26, %v3688_v38 }
 0x429   : > { %v3944_v57 = vsub.s32 32, %v3943_v14  ;;  %v8268_v46 = vadd.s32 4294967169, %v3829_v24  ;;  %v3946_v63 = vshll.u32 %v16166_v40, %v3943_v14  ;;  %v3952_v49 = vshll.u32 %v16168_v30, %v3943_v14 }
 0x42a   : > { %v3691_v32 = vshrl.u32 %v3673_v60, %v3689_v5  ;;  %v3694_v45 = vadd.s32 127, %v3693_v25  ;;  %v3783_v61 = vshrl.u32 %v3782_v21, 30  ;;  %v12386_v47 = vpop.eup %8904  ;;  %v16329_v24 = vand.u32 2147483647, %v12217_v18 }
 0x42b   : > { %16326 = vst [vmem:[#allocation10_spill] sm:$0xff] %v12386_v47  ;;  %v3947_v22 = vshrl.u32 %v16167_v56, %v3944_v57  ;;  %v3950_v0 = vshrl.u32 %v16168_v30, %v3944_v57  ;;  %v3953_v2 = vshrl.u32 %v16159_v7, %v3944_v57  ;;  %v12392_v26 = vpop.eup %8906  ;;  %v3945_v38 = vshrl.u32 %v16166_v40, %v3944_v57 }
 0x42c   : > { %16327 = vst [vmem:[#allocation44_spill] sm:$0xff] %v12392_v26  ;;  %v3692_v4 = vor.u32 %v3691_v32, %v3690_v50  ;;  %v3695_v1 = vshll.u32 %v3694_v45, 23  ;;  %v3784_v29 = vshll.u32 %v3783_v61, 30  ;;  %v3807_v60 = vsub.s32 4, %v3783_v61  ;;  %v12394_v34 = vpop.eup %8908 }
 0x42d   : > { %16328 = vst [vmem:[#allocation43_spill] sm:$0xff] %v12394_v34  ;;  %vm12398_vm15 = vcmp.le.f32.partialorder %v16329_v24, 0.7853982  ;;  %v3949_v5 = vshll.u32 %v16167_v56, %v3943_v14  ;;  %v3955_v25 = vshll.u32 %v16159_v7, %v3943_v14  ;;  %v3956_v21 = vshrl.u32 %v16165_v39, %v3944_v57 }
 0x42e   : > { %v3696_v50 = vor.u32 4788187, %v3695_v1  ;;  %v12406_v32 = vsub.s32 %v3781_v42, %v3784_v29  ;;  %v3948_v45 = vor.u32 %v3947_v22, %v3946_v63  ;;  %v3954_v10 = vor.u32 %v3953_v2, %v3952_v49  ;;  %v12408_v31 = vpop.eup %8910 }
 0x42f   : > { %vm16013_vm12 = vcmp.lt.s32.totalorder %v12085_v48, 0  ;;  %v3951_v24 = vor.u32 %v3950_v0, %v3949_v5  ;;  %v3957_v20 = vor.u32 %v3956_v21, %v3955_v25  ;;  %v3958_v26 = vshll.u32 %v16165_v39, %v3943_v14  ;;  %v12413_v3 = vpop.eup %8912 }
 0x430   : > { %v3959_v34 = vshrl.u32 %v16156_v16, %v3944_v57  ;;  %v3697_v47 = vand.u32 2147483647, %v3696_v50  ;;  %v3699_v58 = vcvt.s32.f32 %v3692_v4  ;;  %v3787_v1 = vsub.s32 0, %v12406_v32 }
 0x431   : > { %v3808_v42 = vsel %vm3723_vm3, %v3807_v60, %v3783_v61  ;;  %vm3961_vm7 = vcmp.lt.s32.totalorder %v12383_v62, 1  ;;  %vm3962_vm6 = vcmp.lt.s32.totalorder %v12383_v62, 2  ;;  %vm3964_vm13 = vcmp.lt.s32.totalorder %v12383_v62, 4 }
 0x432   : > { %v3960_v63 = vor.u32 %v3959_v34, %v3958_v26  ;;  %v16332_v14 = vand.u32 2147483647, %v12085_v48  ;;  %v16333_v57 = vmov 0  ;;  %v3700_v22 = vmul.f32 %v3699_v58, %v3697_v47 }
 0x433   : > { %v8265_v0 = vmin.u32 %v3787_v1, %v12406_v32  ;;  %vm3963_vm5 = vcmp.lt.s32.totalorder %v12383_v62, 3  ;;  %v3966_v49 = vsel %vm3964_vm13, %v3954_v10, 2102212464  ;;  %v3965_v61 = vsel %vm3961_vm7, %v3945_v38, %v3948_v45 }
 0x434   : > { %vm12423_vm8 = vcmp.le.f32.partialorder %v16332_v14, 0.7853982  ;;  %v3967_v2 = vsel %vm3963_vm5, %v3951_v24, %v3966_v49  ;;  %v3969_v26 = vsel %vm3961_vm7, %v3948_v45, %v3951_v24  ;;  %v3970_v4 = vsel %vm3964_vm13, %v3957_v20, 920167782 }
 0x435   : > { %v16334_v57 = vsel %vm12423_vm8, 4294967295, %v16333_v57  ;;  %v3701_v29 = vxor.u32 2147483648, %v3700_v22  ;;  %v3789_v60 = vclz %v8265_v0  ;;  %v3971_v34 = vsel %vm3963_vm5, %v3954_v10, %v3970_v4 }
 0x436   : > { %16335 = vst [vmem:[#allocation9_spill] sm:$0xff] %v16334_v57  ;;  %v3973_v5 = vsel %vm3961_vm7, %v3951_v24, %v3954_v10  ;;  %v3972_v58 = vsel %vm3962_vm6, %v3969_v26, %v3971_v34  ;;  %v3974_v47 = vsel %vm3964_vm13, %v3960_v63, 1326507024  ;;  %v16336_v25 = vand.u32 2147483647, %v12302_v28 }
 0x437   : > { %v3835_v38 = vadd.s32 1, %v8268_v46  ;;  %v3777_v50 = vadd.s32 %v12349_v41, %v12356_v51  ;;  %v8266_v45 = vadd.s32 4294967294, %v3789_v60  ;;  %v3810_v1 = vsel %vm12398_vm15, 0, %v3808_v42 }
 0x438   : > { %v12437_v21 = vand.u32 8388607, %v16336_v25  ;;  %v3975_v14 = vsel %vm3963_vm5, %v3957_v20, %v3974_v47  ;;  %v3968_v10 = vsel %vm3962_vm6, %v3965_v61, %v3967_v2  ;;  %v3702_v41 = vsel %vm16013_vm12, %v3701_v29, %v3700_v22 }
 0x439   : > { %v3976_v24 = vsel %vm3962_vm6, %v3973_v5, %v3975_v14  ;;  %v12450_v63 = vmul.u32.u64.low %v12380_v54, %v3972_v58  ;;  %v12451_v0 = vmul.u32.u64.high %v12380_v54, %v3972_v58, %v12450_v63  ;;  %vm8267_vm7 = vcmp.lt.s32.totalorder %v8266_v45, 0 }
 0x43a   : > { %v12457_v51 = vmul.u32.u64.low %v12380_v54, %v3976_v24  ;;  %v12458_v46 = vmul.u32.u64.high %v12380_v54, %v3976_v24, %v12457_v51  ;;  %v3792_v20 = vsel %vm8267_vm7, 0, %v8266_v45  ;;  %v12460_v42 = vadd.s32 3, %v3810_v1 }
 0x43b   : > { %vm3836_vm5 = vcmp.gt.s32.totalorder %v3835_v38, 0  ;;  %v3793_v62 = vsub.s32 32, %v3792_v20  ;;  %v3797_v61 = vsub.s32 4294967266, %v3792_v20  ;;  %v3984_v2 = vmul.u32 %v12380_v54, %v3968_v10 }
 0x43c   : > { %16337 = vst [vmem:[#allocation29_spill] sm:$0xff] %v12460_v42  ;;  %v3837_v26 = vsel %vm3836_vm5, %v3835_v38, 0  ;;  %v3705_v22 = vsel %vm12423_vm8, %v12085_v48, %v3702_v41  ;;  %v3987_v4 = vadd.s32 1, %v12451_v0  ;;  %v4036_v60 = vand.u32 2139095040, %v12364_v19 }
 0x43d   : > { %v3839_v29 = vand.u32 31, %v3837_v26  ;;  %v3794_v34 = vshll.u32 %v12406_v32, %v3792_v20  ;;  %v3795_v5 = vshrl.u32 %v3777_v50, %v3793_v62  ;;  %v3798_v58 = vadd.s32 127, %v3797_v61 }
 0x43e   : > { %vm3986_vm6 = vc.u32 %v12458_v46, %v12450_v63  ;;  %v3838_v54 = vshrl.u32 %v3837_v26, 5  ;;  %vm3931_vm13 = vcmp.lt.s32.totalorder %v12250_v15, 0  ;;  %8914 = vcosq.f32 %v3705_v22 }
 0x43f   : > { %v3988_v47 = vsel %vm3986_vm6, %v3987_v4, %v12451_v0  ;;  %v3840_v25 = vsub.s32 32, %v3839_v29  ;;  %v3842_v38 = vshll.u32 %v16166_v40, %v3839_v29  ;;  %v3796_v45 = vor.u32 %v3795_v5, %v3794_v34 }
 0x440   : > { %v3799_v1 = vshll.u32 %v3798_v58, 23  ;;  %v3989_v14 = vadd.s32 %v3988_v47, %v3984_v2  ;;  %v3845_v10 = vshll.u32 %v16167_v56, %v3839_v29  ;;  %v3848_v50 = vshll.u32 %v16168_v30, %v3839_v29 }
 0x441   : > { %v3843_v24 = vshrl.u32 %v16167_v56, %v3840_v25  ;;  %v3846_v32 = vshrl.u32 %v16168_v30, %v3840_v25  ;;  %v3849_v41 = vshrl.u32 %v16159_v7, %v3840_v25  ;;  %v3803_v20 = vcvt.s32.f32 %v3796_v45 }
 0x442   : > { %v3800_v51 = vor.u32 4788187, %v3799_v1  ;;  %v3990_v0 = vadd.s32 536870912, %v3989_v14  ;;  %v3851_v62 = vshll.u32 %v16159_v7, %v3839_v29  ;;  %v3852_v4 = vshrl.u32 %v16165_v39, %v3840_v25 }
 0x443   : > { %v3844_v61 = vor.u32 %v3843_v24, %v3842_v38  ;;  %v3847_v26 = vor.u32 %v3846_v32, %v3845_v10  ;;  %v3850_v2 = vor.u32 %v3849_v41, %v3848_v50  ;;  %v3854_v58 = vshll.u32 %v16165_v39, %v3839_v29 }
 0x444   : > { %v3801_v34 = vand.u32 2147483647, %v3800_v51  ;;  %v3991_v5 = vshrl.u32 %v3990_v0, 30  ;;  %v3855_v47 = vshrl.u32 %v16156_v16, %v3840_v25  ;;  %v3841_v1 = vshrl.u32 %v16166_v40, %v3840_v25 }
 0x445   : > { %v3853_v45 = vor.u32 %v3852_v4, %v3851_v62  ;;  %v4037_v49 = vshrl.u32 %v4036_v60, 23  ;;  %v16338_v57 = vand.u32 2147483647, %v12250_v15  ;;  %vm3857_vm5 = vcmp.lt.s32.totalorder %v3838_v54, 1 }
 0x446   : > { %v3804_v42 = vmul.f32 %v3803_v20, %v3801_v34  ;;  %v3992_v10 = vshll.u32 %v3991_v5, 30  ;;  %v3856_v24 = vor.u32 %v3855_v47, %v3854_v58  ;;  %v4015_v32 = vsub.s32 4, %v3991_v5 }
 0x447   : > { %vm12487_vm7 = vcmp.le.f32.partialorder %v16338_v57, 0.7853982  ;;  %vm3859_vm6 = vcmp.lt.s32.totalorder %v3838_v54, 3  ;;  %vm3860_vm12 = vcmp.lt.s32.totalorder %v3838_v54, 4  ;;  %v3861_v29 = vsel %vm3857_vm5, %v3841_v1, %v3844_v61 }
 0x448   : > { %v3805_v50 = vxor.u32 2147483648, %v3804_v42  ;;  %v12491_v41 = vsub.s32 %v3989_v14, %v3992_v10  ;;  %v3862_v25 = vsel %vm3860_vm12, %v3850_v2, 2102212464  ;;  %v3865_v51 = vsel %vm3857_vm5, %v3844_v61, %v3847_v26 }
 0x449   : > { %v3863_v60 = vsel %vm3859_vm6, %v3847_v26, %v3862_v25  ;;  %v3866_v20 = vsel %vm3860_vm12, %v3853_v45, 920167782  ;;  %v3869_v0 = vsel %vm3857_vm5, %v3847_v26, %v3850_v2  ;;  %v3870_v57 = vsel %vm3860_vm12, %v3856_v24, 1326507024 }
 0x44a   : > { %8916 = vsinq.f32 %v3705_v22  ;;  %v3806_v62 = vsel %vm3723_vm3, %v3805_v50, %v3804_v42  ;;  %v3995_v4 = vsub.s32 0, %v12491_v41  ;;  %v16341_v34 = vor.u32 8388608, %v12437_v21 }
 0x44b   : > { %v12501_v14 = vsel %vm3931_vm13, %v4015_v32, %v3991_v5  ;;  %vm3858_vm4 = vcmp.lt.s32.totalorder %v3838_v54, 2  ;;  %v3867_v61 = vsel %vm3859_vm6, %v3850_v2, %v3866_v20  ;;  %v3871_v47 = vsel %vm3859_vm6, %v3853_v45, %v3870_v57  ;;  %v12518_v45 = vpop.eup %8914 }
 0x44c   : > { %v3873_v58 = vshll.u32 %v16341_v34, 8  ;;  %v8273_v26 = vmin.u32 %v3995_v4, %v12491_v41  ;;  %v3864_v22 = vsel %vm3858_vm4, %v3861_v29, %v3863_v60  ;;  %v3868_v1 = vsel %vm3858_vm4, %v3865_v51, %v3867_v61  ;;  %v16343_v60 = vld [vmem:[#allocation25_spill] sm:$0xff] }
 0x44d   : > { %v3872_v10 = vsel %vm3858_vm4, %v3869_v0, %v3871_v47  ;;  %v3809_v42 = vsel %vm12398_vm15, %v12217_v18, %v3806_v62  ;;  %v8276_v50 = vadd.s32 4294967169, %v4037_v49  ;;  %v16342_v54 = vand.u32 2147483647, %v12364_v19 }
 0x44e   : > { %v12509_v21 = vmul.u32.u64.low %v3873_v58, %v3872_v10  ;;  %v12510_v24 = vmul.u32.u64.high %v3873_v58, %v3872_v10, %v12509_v21  ;;  %v3997_v5 = vclz %v8273_v26  ;;  %v3985_v29 = vadd.s32 %v12450_v63, %v12458_v46 }
 0x44f   : > { %v12512_v32 = vmul.u32.u64.low %v3873_v58, %v3868_v1  ;;  %v12513_v25 = vmul.u32.u64.high %v3873_v58, %v3868_v1, %v12512_v32  ;;  %v4040_v2 = vand.u32 8388607, %v16342_v54  ;;  %v4043_v51 = vadd.s32 1, %v8276_v50 }
 0x450   : > { %v2663_v49 = vsub.s32 4, %v16343_v60  ;;  %8918 = vcosq.f32 %v3809_v42  ;;  %v8274_v20 = vadd.s32 4294967294, %v3997_v5  ;;  %v3880_v0 = vmul.u32 %v3873_v58, %v3864_v22 }
 0x451   : > { %v4041_v57 = vor.u32 8388608, %v4040_v2  ;;  %8920 = vsinq.f32 %v3809_v42  ;;  %vm3882_vm4 = vc.u32 %v12510_v24, %v12512_v32  ;;  %vm4044_vm3 = vcmp.gt.s32.totalorder %v4043_v51, 0 }
 0x452   : > { %v12531_v63 = vsel %vm2579_vm14, %v2663_v49, %v16343_v60  ;;  %vm8275_vm15 = vcmp.lt.s32.totalorder %v8274_v20, 0  ;;  %v3883_v46 = vadd.s32 1, %v12513_v25  ;;  %v4045_v62 = vsel %vm4044_vm3, %v4043_v51, 0 }
 0x453   : > { %v4000_v34 = vsel %vm8275_vm15, 0, %v8274_v20  ;;  %v4046_v61 = vshrl.u32 %v4045_v62, 5  ;;  %v4047_v58 = vand.u32 31, %v4045_v62  ;;  %v12535_v47 = vshll.u32 %v4041_v57, 8 }
 0x454   : > { %v12537_v26 = vpop.eup %8916  ;;  %v4001_v22 = vsub.s32 32, %v4000_v34  ;;  %v4005_v1 = vsub.s32 4294967266, %v4000_v34  ;;  %v3884_v10 = vsel %vm3882_vm4, %v3883_v46, %v12513_v25  ;;  %v2666_v42 = vsel %vm11644_vm10, 0, %v12531_v63 }
 0x455   : > { %v4002_v21 = vshll.u32 %v12491_v41, %v4000_v34  ;;  %v3885_v50 = vadd.s32 %v3884_v10, %v3880_v0  ;;  %v4048_v5 = vsub.s32 32, %v4047_v58  ;;  %v4050_v54 = vshll.u32 %v16166_v40, %v4047_v58 }
 0x456   : > { %v4003_v2 = vshrl.u32 %v3985_v29, %v4001_v22  ;;  %v4006_v51 = vadd.s32 127, %v4005_v1  ;;  %v4053_v60 = vshll.u32 %v16167_v56, %v4047_v58  ;;  %v4056_v49 = vshll.u32 %v16168_v30, %v4047_v58 }
 0x457   : > { %v3886_v20 = vadd.s32 536870912, %v3885_v50  ;;  %v4051_v57 = vshrl.u32 %v16167_v56, %v4048_v5  ;;  %v4054_v25 = vshrl.u32 %v16168_v30, %v4048_v5  ;;  %v4059_v53 = vshll.u32 %v16159_v7, %v4047_v58 }
 0x458   : > { %v4004_v63 = vor.u32 %v4003_v2, %v4002_v21  ;;  %v4007_v46 = vshll.u32 %v4006_v51, 23  ;;  %v4057_v41 = vshrl.u32 %v16159_v7, %v4048_v5  ;;  %v4060_v0 = vshrl.u32 %v16165_v39, %v4048_v5 }
 0x459   : > { %v12552_v62 = vshrl.u32 %v3886_v20, 30  ;;  %v4049_v29 = vshrl.u32 %v16166_v40, %v4048_v5  ;;  %v4052_v34 = vor.u32 %v4051_v57, %v4050_v54  ;;  %v4055_v22 = vor.u32 %v4054_v25, %v4053_v60 }
 0x45a   : > { %v12555_v1 = vpop.eup %8918  ;;  %v4008_v10 = vor.u32 4788187, %v4007_v46  ;;  %v4058_v59 = vor.u32 %v4057_v41, %v4056_v49  ;;  %v4061_v4 = vor.u32 %v4060_v0, %v4059_v53  ;;  %v4062_v30 = vshll.u32 %v16165_v39, %v4047_v58 }
 0x45b   : > { %v12558_v56 = vpop.eup %8920  ;;  %v4011_v21 = vcvt.s32.f32 %v4004_v63  ;;  %v3888_v2 = vshll.u32 %v12552_v62, 30  ;;  %v4063_v51 = vshrl.u32 %v16156_v16, %v4048_v5  ;;  %vm4065_vm14 = vcmp.lt.s32.totalorder %v4046_v61, 1 }
 0x45c   : > { %v4009_v20 = vand.u32 2147483647, %v4008_v10  ;;  %vm4067_vm10 = vcmp.lt.s32.totalorder %v4046_v61, 3  ;;  %vm4068_vm12 = vcmp.lt.s32.totalorder %v4046_v61, 4  ;;  %v4069_v54 = vsel %vm4065_vm14, %v4049_v29, %v4052_v34 }
 0x45d   : > { %v12562_v60 = vsub.s32 %v3885_v50, %v3888_v2  ;;  %v4064_v57 = vor.u32 %v4063_v51, %v4062_v30  ;;  %v4070_v25 = vsel %vm4068_vm12, %v4058_v59, 2102212464  ;;  %v4073_v49 = vsel %vm4065_vm14, %v4052_v34, %v4055_v22 }
 0x45e   : > { %v4012_v53 = vmul.f32 %v4011_v21, %v4009_v20  ;;  %v4071_v58 = vsel %vm4067_vm10, %v4055_v22, %v4070_v25  ;;  %v4074_v46 = vsel %vm4068_vm12, %v4061_v4, 920167782  ;;  %v4077_v41 = vsel %vm4065_vm14, %v4055_v22, %v4058_v59 }
 0x45f   : > { %v3891_v63 = vsub.s32 0, %v12562_v60  ;;  %vm4066_vm5 = vcmp.lt.s32.totalorder %v4046_v61, 2  ;;  %v4075_v5 = vsel %vm4067_vm10, %v4058_v59, %v4074_v46  ;;  %v4078_v0 = vsel %vm4068_vm12, %v4064_v57, 1326507024 }
 0x460   : > { %v4013_v10 = vxor.u32 2147483648, %v4012_v53  ;;  %v4072_v16 = vsel %vm4066_vm5, %v4069_v54, %v4071_v58  ;;  %v4076_v39 = vsel %vm4066_vm5, %v4073_v49, %v4075_v5  ;;  %v4079_v50 = vsel %vm4067_vm10, %v4061_v4, %v4078_v0 }
 0x461   : > { %v8269_v30 = vmin.u32 %v3891_v63, %v12562_v60  ;;  %v4080_v29 = vsel %vm4066_vm5, %v4077_v41, %v4079_v50  ;;  %v12570_v34 = vmul.u32.u64.low %v12535_v47, %v4076_v39  ;;  %v12571_v21 = vmul.u32.u64.high %v12535_v47, %v4076_v39, %v12570_v34 }
 0x462   : > { %vm2669_vm6 = vweird.f32 %v11274_v13  ;;  %v4014_v22 = vsel %vm3931_vm13, %v4013_v10, %v4012_v53  ;;  %v12578_v59 = vmul.u32.u64.low %v12535_v47, %v4080_v29  ;;  %v12579_v2 = vmul.u32.u64.high %v12535_v47, %v4080_v29, %v12578_v59 }
 0x463   : > { %v2670_v51 = vadd.s32 3, %v2666_v42  ;;  %v3893_v61 = vclz %v8269_v30  ;;  %v2674_v4 = vxor.u32 2147483648, %v11895_v17  ;;  %v2677_v20 = vxor.u32 2147483648, %v11885_v43 }
 0x464   : > { %v16344_v39 = vsub.s32 4, %v11897_v33  ;;  %v3881_v57 = vadd.s32 %v12512_v32, %v12510_v24  ;;  %v4088_v25 = vmul.u32 %v12535_v47, %v4072_v16  ;;  %v4017_v53 = vsel %vm12487_vm7, %v12250_v15, %v4014_v22 }
 0x465   : > { %v2671_v49 = vand.u32 3, %v2670_v51  ;;  %v8270_v58 = vadd.s32 4294967294, %v3893_v61  ;;  %v4091_v46 = vadd.s32 1, %v12571_v21  ;;  %vm3085_vm15 = vweird.f32 %v11368_v27 }
 0x466   : > { %v3080_v54 = vsel %vm2995_vm9, %v16344_v39, %v11897_v33  ;;  %vm4090_vm9 = vc.u32 %v12579_v2, %v12570_v34  ;;  %v3090_v33 = vxor.u32 2147483648, %v12252_v6  ;;  %8922 = vcosq.f32 %v4017_v53 }
 0x467   : > { %v3082_v42 = vsel %vm12003_vm2, 0, %v3080_v54  ;;  %vm2672_vm13 = vcmp.lt.s32.totalorder %v2671_v49, 2  ;;  %vm2673_vm4 = vcmp.eq.s32.totalorder %v2671_v49, 0  ;;  %vm8271_vm3 = vcmp.lt.s32.totalorder %v8270_v58, 0 }
 0x468   : > { %v3086_v41 = vadd.s32 3, %v3082_v42  ;;  %v4092_v16 = vsel %vm4090_vm9, %v4091_v46, %v12571_v21  ;;  %v2675_v55 = vsel %vm2673_vm4, %v11885_v43, %v2674_v4  ;;  %vm2676_vm2 = vcmp.eq.s32.totalorder %v2671_v49, 2 }
 0x469   : > { %v3896_v24 = vsel %vm8271_vm3, 0, %v8270_v58  ;;  %v4093_v32 = vadd.s32 %v4092_v16, %v4088_v25  ;;  %v2678_v47 = vsel %vm2676_vm2, %v2677_v20, %v11895_v17  ;;  %v3093_v59 = vxor.u32 2147483648, %v12152_v52  ;;  %v16349_v58 = vld [vmem:[#allocation31_spill] sm:$0xff] }
 0x46a   : > { %v3087_v63 = vand.u32 3, %v3086_v41  ;;  %v3897_v5 = vsub.s32 32, %v3896_v24  ;;  %v3901_v0 = vsub.s32 4294967266, %v3896_v24  ;;  %v2679_v10 = vsel %vm2672_vm13, %v2675_v55, %v2678_v47  ;;  %v16358_v47 = vld [vmem:[#allocation33_spill] sm:$0xff] }
 0x46b   : > { %v3898_v50 = vshll.u32 %v12562_v60, %v3896_v24  ;;  %v4094_v30 = vadd.s32 536870912, %v4093_v32  ;;  %v2680_v29 = vsel %vm2669_vm6, nan, %v2679_v10  ;;  %v2871_v51 = vsub.s32 4, %v11611_v37 }
 0x46c   : > { %v3899_v21 = vshrl.u32 %v3881_v57, %v3897_v5  ;;  %v3902_v43 = vadd.s32 127, %v3901_v0  ;;  %vm3088_vm14 = vcmp.lt.s32.totalorder %v3087_v63, 2  ;;  %vm3089_vm10 = vcmp.eq.s32.totalorder %v3087_v63, 0 }
 0x46d   : > { %v12607_v22 = vshrl.u32 %v4094_v30, 30  ;;  %v3091_v17 = vsel %vm3089_vm10, %v12152_v52, %v3090_v33  ;;  %vm3092_vm12 = vcmp.eq.s32.totalorder %v3087_v63, 2  ;;  %v2882_v60 = vxor.u32 2147483648, %v12064_v11 }
 0x46e   : > { %v3900_v61 = vor.u32 %v3899_v21, %v3898_v50  ;;  %v3903_v4 = vshll.u32 %v3902_v43, 23  ;;  %vm3827_vm5 = vcmp.lt.s32.totalorder %v12302_v28, 0  ;;  %v3094_v20 = vsel %vm3092_vm12, %v3093_v59, %v12252_v6  ;;  %v16352_v50 = vld [vmem:[#allocation19_spill] sm:$0xff] }
 0x46f   : > { %v4096_v13 = vshll.u32 %v12607_v22, 30  ;;  %vm16345_vm6 = vcmp.lt.s32.totalorder %v11377_v23, 0  ;;  %v3287_v54 = vsub.s32 4, %v11980_v8  ;;  %v16346_v52 = vand.u32 2147483647, %v12302_v28 }
 0x470   : > { %v2872_v39 = vsel %vm16345_vm6, %v2871_v51, %v11611_v37  ;;  %v3904_v25 = vor.u32 4788187, %v3903_v4  ;;  %v3095_v49 = vsel %vm3088_vm14, %v3091_v17, %v3094_v20  ;;  %v2885_v6 = vxor.u32 2147483648, %v16349_v58  ;;  %v12644_v30 = vpop.eup %8922  ;;  %v16354_v20 = vld [vmem:[#allocation13_spill] sm:$0xff] }
 0x471   : > { %vm12622_vm9 = vcmp.le.f32.partialorder %v16346_v52, 0.7853982  ;;  %v2874_v42 = vsel %vm11805_vm1, 0, %v2872_v39  ;;  %v12630_v46 = vsub.s32 %v4093_v32, %v4096_v13  ;;  %v3096_v37 = vsel %vm3085_vm15, nan, %v3095_v49  ;;  %v16355_v39 = vld [vmem:[#allocation18_spill] sm:$0xff]  ;;  %v16356_v49 = vld [vmem:[#allocation23_spill] sm:$0xff] }
 0x472   : > { %v2878_v41 = vadd.s32 3, %v2874_v42  ;;  %vm16350_vm13 = vcmp.lt.s32.totalorder %v11801_v9, 0  ;;  %v3905_v16 = vand.u32 2147483647, %v3904_v25  ;;  %v3907_v55 = vcvt.s32.f32 %v3900_v61 }
 0x473   : > { %v3288_v33 = vsel %vm16350_vm13, %v3287_v54, %v11980_v8  ;;  %v8448_v24 = vpack.c.bf16 %v3096_v37, %v2680_v29  ;;  %8924 = vsinq.f32 %v4017_v53  ;;  %v4099_v12 = vsub.s32 0, %v12630_v46  ;;  %v16353_v53 = vld [vmem:[#allocation34_spill] sm:$0xff] }
 0x474   : > { %v3290_v63 = vsel %vm12144_vm11, 0, %v3288_v33  ;;  %v2879_v5 = vand.u32 3, %v2878_v41  ;;  %v3908_v0 = vmul.f32 %v3907_v55, %v3905_v16  ;;  %v4089_v27 = vadd.s32 %v12570_v34, %v12579_v2 }
 0x475   : > { %v3294_v32 = vadd.s32 3, %v3290_v63  ;;  %8449 = vmatprep.subr.bf16.mxu0 %v8448_v24  ;;  %v3298_v10 = vxor.u32 2147483648, %v12275_v35  ;;  %v2567_v8 = vand.u32 3, %v16352_v50  ;;  %v8277_v29 = vmin.u32 %v4099_v12, %v12630_v46  ;;  %v16359_v12 = vld [vmem:[#allocation39_spill] sm:$0xff] }
 0x476   : > { %vm2881_vm1 = vcmp.eq.s32.totalorder %v2879_v5, 0  ;;  %vm2884_vm11 = vcmp.eq.s32.totalorder %v2879_v5, 2  ;;  %v3301_v21 = vxor.u32 2147483648, %v16353_v53  ;;  %v3909_v43 = vxor.u32 2147483648, %v3908_v0 }
 0x477   : > { %v2883_v17 = vsel %vm2881_vm1, %v16349_v58, %v2882_v60  ;;  %v2886_v59 = vsel %vm2884_vm11, %v2885_v6, %v12064_v11  ;;  %v3295_v51 = vand.u32 3, %v3294_v32  ;;  %v4101_v34 = vclz %v8277_v29 }
 0x478   : > { %vm2877_vm4 = vweird.f32 %v11377_v23  ;;  %vm2880_vm3 = vcmp.lt.s32.totalorder %v2879_v5, 2  ;;  %vm3293_vm2 = vweird.f32 %v11801_v9  ;;  %v3910_v2 = vsel %vm3827_vm5, %v3909_v43, %v3908_v0  ;;  %v16357_v23 = vld [vmem:[#allocation14_spill] sm:$0xff] }
 0x479   : > { %v2887_v61 = vsel %vm2880_vm3, %v2883_v17, %v2886_v59  ;;  %vm3297_vm15 = vcmp.eq.s32.totalorder %v3295_v51, 0  ;;  %vm2568_vm14 = vcmp.lt.s32.totalorder %v2567_v8, 2  ;;  %v3913_v4 = vsel %vm12622_vm9, %v12302_v28, %v3910_v2  ;;  %v16362_v59 = vld [vmem:[#allocation37_spill] sm:$0xff] }
 0x47a   : > { %v8278_v60 = vadd.s32 4294967294, %v4101_v34  ;;  %v3299_v11 = vsel %vm3297_vm15, %v16353_v53, %v3298_v10  ;;  %vm3300_vm10 = vcmp.eq.s32.totalorder %v3295_v51, 2  ;;  %vm3296_vm12 = vcmp.lt.s32.totalorder %v3295_v51, 2  ;;  %v16360_v10 = vld [vmem:[#allocation6_spill] sm:$0xff]  ;;  %v16363_v34 = vld [vmem:[#allocation36_spill] sm:$0xff] }
 0x47b   : > { %v3302_v13 = vsel %vm3300_vm10, %v3301_v21, %v12275_v35  ;;  %vm2565_vm6 = vweird.f32 %v16354_v20  ;;  %vm2569_vm13 = vcmp.eq.s32.totalorder %v2567_v8, 0  ;;  %v2570_v54 = vxor.u32 2147483648, %v16355_v39  ;;  %v16368_v20 = vld [vmem:[#allocation7_spill] sm:$0xff] }
 0x47c   : > { %vm8279_vm1 = vcmp.lt.s32.totalorder %v8278_v60, 0  ;;  %v2888_v52 = vsel %vm2877_vm4, nan, %v2887_v61  ;;  %v3303_v25 = vsel %vm3296_vm12, %v3299_v11, %v3302_v13  ;;  %v2573_v42 = vxor.u32 2147483648, %v16356_v49 }
 0x47d   : > { %8926 = vcosq.f32 %v3913_v4  ;;  %v4104_v58 = vsel %vm8279_vm1, 0, %v8278_v60  ;;  %v3304_v6 = vsel %vm3293_vm2, nan, %v3303_v25  ;;  %vm2572_vm11 = vcmp.eq.s32.totalorder %v2567_v8, 2  ;;  %v12666_v37 = vpop.eup %8924 }
 0x47e   : > { %v4105_v35 = vsub.s32 32, %v4104_v58  ;;  %v4109_v41 = vsub.s32 4294967266, %v4104_v58  ;;  %v8456_v33 = vpack.c.bf16 %v3304_v6, %v2888_v52  ;;  %v2571_v16 = vsel %vm2569_vm13, %v16356_v49, %v2570_v54  ;;  %v16367_v49 = vld [vmem:[#allocation12_spill] sm:$0xff] }
 0x47f   : > { %v2574_v55 = vsel %vm2572_vm11, %v2573_v42, %v16355_v39  ;;  %v2983_v24 = vand.u32 3, %v16357_v23  ;;  %v2986_v63 = vxor.u32 2147483648, %v16358_v47  ;;  %v2989_v5 = vxor.u32 2147483648, %v16359_v12  ;;  %v16371_v23 = vld [vmem:[#allocation20_spill] sm:$0xff] }
 0x480   : > { %v4106_v32 = vshll.u32 %v12630_v46, %v4104_v58  ;;  %v4107_v9 = vshrl.u32 %v4089_v27, %v4105_v35  ;;  %v4110_v0 = vadd.s32 127, %v4109_v41  ;;  %8457 = vmatprep.subr.bf16.mxu1 %v8456_v33  ;;  %vm2981_vm4 = vweird.f32 %v16360_v10  ;;  %v16361_v46 = vld [vmem:[#allocation8_spill] sm:$0xff]  ;;  %v16369_v35 = vld [vmem:[#allocation22_spill] sm:$0xff] }
 0x481   : > { %v2575_v50 = vsel %vm2568_vm14, %v2571_v16, %v2574_v55  ;;  %vm2984_vm3 = vcmp.lt.s32.totalorder %v2983_v24, 2  ;;  %vm2985_vm2 = vcmp.eq.s32.totalorder %v2983_v24, 0  ;;  %vm2988_vm15 = vcmp.eq.s32.totalorder %v2983_v24, 2  ;;  %v16370_v33 = vld [vmem:[#allocation42_spill] sm:$0xff] }
 0x482   : > { %v4108_v29 = vor.u32 %v4107_v9, %v4106_v32  ;;  %v4111_v53 = vshll.u32 %v4110_v0, 23  ;;  %v2987_v21 = vsel %vm2985_vm2, %v16359_v12, %v2986_v63  ;;  %v2990_v43 = vsel %vm2988_vm15, %v2989_v5, %v16358_v47  ;;  %v16372_v47 = vld [vmem:[#allocation16_spill] sm:$0xff] }
 0x483   : > { %vm4035_vm10 = vcmp.lt.s32.totalorder %v12364_v19, 0  ;;  %v2991_v17 = vsel %vm2984_vm3, %v2987_v21, %v2990_v43  ;;  %v2775_v27 = vand.u32 3, %v16361_v46  ;;  %v2778_v51 = vxor.u32 2147483648, %v16362_v59 }
 0x484   : > { %v2781_v2 = vxor.u32 2147483648, %v16363_v34  ;;  %8928 = vsinq.f32 %v3913_v4  ;;  %v16364_v8 = vand.u32 2147483647, %v12364_v19  ;;  %v4112_v60 = vor.u32 4788187, %v4111_v53 }
 0x485   : > { %v2576_v11 = vsel %vm2565_vm6, nan, %v2575_v50  ;;  %v2992_v13 = vsel %vm2981_vm4, nan, %v2991_v17  ;;  %v4115_v39 = vcvt.s32.f32 %v4108_v29  ;;  %vm2777_vm12 = vcmp.eq.s32.totalorder %v2775_v27, 0 }
 0x486   : > { %vm12684_vm14 = vcmp.le.f32.partialorder %v16364_v8, 0.7853982  ;;  %v8450_v54 = vpack.c.bf16 %v2992_v13, %v2576_v11  ;;  %vm2780_vm13 = vcmp.eq.s32.totalorder %v2775_v27, 2  ;;  %v4113_v52 = vand.u32 2147483647, %v4112_v60  ;;  %v16375_v60 = vld [vmem:[#allocation30_spill] sm:$0xff] }
 0x487   : > { %v2779_v4 = vsel %vm2777_vm12, %v16363_v34, %v2778_v51  ;;  %v2782_v25 = vsel %vm2780_vm13, %v2781_v2, %v16362_v59  ;;  %v3191_v42 = vand.u32 3, %v16367_v49  ;;  %v12695_v58 = vpop.eup %8926  ;;  %vm2776_vm1 = vcmp.lt.s32.totalorder %v2775_v27, 2 }
 0x488   : > { %8451 = vmatpush1.bf16.msra.mxu0 %v8450_v54  ;;  %v3194_v6 = vxor.u32 2147483648, %v16368_v20  ;;  %v3197_v41 = vxor.u32 2147483648, %v16369_v35  ;;  %v3495_v16 = vsub.s32 4, %v16370_v33  ;;  %v4116_v55 = vmul.f32 %v4115_v39, %v4113_v52 }
 0x489   : > { %vm2773_vm6 = vweird.f32 %v16371_v23  ;;  %v2783_v24 = vsel %vm2776_vm1, %v2779_v4, %v2782_v25  ;;  %vm3193_vm11 = vcmp.eq.s32.totalorder %v3191_v42, 0  ;;  %vm3189_vm4 = vweird.f32 %v16372_v47 }
 0x48a   : > { %v3195_v63 = vsel %vm3193_vm11, %v16369_v35, %v3194_v6  ;;  %vm3196_vm3 = vcmp.eq.s32.totalorder %v3191_v42, 2  ;;  %vm16373_vm2 = vcmp.lt.s32.totalorder %v11994_v44, 0  ;;  %v4117_v5 = vxor.u32 2147483648, %v4116_v55  ;;  %v16378_v35 = vld [vmem:[#allocation21_spill] sm:$0xff] }
 0x48b   : > { %v3496_v12 = vsel %vm16373_vm2, %v3495_v16, %v16370_v33  ;;  %vm3192_vm15 = vcmp.lt.s32.totalorder %v3191_v42, 2  ;;  %v3198_v32 = vsel %vm3196_vm3, %v3197_v41, %v16368_v20  ;;  %v2784_v0 = vsel %vm2773_vm6, nan, %v2783_v24 }
 0x48c   : > { %v3498_v9 = vsel %vm12329_vm0, 0, %v3496_v12  ;;  %v3199_v10 = vsel %vm3192_vm15, %v3195_v63, %v3198_v32  ;;  %v3911_v29 = vsub.s32 4, %v12552_v62  ;;  %v4118_v53 = vsel %vm4035_vm10, %v4117_v5, %v4116_v55 }
 0x48d   : > { %v3502_v50 = vadd.s32 3, %v3498_v9  ;;  %v3200_v21 = vsel %vm3189_vm4, nan, %v3199_v10  ;;  %v3506_v43 = vxor.u32 2147483648, %v12413_v3  ;;  %v3509_v17 = vxor.u32 2147483648, %v12408_v31 }
 0x48e   : > { %v4121_v46 = vsel %vm12684_vm14, %v12364_v19, %v4118_v53  ;;  %v8458_v27 = vpack.c.bf16 %v3200_v21, %v2784_v0  ;;  %v3912_v59 = vsel %vm3827_vm5, %v3911_v29, %v12552_v62  ;;  %v8929_v51 = vpop.eup %8928  ;;  %v16374_v34 = vsel %vm12487_vm7, 0, %v12501_v14  ;;  %v16382_v53 = vld [vmem:[#allocation29_spill] sm:$0xff] }
 0x48f   : > { %v3503_v36 = vand.u32 3, %v3502_v50  ;;  %v12724_v2 = vadd.s32 3, %v16374_v34  ;;  %8930 = vcosq.f32 %v4121_v46  ;;  %v3914_v8 = vsel %vm12622_vm9, 0, %v3912_v59 }
 0x490   : > { %v3703_v11 = vsub.s32 4, %v16375_v60  ;;  %8932 = vsinq.f32 %v4121_v46  ;;  %8459 = vmatpush1.bf16.msra.mxu1 %v8458_v27  ;;  %v3918_v38 = vadd.s32 3, %v3914_v8  ;;  %vm16376_vm7 = vcmp.lt.s32.totalorder %v12085_v48, 0 }
 0x491   : > { %vm3504_vm0 = vcmp.lt.s32.totalorder %v3503_v36, 2  ;;  %vm3505_vm12 = vcmp.eq.s32.totalorder %v3503_v36, 0  ;;  %vm3508_vm13 = vcmp.eq.s32.totalorder %v3503_v36, 2  ;;  %v3922_v54 = vxor.u32 2147483648, %v8929_v51 }
 0x492   : > { %v3507_v62 = vsel %vm3505_vm12, %v12408_v31, %v3506_v43  ;;  %v3510_v13 = vsel %vm3508_vm13, %v3509_v17, %v12413_v3  ;;  %v3704_v14 = vsel %vm16376_vm7, %v3703_v11, %v16375_v60  ;;  %v3925_v57 = vxor.u32 2147483648, %v12695_v58 }
 0x493   : > { %v3511_v39 = vsel %vm3504_vm0, %v3507_v62, %v3510_v13  ;;  %v3706_v4 = vsel %vm12423_vm8, 0, %v3704_v14  ;;  %vm3501_vm5 = vweird.f32 %v11994_v44  ;;  %vm3917_vm9 = vweird.f32 %v12302_v28  ;;  %v16380_v28 = vld [vmem:[#allocation10_spill] sm:$0xff]  ;;  %v16383_v13 = vld [vmem:[#allocation27_spill] sm:$0xff] }
 0x494   : > { %v3919_v25 = vand.u32 3, %v3918_v38  ;;  %v3710_v31 = vadd.s32 3, %v3706_v4  ;;  %v3512_v49 = vsel %vm3501_vm5, nan, %v3511_v39  ;;  %vm3709_vm1 = vweird.f32 %v12085_v48  ;;  %v16384_v14 = vld [vmem:[#allocation43_spill] sm:$0xff] }
 0x495   : > { %v3714_v3 = vxor.u32 2147483648, %v12537_v26  ;;  %v3717_v42 = vxor.u32 2147483648, %v12518_v45  ;;  %v4119_v20 = vsub.s32 4, %v12607_v22  ;;  %v3399_v41 = vand.u32 3, %v16378_v35 }
 0x496   : > { %vm3921_vm6 = vcmp.eq.s32.totalorder %v3919_v25, 0  ;;  %vm3924_vm11 = vcmp.eq.s32.totalorder %v3919_v25, 2  ;;  %v3711_v6 = vand.u32 3, %v3710_v31  ;;  %vm3920_vm8 = vcmp.lt.s32.totalorder %v3919_v25, 2 }
 0x497   : > { %v3923_v44 = vsel %vm3921_vm6, %v12695_v58, %v3922_v54  ;;  %v3926_v33 = vsel %vm3924_vm11, %v3925_v57, %v8929_v51  ;;  %v4120_v16 = vsel %vm4035_vm10, %v4119_v20, %v12607_v22  ;;  %vm4125_vm2 = vweird.f32 %v12364_v19  ;;  %v16379_v22 = vld [vmem:[#allocation15_spill] sm:$0xff]  ;;  %v16385_v57 = vld [vmem:[#allocation44_spill] sm:$0xff] }
 0x498   : > { %v3927_v55 = vsel %vm3920_vm8, %v3923_v44, %v3926_v33  ;;  %vm3713_vm4 = vcmp.eq.s32.totalorder %v3711_v6, 0  ;;  %vm3716_vm3 = vcmp.eq.s32.totalorder %v3711_v6, 2  ;;  %v4122_v58 = vsel %vm12684_vm14, 0, %v4120_v16  ;;  %v16386_v20 = vld [vmem:[#allocation28_spill] sm:$0xff]  ;;  %v4138_v33 = vld [vmem:[%s15882_s5 + $0x8] sm:$0xff] }
 0x499   : > { %v3928_v23 = vsel %vm3917_vm9, nan, %v3927_v55  ;;  %v3715_v24 = vsel %vm3713_vm4, %v12518_v45, %v3714_v3  ;;  %v3718_v47 = vsel %vm3716_vm3, %v3717_v42, %v12537_v26  ;;  %v8931_v63 = vpop.eup %8930  ;;  %vm3712_vm15 = vcmp.lt.s32.totalorder %v3711_v6, 2  ;;  %v16381_v26 = vld [vmem:[#allocation35_spill] sm:$0xff] }
 0x49a   : > { %v8452_v12 = vpack.c.bf16 %v3928_v23, %v3512_v49  ;;  %v4126_v5 = vadd.s32 3, %v4122_v58  ;;  %vm3397_vm10 = vweird.f32 %v16379_v22  ;;  %vm3400_vm0 = vcmp.lt.s32.totalorder %v3399_v41, 2  ;;  %v8933_v32 = vpop.eup %8932  ;;  %v4137_v49 = vld [vmem:[%s15882_s5] sm:$0xff] }
 0x49b   : > { %v3719_v9 = vsel %vm3712_vm15, %v3715_v24, %v3718_v47  ;;  %v4133_v0 = vxor.u32 2147483648, %v8931_v63  ;;  %vm3401_vm12 = vcmp.eq.s32.totalorder %v3399_v41, 0  ;;  %v3402_v10 = vxor.u32 2147483648, %v16380_v28 }
 0x49c   : > { %8453 = vmatprep.subr.bf16.mxu0 %v8452_v12  ;;  %v4127_v45 = vand.u32 3, %v4126_v5  ;;  %v4130_v50 = vxor.u32 2147483648, %v8933_v32  ;;  %vm3404_vm13 = vcmp.eq.s32.totalorder %v3399_v41, 2  ;;  %v3405_v61 = vxor.u32 2147483648, %v16381_v26 }
 0x49d   : > { %v3403_v29 = vsel %vm3401_vm12, %v16381_v26, %v3402_v10  ;;  %v3815_v21 = vand.u32 3, %v16382_v53  ;;  %v3818_v43 = vxor.u32 2147483648, %v12558_v56  ;;  %v3821_v17 = vxor.u32 2147483648, %v12555_v1 }
 0x49e   : > { %v3720_v46 = vsel %vm3709_vm1, nan, %v3719_v9  ;;  %vm4129_vm14 = vcmp.eq.s32.totalorder %v4127_v45, 0  ;;  %vm4132_vm7 = vcmp.eq.s32.totalorder %v4127_v45, 2  ;;  %v3406_v27 = vsel %vm3404_vm13, %v3405_v61, %v16380_v28 }
 0x49f   : > { %vm4128_vm5 = vcmp.lt.s32.totalorder %v4127_v45, 2  ;;  %v4131_v36 = vsel %vm4129_vm14, %v8931_v63, %v4130_v50  ;;  %v4134_v59 = vsel %vm4132_vm7, %v4133_v0, %v8933_v32  ;;  %vm3813_vm9 = vweird.f32 %v12217_v18 }
 0x4a0   : > { %v4135_v51 = vsel %vm4128_vm5, %v4131_v36, %v4134_v59  ;;  %v3407_v34 = vsel %vm3400_vm0, %v3403_v29, %v3406_v27  ;;  %vm3817_vm6 = vcmp.eq.s32.totalorder %v3815_v21, 0  ;;  %vm3820_vm11 = vcmp.eq.s32.totalorder %v3815_v21, 2 }
 0x4a1   : > { %v4136_v8 = vsel %vm4125_vm2, nan, %v4135_v51  ;;  %vm3816_vm8 = vcmp.lt.s32.totalorder %v3815_v21, 2  ;;  %v3819_v48 = vsel %vm3817_vm6, %v12555_v1, %v3818_v43  ;;  %v3822_v60 = vsel %vm3820_vm11, %v3821_v17, %v12558_v56 }
 0x4a2   : > { %v8460_v11 = vpack.c.bf16 %v4136_v8, %v3720_v46  ;;  %v3823_v62 = vsel %vm3816_vm8, %v3819_v48, %v3822_v60  ;;  %v3607_v38 = vand.u32 3, %v16383_v13  ;;  %v3610_v39 = vxor.u32 2147483648, %v16384_v14 }
 0x4a3   : > { %v3408_v18 = vsel %vm3397_vm10, nan, %v3407_v34  ;;  %v3824_v54 = vsel %vm3813_vm9, nan, %v3823_v62  ;;  %v3613_v52 = vxor.u32 2147483648, %v16385_v57  ;;  %v4023_v19 = vand.u32 3, %v12724_v2 }
 0x4a4   : > { %8461 = vmatprep.subr.bf16.mxu1 %v8460_v11  ;;  %v8454_v4 = vpack.c.bf16 %v3824_v54, %v3408_v18  ;;  %vm3609_vm1 = vcmp.eq.s32.totalorder %v3607_v38, 0  ;;  %vm3612_vm4 = vcmp.eq.s32.totalorder %v3607_v38, 2  ;;  %vm3608_vm3 = vcmp.lt.s32.totalorder %v3607_v38, 2 }
 0x4a5   : > { %v3611_v56 = vsel %vm3609_vm1, %v16385_v57, %v3610_v39  ;;  %v3614_v1 = vsel %vm3612_vm4, %v3613_v52, %v16384_v14  ;;  %v4026_v25 = vxor.u32 2147483648, %v12666_v37  ;;  %v4029_v31 = vxor.u32 2147483648, %v12644_v30 }
 0x4a6   : > { %8455 = vmatpush1.bf16.msra.mxu0 %v8454_v4  ;;  %v3615_v3 = vsel %vm3608_vm3, %v3611_v56, %v3614_v1  ;;  %vm4025_vm2 = vcmp.eq.s32.totalorder %v4023_v19, 0  ;;  %vm4028_vm15 = vcmp.eq.s32.totalorder %v4023_v19, 2  ;;  %vm4024_vm10 = vcmp.lt.s32.totalorder %v4023_v19, 2 }
 0x4a7   : > { %v4027_v2 = vsel %vm4025_vm2, %v12644_v30, %v4026_v25  ;;  %v4030_v42 = vsel %vm4028_vm15, %v4029_v31, %v12666_v37  ;;  %vm3605_vm0 = vweird.f32 %v16386_v20  ;;  %vm4021_vm12 = vweird.f32 %v12250_v15  ;;  %v4139_v15 = vld [vmem:[%s15882_s5 + $0x10] sm:$0xff]  ;;  %v4140_v30 = vld [vmem:[%s15882_s5 + $0x18] sm:$0xff]  ;;  %v12813_v37 = vpop.permute.xlu0 %4147 }
 0x4a8   : > { %v4031_v6 = vsel %vm4024_vm10, %v4027_v2, %v4030_v42  ;;  %vm16387_vm13 = vcmask 261120   ;;  %v3616_v35 = vsel %vm3605_vm0, nan, %v3615_v3  ;;  %v16388_v44 = vmov 0.0  }
 0x4a9   : > { %8280 = vmatmul.mubr.msk.f32.vlgmr.msra.gmra.mrb[8].mxu0 %vm16387_vm13, %v4137_v49  ;;  %v4032_v41 = vsel %vm4021_vm12, nan, %v4031_v6  ;;  %vm16389_vm14 = vmmov %vm16387_vm13  ;;  %v16399_v39 = vmov 2475754826   ;;  %v16400_v54 = vmov 2131351028  }
 0x4aa   : > { %4247 = vmatprep.mubr.f32.mxu0 %v16388_v44  ;;  %v8462_v16 = vpack.c.bf16 %v4032_v41, %v3616_v35  ;;  %vm16390_vm7 = vmmov %vm16387_vm13  ;;  %v16401_v1 = vmov 920167782   ;;  %v16402_v2 = vmov 1326507024  }
 0x4ab   : > { %vm16391_vm5 = vmmov %vm16390_vm7 }
 0x4ac   : > { %8463 = vmatpush1.bf16.msra.mxu1 %v8462_v16  ;;  %vm16392_vm9 = vmmov %vm16391_vm5 }
 0x4ad   : > { %8281 = vmatmul.mubr.msk.f32.gmra.mrb[10].mxu0 %vm16389_vm14, %v4138_v33  ;;  %vm16393_vm6 = vmmov %vm16391_vm5 }
 0x4ae   : > { %4253 = vmatprep.mubr.f32.mxu0 %v16388_v44  ;;  %vm16394_vm11 = vmmov %vm16391_vm5 }
 0x4af   : > { %8284 = vmatmul.mubr.msk.f32.vlgmr.msra.gmra.mrb[8].mxu1 %vm16390_vm7, %v4137_v49  ;;  %vm16395_vm8 = vmmov %vm16391_vm5 }
 0x4b0   : > { %4336 = vmatprep.mubr.f32.mxu1 %v16388_v44 }
 0x4b1   : > { %8282 = vmatmul.mubr.msk.f32.gmra.mrb[12].mxu0 %vm16391_vm5, %v4139_v15 }
 0x4b2   : > { %4259 = vmatprep.mubr.f32.mxu0 %v16388_v44 }
 0x4b3   : > { %8285 = vmatmul.mubr.msk.f32.gmra.mrb[10].mxu1 %vm16392_vm9, %v4138_v33 }
 0x4b4   : > { %4342 = vmatprep.mubr.f32.mxu1 %v16388_v44 }
 0x4b5   : > { %8283 = vmatmul.mubr.msk.f32.gmra.mrb[14].mxu0 %vm16393_vm6, %v4140_v30 }
 0x4b6   : > { %6123 = vmatprep.mubr.f32.mxu0 %v16388_v44 }
 0x4b7   : > { %8286 = vmatmul.mubr.msk.f32.gmra.mrb[12].mxu1 %vm16394_vm11, %v4139_v15 }
 0x4b8   : > { %4348 = vmatprep.mubr.f32.mxu1 %v16388_v44 }
 0x4bb   : > { %8287 = vmatmul.mubr.msk.f32.gmra.mrb[14].mxu1 %vm16395_vm8, %v4140_v30 }
 0x4bc   : > { %6212 = vmatprep.mubr.f32.mxu1 %v16388_v44 }
 0x57c   : > { %v4243_v55 = vpop.f32.mrb[8].mxu0 }
 0x57d   : > { %v12816_v23 = vadd.f32 %v4243_v55, %v12813_v37  ;;  %v4245_v24 = vpop.f32.mrb[9].mxu0 }
 0x57e   : > { %v12819_v47 = vadd.f32 %v4245_v24, %v12813_v37 }
 0x57f   : > { %16396 = vst [vmem:[#allocation26_spill] sm:$0xff] %v12816_v23  ;;  %v4355_v58 = vand.u32 2147483647, %v12816_v23  ;;  %v4358_v63 = vand.u32 2139095040, %v12816_v23 }
 0x580   : > { %16397 = vst [vmem:[#allocation32_spill] sm:$0xff] %v12819_v47  ;;  %v4462_v12 = vand.u32 2139095040, %v12819_v47  ;;  %v12824_v5 = vpop.f32.mrb[10].mxu0  ;;  %v16023_v29 = vand.u32 2147483647, %v12819_v47 }
 0x581   : > { %v4359_v22 = vshrl.u32 %v4358_v63, 23  ;;  %v12826_v32 = vpop.f32.mrb[11].mxu0  ;;  %v4362_v9 = vand.u32 8388607, %v4355_v58 }
 0x582   : > { %v4463_v0 = vshrl.u32 %v4462_v12, 23  ;;  %v4332_v10 = vpop.f32.mrb[8].mxu1  ;;  %v12848_v60 = vand.u32 8388607, %v16023_v29 }
 0x583   : > { %v8288_v28 = vadd.s32 4294967169, %v4359_v22  ;;  %v12831_v45 = vadd.f32 %v4332_v10, %v12813_v37  ;;  %v12833_v26 = vpop.f32.mrb[9].mxu1  ;;  %v4363_v53 = vor.u32 8388608, %v4362_v9 }
 0x584   : > { %v8292_v50 = vadd.s32 4294967169, %v4463_v0  ;;  %v12858_v31 = vpop.f32.mrb[12].mxu0 }
 0x585   : > { %16398 = vst [vmem:[#allocation41_spill] sm:$0xff] %v12831_v45  ;;  %v4365_v61 = vadd.s32 1, %v8288_v28  ;;  %v4563_v21 = vand.u32 2147483647, %v12831_v45  ;;  %v4566_v43 = vand.u32 2139095040, %v12831_v45  ;;  %v12844_v48 = vshll.u32 %v4363_v53, 8 }
 0x586   : > { %v4469_v17 = vadd.s32 1, %v8292_v50  ;;  %v12838_v46 = vpop.f32.mrb[10].mxu1 }
 0x587   : > { %vm4366_vm1 = vcmp.gt.s32.totalorder %v4365_v61, 0  ;;  %v4567_v36 = vshrl.u32 %v4566_v43, 23  ;;  %v4570_v59 = vand.u32 8388607, %v4563_v21  ;;  %v12842_v34 = vpop.f32.mrb[11].mxu1 }
 0x588   : > { %v4367_v27 = vsel %vm4366_vm1, %v4365_v61, 0  ;;  %vm4470_vm4 = vcmp.gt.s32.totalorder %v4469_v17, 0 }
 0x589   : > { %v4369_v51 = vand.u32 31, %v4367_v27  ;;  %v4368_v8 = vshrl.u32 %v4367_v27, 5  ;;  %v8296_v62 = vadd.s32 4294967169, %v4567_v36  ;;  %v4571_v13 = vor.u32 8388608, %v4570_v59 }
 0x58a   : > { %v4471_v38 = vsel %vm4470_vm4, %v4469_v17, 0 }
 0x58b   : > { %v4370_v11 = vsub.s32 32, %v4369_v51  ;;  %v4372_v14 = vshll.u32 %v16166_v40, %v4369_v51  ;;  %v4375_v18 = vshll.u32 %v16399_v39, %v4369_v51  ;;  %v4378_v57 = vshll.u32 %v16400_v54, %v4369_v51 }
 0x58c   : > { %v4381_v52 = vshll.u32 %v16159_v7, %v4369_v51  ;;  %v4384_v25 = vshll.u32 %v16401_v1, %v4369_v51  ;;  %vm4387_vm3 = vcmp.lt.s32.totalorder %v4368_v8, 1  ;;  %v4573_v41 = vadd.s32 1, %v8296_v62 }
 0x58d   : > { %v4373_v19 = vshrl.u32 %v16399_v39, %v4370_v11  ;;  %v4376_v4 = vshrl.u32 %v16400_v54, %v4370_v11  ;;  %v4379_v56 = vshrl.u32 %v16159_v7, %v4370_v11  ;;  %v4371_v49 = vshrl.u32 %v16166_v40, %v4370_v11 }
 0x58e   : > { %v4382_v3 = vshrl.u32 %v16401_v1, %v4370_v11  ;;  %v4385_v42 = vshrl.u32 %v16402_v2, %v4370_v11  ;;  %vm4389_vm2 = vcmp.lt.s32.totalorder %v4368_v8, 3  ;;  %vm4390_vm15 = vcmp.lt.s32.totalorder %v4368_v8, 4 }
 0x58f   : > { %v4374_v20 = vor.u32 %v4373_v19, %v4372_v14  ;;  %v4377_v6 = vor.u32 %v4376_v4, %v4375_v18  ;;  %v4380_v35 = vor.u32 %v4379_v56, %v4378_v57  ;;  %vm4574_vm10 = vcmp.gt.s32.totalorder %v4573_v41, 0 }
 0x590   : > { %v4383_v33 = vor.u32 %v4382_v3, %v4381_v52  ;;  %v4386_v16 = vor.u32 %v4385_v42, %v4384_v25  ;;  %vm4388_vm0 = vcmp.lt.s32.totalorder %v4368_v8, 2  ;;  %v4575_v28 = vsel %vm4574_vm10, %v4573_v41, 0 }
 0x591   : > { %v4391_v15 = vsel %vm4387_vm3, %v4371_v49, %v4374_v20  ;;  %v4392_v30 = vsel %vm4390_vm15, %v4380_v35, 2102212464  ;;  %v4395_v55 = vsel %vm4387_vm3, %v4374_v20, %v4377_v6  ;;  %v4399_v24 = vsel %vm4387_vm3, %v4377_v6, %v4380_v35 }
 0x592   : > { %v4393_v63 = vsel %vm4389_vm2, %v4377_v6, %v4392_v30  ;;  %v4396_v12 = vsel %vm4390_vm15, %v4383_v33, 920167782  ;;  %v4400_v22 = vsel %vm4390_vm15, %v4386_v16, 1326507024  ;;  %v12863_v53 = vshrl.u32 %v4575_v28, 5 }
 0x593   : > { %v4397_v9 = vsel %vm4389_vm2, %v4380_v35, %v4396_v12  ;;  %v4401_v0 = vsel %vm4389_vm2, %v4383_v33, %v4400_v22  ;;  %v4394_v10 = vsel %vm4388_vm0, %v4391_v15, %v4393_v63  ;;  %v4577_v59 = vand.u32 31, %v4575_v28 }
 0x594   : > { %v4398_v50 = vsel %vm4388_vm0, %v4395_v55, %v4397_v9  ;;  %v4402_v61 = vsel %vm4388_vm0, %v4399_v24, %v4401_v0  ;;  %v4467_v51 = vor.u32 8388608, %v12848_v60  ;;  %v4410_v8 = vmul.u32 %v12844_v48, %v4394_v10 }
 0x595   : > { %v12866_v43 = vmul.u32.u64.low %v12844_v48, %v4402_v61  ;;  %v12867_v17 = vmul.u32.u64.high %v12844_v48, %v4402_v61, %v12866_v43  ;;  %v12870_v27 = vmul.u32.u64.low %v12844_v48, %v4398_v50  ;;  %v12871_v36 = vmul.u32.u64.high %v12844_v48, %v4398_v50, %v12870_v27 }
 0x596   : > { %v12876_v11 = vshll.u32 %v4571_v13, 8  ;;  %v12878_v62 = vshrl.u32 %v4471_v38, 5  ;;  %v12882_v14 = vadd.f32 %v12833_v26, %v12813_v37  ;;  %v4578_v18 = vsub.s32 32, %v4577_v59  ;;  %v12924_v43 = vpop.f32.mrb[12].mxu1 }
 0x597   : > { %v4580_v57 = vshll.u32 %v16166_v40, %v4577_v59  ;;  %vm4595_vm12 = vcmp.lt.s32.totalorder %v12863_v53, 1  ;;  %v12886_v52 = vand.u32 31, %v4471_v38  ;;  %vm4412_vm13 = vc.u32 %v12867_v17, %v12870_v27 }
 0x598   : > { %v4413_v48 = vadd.s32 1, %v12871_v36  ;;  %v4583_v60 = vshll.u32 %v16399_v39, %v4577_v59  ;;  %v4586_v13 = vshll.u32 %v16400_v54, %v4577_v59  ;;  %v4581_v19 = vshrl.u32 %v16399_v39, %v4578_v18 }
 0x599   : > { %v4584_v37 = vshrl.u32 %v16400_v54, %v4578_v18  ;;  %v4587_v26 = vshrl.u32 %v16159_v7, %v4578_v18  ;;  %v4589_v4 = vshll.u32 %v16159_v7, %v4577_v59  ;;  %v4590_v56 = vshrl.u32 %v16401_v1, %v4578_v18 }
 0x59a   : > { %v4414_v38 = vsel %vm4412_vm13, %v4413_v48, %v12871_v36  ;;  %v4592_v25 = vshll.u32 %v16401_v1, %v4577_v59  ;;  %v4593_v49 = vshrl.u32 %v16402_v2, %v4578_v18  ;;  %v4582_v42 = vor.u32 %v4581_v19, %v4580_v57 }
 0x59b   : > { %v4415_v3 = vadd.s32 %v4414_v38, %v4410_v8  ;;  %v4585_v20 = vor.u32 %v4584_v37, %v4583_v60  ;;  %v4588_v6 = vor.u32 %v4587_v26, %v4586_v13  ;;  %v4591_v35 = vor.u32 %v4590_v56, %v4589_v4 }
 0x59c   : > { %v4594_v41 = vor.u32 %v4593_v49, %v4592_v25  ;;  %vm4597_vm14 = vcmp.lt.s32.totalorder %v12863_v53, 3  ;;  %vm4598_vm7 = vcmp.lt.s32.totalorder %v12863_v53, 4  ;;  %v4579_v16 = vshrl.u32 %v16166_v40, %v4578_v18 }
 0x59d   : > { %v4416_v33 = vadd.s32 536870912, %v4415_v3  ;;  %v4603_v15 = vsel %vm4595_vm12, %v4582_v42, %v4585_v20  ;;  %v4474_v30 = vsub.s32 32, %v12886_v52  ;;  %v4600_v55 = vsel %vm4598_vm7, %v4588_v6, 2102212464 }
 0x59e   : > { %v4604_v24 = vsel %vm4598_vm7, %v4591_v35, 920167782  ;;  %v4607_v63 = vsel %vm4595_vm12, %v4585_v20, %v4588_v6  ;;  %v4608_v12 = vsel %vm4598_vm7, %v4594_v41, 1326507024  ;;  %vm4596_vm5 = vcmp.lt.s32.totalorder %v12863_v53, 2 }
 0x59f   : > { %v12909_v22 = vshrl.u32 %v4416_v33, 30  ;;  %v4605_v9 = vsel %vm4597_vm14, %v4588_v6, %v4604_v24  ;;  %v4609_v0 = vsel %vm4597_vm14, %v4591_v35, %v4608_v12  ;;  %v4599_v28 = vsel %vm4595_vm12, %v4579_v16, %v4582_v42 }
 0x5a0   : > { %v4606_v10 = vsel %vm4596_vm5, %v4603_v15, %v4605_v9  ;;  %v4610_v50 = vsel %vm4596_vm5, %v4607_v63, %v4609_v0  ;;  %v12922_v61 = vshll.u32 %v4467_v51, 8  ;;  %v4601_v59 = vsel %vm4597_vm14, %v4585_v20, %v4600_v55 }
 0x5a1   : > { %v4418_v36 = vshll.u32 %v12909_v22, 30  ;;  %v12930_v8 = vmul.u32.u64.low %v12876_v11, %v4610_v50  ;;  %v12931_v18 = vmul.u32.u64.high %v12876_v11, %v4610_v50, %v12930_v8  ;;  %v4477_v60 = vshrl.u32 %v16399_v39, %v4474_v30 }
 0x5a2   : > { %v12934_v57 = vmul.u32.u64.low %v12876_v11, %v4606_v10  ;;  %v12935_v48 = vmul.u32.u64.high %v12876_v11, %v4606_v10, %v12934_v57  ;;  %v4670_v51 = vand.u32 2139095040, %v12882_v14  ;;  %v4476_v19 = vshll.u32 %v16166_v40, %v12886_v52 }
 0x5a3   : > { %v12940_v13 = vsub.s32 %v4415_v3, %v4418_v36  ;;  %v4480_v37 = vshrl.u32 %v16400_v54, %v4474_v30  ;;  %vm4491_vm9 = vcmp.lt.s32.totalorder %v12878_v62, 1  ;;  %v4602_v26 = vsel %vm4596_vm5, %v4599_v28, %v4601_v59 }
 0x5a4   : > { %v4479_v4 = vshll.u32 %v16399_v39, %v12886_v52  ;;  %v4482_v38 = vshll.u32 %v16400_v54, %v12886_v52  ;;  %v4483_v56 = vshrl.u32 %v16159_v7, %v4474_v30  ;;  %vm4620_vm6 = vc.u32 %v12931_v18, %v12934_v57 }
 0x5a5   : > { %v4421_v25 = vsub.s32 0, %v12940_v13  ;;  %v4478_v49 = vor.u32 %v4477_v60, %v4476_v19  ;;  %v4485_v3 = vshll.u32 %v16159_v7, %v12886_v52  ;;  %v4621_v53 = vadd.s32 1, %v12935_v48 }
 0x5a6   : > { %v4481_v42 = vor.u32 %v4480_v37, %v4479_v4  ;;  %v4484_v20 = vor.u32 %v4483_v56, %v4482_v38  ;;  %v4486_v6 = vshrl.u32 %v16401_v1, %v4474_v30  ;;  %v4618_v41 = vmul.u32 %v12876_v11, %v4602_v26 }
 0x5a7   : > { %v8289_v35 = vmin.u32 %v4421_v25, %v12940_v13  ;;  %v4488_v33 = vshll.u32 %v16401_v1, %v12886_v52  ;;  %v4489_v16 = vshrl.u32 %v16402_v2, %v4474_v30  ;;  %v4622_v15 = vsel %vm4620_vm6, %v4621_v53, %v12935_v48  ;;  %v12987_v25 = vpop.permute.xlu1 %4152 }
 0x5a8   : > { %v4475_v55 = vshrl.u32 %v16166_v40, %v4474_v30  ;;  %v4487_v24 = vor.u32 %v4486_v6, %v4485_v3  ;;  %vm4492_vm11 = vcmp.lt.s32.totalorder %v12878_v62, 2  ;;  %v4623_v12 = vadd.s32 %v4622_v15, %v4618_v41 }
 0x5a9   : > { %v4423_v63 = vclz %v8289_v35  ;;  %v4490_v9 = vor.u32 %v4489_v16, %v4488_v33  ;;  %vm4494_vm8 = vcmp.lt.s32.totalorder %v12878_v62, 4  ;;  %vm4493_vm1 = vcmp.lt.s32.totalorder %v12878_v62, 3 }
 0x5aa   : > { %v4496_v11 = vsel %vm4494_vm8, %v4484_v20, 2102212464  ;;  %v4499_v52 = vsel %vm4491_vm9, %v4478_v49, %v4481_v42  ;;  %v4500_v0 = vsel %vm4494_vm8, %v4487_v24, 920167782  ;;  %v4624_v10 = vadd.s32 536870912, %v4623_v12 }
 0x5ab   : > { %v8290_v28 = vadd.s32 4294967294, %v4423_v63  ;;  %v4501_v50 = vsel %vm4493_vm1, %v4484_v20, %v4500_v0  ;;  %v4503_v30 = vsel %vm4491_vm9, %v4481_v42, %v4484_v20  ;;  %v4495_v36 = vsel %vm4491_vm9, %v4475_v55, %v4478_v49 }
 0x5ac   : > { %v4502_v59 = vsel %vm4492_vm11, %v4499_v52, %v4501_v50  ;;  %v4504_v8 = vsel %vm4494_vm8, %v4490_v9, 1326507024  ;;  %v4671_v48 = vshrl.u32 %v4670_v51, 23  ;;  %v12978_v60 = vshrl.u32 %v4624_v10, 30  ;;  %v13015_v52 = vpop.f32.mrb[13].mxu0 }
 0x5ad   : > { %vm8291_vm4 = vcmp.lt.s32.totalorder %v8290_v28, 0  ;;  %v4497_v19 = vsel %vm4493_vm1, %v4481_v42, %v4496_v11  ;;  %v4505_v37 = vsel %vm4493_vm1, %v4487_v24, %v4504_v8  ;;  %v12996_v20 = vadd.f32 %v12824_v5, %v12987_v25 }
 0x5ae   : > { %v4426_v26 = vsel %vm8291_vm4, 0, %v8290_v28  ;;  %v4506_v4 = vsel %vm4492_vm11, %v4503_v30, %v4505_v37  ;;  %v12983_v38 = vmul.u32.u64.low %v12922_v61, %v4502_v59  ;;  %v12984_v56 = vmul.u32.u64.high %v12922_v61, %v4502_v59, %v12983_v38 }
 0x5af   : > { %v4431_v49 = vsub.s32 4294967266, %v4426_v26  ;;  %v4626_v3 = vshll.u32 %v12978_v60, 30  ;;  %v12991_v51 = vmul.u32.u64.low %v12922_v61, %v4506_v4  ;;  %v12992_v53 = vmul.u32.u64.high %v12922_v61, %v4506_v4, %v12991_v51  ;;  %16403 = vst [vmem:[#allocation38_spill] sm:$0xff] %v12996_v20 }
 0x5b0   : > { %v8300_v42 = vadd.s32 4294967169, %v4671_v48  ;;  %v4498_v35 = vsel %vm4492_vm11, %v4495_v36, %v4497_v19  ;;  %v16020_v41 = vand.u32 2147483647, %v12882_v14  ;;  %v4517_v33 = vadd.s32 1, %v12984_v56 }
 0x5b1   : > { %v12998_v6 = vsub.s32 %v4623_v12, %v4626_v3  ;;  %v4427_v15 = vsub.s32 32, %v4426_v26  ;;  %v4432_v55 = vadd.s32 127, %v4431_v49  ;;  %v4514_v63 = vmul.u32 %v12922_v61, %v4498_v35 }
 0x5b2   : > { %v4677_v16 = vadd.s32 1, %v8300_v42  ;;  %vm4516_vm3 = vc.u32 %v12992_v53, %v12983_v38  ;;  %v4774_v5 = vand.u32 2139095040, %v12996_v20  ;;  %v4411_v62 = vadd.s32 %v12870_v27, %v12867_v17 }
 0x5b3   : > { %v4629_v24 = vsub.s32 0, %v12998_v6  ;;  %v4518_v9 = vsel %vm4516_vm3, %v4517_v33, %v12984_v56  ;;  %v4674_v11 = vand.u32 8388607, %v16020_v41  ;;  %v4433_v10 = vshll.u32 %v4432_v55, 23 }
 0x5b4   : > { %vm4678_vm2 = vcmp.gt.s32.totalorder %v4677_v16, 0  ;;  %v4519_v0 = vadd.s32 %v4518_v9, %v4514_v63  ;;  %v4429_v28 = vshrl.u32 %v4411_v62, %v4427_v15  ;;  %v4428_v36 = vshll.u32 %v12940_v13, %v4426_v26 }
 0x5b5   : > { %v8297_v12 = vmin.u32 %v4629_v24, %v12998_v6  ;;  %v4679_v61 = vsel %vm4678_vm2, %v4677_v16, 0  ;;  %v4675_v17 = vor.u32 8388608, %v4674_v11  ;;  %v4775_v48 = vshrl.u32 %v4774_v5, 23 }
 0x5b6   : > { %v4681_v30 = vand.u32 31, %v4679_v61  ;;  %v4520_v59 = vadd.s32 536870912, %v4519_v0  ;;  %v4619_v19 = vadd.s32 %v12934_v57, %v12931_v18  ;;  %v13022_v4 = vor.u32 %v4429_v28, %v4428_v36 }
 0x5b7   : > { %v4631_v50 = vclz %v8297_v12  ;;  %v13024_v56 = vor.u32 4788187, %v4433_v10  ;;  %v13031_v18 = vshll.u32 %v4675_v17, 8  ;;  %v8304_v57 = vadd.s32 4294967169, %v4775_v48 }
 0x5b8   : > { %v4682_v27 = vsub.s32 32, %v4681_v30  ;;  %v13020_v37 = vshrl.u32 %v4520_v59, 30  ;;  %v4684_v35 = vshll.u32 %v16166_v40, %v4681_v30  ;;  %v4680_v16 = vshrl.u32 %v4679_v61, 5 }
 0x5b9   : > { %v8298_v8 = vadd.s32 4294967294, %v4631_v50  ;;  %v4687_v15 = vshll.u32 %v16399_v39, %v4681_v30  ;;  %v4690_v55 = vshll.u32 %v16400_v54, %v4681_v30  ;;  %v4693_v62 = vshll.u32 %v16159_v7, %v4681_v30 }
 0x5ba   : > { %v4685_v49 = vshrl.u32 %v16399_v39, %v4682_v27  ;;  %v4522_v13 = vshll.u32 %v13020_v37, 30  ;;  %v4688_v26 = vshrl.u32 %v16400_v54, %v4682_v27  ;;  %v4691_v51 = vshrl.u32 %v16159_v7, %v4682_v27 }
 0x5bb   : > { %vm8299_vm15 = vcmp.lt.s32.totalorder %v8298_v8, 0  ;;  %v4694_v28 = vshrl.u32 %v16401_v1, %v4682_v27  ;;  %v4435_v10 = vand.u32 2147483647, %v13024_v56  ;;  %v4697_v61 = vshrl.u32 %v16402_v2, %v4682_v27 }
 0x5bc   : > { %v4634_v3 = vsel %vm8299_vm15, 0, %v8298_v8  ;;  %v13033_v33 = vsub.s32 %v4519_v0, %v4522_v13  ;;  %v4686_v5 = vor.u32 %v4685_v49, %v4684_v35  ;;  %v4689_v9 = vor.u32 %v4688_v26, %v4687_v15 }
 0x5bd   : > { %v4639_v42 = vsub.s32 4294967266, %v4634_v3  ;;  %v4635_v24 = vsub.s32 32, %v4634_v3  ;;  %v4692_v11 = vor.u32 %v4691_v51, %v4690_v55  ;;  %v4696_v0 = vshll.u32 %v16401_v1, %v4681_v30 }
 0x5be   : > { %v4525_v12 = vsub.s32 0, %v13033_v33  ;;  %v4781_v50 = vadd.s32 1, %v8304_v57  ;;  %v4683_v8 = vshrl.u32 %v16166_v40, %v4682_v27  ;;  %v4695_v17 = vor.u32 %v4694_v28, %v4693_v62 }
 0x5bf   : > { %v4640_v63 = vadd.s32 127, %v4639_v42  ;;  %v4636_v48 = vshll.u32 %v12998_v6, %v4634_v3  ;;  %v4698_v49 = vor.u32 %v4697_v61, %v4696_v0  ;;  %vm4699_vm10 = vcmp.lt.s32.totalorder %v4680_v16, 1 }
 0x5c0   : > { %v8293_v59 = vmin.u32 %v4525_v12, %v13033_v33  ;;  %vm4702_vm0 = vcmp.lt.s32.totalorder %v4680_v16, 4  ;;  %v4637_v13 = vshrl.u32 %v4619_v19, %v4635_v24  ;;  %v4707_v56 = vsel %vm4699_vm10, %v4686_v5, %v4689_v9 }
 0x5c1   : > { %v4641_v36 = vshll.u32 %v4640_v63, 23  ;;  %v4704_v51 = vsel %vm4702_vm0, %v4692_v11, 2102212464  ;;  %vm4700_vm12 = vcmp.lt.s32.totalorder %v4680_v16, 2  ;;  %vm4701_vm13 = vcmp.lt.s32.totalorder %v4680_v16, 3 }
 0x5c2   : > { %v4527_v26 = vclz %v8293_v59  ;;  %v4708_v30 = vsel %vm4702_vm0, %v4695_v17, 920167782  ;;  %v4711_v42 = vsel %vm4699_vm10, %v4689_v9, %v4692_v11  ;;  %v4712_v55 = vsel %vm4702_vm0, %v4698_v49, 1326507024 }
 0x5c3   : > { %v4642_v35 = vor.u32 4788187, %v4641_v36  ;;  %v4709_v15 = vsel %vm4701_vm13, %v4692_v11, %v4708_v30  ;;  %v4703_v63 = vsel %vm4699_vm10, %v4683_v8, %v4686_v5  ;;  %v4705_v27 = vsel %vm4701_vm13, %v4689_v9, %v4704_v51 }
 0x5c4   : > { %v8294_v57 = vadd.s32 4294967294, %v4527_v26  ;;  %v4710_v62 = vsel %vm4700_vm12, %v4707_v56, %v4709_v15  ;;  %v4713_v6 = vsel %vm4701_vm13, %v4695_v17, %v4712_v55  ;;  %v16019_v11 = vand.u32 2147483647, %v12996_v20 }
 0x5c5   : > { %v4714_v3 = vsel %vm4700_vm12, %v4711_v42, %v4713_v6  ;;  %v13049_v19 = vmul.u32.u64.low %v13031_v18, %v4710_v62  ;;  %v13050_v24 = vmul.u32.u64.high %v13031_v18, %v4710_v62, %v13049_v19  ;;  %v4437_v5 = vcvt.s32.f32 %v13022_v4 }
 0x5c6   : > { %vm8295_vm14 = vcmp.lt.s32.totalorder %v8294_v57, 0  ;;  %v13054_v12 = vmul.u32.u64.low %v13031_v18, %v4714_v3  ;;  %v13055_v28 = vmul.u32.u64.high %v13031_v18, %v4714_v3, %v13054_v12  ;;  %v4638_v9 = vor.u32 %v4637_v13, %v4636_v48  ;;  %v13070_v48 = vpop.f32.mrb[13].mxu1 }
 0x5c7   : > { %v4706_v0 = vsel %vm4700_vm12, %v4703_v63, %v4705_v27  ;;  %v13060_v61 = vsel %vm8295_vm14, 0, %v8294_v57  ;;  %vm4782_vm7 = vcmp.gt.s32.totalorder %v4781_v50, 0  ;;  %v13062_v36 = vmul.f32 %v4437_v5, %v4435_v10 }
 0x5c8   : > { %v4643_v59 = vand.u32 2147483647, %v4642_v35  ;;  %v4725_v8 = vadd.s32 1, %v13050_v24  ;;  %v4722_v17 = vmul.u32 %v13031_v18, %v4706_v0  ;;  %vm4724_vm5 = vc.u32 %v13055_v28, %v13049_v19 }
 0x5c9   : > { %v4778_v49 = vand.u32 8388607, %v16019_v11  ;;  %v4783_v4 = vsel %vm4782_vm7, %v4781_v50, 0  ;;  %v4645_v16 = vcvt.s32.f32 %v4638_v9  ;;  %v4535_v13 = vsub.s32 4294967266, %v13060_v61 }
 0x5ca   : > { %v4726_v10 = vsel %vm4724_vm5, %v4725_v8, %v13050_v24  ;;  %v4441_v26 = vsub.s32 4, %v12909_v22  ;;  %v4515_v51 = vadd.s32 %v12983_v38, %v12992_v53  ;;  %v4785_v56 = vand.u32 31, %v4783_v4 }
 0x5cb   : > { %v4727_v18 = vadd.s32 %v4726_v10, %v4722_v17  ;;  %v4439_v30 = vxor.u32 2147483648, %v13062_v36  ;;  %v13078_v42 = vmul.f32 %v4645_v16, %v4643_v59  ;;  %v4531_v50 = vsub.s32 32, %v13060_v61 }
 0x5cc   : > { %v13083_v35 = vadd.f32 %v12838_v46, %v12987_v25  ;;  %v4532_v57 = vshll.u32 %v13033_v33, %v13060_v61  ;;  %v4779_v55 = vor.u32 8388608, %v4778_v49  ;;  %v4786_v63 = vsub.s32 32, %v4785_v56 }
 0x5cd   : > { %v4728_v15 = vadd.s32 536870912, %v4727_v18  ;;  %v4536_v27 = vadd.s32 127, %v4535_v13  ;;  %v4784_v38 = vshrl.u32 %v4783_v4, 5  ;;  %v4788_v53 = vshll.u32 %v16166_v40, %v4785_v56 }
 0x5ce   : > { %16404 = vst [vmem:[#allocation40_spill] sm:$0xff] %v13083_v35  ;;  %v4791_v62 = vshll.u32 %v16399_v39, %v4785_v56  ;;  %v4789_v3 = vshrl.u32 %v16399_v39, %v4786_v63  ;;  %v4792_v24 = vshrl.u32 %v16400_v54, %v4786_v63  ;;  %v4794_v46 = vshll.u32 %v16400_v54, %v4785_v56 }
 0x5cf   : > { %v13089_v6 = vshrl.u32 %v4728_v15, 30  ;;  %v4795_v12 = vshrl.u32 %v16159_v7, %v4786_v63  ;;  %v4797_v33 = vshll.u32 %v16159_v7, %v4785_v56  ;;  %v4798_v5 = vshrl.u32 %v16401_v1, %v4786_v63 }
 0x5d0   : > { %v4801_v9 = vshrl.u32 %v16402_v2, %v4786_v63  ;;  %v4790_v61 = vor.u32 %v4789_v3, %v4788_v53  ;;  %v4793_v59 = vor.u32 %v4792_v24, %v4791_v62  ;;  %v4800_v8 = vshll.u32 %v16401_v1, %v4785_v56 }
 0x5d1   : > { %16405 = vst [vmem:[#allocation11_spill] sm:$0xff] %v13089_v6  ;;  %v4730_v0 = vshll.u32 %v13089_v6, 30  ;;  %vm4357_vm9 = vcmp.lt.s32.totalorder %v12816_v23, 0  ;;  %v4533_v17 = vshrl.u32 %v4515_v51, %v4531_v50  ;;  %v4537_v49 = vshll.u32 %v4536_v27, 23 }
 0x5d2   : > { %v4796_v4 = vor.u32 %v4795_v12, %v4794_v46  ;;  %v4799_v16 = vor.u32 %v4798_v5, %v4797_v33  ;;  %v4802_v10 = vor.u32 %v4801_v9, %v4800_v8  ;;  %vm4803_vm6 = vcmp.lt.s32.totalorder %v4784_v38, 1 }
 0x5d3   : > { %v13101_v13 = vsub.s32 %v4727_v18, %v4730_v0  ;;  %v4819_v15 = vshll.u32 %v4779_v55, 8  ;;  %v4787_v11 = vshrl.u32 %v16166_v40, %v4786_v63  ;;  %vm4806_vm11 = vcmp.lt.s32.totalorder %v4784_v38, 4 }
 0x5d4   : > { %v4811_v41 = vsel %vm4803_vm6, %v4790_v61, %v4793_v59  ;;  %v4982_v53 = vand.u32 2139095040, %v13083_v35  ;;  %vm13108_vm8 = vcmp.le.f32.partialorder %v4355_v58, 0.7853982  ;;  %vm4805_vm1 = vcmp.lt.s32.totalorder %v4784_v38, 3 }
 0x5d5   : > { %v4733_v51 = vsub.s32 0, %v13101_v13  ;;  %v4808_v18 = vsel %vm4806_vm11, %v4796_v4, 2102212464  ;;  %v4812_v50 = vsel %vm4806_vm11, %v4799_v16, 920167782  ;;  %vm4804_vm4 = vcmp.lt.s32.totalorder %v4784_v38, 2 }
 0x5d6   : > { %v4538_v27 = vor.u32 4788187, %v4537_v49  ;;  %v4813_v55 = vsel %vm4805_vm1, %v4796_v4, %v4812_v50  ;;  %v4815_v63 = vsel %vm4803_vm6, %v4793_v59, %v4796_v4  ;;  %v4807_v3 = vsel %vm4803_vm6, %v4787_v11, %v4790_v61  ;;  %v13155_v50 = vpop.f32.mrb[14].mxu0 }
 0x5d7   : > { %v8301_v62 = vmin.u32 %v4733_v51, %v13101_v13  ;;  %v4814_v24 = vsel %vm4804_vm4, %v4811_v41, %v4813_v55  ;;  %v4816_v58 = vsel %vm4806_vm11, %v4802_v10, 1326507024  ;;  %v4809_v46 = vsel %vm4805_vm1, %v4793_v59, %v4808_v18 }
 0x5d8   : > { %v4817_v12 = vsel %vm4805_vm1, %v4799_v16, %v4816_v58  ;;  %v13117_v33 = vmul.u32.u64.low %v4819_v15, %v4814_v24  ;;  %v13118_v5 = vmul.u32.u64.high %v4819_v15, %v4814_v24, %v13117_v33  ;;  %v4983_v8 = vshrl.u32 %v4982_v53, 23 }
 0x5d9   : > { %v4735_v9 = vclz %v8301_v62  ;;  %v4818_v0 = vsel %vm4804_vm4, %v4815_v63, %v4817_v12  ;;  %v13124_v49 = vadd.f32 %v12826_v32, %v12987_v25  ;;  %vm4565_vm3 = vcmp.lt.s32.totalorder %v12831_v45, 0 }
 0x5da   : > { %v4534_v11 = vor.u32 %v4533_v17, %v4532_v57  ;;  %v13127_v61 = vmul.u32.u64.low %v4819_v15, %v4818_v0  ;;  %v13128_v41 = vmul.u32.u64.high %v4819_v15, %v4818_v0, %v13127_v61  ;;  %v4442_v59 = vsel %vm4357_vm9, %v4441_v26, %v12909_v22 }
 0x5db   : > { %v8302_v4 = vadd.s32 4294967294, %v4735_v9  ;;  %v4810_v16 = vsel %vm4804_vm4, %v4807_v3, %v4809_v46  ;;  %v8312_v10 = vadd.s32 4294967169, %v4983_v8  ;;  %v4440_v32 = vsel %vm4357_vm9, %v4439_v30, %v13062_v36 }
 0x5dc   : > { %v4647_v57 = vxor.u32 2147483648, %v13078_v42  ;;  %v4539_v17 = vand.u32 2147483647, %v4538_v27  ;;  %v4829_v53 = vadd.s32 1, %v13118_v5  ;;  %vm13145_vm2 = vcmp.le.f32.partialorder %v4563_v21, 0.7853982 }
 0x5dd   : > { %v16022_v22 = vand.u32 2147483647, %v13083_v35  ;;  %v4989_v26 = vadd.s32 1, %v8312_v10  ;;  %v4878_v38 = vand.u32 2139095040, %v13124_v49  ;;  %v4444_v18 = vsel %vm13108_vm8, 0, %v4442_v59 }
 0x5de   : > { %v4541_v36 = vcvt.s32.f32 %v4534_v11  ;;  %v4826_v30 = vmul.u32 %v4819_v15, %v4810_v16  ;;  %vm4828_vm15 = vc.u32 %v13128_v41, %v13117_v33  ;;  %v4443_v21 = vsel %vm13108_vm8, %v12816_v23, %v4440_v32 }
 0x5df   : > { %v4649_v27 = vsub.s32 4, %v12978_v60  ;;  %vm4461_vm10 = vcmp.lt.s32.totalorder %v12819_v47, 0  ;;  %vm8303_vm0 = vcmp.lt.s32.totalorder %v8302_v4, 0  ;;  %v4830_v55 = vsel %vm4828_vm15, %v4829_v53, %v13118_v5 }
 0x5e0   : > { %v4648_v15 = vsel %vm4565_vm3, %v4647_v57, %v13078_v42  ;;  %v4542_v63 = vmul.f32 %v4541_v36, %v4539_v17  ;;  %v4831_v62 = vadd.s32 %v4830_v55, %v4826_v30  ;;  %vm4990_vm12 = vcmp.gt.s32.totalorder %v4989_v26, 0 }
 0x5e1   : > { %v4986_v3 = vand.u32 8388607, %v16022_v22  ;;  %v4991_v24 = vsel %vm4990_vm12, %v4989_v26, 0  ;;  %v16021_v56 = vand.u32 2147483647, %v13124_v49  ;;  %v4879_v58 = vshrl.u32 %v4878_v38, 23 }
 0x5e2   : > { %8934 = vcosq.f32 %v4443_v21  ;;  %v13169_v46 = vsel %vm8303_vm0, 0, %v8302_v4  ;;  %v4832_v12 = vadd.s32 536870912, %v4831_v62  ;;  %v4993_v9 = vand.u32 31, %v4991_v24 }
 0x5e3   : > { %8936 = vsinq.f32 %v4443_v21  ;;  %v13171_v5 = vadd.s32 3, %v4444_v18  ;;  %v13176_v42 = vsel %vm4565_vm3, %v4649_v27, %v12978_v60  ;;  %v13181_v0 = vsel %vm13145_vm2, %v12831_v45, %v4648_v15 }
 0x5e4   : > { %v4543_v8 = vxor.u32 2147483648, %v4542_v63  ;;  %v4723_v11 = vadd.s32 %v13049_v19, %v13055_v28  ;;  %v13185_v61 = vshrl.u32 %v4832_v12, 30  ;;  %v4994_v59 = vsub.s32 32, %v4993_v9 }
 0x5e5   : > { %16410 = vst [vmem:[#allocation24_spill] sm:$0xff] %v13171_v5  ;;  %v4743_v4 = vsub.s32 4294967266, %v13169_v46  ;;  %v4987_v16 = vor.u32 8388608, %v4986_v3  ;;  %v8308_v10 = vadd.s32 4294967169, %v4879_v58  ;;  %v13190_v60 = vand.u32 8388607, %v16021_v56 }
 0x5e6   : > { %v4834_v32 = vshll.u32 %v13185_v61, 30  ;;  %v4996_v57 = vshll.u32 %v16166_v40, %v4993_v9  ;;  %v4997_v17 = vshrl.u32 %v16399_v39, %v4994_v59  ;;  %v4999_v53 = vshll.u32 %v16399_v39, %v4993_v9 }
 0x5e7   : > { %v5000_v19 = vshrl.u32 %v16400_v54, %v4994_v59  ;;  %v5002_v28 = vshll.u32 %v16400_v54, %v4993_v9  ;;  %v5003_v26 = vshrl.u32 %v16159_v7, %v4994_v59  ;;  %v5006_v38 = vshrl.u32 %v16401_v1, %v4994_v59 }
 0x5e8   : > { %v4544_v18 = vsel %vm4461_vm10, %v4543_v8, %v4542_v63  ;;  %v13202_v36 = vsub.s32 %v4831_v62, %v4834_v32  ;;  %v4992_v30 = vshrl.u32 %v4991_v24, 5  ;;  %v5005_v21 = vshll.u32 %v16159_v7, %v4993_v9 }
 0x5e9   : > { %v4998_v27 = vor.u32 %v4997_v17, %v4996_v57  ;;  %v5001_v55 = vor.u32 %v5000_v19, %v4999_v53  ;;  %v5004_v15 = vor.u32 %v5003_v26, %v5002_v28  ;;  %v13205_v3 = vshll.u32 %v4987_v16, 8 }
 0x5ea   : > { %v4837_v58 = vsub.s32 0, %v13202_v36  ;;  %v5007_v12 = vor.u32 %v5006_v38, %v5005_v21  ;;  %v5008_v56 = vshll.u32 %v16401_v1, %v4993_v9  ;;  %v5009_v22 = vshrl.u32 %v16402_v2, %v4994_v59  ;;  %v13232_v21 = vpop.f32.mrb[14].mxu1 }
 0x5eb   : > { %v4739_v29 = vsub.s32 32, %v13169_v46  ;;  %v4744_v63 = vadd.s32 127, %v4743_v4  ;;  %v4883_v62 = vor.u32 8388608, %v13190_v60  ;;  %v4885_v24 = vadd.s32 1, %v8308_v10 }
 0x5ec   : > { %v13212_v8 = vpop.eup %8934  ;;  %v16412_v32 = vand.u32 2147483647, %v12819_v47  ;;  %v16413_v16 = vmov 0  ;;  %v8305_v57 = vmin.u32 %v4837_v58, %v13202_v36  ;;  %v5010_v17 = vor.u32 %v5009_v22, %v5008_v56 }
 0x5ed   : > { %16411 = vst [vmem:[#allocation5_spill] sm:$0xff] %v13212_v8  ;;  %vm5011_vm14 = vcmp.lt.s32.totalorder %v4992_v30, 1  ;;  %vm5014_vm7 = vcmp.lt.s32.totalorder %v4992_v30, 4  ;;  %v13221_v9 = vpop.eup %8936  ;;  %vm5013_vm5 = vcmp.lt.s32.totalorder %v4992_v30, 3  ;;  %v4995_v19 = vshrl.u32 %v16166_v40, %v4994_v59 }
 0x5ee   : > { %vm13216_vm13 = vcmp.le.f32.partialorder %v16412_v32, 0.7853982  ;;  %16416 = vst [vmem:[#allocation31_spill] sm:$0xff] %v13221_v9  ;;  %v5016_v4 = vsel %vm5014_vm7, %v5004_v15, 2102212464  ;;  %v5019_v10 = vsel %vm5011_vm14, %v4998_v27, %v5001_v55  ;;  %v4839_v53 = vclz %v8305_v57 }
 0x5ef   : > { %v16414_v16 = vsel %vm13216_vm13, 4294967295, %v16413_v16  ;;  %v5020_v60 = vsel %vm5014_vm7, %v5007_v12, 920167782  ;;  %vm5012_vm9 = vcmp.lt.s32.totalorder %v4992_v30, 2  ;;  %v4740_v22 = vshll.u32 %v13101_v13, %v13169_v46 }
 0x5f0   : > { %16415 = vst [vmem:[#allocation25_spill] sm:$0xff] %v16414_v16  ;;  %v5021_v28 = vsel %vm5013_vm5, %v5004_v15, %v5020_v60  ;;  %v4741_v56 = vshrl.u32 %v4723_v11, %v4739_v29  ;;  %v5023_v38 = vsel %vm5011_vm14, %v5001_v55, %v5004_v15  ;;  %v8306_v58 = vadd.s32 4294967294, %v4839_v53 }
 0x5f1   : > { %v5022_v26 = vsel %vm5012_vm9, %v5019_v10, %v5021_v28  ;;  %v5015_v32 = vsel %vm5011_vm14, %v4995_v19, %v4998_v27  ;;  %v5017_v57 = vsel %vm5013_vm5, %v5001_v55, %v5016_v4  ;;  %v5024_v59 = vsel %vm5014_vm7, %v5010_v17, 1326507024 }
 0x5f2   : > { %v5025_v44 = vsel %vm5013_vm5, %v5007_v12, %v5024_v59  ;;  %v13239_v60 = vmul.u32.u64.low %v13205_v3, %v5022_v26  ;;  %v13240_v45 = vmul.u32.u64.high %v13205_v3, %v5022_v26, %v13239_v60  ;;  %vm4886_vm6 = vcmp.gt.s32.totalorder %v4885_v24, 0 }
 0x5f3   : > { %v4745_v29 = vshll.u32 %v4744_v63, 23  ;;  %vm8307_vm11 = vcmp.lt.s32.totalorder %v8306_v58, 0  ;;  %v5026_v13 = vsel %vm5012_vm9, %v5023_v38, %v5025_v44  ;;  %v4887_v46 = vsel %vm4886_vm6, %v4885_v24, 0 }
 0x5f4   : > { %v4742_v11 = vor.u32 %v4741_v56, %v4740_v22  ;;  %v13244_v15 = vsel %vm8307_vm11, 0, %v8306_v58  ;;  %v13247_v27 = vmul.u32.u64.low %v13205_v3, %v5026_v13  ;;  %v13248_v55 = vmul.u32.u64.high %v13205_v3, %v5026_v13, %v13247_v27 }
 0x5f5   : > { %8938 = vcosq.f32 %v13181_v0  ;;  %v4847_v12 = vsub.s32 4294967266, %v13244_v15  ;;  %v5018_v17 = vsel %vm5012_vm9, %v5015_v32, %v5017_v57  ;;  %v4889_v4 = vand.u32 31, %v4887_v46 }
 0x5f6   : > { %v13256_v63 = vsel %vm13216_vm13, %v12819_v47, %v4544_v18  ;;  %v4827_v44 = vadd.s32 %v13117_v33, %v13128_v41  ;;  %v5037_v24 = vadd.s32 1, %v13240_v45  ;;  %v13263_v10 = vadd.f32 %v12842_v34, %v12987_v25 }
 0x5f7   : > { %v4746_v53 = vor.u32 4788187, %v4745_v29  ;;  %v4848_v19 = vadd.s32 127, %v4847_v12  ;;  %v4890_v28 = vsub.s32 32, %v4889_v4  ;;  %v13265_v30 = vshll.u32 %v4883_v62, 8 }
 0x5f8   : > { %v4749_v22 = vcvt.s32.f32 %v4742_v11  ;;  %v5034_v56 = vmul.u32 %v13205_v3, %v5018_v17  ;;  %vm5036_vm8 = vc.u32 %v13248_v55, %v13239_v60  ;;  %v13270_v18 = vshrl.u32 %v4887_v46, 5 }
 0x5f9   : > { %v5038_v33 = vsel %vm5036_vm8, %v5037_v24, %v13240_v45  ;;  %v4892_v41 = vshll.u32 %v16166_v40, %v4889_v4  ;;  %v4895_v34 = vshll.u32 %v16399_v39, %v4889_v4  ;;  %v4898_v25 = vshll.u32 %v16400_v54, %v4889_v4 }
 0x5fa   : > { %v5039_v26 = vadd.s32 %v5038_v33, %v5034_v56  ;;  %v4893_v62 = vshrl.u32 %v16399_v39, %v4890_v28  ;;  %v4896_v38 = vshrl.u32 %v16400_v54, %v4890_v28  ;;  %v4899_v3 = vshrl.u32 %v16159_v7, %v4890_v28 }
 0x5fb   : > { %v4843_v58 = vsub.s32 32, %v13244_v15  ;;  %v4849_v32 = vshll.u32 %v4848_v19, 23  ;;  %v4901_v57 = vshll.u32 %v16159_v7, %v4889_v4  ;;  %v4902_v45 = vshrl.u32 %v16401_v1, %v4890_v28 }
 0x5fc   : > { %v5040_v59 = vadd.s32 536870912, %v5039_v26  ;;  %v4894_v29 = vor.u32 %v4893_v62, %v4892_v41  ;;  %v4897_v13 = vor.u32 %v4896_v38, %v4895_v34  ;;  %v4900_v46 = vor.u32 %v4899_v3, %v4898_v25 }
 0x5fd   : > { %v4747_v11 = vand.u32 2147483647, %v4746_v53  ;;  %v4903_v27 = vor.u32 %v4902_v45, %v4901_v57  ;;  %v4904_v12 = vshll.u32 %v16401_v1, %v4889_v4  ;;  %v4905_v17 = vshrl.u32 %v16402_v2, %v4890_v28 }
 0x5fe   : > { %v13284_v24 = vshrl.u32 %v5040_v59, 30  ;;  %vm4907_vm1 = vcmp.lt.s32.totalorder %v13270_v18, 1  ;;  %vm4910_vm4 = vcmp.lt.s32.totalorder %v13270_v18, 4  ;;  %v5086_v19 = vand.u32 2139095040, %v13263_v10 }
 0x5ff   : > { %v13289_v56 = vpop.eup %8938  ;;  %v4845_v33 = vshrl.u32 %v4827_v44, %v4843_v58  ;;  %v4906_v41 = vor.u32 %v4905_v17, %v4904_v12  ;;  %vm4909_vm3 = vcmp.lt.s32.totalorder %v13270_v18, 3  ;;  %v4916_v53 = vsel %vm4910_vm4, %v4903_v27, 920167782 }
 0x600   : > { %16417 = vst [vmem:[#allocation17_spill] sm:$0xff] %v13289_v56  ;;  %v4850_v4 = vor.u32 4788187, %v4849_v32  ;;  %v5042_v34 = vshll.u32 %v13284_v24, 30  ;;  %v4915_v25 = vsel %vm4907_vm1, %v4894_v29, %v4897_v13  ;;  %v4917_v62 = vsel %vm4909_vm3, %v4900_v46, %v4916_v53 }
 0x601   : > { %v4750_v38 = vmul.f32 %v4749_v22, %v4747_v11  ;;  %v4844_v3 = vshll.u32 %v13202_v36, %v13244_v15  ;;  %vm4908_vm15 = vcmp.lt.s32.totalorder %v13270_v18, 2  ;;  %v4919_v44 = vsel %vm4907_vm1, %v4897_v13, %v4900_v46 }
 0x602   : > { %vm16063_vm0 = vcmp.lt.s32.totalorder %v12882_v14, 0  ;;  %vm4773_vm12 = vcmp.lt.s32.totalorder %v12996_v20, 0  ;;  %v13306_v58 = vsub.s32 %v5039_v26, %v5042_v34  ;;  %v4891_v32 = vshrl.u32 %v16166_v40, %v4890_v28 }
 0x603   : > { %v4912_v57 = vsel %vm4910_vm4, %v4900_v46, 2102212464  ;;  %v4920_v22 = vsel %vm4910_vm4, %v4906_v41, 1326507024  ;;  %v4846_v36 = vor.u32 %v4845_v33, %v4844_v3  ;;  %v4918_v15 = vsel %vm4908_vm15, %v4915_v25, %v4917_v62 }
 0x604   : > { %v4921_v45 = vsel %vm4909_vm3, %v4903_v27, %v4920_v22  ;;  %v5087_v59 = vshrl.u32 %v5086_v19, 23  ;;  %v4851_v11 = vand.u32 2147483647, %v4850_v4  ;;  %v5045_v26 = vsub.s32 0, %v13306_v58 }
 0x605   : > { %v4911_v28 = vsel %vm4907_vm1, %v4891_v32, %v4894_v29  ;;  %v4922_v46 = vsel %vm4908_vm15, %v4919_v44, %v4921_v45  ;;  %v4913_v12 = vsel %vm4909_vm3, %v4897_v13, %v4912_v57  ;;  %v16026_v29 = vand.u32 2147483647, %v13263_v10 }
 0x606   : > { %v13325_v17 = vmul.u32.u64.low %v13265_v30, %v4922_v46  ;;  %v13326_v33 = vmul.u32.u64.high %v13265_v30, %v4922_v46, %v13325_v17  ;;  %v8316_v41 = vadd.s32 4294967169, %v5087_v59  ;;  %v8313_v27 = vmin.u32 %v5045_v26, %v13306_v58 }
 0x607   : > { %v13330_v19 = vmul.u32.u64.low %v13265_v30, %v4918_v15  ;;  %v13331_v53 = vmul.u32.u64.high %v13265_v30, %v4918_v15, %v13330_v19  ;;  %v4751_v4 = vxor.u32 2147483648, %v4750_v38  ;;  %v4853_v34 = vcvt.s32.f32 %v4846_v36 }
 0x608   : > { %v4857_v25 = vsub.s32 4, %v13185_v61  ;;  %v5093_v62 = vadd.s32 1, %v8316_v41  ;;  %8940 = vsinq.f32 %v13181_v0  ;;  %v5047_v3 = vclz %v8313_v27  ;;  %v13350_v0 = vpop.f32.mrb[15].mxu0 }
 0x609   : > { %v4914_v44 = vsel %vm4908_vm15, %v4911_v28, %v4913_v12  ;;  %8942 = vcosq.f32 %v13256_v63  ;;  %v13343_v32 = vmul.f32 %v4853_v34, %v4851_v11  ;;  %vm4932_vm14 = vc.u32 %v13326_v33, %v13330_v19  ;;  %v13366_v12 = vpop.permute.xlu0 %4157 }
 0x60a   : > { %vm5094_vm7 = vcmp.gt.s32.totalorder %v5093_v62, 0  ;;  %v8314_v57 = vadd.s32 4294967294, %v5047_v3  ;;  %v4933_v22 = vadd.s32 1, %v13331_v53  ;;  %v5090_v36 = vand.u32 8388607, %v16026_v29 }
 0x60b   : > { %v5095_v15 = vsel %vm5094_vm7, %v5093_v62, 0  ;;  %v13354_v18 = vsel %vm16063_vm0, %v4751_v4, %v4750_v38  ;;  %v13359_v45 = vsel %vm4773_vm12, %v4857_v25, %v13185_v61  ;;  %v4930_v59 = vmul.u32 %v13265_v30, %v4914_v44 }
 0x60c   : > { %v5097_v11 = vand.u32 31, %v5095_v15  ;;  %v5035_v26 = vadd.s32 %v13239_v60, %v13248_v55  ;;  %vm8315_vm5 = vcmp.lt.s32.totalorder %v8314_v57, 0  ;;  %v4934_v46 = vsel %vm4932_vm14, %v4933_v22, %v13331_v53 }
 0x60d   : > { %v5050_v17 = vsel %vm8315_vm5, 0, %v8314_v57  ;;  %v4935_v41 = vadd.s32 %v4934_v46, %v4930_v59  ;;  %v5091_v4 = vor.u32 8388608, %v5090_v36  ;;  %v13372_v34 = vadd.f32 %v12858_v31, %v13366_v12 }
 0x60e   : > { %v5098_v27 = vsub.s32 32, %v5097_v11  ;;  %v5055_v61 = vsub.s32 4294967266, %v5050_v17  ;;  %v5100_v30 = vshll.u32 %v16166_v40, %v5097_v11  ;;  %v5103_v53 = vshll.u32 %v16399_v39, %v5097_v11 }
 0x60f   : > { %16418 = vst [vmem:[#allocation19_spill] sm:$0xff] %v13372_v34  ;;  %v4936_v60 = vadd.s32 536870912, %v4935_v41  ;;  %v5096_v3 = vshrl.u32 %v5095_v15, 5  ;;  %v5106_v44 = vshll.u32 %v16400_v54, %v5097_v11  ;;  %v5051_v22 = vsub.s32 32, %v5050_v17 }
 0x610   : > { %v5101_v55 = vshrl.u32 %v16399_v39, %v5098_v27  ;;  %v5104_v25 = vshrl.u32 %v16400_v54, %v5098_v27  ;;  %v5056_v62 = vadd.s32 127, %v5055_v61  ;;  %v5107_v57 = vshrl.u32 %v16159_v7, %v5098_v27 }
 0x611   : > { %v13379_v36 = vshrl.u32 %v4936_v60, 30  ;;  %v5109_v38 = vshll.u32 %v16159_v7, %v5097_v11  ;;  %v5110_v28 = vshrl.u32 %v16401_v1, %v5098_v27  ;;  %v16422_v15 = vand.u32 2147483647, %v12882_v14 }
 0x612   : > { %v5102_v59 = vor.u32 %v5101_v55, %v5100_v30  ;;  %v5105_v46 = vor.u32 %v5104_v25, %v5103_v53  ;;  %v13381_v31 = vpop.eup %8940  ;;  %v5057_v29 = vshll.u32 %v5056_v62, 23  ;;  %v5108_v13 = vor.u32 %v5107_v57, %v5106_v44 }
 0x613   : > { %16419 = vst [vmem:[#allocation34_spill] sm:$0xff] %v13379_v36  ;;  %16420 = vst [vmem:[#allocation13_spill] sm:$0xff] %v13381_v31  ;;  %v13385_v56 = vpop.eup %8942  ;;  %vm13389_vm9 = vcmp.le.f32.partialorder %v16422_v15, 0.7853982  ;;  %v16425_v60 = vand.u32 2147483647, %v12996_v20  ;;  %v5112_v53 = vshll.u32 %v16401_v1, %v5097_v11  ;;  %v5113_v25 = vshrl.u32 %v16402_v2, %v5098_v27 }
 0x614   : > { %16421 = vst [vmem:[#allocation18_spill] sm:$0xff] %v13385_v56  ;;  %v4938_v55 = vshll.u32 %v13379_v36, 30  ;;  %v5131_v62 = vshll.u32 %v5091_v4, 8  ;;  %vm4981_vm11 = vcmp.lt.s32.totalorder %v13083_v35, 0  ;;  %v5052_v44 = vshll.u32 %v13306_v58, %v5050_v17 }
 0x615   : > { %vm13395_vm6 = vcmp.le.f32.partialorder %v16425_v60, 0.7853982  ;;  %v5099_v57 = vshrl.u32 %v16166_v40, %v5098_v27  ;;  %v5111_v15 = vor.u32 %v5110_v28, %v5109_v38  ;;  %v5190_v31 = vand.u32 2139095040, %v13372_v34 }
 0x616   : > { %v13406_v60 = vsub.s32 %v4935_v41, %v4938_v55  ;;  %v5114_v23 = vor.u32 %v5113_v25, %v5112_v53  ;;  %vm5115_vm8 = vcmp.lt.s32.totalorder %v5096_v3, 1  ;;  %vm5118_vm1 = vcmp.lt.s32.totalorder %v5096_v3, 4 }
 0x617   : > { %v5053_v8 = vshrl.u32 %v5035_v26, %v5051_v22  ;;  %v5058_v9 = vor.u32 4788187, %v5057_v29  ;;  %v5120_v11 = vsel %vm5118_vm1, %v5108_v13, 2102212464  ;;  %v5123_v5 = vsel %vm5115_vm8, %v5102_v59, %v5105_v46 }
 0x618   : > { %v4941_v4 = vsub.s32 0, %v13406_v60  ;;  %vm5117_vm4 = vcmp.lt.s32.totalorder %v5096_v3, 3  ;;  %v5124_v6 = vsel %vm5118_vm1, %v5111_v15, 920167782  ;;  %v5127_v36 = vsel %vm5115_vm8, %v5105_v46, %v5108_v13 }
 0x619   : > { %v16428_v58 = vand.u32 2147483647, %v13083_v35  ;;  %vm5116_vm15 = vcmp.lt.s32.totalorder %v5096_v3, 2  ;;  %v5119_v38 = vsel %vm5115_vm8, %v5099_v57, %v5102_v59  ;;  %v5125_v17 = vsel %vm5117_vm4, %v5108_v13, %v5124_v6  ;;  %v13425_v6 = vpop.f32.mrb[15].mxu1 }
 0x61a   : > { %v5128_v41 = vsel %vm5118_vm1, %v5114_v23, 1326507024  ;;  %v8309_v26 = vmin.u32 %v4941_v4, %v13406_v60  ;;  %v5121_v29 = vsel %vm5117_vm4, %v5105_v46, %v5120_v11  ;;  %v5126_v27 = vsel %vm5116_vm15, %v5123_v5, %v5125_v17 }
 0x61b   : > { %vm13411_vm3 = vcmp.le.f32.partialorder %v16428_v58, 0.7853982  ;;  %v5129_v22 = vsel %vm5117_vm4, %v5111_v15, %v5128_v41  ;;  %v5054_v55 = vor.u32 %v5053_v8, %v5052_v44  ;;  %v5191_v59 = vshrl.u32 %v5190_v31, 23 }
 0x61c   : > { %v5130_v53 = vsel %vm5116_vm15, %v5127_v36, %v5129_v22  ;;  %v13418_v25 = vmul.u32.u64.low %v5131_v62, %v5126_v27  ;;  %v13419_v56 = vmul.u32.u64.high %v5131_v62, %v5126_v27, %v13418_v25  ;;  %v4943_v58 = vclz %v8309_v26 }
 0x61d   : > { %v13422_v16 = vmul.u32.u64.low %v5131_v62, %v5130_v53  ;;  %v13423_v47 = vmul.u32.u64.high %v5131_v62, %v5130_v53, %v13422_v16  ;;  %8944 = vsinq.f32 %v13256_v63  ;;  %v4755_v23 = vsel %vm13389_vm9, %v12882_v14, %v13354_v18 }
 0x61e   : > { %v4860_v5 = vsel %vm13395_vm6, 0, %v13359_v45  ;;  %v5122_v8 = vsel %vm5116_vm15, %v5119_v38, %v5121_v29  ;;  %v5059_v13 = vand.u32 2147483647, %v5058_v9  ;;  %v16431_v16 = vsub.s32 4, %v13284_v24 }
 0x61f   : > { %v8310_v46 = vadd.s32 4294967294, %v4943_v58  ;;  %v8320_v63 = vadd.s32 4294967169, %v5191_v59  ;;  %v16432_v31 = vxor.u32 2147483648, %v13343_v32  ;;  %v5141_v44 = vadd.s32 1, %v13419_v56 }
 0x620   : > { %v5066_v36 = vsel %vm4981_vm11, %v16431_v16, %v13284_v24  ;;  %v16041_v45 = vand.u32 2147483647, %v13372_v34  ;;  %v13450_v9 = vadd.f32 %v12924_v43, %v13366_v12  ;;  %v5061_v3 = vcvt.s32.f32 %v5054_v55 }
 0x621   : > { %v4856_v18 = vsel %vm4773_vm12, %v16432_v31, %v13343_v32  ;;  %vm8311_vm14 = vcmp.lt.s32.totalorder %v8310_v46, 0  ;;  %v5138_v57 = vmul.u32 %v5131_v62, %v5122_v8  ;;  %vm5140_vm7 = vc.u32 %v13423_v47, %v13418_v25 }
 0x622   : > { %16433 = vst [vmem:[#allocation23_spill] sm:$0xff] %v13450_v9  ;;  %8946 = vcosq.f32 %v4755_v23  ;;  %v13454_v24 = vsel %vm8311_vm14, 0, %v8310_v46  ;;  %v5142_v15 = vsel %vm5140_vm7, %v5141_v44, %v13419_v56  ;;  %v5197_v32 = vadd.s32 1, %v8320_v63 }
 0x623   : > { %v13460_v11 = vsel %vm13395_vm6, %v12996_v20, %v4856_v18  ;;  %v13462_v4 = vmul.f32 %v5061_v3, %v5059_v13  ;;  %v5068_v43 = vsel %vm13411_vm3, 0, %v5066_v36  ;;  %v5143_v62 = vadd.s32 %v5142_v15, %v5138_v57 }
 0x624   : > { %v4951_v38 = vsub.s32 4294967266, %v13454_v24  ;;  %v5194_v17 = vand.u32 8388607, %v16041_v45  ;;  %vm5198_vm12 = vcmp.gt.s32.totalorder %v5197_v32, 0  ;;  %v5398_v56 = vand.u32 2139095040, %v13450_v9 }
 0x625   : > { %v16434_v30 = vsel %vm13145_vm2, 0, %v13176_v42  ;;  %8948 = vsinq.f32 %v4755_v23  ;;  %v5144_v26 = vadd.s32 536870912, %v5143_v62  ;;  %v5199_v29 = vsel %vm5198_vm12, %v5197_v32, 0 }
 0x626   : > { %v13474_v41 = vadd.s32 3, %v16434_v30  ;;  %8950 = vcosq.f32 %v13460_v11  ;;  %v13477_v27 = vadd.s32 3, %v4860_v5  ;;  %v13479_v22 = vadd.s32 3, %v5068_v43 }
 0x627   : > { %v5201_v55 = vand.u32 31, %v5199_v29  ;;  %v4931_v58 = vadd.s32 %v13330_v19, %v13326_v33  ;;  %v13484_v51 = vshrl.u32 %v5144_v26, 30  ;;  %v13487_v59 = vpop.eup %8944  ;;  %v4952_v23 = vadd.s32 127, %v4951_v38 }
 0x628   : > { %16435 = vst [vmem:[#allocation14_spill] sm:$0xff] %v13474_v41  ;;  %16436 = vst [vmem:[#allocation33_spill] sm:$0xff] %v13477_v27  ;;  %v5195_v8 = vor.u32 8388608, %v5194_v17  ;;  %v5399_v16 = vshrl.u32 %v5398_v56, 23  ;;  %v5200_v36 = vshrl.u32 %v5199_v29, 5  ;;  %v4947_v30 = vsub.s32 32, %v13454_v24 }
 0x629   : > { %16437 = vst [vmem:[#allocation39_spill] sm:$0xff] %v13479_v22  ;;  %16438 = vst [vmem:[#allocation6_spill] sm:$0xff] %v13484_v51  ;;  %v5202_v13 = vsub.s32 32, %v5201_v55  ;;  %v5146_v5 = vshll.u32 %v13484_v51, 30  ;;  %v5204_v46 = vshll.u32 %v16166_v40, %v5201_v55  ;;  %v5207_v63 = vshll.u32 %v16399_v39, %v5201_v55 }
 0x62a   : > { %v5210_v19 = vshll.u32 %v16400_v54, %v5201_v55  ;;  %v5213_v3 = vshll.u32 %v16159_v7, %v5201_v55  ;;  %v5216_v15 = vshll.u32 %v16401_v1, %v5201_v55  ;;  %v4953_v45 = vshll.u32 %v4952_v23, 23 }
 0x62b   : > { %v5205_v31 = vshrl.u32 %v16399_v39, %v5202_v13  ;;  %v5208_v33 = vshrl.u32 %v16400_v54, %v5202_v13  ;;  %v5211_v18 = vshrl.u32 %v16159_v7, %v5202_v13  ;;  %v13496_v44 = vsub.s32 %v5143_v62, %v5146_v5 }
 0x62c   : > { %v5214_v57 = vshrl.u32 %v16401_v1, %v5202_v13  ;;  %v13501_v32 = vpop.eup %8946  ;;  %v5217_v56 = vshrl.u32 %v16402_v2, %v5202_v13  ;;  %v5235_v62 = vshll.u32 %v5195_v8, 8  ;;  %v4948_v5 = vshll.u32 %v13406_v60, %v13454_v24 }
 0x62d   : > { %v5206_v43 = vor.u32 %v5205_v31, %v5204_v46  ;;  %v5209_v38 = vor.u32 %v5208_v33, %v5207_v63  ;;  %v5212_v17 = vor.u32 %v5211_v18, %v5210_v19  ;;  %v5149_v26 = vsub.s32 0, %v13496_v44 }
 0x62e   : > { %v5215_v29 = vor.u32 %v5214_v57, %v5213_v3  ;;  %v5218_v42 = vor.u32 %v5217_v56, %v5216_v15  ;;  %v8328_v53 = vadd.s32 4294967169, %v5399_v16  ;;  %v5203_v63 = vshrl.u32 %v16166_v40, %v5202_v13 }
 0x62f   : > { %v13508_v55 = vpop.eup %8948  ;;  %v8317_v46 = vmin.u32 %v5149_v26, %v13496_v44  ;;  %vm5219_vm2 = vcmp.lt.s32.totalorder %v5200_v36, 1  ;;  %vm5222_vm5 = vcmp.lt.s32.totalorder %v5200_v36, 4  ;;  %vm5221_vm6 = vcmp.lt.s32.totalorder %v5200_v36, 3 }
 0x630   : > { %v13512_v31 = vpop.eup %8950  ;;  %v5224_v33 = vsel %vm5222_vm5, %v5212_v17, 2102212464  ;;  %v5227_v19 = vsel %vm5219_vm2, %v5206_v43, %v5209_v38  ;;  %v5228_v8 = vsel %vm5222_vm5, %v5215_v29, 920167782  ;;  %vm5220_vm8 = vcmp.lt.s32.totalorder %v5200_v36, 2 }
 0x631   : > { %16439 = vst [vmem:[#allocation8_spill] sm:$0xff] %v13512_v31  ;;  %v5151_v18 = vclz %v8317_v46  ;;  %v5229_v60 = vsel %vm5221_vm6, %v5212_v17, %v5228_v8  ;;  %v5231_v24 = vsel %vm5219_vm2, %v5209_v38, %v5212_v17  ;;  %v4949_v23 = vshrl.u32 %v4931_v58, %v4947_v30 }
 0x632   : > { %v5223_v16 = vsel %vm5219_vm2, %v5203_v63, %v5206_v43  ;;  %v5230_v3 = vsel %vm5220_vm8, %v5227_v19, %v5229_v60  ;;  %v5232_v57 = vsel %vm5222_vm5, %v5218_v42, 1326507024  ;;  %v5225_v56 = vsel %vm5221_vm6, %v5209_v38, %v5224_v33 }
 0x633   : > { %v8318_v15 = vadd.s32 4294967294, %v5151_v18  ;;  %v5233_v13 = vsel %vm5221_vm6, %v5215_v29, %v5232_v57  ;;  %v5405_v26 = vadd.s32 1, %v8328_v53  ;;  %v4954_v22 = vor.u32 4788187, %v4953_v45  ;;  %v13538_v29 = vpop.permute.xlu1 %4162 }
 0x634   : > { %v5234_v41 = vsel %vm5220_vm8, %v5231_v24, %v5233_v13  ;;  %v13516_v31 = vmul.u32.u64.low %v5235_v62, %v5230_v3  ;;  %v13517_v20 = vmul.u32.u64.high %v5235_v62, %v5230_v3, %v13516_v31  ;;  %v4950_v58 = vor.u32 %v4949_v23, %v4948_v5 }
 0x635   : > { %vm8319_vm1 = vcmp.lt.s32.totalorder %v8318_v15, 0  ;;  %v13520_v46 = vmul.u32.u64.low %v5235_v62, %v5234_v41  ;;  %v13521_v8 = vmul.u32.u64.high %v5235_v62, %v5234_v41, %v13520_v46  ;;  %vm5406_vm4 = vcmp.gt.s32.totalorder %v5405_v26, 0 }
 0x636   : > { %v13523_v43 = vsel %vm8319_vm1, 0, %v8318_v15  ;;  %v5226_v42 = vsel %vm5220_vm8, %v5223_v16, %v5225_v56  ;;  %v5407_v38 = vsel %vm5406_vm4, %v5405_v26, 0  ;;  %8952 = vsinq.f32 %v13460_v11 }
 0x637   : > { %v16440_v45 = vxor.u32 2147483648, %v13462_v4  ;;  %v16441_v17 = vand.u32 2147483647, %v13450_v9  ;;  %v13536_v41 = vadd.f32 %v13015_v52, %v13366_v12  ;;  %v4955_v36 = vand.u32 2147483647, %v4954_v22 }
 0x638   : > { %v5245_v5 = vadd.s32 1, %v13517_v20  ;;  %v5409_v63 = vand.u32 31, %v5407_v38  ;;  %v13543_v11 = vadd.f32 %v13070_v48, %v13366_v12  ;;  %v5159_v33 = vsub.s32 4294967266, %v13523_v43 }
 0x639   : > { %v5064_v53 = vsel %vm4981_vm11, %v16440_v45, %v13462_v4  ;;  %v5402_v30 = vand.u32 8388607, %v16441_v17  ;;  %v5242_v4 = vmul.u32 %v5235_v62, %v5226_v42  ;;  %vm5244_vm11 = vc.u32 %v13521_v8, %v13516_v31 }
 0x63a   : > { %v13550_v52 = vadd.f32 %v13155_v50, %v13538_v29  ;;  %v13555_v22 = vsel %vm13411_vm3, %v13083_v35, %v5064_v53  ;;  %v4957_v19 = vcvt.s32.f32 %v4950_v58  ;;  %v5246_v18 = vsel %vm5244_vm11, %v5245_v5, %v13517_v20 }
 0x63b   : > { %v5410_v48 = vsub.s32 32, %v5409_v63  ;;  %v5139_v12 = vadd.s32 %v13418_v25, %v13423_v47  ;;  %v5247_v62 = vadd.s32 %v5246_v18, %v5242_v4  ;;  %v5403_v60 = vor.u32 8388608, %v5402_v30 }
 0x63c   : > { %16442 = vst [vmem:[#allocation37_spill] sm:$0xff] %v13550_v52  ;;  %v4958_v23 = vmul.f32 %v4957_v19, %v4955_v36  ;;  %v5155_v3 = vsub.s32 32, %v13523_v43  ;;  %v5160_v57 = vadd.s32 127, %v5159_v33  ;;  %v5412_v20 = vshll.u32 %v16166_v40, %v5409_v63 }
 0x63d   : > { %v5413_v50 = vshrl.u32 %v16399_v39, %v5410_v48  ;;  %v5416_v16 = vshrl.u32 %v16400_v54, %v5410_v48  ;;  %v5419_v28 = vshrl.u32 %v16159_v7, %v5410_v48  ;;  %v5248_v15 = vadd.s32 536870912, %v5247_v62 }
 0x63e   : > { %v5415_v56 = vshll.u32 %v16399_v39, %v5409_v63  ;;  %v5418_v47 = vshll.u32 %v16400_v54, %v5409_v63  ;;  %v5421_v25 = vshll.u32 %v16159_v7, %v5409_v63  ;;  %v5422_v13 = vshrl.u32 %v16401_v1, %v5410_v48 }
 0x63f   : > { %v13570_v26 = vshrl.u32 %v5248_v15, 30  ;;  %v5408_v46 = vshrl.u32 %v5407_v38, 5  ;;  %v5424_v58 = vshll.u32 %v16401_v1, %v5409_v63  ;;  %v5425_v42 = vshrl.u32 %v16402_v2, %v5410_v48 }
 0x640   : > { %v5414_v45 = vor.u32 %v5413_v50, %v5412_v20  ;;  %v5417_v53 = vor.u32 %v5416_v16, %v5415_v56  ;;  %v5420_v17 = vor.u32 %v5419_v28, %v5418_v47  ;;  %v5423_v30 = vor.u32 %v5422_v13, %v5421_v25  ;;  %v13574_v36 = vpop.eup %8952 }
 0x641   : > { %16443 = vst [vmem:[#allocation36_spill] sm:$0xff] %v13574_v36  ;;  %vm4877_vm3 = vcmp.lt.s32.totalorder %v13124_v49, 0  ;;  %v4959_v5 = vxor.u32 2147483648, %v4958_v23  ;;  %v5161_v33 = vshll.u32 %v5160_v57, 23  ;;  %v5250_v4 = vshll.u32 %v13570_v26, 30 }
 0x642   : > { %v5426_v19 = vor.u32 %v5425_v42, %v5424_v58  ;;  %v5156_v38 = vshll.u32 %v13496_v44, %v13523_v43  ;;  %v5157_v18 = vshrl.u32 %v5139_v12, %v5155_v3  ;;  %v5443_v63 = vshll.u32 %v5403_v60, 8 }
 0x643   : > { %v5294_v15 = vand.u32 2139095040, %v13536_v41  ;;  %v13581_v50 = vsub.s32 %v5247_v62, %v5250_v4  ;;  %v5411_v16 = vshrl.u32 %v16166_v40, %v5410_v48  ;;  %vm5427_vm15 = vcmp.lt.s32.totalorder %v5408_v46, 1 }
 0x644   : > { %vm5430_vm14 = vcmp.lt.s32.totalorder %v5408_v46, 4  ;;  %v16444_v28 = vand.u32 2147483647, %v13124_v49  ;;  %v5435_v20 = vsel %vm5427_vm15, %v5414_v45, %v5417_v53  ;;  %v5439_v44 = vsel %vm5427_vm15, %v5417_v53, %v5420_v17 }
 0x645   : > { %v5436_v56 = vsel %vm5430_vm14, %v5423_v30, 920167782  ;;  %v5440_v43 = vsel %vm5430_vm14, %v5426_v19, 1326507024  ;;  %v5162_v12 = vor.u32 4788187, %v5161_v33  ;;  %v5158_v60 = vor.u32 %v5157_v18, %v5156_v38 }
 0x646   : > { %vm13586_vm7 = vcmp.le.f32.partialorder %v16444_v28, 0.7853982  ;;  %vm5189_vm12 = vcmp.lt.s32.totalorder %v13372_v34, 0  ;;  %v5253_v62 = vsub.s32 0, %v13581_v50  ;;  %vm5429_vm2 = vcmp.lt.s32.totalorder %v5408_v46, 3 }
 0x647   : > { %v5432_v48 = vsel %vm5430_vm14, %v5420_v17, 2102212464  ;;  %vm5428_vm5 = vcmp.lt.s32.totalorder %v5408_v46, 2  ;;  %v5437_v3 = vsel %vm5429_vm2, %v5420_v17, %v5436_v56  ;;  %v5441_v47 = vsel %vm5429_vm2, %v5423_v30, %v5440_v43 }
 0x648   : > { %v8321_v25 = vmin.u32 %v5253_v62, %v13581_v50  ;;  %v5431_v13 = vsel %vm5427_vm15, %v5411_v16, %v5414_v45  ;;  %v5438_v58 = vsel %vm5428_vm5, %v5435_v20, %v5437_v3  ;;  %v5442_v42 = vsel %vm5428_vm5, %v5439_v44, %v5441_v47 }
 0x649   : > { %v5433_v4 = vsel %vm5429_vm2, %v5417_v53, %v5432_v48  ;;  %v13598_v33 = vmul.u32.u64.low %v5443_v63, %v5442_v42  ;;  %v13599_v19 = vmul.u32.u64.high %v5443_v63, %v5442_v42, %v13598_v33  ;;  %v5295_v28 = vshrl.u32 %v5294_v15, 23 }
 0x64a   : > { %v5163_v24 = vand.u32 2147483647, %v5162_v12  ;;  %v16447_v35 = vand.u32 2147483647, %v13372_v34  ;;  %v5255_v17 = vclz %v8321_v25  ;;  %8954 = vcosq.f32 %v13555_v22 }
 0x64b   : > { %v13607_v30 = vmul.u32.u64.low %v5443_v63, %v5438_v58  ;;  %v13608_v18 = vmul.u32.u64.high %v5443_v63, %v5438_v58, %v13607_v30  ;;  %v4960_v45 = vsel %vm4877_vm3, %v4959_v5, %v4958_v23  ;;  %v5273_v53 = vsub.s32 4, %v13570_v26 }
 0x64c   : > { %vm13603_vm6 = vcmp.le.f32.partialorder %v16447_v35, 0.7853982  ;;  %v8324_v15 = vadd.s32 4294967169, %v5295_v28  ;;  %v5165_v16 = vcvt.s32.f32 %v5158_v60  ;;  %v8322_v20 = vadd.s32 4294967294, %v5255_v17 }
 0x64d   : > { %v5434_v35 = vsel %vm5428_vm5, %v5431_v13, %v5433_v4  ;;  %v16450_v56 = vand.u32 2147483647, %v13536_v41  ;;  %8956 = vsinq.f32 %v13555_v22  ;;  %vm5452_vm8 = vc.u32 %v13599_v19, %v13607_v30 }
 0x64e   : > { %v5301_v43 = vadd.s32 1, %v8324_v15  ;;  %v5502_v12 = vand.u32 2139095040, %v13543_v11  ;;  %v4963_v23 = vsel %vm13586_vm7, %v13124_v49, %v4960_v45  ;;  %v13625_v5 = vmul.f32 %v5165_v16, %v5163_v24 }
 0x64f   : > { %v5298_v44 = vand.u32 8388607, %v16450_v56  ;;  %vm8323_vm1 = vcmp.lt.s32.totalorder %v8322_v20, 0  ;;  %v5453_v46 = vadd.s32 1, %v13608_v18  ;;  %v13631_v22 = vsel %vm5189_vm12, %v5273_v53, %v13570_v26 }
 0x650   : > { %v5258_v62 = vsel %vm8323_vm1, 0, %v8322_v20  ;;  %v5450_v48 = vmul.u32 %v5443_v63, %v5434_v35  ;;  %vm5302_vm4 = vcmp.gt.s32.totalorder %v5301_v43, 0  ;;  %v16046_v25 = vand.u32 2147483647, %v13543_v11 }
 0x651   : > { %v5263_v60 = vsub.s32 4294967266, %v5258_v62  ;;  %v5454_v3 = vsel %vm5452_vm8, %v5453_v46, %v13608_v18  ;;  %v5299_v47 = vor.u32 8388608, %v5298_v44  ;;  %8958 = vcosq.f32 %v4963_v23 }
 0x652   : > { %v5455_v24 = vadd.s32 %v5454_v3, %v5450_v48  ;;  %v5303_v13 = vsel %vm5302_vm4, %v5301_v43, 0  ;;  %v5503_v58 = vshrl.u32 %v5502_v12, 23  ;;  %8960 = vsinq.f32 %v4963_v23 }
 0x653   : > { %v5259_v42 = vsub.s32 32, %v5258_v62  ;;  %v5264_v4 = vadd.s32 127, %v5263_v60  ;;  %v5305_v33 = vand.u32 31, %v5303_v13  ;;  %v5243_v26 = vadd.s32 %v13516_v31, %v13521_v8 }
 0x654   : > { %v5456_v17 = vadd.s32 536870912, %v5455_v24  ;;  %v13641_v53 = vshll.u32 %v5299_v47, 8  ;;  %v13645_v15 = vand.u32 8388607, %v16046_v25  ;;  %v13647_v16 = vpop.eup %8954  ;;  %v5260_v20 = vshll.u32 %v13581_v50, %v5258_v62 }
 0x655   : > { %v5265_v18 = vshll.u32 %v5264_v4, 23  ;;  %v5306_v45 = vsub.s32 32, %v5305_v33  ;;  %16451 = vst [vmem:[#allocation12_spill] sm:$0xff] %v13647_v16  ;;  %v8332_v31 = vadd.s32 4294967169, %v5503_v58  ;;  %v5606_v8 = vand.u32 2139095040, %v13550_v52 }
 0x656   : > { %v13650_v35 = vshrl.u32 %v5456_v17, 30  ;;  %v5261_v56 = vshrl.u32 %v5243_v26, %v5259_v42  ;;  %v5308_v44 = vshll.u32 %v16166_v40, %v5305_v33  ;;  %v5311_v12 = vshll.u32 %v16399_v39, %v5305_v33 }
 0x657   : > { %v5309_v43 = vshrl.u32 %v16399_v39, %v5306_v45  ;;  %v13656_v23 = vpop.eup %8956  ;;  %v5312_v48 = vshrl.u32 %v16400_v54, %v5306_v45  ;;  %v5314_v50 = vshll.u32 %v16400_v54, %v5305_v33  ;;  %v5315_v62 = vshrl.u32 %v16159_v7, %v5306_v45 }
 0x658   : > { %16452 = vst [vmem:[#allocation7_spill] sm:$0xff] %v13656_v23  ;;  %v5458_v46 = vshll.u32 %v13650_v35, 30  ;;  %v5266_v60 = vor.u32 4788187, %v5265_v18  ;;  %v5304_v3 = vshrl.u32 %v5303_v13, 5  ;;  %v5317_v47 = vshll.u32 %v16159_v7, %v5305_v33 }
 0x659   : > { %v5318_v58 = vshrl.u32 %v16401_v1, %v5306_v45  ;;  %v5310_v4 = vor.u32 %v5309_v43, %v5308_v44  ;;  %v5313_v26 = vor.u32 %v5312_v48, %v5311_v12  ;;  %v5316_v17 = vor.u32 %v5315_v62, %v5314_v50 }
 0x65a   : > { %v13664_v42 = vsub.s32 %v5455_v24, %v5458_v46  ;;  %v5262_v25 = vor.u32 %v5261_v56, %v5260_v20  ;;  %v5320_v28 = vshll.u32 %v16401_v1, %v5305_v33  ;;  %v5321_v16 = vshrl.u32 %v16402_v2, %v5306_v45 }
 0x65b   : > { %v5319_v63 = vor.u32 %v5318_v58, %v5317_v47  ;;  %v13668_v23 = vpop.eup %8958  ;;  %v5307_v13 = vshrl.u32 %v16166_v40, %v5306_v45  ;;  %v5507_v36 = vor.u32 8388608, %v13645_v15  ;;  %v5509_v27 = vadd.s32 1, %v8332_v31 }
 0x65c   : > { %v5461_v18 = vsub.s32 0, %v13664_v42  ;;  %v13673_v24 = vpop.eup %8960  ;;  %v5267_v44 = vand.u32 2147483647, %v5266_v60  ;;  %v5322_v43 = vor.u32 %v5321_v16, %v5320_v28  ;;  %vm5323_vm11 = vcmp.lt.s32.totalorder %v5304_v3, 1 }
 0x65d   : > { %vm5326_vm15 = vcmp.lt.s32.totalorder %v5304_v3, 4  ;;  %vm5325_vm14 = vcmp.lt.s32.totalorder %v5304_v3, 3  ;;  %v5331_v56 = vsel %vm5323_vm11, %v5310_v4, %v5313_v26  ;;  %v5269_v12 = vcvt.s32.f32 %v5262_v25 }
 0x65e   : > { %v8329_v20 = vmin.u32 %v5461_v18, %v13664_v42  ;;  %v5328_v33 = vsel %vm5326_vm15, %v5316_v17, 2102212464  ;;  %v5327_v46 = vsel %vm5323_vm11, %v5307_v13, %v5310_v4  ;;  %v5332_v50 = vsel %vm5326_vm15, %v5319_v63, 920167782 }
 0x65f   : > { %v5329_v48 = vsel %vm5325_vm14, %v5313_v26, %v5328_v33  ;;  %vm5324_vm2 = vcmp.lt.s32.totalorder %v5304_v3, 2  ;;  %v5333_v15 = vsel %vm5325_vm14, %v5316_v17, %v5332_v50  ;;  %v5335_v31 = vsel %vm5323_vm11, %v5313_v26, %v5316_v17 }
 0x660   : > { %v5463_v45 = vclz %v8329_v20  ;;  %v13678_v62 = vmul.f32 %v5269_v12, %v5267_v44  ;;  %v5334_v28 = vsel %vm5324_vm2, %v5331_v56, %v5333_v15  ;;  %v5336_v16 = vsel %vm5326_vm15, %v5322_v43, 1326507024 }
 0x661   : > { %v5607_v60 = vshrl.u32 %v5606_v8, 23  ;;  %v5330_v58 = vsel %vm5324_vm2, %v5327_v46, %v5329_v48  ;;  %v5337_v18 = vsel %vm5325_vm14, %v5319_v63, %v5336_v16  ;;  %vm5510_vm5 = vcmp.gt.s32.totalorder %v5509_v27, 0 }
 0x662   : > { %v8330_v47 = vadd.s32 4294967294, %v5463_v45  ;;  %v5338_v25 = vsel %vm5324_vm2, %v5335_v31, %v5337_v18  ;;  %v13682_v4 = vmul.u32.u64.low %v13641_v53, %v5334_v28  ;;  %v13683_v13 = vmul.u32.u64.high %v13641_v53, %v5334_v28, %v13682_v4 }
 0x663   : > { %v5511_v20 = vsel %vm5510_vm5, %v5509_v27, 0  ;;  %v13687_v26 = vmul.u32.u64.low %v13641_v53, %v5338_v25  ;;  %v13688_v17 = vmul.u32.u64.high %v13641_v53, %v5338_v25, %v13687_v26  ;;  %v16050_v44 = vand.u32 2147483647, %v13550_v52 }
 0x664   : > { %vm8331_vm8 = vcmp.lt.s32.totalorder %v8330_v47, 0  ;;  %v5451_v8 = vadd.s32 %v13607_v30, %v13599_v19  ;;  %v5513_v63 = vand.u32 31, %v5511_v20  ;;  %v13693_v43 = vshll.u32 %v5507_v36, 8 }
 0x665   : > { %v5466_v3 = vsel %vm8331_vm8, 0, %v8330_v47  ;;  %v5271_v33 = vxor.u32 2147483648, %v13678_v62  ;;  %v5346_v27 = vmul.u32 %v13641_v53, %v5330_v58  ;;  %v5349_v46 = vadd.s32 1, %v13683_v13 }
 0x666   : > { %v5467_v56 = vsub.s32 32, %v5466_v3  ;;  %v5471_v12 = vsub.s32 4294967266, %v5466_v3  ;;  %v13698_v48 = vshrl.u32 %v5511_v20, 5  ;;  %v5514_v50 = vsub.s32 32, %v5513_v63 }
 0x667   : > { %v8336_v45 = vadd.s32 4294967169, %v5607_v60  ;;  %vm5348_vm1 = vc.u32 %v13688_v17, %v13682_v4  ;;  %v5516_v19 = vshll.u32 %v16166_v40, %v5513_v63  ;;  %v13705_v36 = vand.u32 8388607, %v16050_v44 }
 0x668   : > { %v5472_v15 = vadd.s32 127, %v5471_v12  ;;  %v5350_v30 = vsel %vm5348_vm1, %v5349_v46, %v13683_v13  ;;  %v5517_v53 = vshrl.u32 %v16399_v39, %v5514_v50  ;;  %v5519_v31 = vshll.u32 %v16399_v39, %v5513_v63 }
 0x669   : > { %v5520_v28 = vshrl.u32 %v16400_v54, %v5514_v50  ;;  %v5468_v16 = vshll.u32 %v13664_v42, %v5466_v3  ;;  %v5469_v60 = vshrl.u32 %v5451_v8, %v5467_v56  ;;  %v5351_v58 = vadd.s32 %v5350_v30, %v5346_v27 }
 0x66a   : > { %v5473_v47 = vshll.u32 %v5472_v15, 23  ;;  %vm16061_vm4 = vcmp.lt.s32.totalorder %v13263_v10, 0  ;;  %v5518_v18 = vor.u32 %v5517_v53, %v5516_v19  ;;  %v5522_v20 = vshll.u32 %v16400_v54, %v5513_v63 }
 0x66b   : > { %v5521_v25 = vor.u32 %v5520_v28, %v5519_v31  ;;  %v5523_v26 = vshrl.u32 %v16159_v7, %v5514_v50  ;;  %v5352_v13 = vadd.s32 536870912, %v5351_v58  ;;  %v5525_v12 = vshll.u32 %v16159_v7, %v5513_v63 }
 0x66c   : > { %v5526_v46 = vshrl.u32 %v16401_v1, %v5514_v50  ;;  %vm5531_vm11 = vcmp.lt.s32.totalorder %v13698_v48, 1  ;;  %v5474_v44 = vor.u32 4788187, %v5473_v47  ;;  %v5528_v8 = vshll.u32 %v16401_v1, %v5513_v63 }
 0x66d   : > { %v5524_v42 = vor.u32 %v5523_v26, %v5522_v20  ;;  %v5529_v3 = vshrl.u32 %v16402_v2, %v5514_v50  ;;  %v16453_v56 = vand.u32 2147483647, %v13263_v10  ;;  %v5470_v15 = vor.u32 %v5469_v60, %v5468_v16 }
 0x66e   : > { %v13726_v19 = vshrl.u32 %v5352_v13, 30  ;;  %v5515_v30 = vshrl.u32 %v16166_v40, %v5514_v50  ;;  %v5527_v53 = vor.u32 %v5526_v46, %v5525_v12  ;;  %vm5532_vm14 = vcmp.lt.s32.totalorder %v13698_v48, 2 }
 0x66f   : > { %vm13722_vm15 = vcmp.le.f32.partialorder %v16453_v56, 0.7853982  ;;  %v5530_v31 = vor.u32 %v5529_v3, %v5528_v8  ;;  %vm5534_vm2 = vcmp.lt.s32.totalorder %v13698_v48, 4  ;;  %v5539_v63 = vsel %vm5531_vm11, %v5518_v18, %v5521_v25 }
 0x670   : > { %16456 = vst [vmem:[#allocation22_spill] sm:$0xff] %v13726_v19  ;;  %v5354_v28 = vshll.u32 %v13726_v19, 30  ;;  %vm5533_vm5 = vcmp.lt.s32.totalorder %v13698_v48, 3  ;;  %v5536_v47 = vsel %vm5534_vm2, %v5524_v42, 2102212464  ;;  %v5543_v50 = vsel %vm5531_vm11, %v5521_v25, %v5524_v42 }
 0x671   : > { %v5540_v20 = vsel %vm5534_vm2, %v5527_v53, 920167782  ;;  %v5475_v16 = vand.u32 2147483647, %v5474_v44  ;;  %v5544_v26 = vsel %vm5534_vm2, %v5530_v31, 1326507024  ;;  %v5477_v13 = vcvt.s32.f32 %v5470_v15 }
 0x672   : > { %v5541_v60 = vsel %vm5533_vm5, %v5524_v42, %v5540_v20  ;;  %v13737_v12 = vsub.s32 %v5351_v58, %v5354_v28  ;;  %v5535_v46 = vsel %vm5531_vm11, %v5515_v30, %v5518_v18  ;;  %v5537_v3 = vsel %vm5533_vm5, %v5521_v25, %v5536_v47 }
 0x673   : > { %v5542_v8 = vsel %vm5532_vm14, %v5539_v63, %v5541_v60  ;;  %v5545_v56 = vsel %vm5533_vm5, %v5527_v53, %v5544_v26  ;;  %v16457_v44 = vxor.u32 2147483648, %v13625_v5  ;;  %v5272_v18 = vsel %vm5189_vm12, %v5271_v33, %v13678_v62 }
 0x674   : > { %v13744_v19 = vmul.u32.u64.low %v13693_v43, %v5542_v8  ;;  %v13745_v51 = vmul.u32.u64.high %v13693_v43, %v5542_v8, %v13744_v19  ;;  %v5357_v42 = vsub.s32 0, %v13737_v12  ;;  %v5546_v25 = vsel %vm5532_vm14, %v5543_v50, %v5545_v56 }
 0x675   : > { %v5168_v58 = vsel %vm16061_vm4, %v16457_v44, %v13625_v5  ;;  %v13759_v15 = vmul.f32 %v5477_v13, %v5475_v16  ;;  %v13762_v30 = vmul.u32.u64.low %v13693_v43, %v5546_v25  ;;  %v13763_v53 = vmul.u32.u64.high %v13693_v43, %v5546_v25, %v13762_v30 }
 0x676   : > { %v5613_v31 = vadd.s32 1, %v8336_v45  ;;  %v16458_v5 = vsel %vm13603_vm6, 0, %v13631_v22  ;;  %v8325_v62 = vmin.u32 %v5357_v42, %v13737_v12  ;;  %v5538_v33 = vsel %vm5532_vm14, %v5535_v46, %v5537_v3 }
 0x677   : > { %v13769_v63 = vadd.s32 3, %v16458_v5  ;;  %v5611_v28 = vor.u32 8388608, %v13705_v36  ;;  %v13778_v47 = vsel %vm13722_vm15, %v13263_v10, %v5168_v58  ;;  %v5557_v20 = vadd.s32 1, %v13745_v51 }
 0x678   : > { %vm5614_vm12 = vcmp.gt.s32.totalorder %v5613_v31, 0  ;;  %v13785_v22 = vsel %vm13603_vm6, %v13372_v34, %v5272_v18  ;;  %v5347_v48 = vadd.s32 %v13682_v4, %v13688_v17  ;;  %v5359_v16 = vclz %v8325_v62 }
 0x679   : > { %16459 = vst [vmem:[#allocation42_spill] sm:$0xff] %v13769_v63  ;;  %v5615_v36 = vsel %vm5614_vm12, %v5613_v31, 0  ;;  %v5554_v50 = vmul.u32 %v13693_v43, %v5538_v33  ;;  %vm5556_vm8 = vc.u32 %v13763_v53, %v13744_v19  ;;  %v13794_v8 = vshll.u32 %v5611_v28, 8 }
 0x67a   : > { %v5617_v26 = vand.u32 31, %v5615_v36  ;;  %v8326_v13 = vadd.s32 4294967294, %v5359_v16  ;;  %v5558_v46 = vsel %vm5556_vm8, %v5557_v20, %v13745_v51  ;;  %v13798_v38 = vadd.f32 %v13232_v21, %v13538_v29 }
 0x67b   : > { %v5559_v4 = vadd.s32 %v5558_v46, %v5554_v50  ;;  %v13800_v17 = vshrl.u32 %v5615_v36, 5  ;;  %vm5397_vm1 = vcmp.lt.s32.totalorder %v13450_v9, 0  ;;  %vm16060_vm8 = vcmp.lt.s32.totalorder %v13536_v41, 0 }
 0x67c   : > { %v5618_v3 = vsub.s32 32, %v5617_v26  ;;  %v5620_v56 = vshll.u32 %v16166_v40, %v5617_v26  ;;  %vm8327_vm6 = vcmp.lt.s32.totalorder %v8326_v13, 0  ;;  %v5623_v43 = vshll.u32 %v16399_v39, %v5617_v26 }
 0x67d   : > { %v5626_v44 = vshll.u32 %v16400_v54, %v5617_v26  ;;  %v5629_v58 = vshll.u32 %v16159_v7, %v5617_v26  ;;  %v5362_v51 = vsel %vm8327_vm6, 0, %v8326_v13  ;;  %v5560_v18 = vadd.s32 536870912, %v5559_v4 }
 0x67e   : > { %v5621_v42 = vshrl.u32 %v16399_v39, %v5618_v3  ;;  %v5632_v21 = vshll.u32 %v16401_v1, %v5617_v26  ;;  %v5363_v25 = vsub.s32 32, %v5362_v51  ;;  %v5364_v30 = vshll.u32 %v13737_v12, %v5362_v51 }
 0x67f   : > { %v5367_v31 = vsub.s32 4294967266, %v5362_v51  ;;  %v5624_v5 = vshrl.u32 %v16400_v54, %v5618_v3  ;;  %v13810_v62 = vshrl.u32 %v5560_v18, 30  ;;  %v5627_v28 = vshrl.u32 %v16159_v7, %v5618_v3 }
 0x680   : > { %v5622_v33 = vor.u32 %v5621_v42, %v5620_v56  ;;  %v5630_v20 = vshrl.u32 %v16401_v1, %v5618_v3  ;;  %v5365_v16 = vshrl.u32 %v5347_v48, %v5363_v25  ;;  %v5633_v13 = vshrl.u32 %v16402_v2, %v5618_v3 }
 0x681   : > { %v5368_v36 = vadd.s32 127, %v5367_v31  ;;  %v5625_v50 = vor.u32 %v5624_v5, %v5623_v43  ;;  %v5562_v26 = vshll.u32 %v13810_v62, 30  ;;  %v5628_v12 = vor.u32 %v5627_v28, %v5626_v44 }
 0x682   : > { %v5631_v46 = vor.u32 %v5630_v20, %v5629_v58  ;;  %v5814_v51 = vand.u32 2139095040, %v13798_v38  ;;  %v5366_v18 = vor.u32 %v5365_v16, %v5364_v30  ;;  %v5619_v56 = vshrl.u32 %v16166_v40, %v5618_v3 }
 0x683   : > { %v5369_v45 = vshll.u32 %v5368_v36, 23  ;;  %v5634_v42 = vor.u32 %v5633_v13, %v5632_v21  ;;  %v13819_v60 = vsub.s32 %v5559_v4, %v5562_v26  ;;  %vm5635_vm11 = vcmp.lt.s32.totalorder %v13800_v17, 1 }
 0x684   : > { %vm5636_vm14 = vcmp.lt.s32.totalorder %v13800_v17, 2  ;;  %vm5638_vm2 = vcmp.lt.s32.totalorder %v13800_v17, 4  ;;  %v16460_v48 = vand.u32 2147483647, %v13450_v9  ;;  %vm5637_vm12 = vcmp.lt.s32.totalorder %v13800_v17, 3 }
 0x685   : > { %v5370_v44 = vor.u32 4788187, %v5369_v45  ;;  %v5640_v58 = vsel %vm5638_vm2, %v5628_v12, 2102212464  ;;  %v5643_v3 = vsel %vm5635_vm11, %v5622_v33, %v5625_v50  ;;  %v5565_v4 = vsub.s32 0, %v13819_v60 }
 0x686   : > { %vm13826_vm5 = vcmp.le.f32.partialorder %v16460_v48, 0.7853982  ;;  %v5639_v21 = vsel %vm5635_vm11, %v5619_v56, %v5622_v33  ;;  %v5644_v25 = vsel %vm5638_vm2, %v5631_v46, 920167782  ;;  %v5647_v30 = vsel %vm5635_vm11, %v5625_v50, %v5628_v12 }
 0x687   : > { %v5371_v31 = vand.u32 2147483647, %v5370_v44  ;;  %v5373_v5 = vcvt.s32.f32 %v5366_v18  ;;  %v5645_v28 = vsel %vm5637_vm12, %v5628_v12, %v5644_v25  ;;  %v5648_v20 = vsel %vm5638_vm2, %v5634_v42, 1326507024 }
 0x688   : > { %v8333_v16 = vmin.u32 %v5565_v4, %v13819_v60  ;;  %v5641_v36 = vsel %vm5637_vm12, %v5625_v50, %v5640_v58  ;;  %v5646_v45 = vsel %vm5636_vm14, %v5643_v3, %v5645_v28  ;;  %v5649_v13 = vsel %vm5637_vm12, %v5631_v46, %v5648_v20 }
 0x689   : > { %v16463_v26 = vand.u32 2147483647, %v13536_v41  ;;  %v5374_v33 = vmul.f32 %v5373_v5, %v5371_v31  ;;  %v5650_v56 = vsel %vm5636_vm14, %v5647_v30, %v5649_v13  ;;  %v5815_v46 = vshrl.u32 %v5814_v51, 23 }
 0x68a   : > { %v13845_v12 = vmul.u32.u64.low %v13794_v8, %v5646_v45  ;;  %v13846_v18 = vmul.u32.u64.high %v13794_v8, %v5646_v45, %v13845_v12  ;;  %v5567_v42 = vclz %v8333_v16  ;;  %8962 = vcosq.f32 %v13778_v47 }
 0x68b   : > { %vm13838_vm6 = vcmp.le.f32.partialorder %v16463_v26, 0.7853982  ;;  %v13849_v50 = vmul.u32.u64.low %v13794_v8, %v5650_v56  ;;  %v13850_v44 = vmul.u32.u64.high %v13794_v8, %v5650_v56, %v13849_v50  ;;  %v16466_v58 = vxor.u32 2147483648, %v13759_v15 }
 0x68c   : > { %v5375_v4 = vxor.u32 2147483648, %v5374_v33  ;;  %v5642_v25 = vsel %vm5636_vm14, %v5639_v21, %v5641_v36  ;;  %8964 = vsinq.f32 %v13778_v47  ;;  %v8334_v30 = vadd.s32 4294967294, %v5567_v42 }
 0x68d   : > { %v5480_v3 = vsel %vm5397_vm1, %v16466_v58, %v13759_v15  ;;  %v16055_v31 = vand.u32 2147483647, %v13798_v38  ;;  %v8344_v5 = vadd.s32 4294967169, %v5815_v46  ;;  %8966 = vcosq.f32 %v13785_v22 }
 0x68e   : > { %v16467_v51 = vsub.s32 4, %v13650_v35  ;;  %v5661_v15 = vadd.s32 1, %v13846_v18  ;;  %v13871_v17 = vadd.f32 %v13350_v0, %v13538_v29  ;;  %v5483_v47 = vsel %vm13826_vm5, %v13450_v9, %v5480_v3 }
 0x68f   : > { %vm8335_vm11 = vcmp.lt.s32.totalorder %v8334_v30, 0  ;;  %v5658_v21 = vmul.u32 %v13794_v8, %v5642_v25  ;;  %vm5660_vm14 = vc.u32 %v13850_v44, %v13845_v12  ;;  %v5376_v20 = vsel %vm16060_vm8, %v5375_v4, %v5374_v33 }
 0x690   : > { %v5482_v28 = vsel %vm5397_vm1, %v16467_v51, %v13650_v35  ;;  %v5570_v16 = vsel %vm8335_vm11, 0, %v8334_v30  ;;  %v5662_v35 = vsel %vm5660_vm14, %v5661_v15, %v13846_v18  ;;  %v5821_v36 = vadd.s32 1, %v8344_v5 }
 0x691   : > { %8968 = vsinq.f32 %v13785_v22  ;;  %v5484_v0 = vsel %vm13826_vm5, 0, %v5482_v28  ;;  %v5575_v45 = vsub.s32 4294967266, %v5570_v16  ;;  %v5818_v13 = vand.u32 8388607, %v16055_v31 }
 0x692   : > { %8970 = vcosq.f32 %v5483_v47  ;;  %v5663_v8 = vadd.s32 %v5662_v35, %v5658_v21  ;;  %vm5822_vm1 = vcmp.gt.s32.totalorder %v5821_v36, 0  ;;  %v5710_v26 = vand.u32 2139095040, %v13871_v17 }
 0x693   : > { %v13890_v33 = vsel %vm13838_vm6, %v13536_v41, %v5376_v20  ;;  %v5571_v56 = vsub.s32 32, %v5570_v16  ;;  %v5576_v18 = vadd.s32 127, %v5575_v45  ;;  %v5823_v22 = vsel %vm5822_vm1, %v5821_v36, 0 }
 0x694   : > { %8972 = vsinq.f32 %v5483_v47  ;;  %v13892_v43 = vadd.s32 3, %v5484_v0  ;;  %v5664_v42 = vadd.s32 536870912, %v5663_v8  ;;  %v5825_v50 = vand.u32 31, %v5823_v22  ;;  %v13901_v25 = vpop.eup %8962 }
 0x695   : > { %v5555_v46 = vadd.s32 %v13744_v19, %v13763_v53  ;;  %v5819_v58 = vor.u32 8388608, %v5818_v13  ;;  %v13899_v4 = vadd.f32 %v13425_v6, %v13538_v29  ;;  %8974 = vcosq.f32 %v13890_v33 }
 0x696   : > { %16468 = vst [vmem:[#allocation20_spill] sm:$0xff] %v13892_v43  ;;  %v13905_v30 = vadd.s32 %v13845_v12, %v13850_v44  ;;  %v13907_v5 = vshrl.u32 %v5664_v42, 30  ;;  %v5826_v51 = vsub.s32 32, %v5825_v50  ;;  %v13909_v28 = vpop.eup %8964  ;;  %v5572_v19 = vshll.u32 %v13819_v60, %v5570_v16 }
 0x697   : > { %v5573_v53 = vshrl.u32 %v5555_v46, %v5571_v56  ;;  %v5577_v15 = vshll.u32 %v5576_v18, 23  ;;  %v5711_v47 = vshrl.u32 %v5710_v26, 23  ;;  %v13912_v21 = vpop.eup %8966  ;;  %v5828_v29 = vshll.u32 %v16166_v40, %v5825_v50 }
 0x698   : > { %16469 = vst [vmem:[#allocation16_spill] sm:$0xff] %v13912_v21  ;;  %v5666_v6 = vshll.u32 %v13907_v5, 30  ;;  %v5829_v20 = vshrl.u32 %v16399_v39, %v5826_v51  ;;  %v5831_v12 = vshll.u32 %v16399_v39, %v5825_v50  ;;  %v5832_v44 = vshrl.u32 %v16400_v54, %v5826_v51 }
 0x699   : > { %v5834_v35 = vshll.u32 %v16400_v54, %v5825_v50  ;;  %v5835_v36 = vshrl.u32 %v16159_v7, %v5826_v51  ;;  %v5838_v60 = vshrl.u32 %v16401_v1, %v5826_v51  ;;  %v5824_v0 = vshrl.u32 %v5823_v22, 5 }
 0x69a   : > { %v13922_v16 = vsub.s32 %v5663_v8, %v5666_v6  ;;  %v5837_v45 = vshll.u32 %v16159_v7, %v5825_v50  ;;  %v13925_v13 = vshll.u32 %v5819_v58, 8  ;;  %v5578_v56 = vor.u32 4788187, %v5577_v15 }
 0x69b   : > { %v13927_v26 = vpop.eup %8968  ;;  %vm5605_vm2 = vcmp.lt.s32.totalorder %v13550_v52, 0  ;;  %v5830_v18 = vor.u32 %v5829_v20, %v5828_v29  ;;  %v5833_v42 = vor.u32 %v5832_v44, %v5831_v12  ;;  %v5836_v46 = vor.u32 %v5835_v36, %v5834_v35 }
 0x69c   : > { %16470 = vst [vmem:[#allocation30_spill] sm:$0xff] %v13927_v26  ;;  %v13930_v31 = vpop.eup %8970  ;;  %v5669_v3 = vsub.s32 0, %v13922_v16  ;;  %v5839_v9 = vor.u32 %v5838_v60, %v5837_v45  ;;  %v5840_v8 = vshll.u32 %v16401_v1, %v5825_v50  ;;  %v5841_v22 = vshrl.u32 %v16402_v2, %v5826_v51 }
 0x69d   : > { %16471 = vst [vmem:[#allocation9_spill] sm:$0xff] %v13930_v31  ;;  %v5574_v6 = vor.u32 %v5573_v53, %v5572_v19  ;;  %v5689_v58 = vsub.s32 4, %v13907_v5  ;;  %v5827_v43 = vshrl.u32 %v16166_v40, %v5826_v51  ;;  %v8340_v15 = vadd.s32 4294967169, %v5711_v47 }
 0x69e   : > { %v13937_v21 = vpop.eup %8972  ;;  %v8337_v29 = vmin.u32 %v5669_v3, %v13922_v16  ;;  %v5842_v20 = vor.u32 %v5841_v22, %v5840_v8  ;;  %vm5843_vm5 = vcmp.lt.s32.totalorder %v5824_v0, 1  ;;  %vm5846_vm12 = vcmp.lt.s32.totalorder %v5824_v0, 4 }
 0x69f   : > { %16472 = vst [vmem:[#allocation21_spill] sm:$0xff] %v13937_v21  ;;  %vm5845_vm11 = vcmp.lt.s32.totalorder %v5824_v0, 3  ;;  %v5848_v12 = vsel %vm5846_vm12, %v5836_v46, 2102212464  ;;  %v5851_v50 = vsel %vm5843_vm5, %v5830_v18, %v5833_v42  ;;  %v5852_v44 = vsel %vm5846_vm12, %v5839_v9, 920167782  ;;  %v13943_v19 = vpop.eup %8974 }
 0x6a0   : > { %v5579_v53 = vand.u32 2147483647, %v5578_v56  ;;  %v16473_v51 = vand.u32 2147483647, %v13550_v52  ;;  %v16474_v47 = vmov 0  ;;  %v5671_v3 = vclz %v8337_v29 }
 0x6a1   : > { %vm5844_vm1 = vcmp.lt.s32.totalorder %v5824_v0, 2  ;;  %v5853_v35 = vsel %vm5845_vm11, %v5836_v46, %v5852_v44  ;;  %v5581_v36 = vcvt.s32.f32 %v5574_v6  ;;  %v5855_v45 = vsel %vm5843_vm5, %v5833_v42, %v5836_v46 }
 0x6a2   : > { %vm13947_vm14 = vcmp.le.f32.partialorder %v16473_v51, 0.7853982  ;;  %v5854_v60 = vsel %vm5844_vm1, %v5851_v50, %v5853_v35  ;;  %v16477_v8 = vand.u32 2147483647, %v13871_v17  ;;  %v8338_v56 = vadd.s32 4294967294, %v5671_v3 }
 0x6a3   : > { %v16475_v47 = vsel %vm13947_vm14, 4294967295, %v16474_v47  ;;  %v5847_v31 = vsel %vm5843_vm5, %v5827_v43, %v5830_v18  ;;  %v5849_v51 = vsel %vm5845_vm11, %v5833_v42, %v5848_v12  ;;  %v5856_v21 = vsel %vm5846_vm12, %v5842_v20, 1326507024 }
 0x6a4   : > { %16476 = vst [vmem:[#allocation15_spill] sm:$0xff] %v16475_v47  ;;  %v13956_v22 = vand.u32 8388607, %v16477_v8  ;;  %v5857_v29 = vsel %vm5845_vm11, %v5839_v9, %v5856_v21  ;;  %v13963_v44 = vmul.u32.u64.low %v13925_v13, %v5854_v60  ;;  %v13964_v6 = vmul.u32.u64.high %v13925_v13, %v5854_v60, %v13963_v44 }
 0x6a5   : > { %v5717_v50 = vadd.s32 1, %v8340_v15  ;;  %v5582_v46 = vmul.f32 %v5581_v36, %v5579_v53  ;;  %vm8339_vm8 = vcmp.lt.s32.totalorder %v8338_v56, 0  ;;  %v13970_v3 = vsel %vm5605_vm2, %v5689_v58, %v13907_v5 }
 0x6a6   : > { %16478 = vst [vmem:[#allocation10_spill] sm:$0xff] %v13970_v3  ;;  %v5858_v43 = vsel %vm5844_vm1, %v5855_v45, %v5857_v29  ;;  %v5674_v18 = vsel %vm8339_vm8, 0, %v8338_v56  ;;  %vm16062_vm12 = vcmp.lt.s32.totalorder %v13543_v11, 0  ;;  %v5850_v15 = vsel %vm5844_vm1, %v5847_v31, %v5849_v51 }
 0x6a7   : > { %v13974_v42 = vmul.u32.u64.low %v13925_v13, %v5858_v43  ;;  %v13975_v20 = vmul.u32.u64.high %v13925_v13, %v5858_v43, %v13974_v42  ;;  %vm5718_vm5 = vcmp.gt.s32.totalorder %v5717_v50, 0  ;;  %v5675_v9 = vsub.s32 32, %v5674_v18 }
 0x6a8   : > { %v5679_v21 = vsub.s32 4294967266, %v5674_v18  ;;  %v5719_v12 = vsel %vm5718_vm5, %v5717_v50, 0  ;;  %8976 = vsinq.f32 %v13890_v33  ;;  %v5869_v5 = vadd.s32 1, %v13964_v6 }
 0x6a9   : > { %v5715_v58 = vor.u32 8388608, %v13956_v22  ;;  %v5721_v53 = vand.u32 31, %v5719_v12  ;;  %v5676_v35 = vshll.u32 %v13922_v16, %v5674_v18  ;;  %v5677_v36 = vshrl.u32 %v13905_v30, %v5675_v9 }
 0x6aa   : > { %v5680_v60 = vadd.s32 127, %v5679_v21  ;;  %v5866_v31 = vmul.u32 %v13925_v13, %v5850_v15  ;;  %vm5868_vm8 = vc.u32 %v13975_v20, %v13963_v44  ;;  %v5583_v8 = vxor.u32 2147483648, %v5582_v46 }
 0x6ab   : > { %v5722_v33 = vsub.s32 32, %v5721_v53  ;;  %v5678_v22 = vor.u32 %v5677_v36, %v5676_v35  ;;  %v5870_v16 = vsel %vm5868_vm8, %v5869_v5, %v13964_v6  ;;  %v5724_v30 = vshll.u32 %v16166_v40, %v5721_v53 }
 0x6ac   : > { %v5681_v56 = vshll.u32 %v5680_v60, 23  ;;  %v5871_v51 = vadd.s32 %v5870_v16, %v5866_v31  ;;  %v16479_v43 = vand.u32 2147483647, %v13543_v11  ;;  %v5720_v42 = vshrl.u32 %v5719_v12, 5 }
 0x6ad   : > { %v5725_v29 = vshrl.u32 %v16399_v39, %v5722_v33  ;;  %v5728_v50 = vshrl.u32 %v16400_v54, %v5722_v33  ;;  %v5727_v9 = vshll.u32 %v16399_v39, %v5721_v53  ;;  %v5731_v21 = vshrl.u32 %v16159_v7, %v5722_v33 }
 0x6ae   : > { %vm13997_vm11 = vcmp.le.f32.partialorder %v16479_v43, 0.7853982  ;;  %v5682_v18 = vor.u32 4788187, %v5681_v56  ;;  %v5685_v6 = vcvt.s32.f32 %v5678_v22  ;;  %v5872_v15 = vadd.s32 536870912, %v5871_v51 }
 0x6af   : > { %v5726_v5 = vor.u32 %v5725_v29, %v5724_v30  ;;  %v5730_v35 = vshll.u32 %v16400_v54, %v5721_v53  ;;  %v5729_v60 = vor.u32 %v5728_v50, %v5727_v9  ;;  %v5733_v31 = vshll.u32 %v16159_v7, %v5721_v53 }
 0x6b0   : > { %v5683_v36 = vand.u32 2147483647, %v5682_v18  ;;  %v5734_v16 = vshrl.u32 %v16401_v1, %v5722_v33  ;;  %v5584_v43 = vsel %vm16062_vm12, %v5583_v8, %v5582_v46  ;;  %vm5813_vm1 = vcmp.lt.s32.totalorder %v13798_v38, 0 }
 0x6b1   : > { %v5873_v12 = vshrl.u32 %v5872_v15, 30  ;;  %v5732_v56 = vor.u32 %v5731_v21, %v5730_v35  ;;  %v5737_v0 = vshrl.u32 %v16402_v2, %v5722_v33  ;;  %v5723_v30 = vshrl.u32 %v16166_v40, %v5722_v33 }
 0x6b2   : > { %v5686_v22 = vmul.f32 %v5685_v6, %v5683_v36  ;;  %v5735_v29 = vor.u32 %v5734_v16, %v5733_v31  ;;  %v5736_v18 = vshll.u32 %v16401_v1, %v5721_v53  ;;  %v14012_v50 = vpop.eup %8976  ;;  %vm5739_vm5 = vcmp.lt.s32.totalorder %v5720_v42, 1 }
 0x6b3   : > { %v5874_v9 = vshll.u32 %v5873_v12, 30  ;;  %vm5740_vm8 = vcmp.lt.s32.totalorder %v5720_v42, 2  ;;  %vm5742_vm4 = vcmp.lt.s32.totalorder %v5720_v42, 4  ;;  %vm5741_vm12 = vcmp.lt.s32.totalorder %v5720_v42, 3 }
 0x6b4   : > { %v5738_v45 = vor.u32 %v5737_v0, %v5736_v18  ;;  %v5747_v46 = vsel %vm5739_vm5, %v5726_v5, %v5729_v60  ;;  %v5748_v8 = vsel %vm5742_vm4, %v5735_v29, 920167782  ;;  %v5687_v21 = vxor.u32 2147483648, %v5686_v22 }
 0x6b5   : > { %v16482_v6 = vand.u32 2147483647, %v13798_v38  ;;  %v14022_v53 = vsub.s32 %v5871_v51, %v5874_v9  ;;  %v5744_v15 = vsel %vm5742_vm4, %v5732_v56, 2102212464  ;;  %v5749_v35 = vsel %vm5741_vm12, %v5732_v56, %v5748_v8 }
 0x6b6   : > { %v5897_v36 = vsub.s32 4, %v5873_v12  ;;  %v5750_v0 = vsel %vm5740_vm8, %v5747_v46, %v5749_v35  ;;  %v5755_v31 = vshll.u32 %v5715_v58, 8  ;;  %v5918_v16 = vand.u32 2139095040, %v13899_v4 }
 0x6b7   : > { %vm14018_vm0 = vcmp.le.f32.partialorder %v16482_v6, 0.7853982  ;;  %v5587_v18 = vsel %vm13997_vm11, %v13543_v11, %v5584_v43  ;;  %v5877_v6 = vsub.s32 0, %v14022_v53  ;;  %v5743_v34 = vsel %vm5739_vm5, %v5723_v30, %v5726_v5 }
 0x6b8   : > { %v5751_v51 = vsel %vm5739_vm5, %v5729_v60, %v5732_v56  ;;  %v5745_v9 = vsel %vm5741_vm12, %v5729_v60, %v5744_v15  ;;  %v5752_v8 = vsel %vm5742_vm4, %v5738_v45, 1326507024  ;;  %v5688_v58 = vsel %vm5605_vm2, %v5687_v21, %v5686_v22 }
 0x6b9   : > { %v14036_v3 = vmul.u32.u64.low %v5755_v31, %v5750_v0  ;;  %v14037_v26 = vmul.u32.u64.high %v5755_v31, %v5750_v0, %v14036_v3  ;;  %v8345_v46 = vmin.u32 %v5877_v6, %v14022_v53  ;;  %v5753_v43 = vsel %vm5741_vm12, %v5735_v29, %v5752_v8 }
 0x6ba   : > { %v16485_v35 = vand.u32 2147483647, %v13899_v4  ;;  %v14047_v5 = vsel %vm5813_vm1, %v5897_v36, %v5873_v12  ;;  %v5754_v60 = vsel %vm5740_vm8, %v5751_v51, %v5753_v43  ;;  %v5919_v45 = vshrl.u32 %v5918_v16, 23  ;;  %v16487_v36 = vld [vmem:[#allocation32_spill] sm:$0xff] }
 0x6bb   : > { %16486 = vst [vmem:[#allocation35_spill] sm:$0xff] %v14047_v5  ;;  %v4545_v56 = vsub.s32 4, %v13020_v37  ;;  %v5879_v30 = vclz %v8345_v46  ;;  %v5746_v15 = vsel %vm5740_vm8, %v5743_v34, %v5745_v9  ;;  %v14058_v29 = vsel %vm13947_vm14, %v13550_v52, %v5688_v58 }
 0x6bc   : > { %v5922_v63 = vand.u32 8388607, %v16485_v35  ;;  %v14052_v22 = vmul.u32.u64.low %v5755_v31, %v5754_v60  ;;  %v14053_v21 = vmul.u32.u64.high %v5755_v31, %v5754_v60, %v14052_v22  ;;  %v5765_v0 = vadd.s32 1, %v14037_v26 }
 0x6bd   : > { %v8348_v12 = vadd.s32 4294967169, %v5919_v45  ;;  %v4546_v16 = vsel %vm4461_vm10, %v4545_v56, %v13020_v37  ;;  %8978 = vcosq.f32 %v5587_v18  ;;  %v8346_v6 = vadd.s32 4294967294, %v5879_v30  ;;  %v16489_v56 = vld [vmem:[#allocation18_spill] sm:$0xff] }
 0x6be   : > { %v5923_v51 = vor.u32 8388608, %v5922_v63  ;;  %v4548_v34 = vsel %vm13216_vm13, 0, %v4546_v16  ;;  %8980 = vsinq.f32 %v5587_v18  ;;  %v5867_v9 = vadd.s32 %v13963_v44, %v13975_v20  ;;  %v16490_v22 = vld [vmem:[#allocation34_spill] sm:$0xff] }
 0x6bf   : > { %v5925_v58 = vadd.s32 1, %v8348_v12  ;;  %8982 = vcosq.f32 %v14058_v29  ;;  %vm8347_vm4 = vcmp.lt.s32.totalorder %v8346_v6, 0  ;;  %v5762_v46 = vmul.u32 %v5755_v31, %v5746_v15 }
 0x6c0   : > { %vm5764_vm10 = vc.u32 %v14053_v21, %v14036_v3  ;;  %v5882_v37 = vsel %vm8347_vm4, 0, %v8346_v6  ;;  %v4552_v43 = vadd.s32 3, %v4548_v34  ;;  %v14074_v44 = vshll.u32 %v5923_v51, 8 }
 0x6c1   : > { %v5766_v63 = vsel %vm5764_vm10, %v5765_v0, %v14037_v26  ;;  %vm5926_vm2 = vcmp.gt.s32.totalorder %v5925_v58, 0  ;;  %v5883_v18 = vsub.s32 32, %v5882_v37  ;;  %v5887_v35 = vsub.s32 4294967266, %v5882_v37 }
 0x6c2   : > { %v5767_v60 = vadd.s32 %v5766_v63, %v5762_v46  ;;  %v5927_v20 = vsel %vm5926_vm2, %v5925_v58, 0  ;;  %v4961_v12 = vsub.s32 4, %v16490_v22  ;;  %v5884_v31 = vshll.u32 %v14022_v53, %v5882_v37 }
 0x6c3   : > { %v5885_v15 = vshrl.u32 %v5867_v9, %v5883_v18  ;;  %v5888_v16 = vadd.s32 127, %v5887_v35  ;;  %v14081_v26 = vadd.s32 %v14036_v3, %v14053_v21  ;;  %v5929_v0 = vand.u32 31, %v5927_v20 }
 0x6c4   : > { %v5768_v6 = vadd.s32 536870912, %v5767_v60  ;;  %v14083_v42 = vand.u32 3, %v4552_v43  ;;  %v5928_v63 = vshrl.u32 %v5927_v20, 5  ;;  %v4764_v61 = vxor.u32 2147483648, %v13508_v55 }
 0x6c5   : > { %v5886_v34 = vor.u32 %v5885_v15, %v5884_v31  ;;  %v5889_v58 = vshll.u32 %v5888_v16, 23  ;;  %v5930_v8 = vsub.s32 32, %v5929_v0  ;;  %v5932_v30 = vshll.u32 %v16166_v40, %v5929_v0 }
 0x6c6   : > { %v14086_v46 = vshrl.u32 %v5768_v6, 30  ;;  %v5935_v53 = vshll.u32 %v16399_v39, %v5929_v0  ;;  %v5938_v9 = vshll.u32 %v16400_v54, %v5929_v0  ;;  %v5941_v18 = vshll.u32 %v16159_v7, %v5929_v0 }
 0x6c7   : > { %v14091_v37 = vpop.eup %8978  ;;  %v5890_v3 = vor.u32 4788187, %v5889_v58  ;;  %v5893_v21 = vcvt.s32.f32 %v5886_v34  ;;  %v5931_v31 = vshrl.u32 %v16166_v40, %v5930_v8  ;;  %v5933_v20 = vshrl.u32 %v16399_v39, %v5930_v8 }
 0x6c8   : > { %16491 = vst [vmem:[#allocation29_spill] sm:$0xff] %v14091_v37  ;;  %v5770_v43 = vshll.u32 %v14086_v46, 30  ;;  %v14095_v35 = vpop.eup %8980  ;;  %v5936_v15 = vshrl.u32 %v16400_v54, %v5930_v8  ;;  %v5939_v16 = vshrl.u32 %v16159_v7, %v5930_v8  ;;  %v5942_v34 = vshrl.u32 %v16401_v1, %v5930_v8 }
 0x6c9   : > { %v14101_v6 = vpop.eup %8982  ;;  %v5891_v51 = vand.u32 2147483647, %v5890_v3  ;;  %v5944_v58 = vshll.u32 %v16401_v1, %v5929_v0  ;;  %v5934_v52 = vor.u32 %v5933_v20, %v5932_v30  ;;  %v5945_v40 = vshrl.u32 %v16402_v2, %v5930_v8 }
 0x6ca   : > { %v14103_v45 = vsub.s32 %v5767_v60, %v5770_v43  ;;  %v5937_v5 = vor.u32 %v5936_v15, %v5935_v53  ;;  %v5940_v47 = vor.u32 %v5939_v16, %v5938_v9  ;;  %v5943_v54 = vor.u32 %v5942_v34, %v5941_v18 }
 0x6cb   : > { %v5894_v37 = vmul.f32 %v5893_v21, %v5891_v51  ;;  %vm5947_vm13 = vcmp.lt.s32.totalorder %v5928_v63, 1  ;;  %v5946_v7 = vor.u32 %v5945_v40, %v5944_v58  ;;  %vm5949_vm12 = vcmp.lt.s32.totalorder %v5928_v63, 3 }
 0x6cc   : > { %v5773_v39 = vsub.s32 0, %v14103_v45  ;;  %vm5950_vm5 = vcmp.lt.s32.totalorder %v5928_v63, 4  ;;  %v5951_v3 = vsel %vm5947_vm13, %v5931_v31, %v5934_v52  ;;  %vm4554_vm8 = vcmp.lt.s32.totalorder %v14083_v42, 2 }
 0x6cd   : > { %v5895_v60 = vxor.u32 2147483648, %v5894_v37  ;;  %v5952_v0 = vsel %vm5950_vm5, %v5940_v47, 2102212464  ;;  %v5955_v30 = vsel %vm5947_vm13, %v5934_v52, %v5937_v5  ;;  %v5956_v9 = vsel %vm5950_vm5, %v5943_v54, 920167782 }
 0x6ce   : > { %v8341_v43 = vmin.u32 %v5773_v39, %v14103_v45  ;;  %v5953_v53 = vsel %vm5949_vm12, %v5937_v5, %v5952_v0  ;;  %v5959_v8 = vsel %vm5947_vm13, %v5937_v5, %v5940_v47  ;;  %v5960_v51 = vsel %vm5950_vm5, %v5946_v7, 1326507024 }
 0x6cf   : > { %vm5948_vm4 = vcmp.lt.s32.totalorder %v5928_v63, 2  ;;  %v5957_v18 = vsel %vm5949_vm12, %v5940_v47, %v5956_v9  ;;  %vm4555_vm10 = vcmp.eq.s32.totalorder %v14083_v42, 0  ;;  %v5961_v31 = vsel %vm5949_vm12, %v5943_v54, %v5960_v51 }
 0x6d0   : > { %v5775_v21 = vclz %v8341_v43  ;;  %v5958_v40 = vsel %vm5948_vm4, %v5955_v30, %v5957_v18  ;;  %vm4558_vm2 = vcmp.eq.s32.totalorder %v14083_v42, 2  ;;  %v4962_v39 = vsel %vm4877_vm3, %v4961_v12, %v16490_v22  ;;  %v16494_v43 = vld [vmem:[#allocation11_spill] sm:$0xff] }
 0x6d1   : > { %v5954_v20 = vsel %vm5948_vm4, %v5951_v3, %v5953_v53  ;;  %v5962_v15 = vsel %vm5948_vm4, %v5959_v8, %v5961_v31  ;;  %v16492_v7 = vxor.u32 2147483648, %v13487_v59  ;;  %v5896_v47 = vsel %vm5813_vm1, %v5895_v60, %v5894_v37 }
 0x6d2   : > { %v8342_v52 = vadd.s32 4294967294, %v5775_v21  ;;  %v14125_v16 = vmul.u32.u64.low %v14074_v44, %v5962_v15  ;;  %v14126_v63 = vmul.u32.u64.high %v14074_v44, %v5962_v15, %v14125_v16  ;;  %vm4551_vm13 = vweird.f32 %v16487_v36 }
 0x6d3   : > { %v4557_v5 = vsel %vm4555_vm10, %v16489_v56, %v16492_v7  ;;  %v16493_v54 = vxor.u32 2147483648, %v16489_v56  ;;  %v14133_v12 = vmul.u32.u64.low %v14074_v44, %v5958_v40  ;;  %v14134_v34 = vmul.u32.u64.high %v14074_v44, %v5958_v40, %v14133_v12 }
 0x6d4   : > { %vm8343_vm3 = vcmp.lt.s32.totalorder %v8342_v52, 0  ;;  %v4964_v58 = vsel %vm13586_vm7, 0, %v4962_v39  ;;  %vm4967_vm1 = vweird.f32 %v13124_v49  ;;  %v5970_v3 = vmul.u32 %v14074_v44, %v5954_v20 }
 0x6d5   : > { %v4560_v22 = vsel %vm4558_vm2, %v16493_v54, %v13487_v59  ;;  %v5778_v37 = vsel %vm8343_vm3, 0, %v8342_v52  ;;  %v4968_v60 = vadd.s32 3, %v4964_v58  ;;  %v4753_v0 = vsub.s32 4, %v16494_v43 }
 0x6d6   : > { %v5779_v30 = vsub.s32 32, %v5778_v37  ;;  %v5783_v53 = vsub.s32 4294967266, %v5778_v37  ;;  %v4561_v59 = vsel %vm4554_vm8, %v4557_v5, %v4560_v22  ;;  %v4975_v56 = vxor.u32 2147483648, %v13668_v23 }
 0x6d7   : > { %v5780_v9 = vshll.u32 %v14103_v45, %v5778_v37  ;;  %vm5972_vm12 = vc.u32 %v14126_v63, %v14133_v12  ;;  %v4969_v57 = vand.u32 3, %v4968_v60  ;;  %vm16495_vm7 = vcmp.lt.s32.totalorder %v12882_v14, 0 }
 0x6d8   : > { %v4754_v8 = vsel %vm16495_vm7, %v4753_v0, %v16494_v43  ;;  %v5781_v44 = vshrl.u32 %v14081_v26, %v5779_v30  ;;  %v5784_v51 = vadd.s32 127, %v5783_v53  ;;  %v5973_v21 = vadd.s32 1, %v14134_v34  ;;  %v16500_v0 = vld [vmem:[#allocation6_spill] sm:$0xff] }
 0x6d9   : > { %v4756_v42 = vsel %vm13389_vm9, 0, %v4754_v8  ;;  %vm4970_vm5 = vcmp.lt.s32.totalorder %v4969_v57, 2  ;;  %vm4971_vm8 = vcmp.eq.s32.totalorder %v4969_v57, 0  ;;  %vm4974_vm4 = vcmp.eq.s32.totalorder %v4969_v57, 2  ;;  %v16503_v8 = vld [vmem:[#allocation31_spill] sm:$0xff] }
 0x6da   : > { %v4760_v18 = vadd.s32 3, %v4756_v42  ;;  %v5782_v45 = vor.u32 %v5781_v44, %v5780_v9  ;;  %v5785_v40 = vshll.u32 %v5784_v51, 23  ;;  %v5974_v31 = vsel %vm5972_vm12, %v5973_v21, %v14134_v34  ;;  %v16502_v9 = vld [vmem:[#allocation24_spill] sm:$0xff]  ;;  %v16504_v21 = vld [vmem:[#allocation5_spill] sm:$0xff] }
 0x6db   : > { %v16496_v39 = vxor.u32 2147483648, %v13673_v24  ;;  %vm5709_vm10 = vcmp.lt.s32.totalorder %v13871_v17, 0  ;;  %v5975_v26 = vadd.s32 %v5974_v31, %v5970_v3  ;;  %v4976_v20 = vsel %vm4974_vm4, %v4975_v56, %v13673_v24 }
 0x6dc   : > { %v4761_v15 = vand.u32 3, %v4760_v18  ;;  %v16497_v7 = vand.u32 2147483647, %v13871_v17  ;;  %v5786_v16 = vor.u32 4788187, %v5785_v40  ;;  %v4562_v54 = vsel %vm4551_vm13, nan, %v4561_v59 }
 0x6dd   : > { %v4973_v52 = vsel %vm4971_vm8, %v13668_v23, %v16496_v39  ;;  %v4767_v22 = vxor.u32 2147483648, %v13501_v32  ;;  %v5789_v34 = vcvt.s32.f32 %v5782_v45  ;;  %v5976_v58 = vadd.s32 536870912, %v5975_v26 }
 0x6de   : > { %vm14162_vm9 = vcmp.le.f32.partialorder %v16497_v7, 0.7853982  ;;  %v4977_v23 = vsel %vm4970_vm5, %v4973_v52, %v4976_v20  ;;  %vm4763_vm2 = vcmp.eq.s32.totalorder %v4761_v15, 0  ;;  %v5787_v37 = vand.u32 2147483647, %v5786_v16  ;;  %v16505_v52 = vld [vmem:[#allocation26_spill] sm:$0xff] }
 0x6df   : > { %v4978_v24 = vsel %vm4967_vm1, nan, %v4977_v23  ;;  %v4765_v60 = vsel %vm4763_vm2, %v13501_v32, %v4764_v61  ;;  %vm4766_vm3 = vcmp.eq.s32.totalorder %v4761_v15, 2  ;;  %8984 = vsinq.f32 %v14058_v29  ;;  %v16507_v61 = vld [vmem:[#allocation36_spill] sm:$0xff] }
 0x6e0   : > { %v8464_v3 = vpack.c.bf16 %v4978_v24, %v4562_v54  ;;  %v14174_v43 = vshrl.u32 %v5976_v58, 30  ;;  %v4768_v36 = vsel %vm4766_vm3, %v4767_v22, %v13508_v55  ;;  %v5169_v30 = vsub.s32 4, %v16500_v0  ;;  %v16508_v54 = vld [vmem:[#allocation38_spill] sm:$0xff] }
 0x6e1   : > { %v14181_v53 = vsel %vm14018_vm0, %v13798_v38, %v5896_v47  ;;  %v5790_v49 = vmul.f32 %v5789_v34, %v5787_v37  ;;  %vm4759_vm13 = vweird.f32 %v12882_v14  ;;  %vm4762_vm1 = vcmp.lt.s32.totalorder %v4761_v15, 2  ;;  %v16506_v15 = vld [vmem:[#allocation33_spill] sm:$0xff] }
 0x6e2   : > { %8465 = vmatprep.subr.bf16.mxu0 %v8464_v3  ;;  %v14185_v32 = vadd.s32 %v14133_v12, %v14126_v63  ;;  %v5978_v29 = vshll.u32 %v14174_v43, 30  ;;  %v4769_v59 = vsel %vm4762_vm1, %v4765_v60, %v4768_v36  ;;  %vm16501_vm12 = vcmp.lt.s32.totalorder %v13263_v10, 0  ;;  %v16509_v3 = vld [vmem:[#allocation8_spill] sm:$0xff] }
 0x6e3   : > { %v5170_v55 = vsel %vm16501_vm12, %v5169_v30, %v16500_v0  ;;  %v5791_v56 = vxor.u32 2147483648, %v5790_v49  ;;  %vm5175_vm7 = vweird.f32 %v13263_v10  ;;  %v4449_v57 = vand.u32 3, %v16502_v9 }
 0x6e4   : > { %v5172_v47 = vsel %vm13722_vm15, 0, %v5170_v55  ;;  %v4452_v44 = vxor.u32 2147483648, %v16503_v8  ;;  %v14196_v51 = vsub.s32 %v5975_v26, %v5978_v29  ;;  %v5180_v12 = vxor.u32 2147483648, %v13909_v28  ;;  %v16511_v55 = vld [vmem:[#allocation13_spill] sm:$0xff] }
 0x6e5   : > { %v5176_v63 = vadd.s32 3, %v5172_v47  ;;  %v4455_v42 = vxor.u32 2147483648, %v16504_v21  ;;  %v5792_v18 = vsel %vm5709_vm10, %v5791_v56, %v5790_v49  ;;  %v4770_v27 = vsel %vm4759_vm13, nan, %v4769_v59  ;;  %v16512_v56 = vld [vmem:[#allocation17_spill] sm:$0xff] }
 0x6e6   : > { %v5183_v45 = vxor.u32 2147483648, %v13901_v25  ;;  %vm4451_vm15 = vcmp.eq.s32.totalorder %v4449_v57, 0  ;;  %v5795_v40 = vsel %vm14162_vm9, %v13871_v17, %v5792_v18  ;;  %v5981_v31 = vsub.s32 0, %v14196_v51  ;;  %v16513_v18 = vld [vmem:[#allocation39_spill] sm:$0xff] }
 0x6e7   : > { %v5177_v39 = vand.u32 3, %v5176_v63  ;;  %vm4447_vm5 = vweird.f32 %v16505_v52  ;;  %vm4454_vm8 = vcmp.eq.s32.totalorder %v4449_v57, 2  ;;  %v4453_v26 = vsel %vm4451_vm15, %v16504_v21, %v4452_v44 }
 0x6e8   : > { %v4456_v20 = vsel %vm4454_vm8, %v4455_v42, %v16503_v8  ;;  %v4865_v14 = vand.u32 3, %v16506_v15  ;;  %v4868_v7 = vxor.u32 2147483648, %v16507_v61  ;;  %v8349_v16 = vmin.u32 %v5981_v31, %v14196_v51 }
 0x6e9   : > { %vm5179_vm4 = vcmp.eq.s32.totalorder %v5177_v39, 0  ;;  %vm4450_vm2 = vcmp.lt.s32.totalorder %v4449_v57, 2  ;;  %vm4863_vm3 = vweird.f32 %v16508_v54  ;;  %8986 = vsinq.f32 %v5795_v40  ;;  %v14217_v22 = vpop.eup %8984 }
 0x6ea   : > { %vm5178_vm13 = vcmp.lt.s32.totalorder %v5177_v39, 2  ;;  %v5181_v23 = vsel %vm5179_vm4, %v13901_v25, %v5180_v12  ;;  %vm5182_vm1 = vcmp.eq.s32.totalorder %v5177_v39, 2  ;;  %v5983_v34 = vclz %v8349_v16  ;;  %v16510_v25 = vld [vmem:[#allocation14_spill] sm:$0xff] }
 0x6eb   : > { %v5184_v58 = vsel %vm5182_vm1, %v5183_v45, %v13909_v28  ;;  %v4457_v24 = vsel %vm4450_vm2, %v4453_v26, %v4456_v20  ;;  %vm4867_vm12 = vcmp.eq.s32.totalorder %v4865_v14, 0  ;;  %vm4866_vm15 = vcmp.lt.s32.totalorder %v4865_v14, 2  ;;  %v16514_v45 = vld [vmem:[#allocation7_spill] sm:$0xff]  ;;  %v16515_v26 = vld [vmem:[#allocation12_spill] sm:$0xff] }
 0x6ec   : > { %v5185_v37 = vsel %vm5178_vm13, %v5181_v23, %v5184_v58  ;;  %v4869_v60 = vsel %vm4867_vm12, %v16509_v3, %v4868_v7  ;;  %v4871_v36 = vxor.u32 2147483648, %v16509_v3  ;;  %v8350_v0 = vadd.s32 4294967294, %v5983_v34  ;;  %v16518_v34 = vld [vmem:[#allocation22_spill] sm:$0xff] }
 0x6ed   : > { %v5186_v30 = vsel %vm5175_vm7, nan, %v5185_v37  ;;  %vm4870_vm8 = vcmp.eq.s32.totalorder %v4865_v14, 2  ;;  %v4657_v49 = vand.u32 3, %v16510_v25  ;;  %v4660_v28 = vxor.u32 2147483648, %v16511_v55 }
 0x6ee   : > { %v8472_v29 = vpack.c.bf16 %v5186_v30, %v4770_v27  ;;  %v4872_v59 = vsel %vm4870_vm8, %v4871_v36, %v16507_v61  ;;  %v4663_v47 = vxor.u32 2147483648, %v16512_v56  ;;  %8988 = vcosq.f32 %v5795_v40 }
 0x6ef   : > { %vm8351_vm4 = vcmp.lt.s32.totalorder %v8350_v0, 0  ;;  %v4873_v9 = vsel %vm4866_vm15, %v4869_v60, %v4872_v59  ;;  %vm4659_vm2 = vcmp.eq.s32.totalorder %v4657_v49, 0  ;;  %v4458_v10 = vsel %vm4447_vm5, nan, %v4457_v24 }
 0x6f0   : > { %v5986_v57 = vsel %vm8351_vm4, 0, %v8350_v0  ;;  %8473 = vmatprep.subr.bf16.mxu1 %v8472_v29  ;;  %v4874_v8 = vsel %vm4863_vm3, nan, %v4873_v9  ;;  %v4661_v44 = vsel %vm4659_vm2, %v16512_v56, %v4660_v28  ;;  %vm4662_vm7 = vcmp.eq.s32.totalorder %v4657_v49, 2 }
 0x6f1   : > { %v5987_v63 = vsub.s32 32, %v5986_v57  ;;  %v5991_v12 = vsub.s32 4294967266, %v5986_v57  ;;  %v8466_v21 = vpack.c.bf16 %v4874_v8, %v4458_v10  ;;  %vm4658_vm13 = vcmp.lt.s32.totalorder %v4657_v49, 2 }
 0x6f2   : > { %v4664_v42 = vsel %vm4662_vm7, %v4663_v47, %v16511_v55  ;;  %v5073_v27 = vand.u32 3, %v16513_v18  ;;  %v5076_v40 = vxor.u32 2147483648, %v16514_v45  ;;  %v5988_v31 = vshll.u32 %v14196_v51, %v5986_v57  ;;  %v16516_v51 = vld [vmem:[#allocation41_spill] sm:$0xff] }
 0x6f3   : > { %v5989_v39 = vshrl.u32 %v14185_v32, %v5987_v63  ;;  %v5992_v52 = vadd.s32 127, %v5991_v12  ;;  %8467 = vmatpush1.bf16.msra.mxu0 %v8466_v21  ;;  %v5079_v20 = vxor.u32 2147483648, %v16515_v26  ;;  %v14239_v15 = vpop.eup %8986  ;;  %v4665_v14 = vsel %vm4658_vm13, %v4661_v44, %v4664_v42  ;;  %v16517_v32 = vld [vmem:[#allocation40_spill] sm:$0xff] }
 0x6f4   : > { %vm5074_vm5 = vcmp.lt.s32.totalorder %v5073_v27, 2  ;;  %vm5075_vm3 = vcmp.eq.s32.totalorder %v5073_v27, 0  ;;  %vm5078_vm1 = vcmp.eq.s32.totalorder %v5073_v27, 2  ;;  %vm5917_vm12 = vcmp.lt.s32.totalorder %v13899_v4, 0 }
 0x6f5   : > { %v5990_v61 = vor.u32 %v5989_v39, %v5988_v31  ;;  %v5993_v7 = vshll.u32 %v5992_v52, 23  ;;  %v5077_v16 = vsel %vm5075_vm3, %v16515_v26, %v5076_v40  ;;  %v5080_v54 = vsel %vm5078_vm1, %v5079_v20, %v16514_v45  ;;  %v16524_v39 = vld [vmem:[#allocation29_spill] sm:$0xff] }
 0x6f6   : > { %vm4655_vm15 = vweird.f32 %v16516_v51  ;;  %vm5071_vm8 = vweird.f32 %v16517_v32  ;;  %v5081_v23 = vsel %vm5074_vm5, %v5077_v16, %v5080_v54  ;;  %v5377_v58 = vsub.s32 4, %v16518_v34  ;;  %v16525_v54 = vld [vmem:[#allocation42_spill] sm:$0xff] }
 0x6f7   : > { %8990 = vcosq.f32 %v14181_v53  ;;  %v16519_v24 = vand.u32 2147483647, %v13899_v4  ;;  %v5994_v3 = vor.u32 4788187, %v5993_v7  ;;  %v4666_v60 = vsel %vm4655_vm15, nan, %v4665_v14  ;;  %v16526_v32 = vld [vmem:[#allocation30_spill] sm:$0xff] }
 0x6f8   : > { %v5082_v36 = vsel %vm5071_vm8, nan, %v5081_v23  ;;  %8992 = vsinq.f32 %v14181_v53  ;;  %vm16522_vm2 = vcmp.lt.s32.totalorder %v13536_v41, 0  ;;  %v5793_v25 = vsub.s32 4, %v14086_v46  ;;  %v8989_v49 = vpop.eup %8988 }
 0x6f9   : > { %vm14250_vm4 = vcmp.le.f32.partialorder %v16519_v24, 0.7853982  ;;  %v8474_v0 = vpack.c.bf16 %v5082_v36, %v4666_v60  ;;  %v5378_v30 = vsel %vm16522_vm2, %v5377_v58, %v16518_v34  ;;  %v5995_v29 = vand.u32 2147483647, %v5994_v3  ;;  %v16528_v58 = vld [vmem:[#allocation10_spill] sm:$0xff] }
 0x6fa   : > { %v5997_v59 = vcvt.s32.f32 %v5990_v61  ;;  %v5380_v55 = vsel %vm13838_vm6, 0, %v5378_v30  ;;  %v5388_v28 = vxor.u32 2147483648, %v14012_v50  ;;  %v5391_v47 = vxor.u32 2147483648, %v13943_v19  ;;  %v6020_v34 = vld [vmem:[%s15884_s7 + $0x8] sm:$0xff] }
 0x6fb   : > { %8475 = vmatpush1.bf16.msra.mxu1 %v8474_v0  ;;  %v5384_v56 = vadd.s32 3, %v5380_v55  ;;  %v5794_v53 = vsel %vm5709_vm10, %v5793_v25, %v14086_v46  ;;  %v5585_v9 = vsub.s32 4, %v13810_v62  ;;  %vm5383_vm7 = vweird.f32 %v13536_v41 }
 0x6fc   : > { %v5998_v57 = vmul.f32 %v5997_v59, %v5995_v29  ;;  %v5796_v10 = vsel %vm14162_vm9, 0, %v5794_v53  ;;  %vm5799_vm6 = vweird.f32 %v13871_v17  ;;  %v5804_v48 = vxor.u32 2147483648, %v14239_v15  ;;  %v16532_v29 = vld [vmem:[#allocation19_spill] sm:$0xff]  ;;  %v16533_v59 = vld [vmem:[#allocation16_spill] sm:$0xff]  ;;  %v16534_v53 = vld [vmem:[#allocation37_spill] sm:$0xff] }
 0x6fd   : > { %v5385_v8 = vand.u32 3, %v5384_v56  ;;  %v5800_v44 = vadd.s32 3, %v5796_v10  ;;  %v5807_v63 = vxor.u32 2147483648, %v8989_v49  ;;  %vm16523_vm13 = vcmp.lt.s32.totalorder %v13543_v11, 0 }
 0x6fe   : > { %v5586_v12 = vsel %vm16523_vm13, %v5585_v9, %v13810_v62  ;;  %v5999_v46 = vxor.u32 2147483648, %v5998_v57  ;;  %v5596_v42 = vxor.u32 2147483648, %v14095_v35  ;;  %v6001_v5 = vsub.s32 4, %v14174_v43 }
 0x6ff   : > { %v5588_v21 = vsel %vm13997_vm11, 0, %v5586_v12  ;;  %vm5386_vm10 = vcmp.lt.s32.totalorder %v5385_v8, 2  ;;  %vm5387_vm9 = vcmp.eq.s32.totalorder %v5385_v8, 0  ;;  %vm5390_vm5 = vcmp.eq.s32.totalorder %v5385_v8, 2  ;;  %v16535_v12 = vld [vmem:[#allocation20_spill] sm:$0xff] }
 0x700   : > { %v5801_v18 = vand.u32 3, %v5800_v44  ;;  %v6000_v27 = vsel %vm5917_vm12, %v5999_v46, %v5998_v57  ;;  %v5389_v45 = vsel %vm5387_vm9, %v13943_v19, %v5388_v28  ;;  %v5392_v40 = vsel %vm5390_vm5, %v5391_v47, %v14012_v50 }
 0x701   : > { %v5592_v62 = vadd.s32 3, %v5588_v21  ;;  %v6003_v13 = vsel %vm14250_vm4, %v13899_v4, %v6000_v27  ;;  %v5393_v31 = vsel %vm5386_vm10, %v5389_v45, %v5392_v40  ;;  %v5599_v52 = vxor.u32 2147483648, %v16524_v39  ;;  %v14287_v26 = vpop.eup %8990  ;;  %v16536_v21 = vld [vmem:[#allocation21_spill] sm:$0xff] }
 0x702   : > { %vm5803_vm11 = vcmp.eq.s32.totalorder %v5801_v18, 0  ;;  %8994 = vcosq.f32 %v6003_v13  ;;  %vm5802_vm3 = vcmp.lt.s32.totalorder %v5801_v18, 2  ;;  %vm5806_vm1 = vcmp.eq.s32.totalorder %v5801_v18, 2  ;;  %v14289_v14 = vpop.eup %8992  ;;  %v16537_v45 = vld [vmem:[#allocation9_spill] sm:$0xff] }
 0x703   : > { %v5805_v20 = vsel %vm5803_vm11, %v8989_v49, %v5804_v48  ;;  %8996 = vsinq.f32 %v6003_v13  ;;  %v5808_v19 = vsel %vm5806_vm1, %v5807_v63, %v14239_v15  ;;  %v5593_v50 = vand.u32 3, %v5592_v62  ;;  %v16530_v15 = vld [vmem:[#allocation35_spill] sm:$0xff] }
 0x704   : > { %v6002_v61 = vsel %vm5917_vm12, %v6001_v5, %v14174_v43  ;;  %v5809_v7 = vsel %vm5802_vm3, %v5805_v20, %v5808_v19  ;;  %v5281_v51 = vand.u32 3, %v16525_v54  ;;  %v5284_v23 = vxor.u32 2147483648, %v16526_v32 }
 0x705   : > { %v6004_v16 = vsel %vm14250_vm4, 0, %v6002_v61  ;;  %v16529_v24 = vsel %vm13947_vm14, 0, %v16528_v58  ;;  %v16531_v60 = vsel %vm14018_vm0, 0, %v16530_v15  ;;  %v5394_v43 = vsel %vm5383_vm7, nan, %v5393_v31 }
 0x706   : > { %v5696_v3 = vadd.s32 3, %v16529_v24  ;;  %v5904_v36 = vadd.s32 3, %v16531_v60  ;;  %v5810_v37 = vsel %vm5799_vm6, nan, %v5809_v7  ;;  %vm5595_vm12 = vcmp.eq.s32.totalorder %v5593_v50, 0 }
 0x707   : > { %v8468_v0 = vpack.c.bf16 %v5810_v37, %v5394_v43  ;;  %vm5598_vm15 = vcmp.eq.s32.totalorder %v5593_v50, 2  ;;  %v6008_v30 = vadd.s32 3, %v6004_v16  ;;  %v5597_v25 = vsel %vm5595_vm12, %v16524_v39, %v5596_v42 }
 0x708   : > { %v5600_v49 = vsel %vm5598_vm15, %v5599_v52, %v14095_v35  ;;  %vm5279_vm14 = vweird.f32 %v16532_v29  ;;  %vm5283_vm8 = vcmp.eq.s32.totalorder %v5281_v51, 0  ;;  %vm5594_vm0 = vcmp.lt.s32.totalorder %v5593_v50, 2  ;;  %v6019_v50 = vld [vmem:[%s15884_s7] sm:$0xff] }
 0x709   : > { %8469 = vmatprep.subr.bf16.mxu0 %v8468_v0  ;;  %v6009_v33 = vand.u32 3, %v6008_v30  ;;  %v5285_v41 = vsel %vm5283_vm8, %v16533_v59, %v5284_v23  ;;  %v5287_v55 = vxor.u32 2147483648, %v16533_v59  ;;  %vm5591_vm4 = vweird.f32 %v13543_v11  ;;  %v16539_v23 = vld [vmem:[#allocation23_spill] sm:$0xff] }
 0x70a   : > { %vm6007_vm2 = vweird.f32 %v13899_v4  ;;  %vm5286_vm7 = vcmp.eq.s32.totalorder %v5281_v51, 2  ;;  %v5697_v17 = vand.u32 3, %v5696_v3  ;;  %v5700_v28 = vxor.u32 2147483648, %v14217_v22  ;;  %v14372_v3 = vpop.permute.xlu0 %6029 }
 0x70b   : > { %v5703_v35 = vxor.u32 2147483648, %v14101_v6  ;;  %v5601_v56 = vsel %vm5594_vm0, %v5597_v25, %v5600_v49  ;;  %vm5282_vm6 = vcmp.lt.s32.totalorder %v5281_v51, 2  ;;  %v5288_v47 = vsel %vm5286_vm7, %v5287_v55, %v16526_v32 }
 0x70c   : > { %vm5695_vm13 = vweird.f32 %v16534_v53  ;;  %vm6010_vm10 = vcmp.lt.s32.totalorder %v6009_v33, 2  ;;  %v5289_v9 = vsel %vm5282_vm6, %v5285_v41, %v5288_v47  ;;  %vm5699_vm9 = vcmp.eq.s32.totalorder %v5697_v17, 0  ;;  %v8995_v57 = vpop.eup %8994 }
 0x70d   : > { %vm5702_vm5 = vcmp.eq.s32.totalorder %v5697_v17, 2  ;;  %vm6014_vm11 = vcmp.eq.s32.totalorder %v6009_v33, 2  ;;  %vm5698_vm3 = vcmp.lt.s32.totalorder %v5697_v17, 2  ;;  %v5701_v10 = vsel %vm5699_vm9, %v14101_v6, %v5700_v28  ;;  %v8997_v8 = vpop.eup %8996 }
 0x70e   : > { %v5704_v48 = vsel %vm5702_vm5, %v5703_v35, %v14217_v22  ;;  %v6015_v44 = vxor.u32 2147483648, %v8995_v57  ;;  %v5489_v46 = vand.u32 3, %v16535_v12  ;;  %v5492_v42 = vxor.u32 2147483648, %v16536_v21 }
 0x70f   : > { %v5705_v63 = vsel %vm5698_vm3, %v5701_v10, %v5704_v48  ;;  %v6012_v5 = vxor.u32 2147483648, %v8997_v8  ;;  %v5290_v18 = vsel %vm5279_vm14, nan, %v5289_v9  ;;  %v5495_v40 = vxor.u32 2147483648, %v16537_v45 }
 0x710   : > { %v5706_v27 = vsel %vm5695_vm13, nan, %v5705_v63  ;;  %vm6011_vm1 = vcmp.eq.s32.totalorder %v6009_v33, 0  ;;  %v6016_v6 = vsel %vm6014_vm11, %v6015_v44, %v8997_v8  ;;  %vm5491_vm12 = vcmp.eq.s32.totalorder %v5489_v46, 0 }
 0x711   : > { %v8470_v62 = vpack.c.bf16 %v5706_v27, %v5290_v18  ;;  %v6013_v22 = vsel %vm6011_vm1, %v8995_v57, %v6012_v5  ;;  %v5493_v13 = vsel %vm5491_vm12, %v16537_v45, %v5492_v42  ;;  %vm5494_vm15 = vcmp.eq.s32.totalorder %v5489_v46, 2 }
 0x712   : > { %v5905_v31 = vand.u32 3, %v5904_v36  ;;  %v6017_v39 = vsel %vm6010_vm10, %v6013_v22, %v6016_v6  ;;  %v5496_v52 = vsel %vm5494_vm15, %v5495_v40, %v16536_v21  ;;  %v5908_v20 = vxor.u32 2147483648, %v14289_v14 }
 0x713   : > { %8471 = vmatpush1.bf16.msra.mxu0 %v8470_v62  ;;  %v5911_v19 = vxor.u32 2147483648, %v14287_v26  ;;  %v5602_v61 = vsel %vm5591_vm4, nan, %v5601_v56  ;;  %v6018_v7 = vsel %vm6007_vm2, nan, %v6017_v39  ;;  %vm5490_vm14 = vcmp.lt.s32.totalorder %v5489_v46, 2 }
 0x714   : > { %vm5907_vm8 = vcmp.eq.s32.totalorder %v5905_v31, 0  ;;  %v8476_v16 = vpack.c.bf16 %v6018_v7, %v5602_v61  ;;  %v5497_v54 = vsel %vm5490_vm14, %v5493_v13, %v5496_v52  ;;  %vm5910_vm0 = vcmp.eq.s32.totalorder %v5905_v31, 2 }
 0x715   : > { %v5909_v51 = vsel %vm5907_vm8, %v14287_v26, %v5908_v20  ;;  %vm5906_vm7 = vcmp.lt.s32.totalorder %v5905_v31, 2  ;;  %v5912_v32 = vsel %vm5910_vm0, %v5911_v19, %v14289_v14  ;;  %vm16538_vm6 = vcmask 261120   ;;  %v6021_v14 = vld [vmem:[%s15884_s7 + $0x10] sm:$0xff] }
 0x716   : > { %8352 = vmatmul.mubr.msk.f32.vlgmr.msra.gmra.mrb[16].mxu0 %vm16538_vm6, %v6019_v50  ;;  %8477 = vmatprep.subr.bf16.mxu1 %v8476_v16  ;;  %vm5487_vm13 = vweird.f32 %v16539_v23  ;;  %vm5903_vm4 = vweird.f32 %v13798_v38  ;;  %v5913_v11 = vsel %vm5906_vm7, %v5909_v51, %v5912_v32  ;;  %v16540_v4 = vmov 0.0   ;;  %vm16541_vm2 = vmmov %vm16538_vm6  ;;  %v6022_v38 = vld [vmem:[%s15884_s7 + $0x18] sm:$0xff] }
 0x717   : > { %6129 = vmatprep.mubr.f32.mxu0 %v16540_v4  ;;  %v5498_v58 = vsel %vm5487_vm13, nan, %v5497_v54  ;;  %v5914_v26 = vsel %vm5903_vm4, nan, %v5913_v11  ;;  %vm16542_vm10 = vmmov %vm16541_vm2  ;;  %v16550_v40 = vmov 683565275   ;;  %v16551_v62 = vmov 2475754826  }
 0x718   : > { %v8478_v24 = vpack.c.bf16 %v5914_v26, %v5498_v58  ;;  %vm16543_vm9 = vmmov %vm16541_vm2  ;;  %v16552_v13 = vmov 2131351028   ;;  %v16553_v39 = vmov 2102212464  }
 0x719   : > { %vm16544_vm5 = vmmov %vm16541_vm2 }
 0x71a   : > { %8353 = vmatmul.mubr.msk.f32.gmra.mrb[18].mxu0 %vm16541_vm2, %v6020_v34  ;;  %8479 = vmatpush1.bf16.msra.mxu1 %v8478_v24  ;;  %vm16545_vm11 = vmmov %vm16541_vm2 }
 0x71b   : > { %6135 = vmatprep.mubr.f32.mxu0 %v16540_v4  ;;  %vm16546_vm3 = vmmov %vm16541_vm2 }
 0x71c   : > { %vm16547_vm1 = vmmov %vm16541_vm2 }
 0x71d   : > { %8356 = vmatmul.mubr.msk.f32.vlgmr.msra.gmra.mrb[16].mxu1 %vm16542_vm10, %v6019_v50 }
 0x71e   : > { %8354 = vmatmul.mubr.msk.f32.gmra.mrb[20].mxu0 %vm16543_vm9, %v6021_v14  ;;  %6218 = vmatprep.mubr.f32.mxu1 %v16540_v4 }
 0x71f   : > { %6141 = vmatprep.mubr.f32.mxu0 %v16540_v4 }
 0x721   : > { %8357 = vmatmul.mubr.msk.f32.gmra.mrb[18].mxu1 %vm16544_vm5, %v6020_v34 }
 0x722   : > { %8355 = vmatmul.mubr.msk.f32.gmra.mrb[22].mxu0 %vm16545_vm11, %v6022_v38  ;;  %6224 = vmatprep.mubr.f32.mxu1 %v16540_v4 }
 0x723   : > { %7975 = vmatprep.mubr.f32.mxu0 %v16540_v4 }
 0x725   : > { %8358 = vmatmul.mubr.msk.f32.gmra.mrb[20].mxu1 %vm16546_vm3, %v6021_v14 }
 0x726   : > { %6230 = vmatprep.mubr.f32.mxu1 %v16540_v4 }
 0x729   : > { %8359 = vmatmul.mubr.msk.f32.gmra.mrb[22].mxu1 %vm16547_vm1, %v6022_v38 }
 0x72a   : > { %8046 = vmatprep.mubr.f32.mxu1 %v16540_v4 }
 0x7e9   : > { %v6125_v15 = vpop.f32.mrb[16].mxu0 }
 0x7ea   : > { %v14375_v60 = vadd.f32 %v6125_v15, %v14372_v3  ;;  %v6127_v36 = vpop.f32.mrb[17].mxu0 }
 0x7eb   : > { %v14378_v43 = vadd.f32 %v6127_v36, %v14372_v3 }
 0x7ec   : > { %16548 = vst [vmem:[#allocation27_spill] sm:$0xff] %v14375_v60  ;;  %v6237_v37 = vand.u32 2147483647, %v14375_v60  ;;  %v6240_v0 = vand.u32 2139095040, %v14375_v60 }
 0x7ed   : > { %v6344_v30 = vand.u32 2139095040, %v14378_v43  ;;  %v14383_v25 = vpop.f32.mrb[18].mxu0  ;;  %v6341_v59 = vand.u32 2147483647, %v14378_v43 }
 0x7ee   : > { %v6241_v49 = vshrl.u32 %v6240_v0, 23  ;;  %v14385_v29 = vpop.f32.mrb[19].mxu0  ;;  %v6244_v33 = vand.u32 8388607, %v6237_v37 }
 0x7ef   : > { %v6345_v41 = vshrl.u32 %v6344_v30, 23  ;;  %v6348_v9 = vand.u32 8388607, %v6341_v59 }
 0x7f0   : > { %v8360_v55 = vadd.s32 4294967169, %v6241_v49  ;;  %v6214_v17 = vpop.f32.mrb[16].mxu1  ;;  %v6245_v53 = vor.u32 8388608, %v6244_v33 }
 0x7f1   : > { %v8364_v28 = vadd.s32 4294967169, %v6345_v41  ;;  %v14391_v56 = vadd.f32 %v6214_v17, %v14372_v3  ;;  %v14393_v47 = vpop.f32.mrb[17].mxu1  ;;  %v6349_v42 = vor.u32 8388608, %v6348_v9  ;;  %v14418_v51 = vpop.f32.mrb[20].mxu0 }
 0x7f2   : > { %v6247_v35 = vadd.s32 1, %v8360_v55  ;;  %v14403_v21 = vshll.u32 %v6245_v53, 8 }
 0x7f3   : > { %16549 = vst [vmem:[#allocation43_spill] sm:$0xff] %v14391_v56  ;;  %v6351_v57 = vadd.s32 1, %v8364_v28  ;;  %v6445_v10 = vand.u32 2147483647, %v14391_v56  ;;  %v6448_v48 = vand.u32 2139095040, %v14391_v56 }
 0x7f4   : > { %vm6248_vm12 = vcmp.gt.s32.totalorder %v6247_v35, 0  ;;  %v14399_v44 = vpop.f32.mrb[18].mxu1 }
 0x7f5   : > { %v6249_v8 = vsel %vm6248_vm12, %v6247_v35, 0  ;;  %vm6352_vm15 = vcmp.gt.s32.totalorder %v6351_v57, 0  ;;  %v14401_v12 = vpop.f32.mrb[19].mxu1  ;;  %v6449_v18 = vshrl.u32 %v6448_v48, 23  ;;  %v6452_v27 = vand.u32 8388607, %v6445_v10  ;;  %v14429_v48 = vpop.permute.xlu1 %6034 }
 0x7f6   : > { %v6251_v63 = vand.u32 31, %v6249_v8  ;;  %v6250_v46 = vshrl.u32 %v6249_v8, 5  ;;  %v6353_v45 = vsel %vm6352_vm15, %v6351_v57, 0 }
 0x7f7   : > { %v8368_v4 = vadd.s32 4294967169, %v6449_v18  ;;  %v6453_v41 = vor.u32 8388608, %v6452_v27  ;;  %v14437_v18 = vadd.f32 %v14393_v47, %v14372_v3  ;;  %v14441_v27 = vadd.f32 %v14383_v25, %v14429_v48 }
 0x7f8   : > { %v6252_v5 = vsub.s32 32, %v6251_v63  ;;  %v6254_v6 = vshll.u32 %v16550_v40, %v6251_v63  ;;  %v6257_v22 = vshll.u32 %v16551_v62, %v6251_v63  ;;  %v6260_v31 = vshll.u32 %v16552_v13, %v6251_v63 }
 0x7f9   : > { %v6263_v52 = vshll.u32 %v16553_v39, %v6251_v63  ;;  %v6266_v61 = vshll.u32 %v16401_v1, %v6251_v63  ;;  %vm6269_vm14 = vcmp.lt.s32.totalorder %v6250_v46, 1  ;;  %vm6271_vm8 = vcmp.lt.s32.totalorder %v6250_v46, 3  ;;  %16554 = vst [vmem:[#allocation44_spill] sm:$0xff] %v14437_v18  ;;  %16555 = vst [vmem:[#allocation28_spill] sm:$0xff] %v14441_v27 }
 0x7fa   : > { %v6255_v20 = vshrl.u32 %v16551_v62, %v6252_v5  ;;  %v6258_v19 = vshrl.u32 %v16552_v13, %v6252_v5  ;;  %v6261_v50 = vshrl.u32 %v16553_v39, %v6252_v5  ;;  %v6253_v7 = vshrl.u32 %v16550_v40, %v6252_v5 }
 0x7fb   : > { %v6264_v16 = vshrl.u32 %v16401_v1, %v6252_v5  ;;  %v6267_v54 = vshrl.u32 %v16402_v2, %v6252_v5  ;;  %vm6272_vm0 = vcmp.lt.s32.totalorder %v6250_v46, 4  ;;  %v6455_v30 = vadd.s32 1, %v8368_v4 }
 0x7fc   : > { %v6256_v32 = vor.u32 %v6255_v20, %v6254_v6  ;;  %v6259_v23 = vor.u32 %v6258_v19, %v6257_v22  ;;  %v6262_v11 = vor.u32 %v6261_v50, %v6260_v31  ;;  %vm6270_vm7 = vcmp.lt.s32.totalorder %v6250_v46, 2 }
 0x7fd   : > { %v6265_v34 = vor.u32 %v6264_v16, %v6263_v52  ;;  %v6268_v58 = vor.u32 %v6267_v54, %v6266_v61  ;;  %vm6456_vm6 = vcmp.gt.s32.totalorder %v6455_v30, 0  ;;  %v14431_v63 = vand.u32 31, %v6353_v45 }
 0x7fe   : > { %v6273_v26 = vsel %vm6269_vm14, %v6253_v7, %v6256_v32  ;;  %v6274_v24 = vsel %vm6272_vm0, %v6262_v11, 2102212464  ;;  %v6277_v14 = vsel %vm6269_vm14, %v6256_v32, %v6259_v23  ;;  %v6281_v38 = vsel %vm6269_vm14, %v6259_v23, %v6262_v11 }
 0x7ff   : > { %v6275_v15 = vsel %vm6271_vm8, %v6259_v23, %v6274_v24  ;;  %v6278_v36 = vsel %vm6272_vm0, %v6265_v34, 920167782  ;;  %v6282_v0 = vsel %vm6272_vm0, %v6268_v58, 1326507024  ;;  %v6457_v8 = vsel %vm6456_vm6, %v6455_v30, 0 }
 0x800   : > { %v6279_v49 = vsel %vm6271_vm8, %v6262_v11, %v6278_v36  ;;  %v6283_v33 = vsel %vm6271_vm8, %v6265_v34, %v6282_v0  ;;  %v6276_v55 = vsel %vm6270_vm7, %v6273_v26, %v6275_v15  ;;  %v6459_v46 = vand.u32 31, %v6457_v8 }
 0x801   : > { %v6280_v17 = vsel %vm6270_vm7, %v6277_v14, %v6279_v49  ;;  %v6284_v28 = vsel %vm6270_vm7, %v6281_v38, %v6283_v33  ;;  %v14433_v5 = vshll.u32 %v6349_v42, 8  ;;  %v6292_v6 = vmul.u32 %v14403_v21, %v6276_v55  ;;  %v14466_v14 = vpop.f32.mrb[20].mxu1 }
 0x802   : > { %v14421_v35 = vmul.u32.u64.low %v14403_v21, %v6284_v28  ;;  %v14422_v53 = vmul.u32.u64.high %v14403_v21, %v6284_v28, %v14421_v35  ;;  %v14425_v9 = vmul.u32.u64.low %v14403_v21, %v6280_v17  ;;  %v14426_v57 = vmul.u32.u64.high %v14403_v21, %v6280_v17, %v14425_v9 }
 0x803   : > { %v6458_v22 = vshrl.u32 %v6457_v8, 5  ;;  %v14444_v31 = vshll.u32 %v6453_v41, 8  ;;  %v14446_v52 = vshrl.u32 %v6353_v45, 5  ;;  %v6460_v20 = vsub.s32 32, %v6459_v46 }
 0x804   : > { %vm6294_vm13 = vc.u32 %v14422_v53, %v14425_v9  ;;  %v6295_v42 = vadd.s32 1, %v14426_v57  ;;  %v14452_v3 = vsub.s32 32, %v14431_v63  ;;  %v6462_v47 = vshll.u32 %v16550_v40, %v6459_v46 }
 0x805   : > { %v6465_v25 = vshll.u32 %v16551_v62, %v6459_v46  ;;  %v6468_v21 = vshll.u32 %v16552_v13, %v6459_v46  ;;  %v6471_v19 = vshll.u32 %v16553_v39, %v6459_v46  ;;  %v6461_v50 = vshrl.u32 %v16550_v40, %v6460_v20 }
 0x806   : > { %v6296_v45 = vsel %vm6294_vm13, %v6295_v42, %v14426_v57  ;;  %v6463_v61 = vshrl.u32 %v16551_v62, %v6460_v20  ;;  %v6466_v7 = vshrl.u32 %v16552_v13, %v6460_v20  ;;  %v6469_v54 = vshrl.u32 %v16553_v39, %v6460_v20 }
 0x807   : > { %v6297_v16 = vadd.s32 %v6296_v45, %v6292_v6  ;;  %v6472_v32 = vshrl.u32 %v16401_v1, %v6460_v20  ;;  %v6474_v23 = vshll.u32 %v16401_v1, %v6459_v46  ;;  %v6475_v34 = vshrl.u32 %v16402_v2, %v6460_v20 }
 0x808   : > { %v6464_v11 = vor.u32 %v6463_v61, %v6462_v47  ;;  %v6467_v4 = vor.u32 %v6466_v7, %v6465_v25  ;;  %vm6477_vm4 = vcmp.lt.s32.totalorder %v6458_v22, 1  ;;  %v6470_v26 = vor.u32 %v6469_v54, %v6468_v21 }
 0x809   : > { %v6298_v58 = vadd.s32 536870912, %v6297_v16  ;;  %v6473_v24 = vor.u32 %v6472_v32, %v6471_v19  ;;  %vm6478_vm2 = vcmp.lt.s32.totalorder %v6458_v22, 2  ;;  %v6476_v38 = vor.u32 %v6475_v34, %v6474_v23 }
 0x80a   : > { %vm6479_vm10 = vcmp.lt.s32.totalorder %v6458_v22, 3  ;;  %vm6480_vm9 = vcmp.lt.s32.totalorder %v6458_v22, 4  ;;  %v6481_v15 = vsel %vm6477_vm4, %v6461_v50, %v6464_v11  ;;  %v6485_v30 = vsel %vm6477_vm4, %v6464_v11, %v6467_v4 }
 0x80b   : > { %v14469_v36 = vshrl.u32 %v6298_v58, 30  ;;  %v6482_v0 = vsel %vm6480_vm9, %v6470_v26, 2102212464  ;;  %v6486_v49 = vsel %vm6480_vm9, %v6473_v24, 920167782  ;;  %v6489_v55 = vsel %vm6477_vm4, %v6467_v4, %v6470_v26 }
 0x80c   : > { %v6483_v33 = vsel %vm6479_vm10, %v6467_v4, %v6482_v0  ;;  %v6487_v41 = vsel %vm6479_vm10, %v6470_v26, %v6486_v49  ;;  %v6490_v17 = vsel %vm6480_vm9, %v6476_v38, 1326507024  ;;  %v16079_v57 = vand.u32 2147483647, %v14437_v18 }
 0x80d   : > { %v6300_v28 = vshll.u32 %v14469_v36, 30  ;;  %v6488_v35 = vsel %vm6478_vm2, %v6485_v30, %v6487_v41  ;;  %v6552_v8 = vand.u32 2139095040, %v14437_v18  ;;  %v6491_v46 = vsel %vm6479_vm10, %v6473_v24, %v6490_v17 }
 0x80e   : > { %v14478_v6 = vmul.u32.u64.low %v14444_v31, %v6488_v35  ;;  %v14479_v42 = vmul.u32.u64.high %v14444_v31, %v6488_v35, %v14478_v6  ;;  %vm6373_vm5 = vcmp.lt.s32.totalorder %v14446_v52, 1  ;;  %v6484_v47 = vsel %vm6478_vm2, %v6481_v15, %v6483_v33 }
 0x80f   : > { %v14483_v20 = vsub.s32 %v6297_v16, %v6300_v28  ;;  %v6492_v25 = vsel %vm6478_vm2, %v6489_v55, %v6491_v46  ;;  %v6358_v21 = vshll.u32 %v16550_v40, %v14431_v63  ;;  %v6359_v50 = vshrl.u32 %v16551_v62, %v14452_v3 }
 0x810   : > { %v14490_v19 = vmul.u32.u64.low %v14444_v31, %v6492_v25  ;;  %v14491_v45 = vmul.u32.u64.high %v14444_v31, %v6492_v25, %v14490_v19  ;;  %v6361_v61 = vshll.u32 %v16551_v62, %v14431_v63  ;;  %v6362_v16 = vshrl.u32 %v16552_v13, %v14452_v3 }
 0x811   : > { %v6303_v7 = vsub.s32 0, %v14483_v20  ;;  %v6364_v22 = vshll.u32 %v16552_v13, %v14431_v63  ;;  %v6365_v54 = vshrl.u32 %v16553_v39, %v14452_v3  ;;  %v6500_v32 = vmul.u32 %v14444_v31, %v6484_v47 }
 0x812   : > { %v6503_v23 = vadd.s32 1, %v14479_v42  ;;  %v6367_v11 = vshll.u32 %v16553_v39, %v14431_v63  ;;  %v6368_v4 = vshrl.u32 %v16401_v1, %v14452_v3  ;;  %v6360_v58 = vor.u32 %v6359_v50, %v6358_v21 }
 0x813   : > { %v8361_v34 = vmin.u32 %v6303_v7, %v14483_v20  ;;  %v6363_v26 = vor.u32 %v6362_v16, %v6361_v61  ;;  %v6366_v24 = vor.u32 %v6365_v54, %v6364_v22  ;;  %vm6502_vm11 = vc.u32 %v14491_v45, %v14478_v6 }
 0x814   : > { %v6369_v38 = vor.u32 %v6368_v4, %v6367_v11  ;;  %v6370_v31 = vshll.u32 %v16401_v1, %v14431_v63  ;;  %v6371_v15 = vshrl.u32 %v16402_v2, %v14452_v3  ;;  %v6504_v30 = vsel %vm6502_vm11, %v6503_v23, %v14479_v42 }
 0x815   : > { %v6305_v0 = vclz %v8361_v34  ;;  %vm6374_vm3 = vcmp.lt.s32.totalorder %v14446_v52, 2  ;;  %vm6375_vm1 = vcmp.lt.s32.totalorder %v14446_v52, 3  ;;  %v6293_v49 = vadd.s32 %v14425_v9, %v14422_v53 }
 0x816   : > { %v6505_v33 = vadd.s32 %v6504_v30, %v6500_v32  ;;  %v6372_v41 = vor.u32 %v6371_v15, %v6370_v31  ;;  %vm6376_vm12 = vcmp.lt.s32.totalorder %v14446_v52, 4  ;;  %v6381_v63 = vsel %vm6373_vm5, %v6360_v58, %v6363_v26 }
 0x817   : > { %v8362_v55 = vadd.s32 4294967294, %v6305_v0  ;;  %v6382_v17 = vsel %vm6376_vm12, %v6369_v38, 920167782  ;;  %v6385_v28 = vsel %vm6373_vm5, %v6363_v26, %v6366_v24  ;;  %v6357_v46 = vshrl.u32 %v16550_v40, %v14452_v3 }
 0x818   : > { %v6506_v35 = vadd.s32 536870912, %v6505_v33  ;;  %v6383_v42 = vsel %vm6375_vm1, %v6366_v24, %v6382_v17  ;;  %v6386_v53 = vsel %vm6376_vm12, %v6372_v41, 1326507024  ;;  %v6378_v9 = vsel %vm6376_vm12, %v6366_v24, 2102212464 }
 0x819   : > { %vm8363_vm15 = vcmp.lt.s32.totalorder %v8362_v55, 0  ;;  %v6387_v47 = vsel %vm6375_vm1, %v6369_v38, %v6386_v53  ;;  %v6553_v25 = vshrl.u32 %v6552_v8, 23  ;;  %v6384_v50 = vsel %vm6374_vm3, %v6381_v63, %v6383_v42 }
 0x81a   : > { %v6308_v21 = vsel %vm8363_vm15, 0, %v8362_v55  ;;  %v14533_v19 = vshrl.u32 %v6506_v35, 30  ;;  %v6388_v61 = vsel %vm6374_vm3, %v6385_v28, %v6387_v47  ;;  %v6377_v16 = vsel %vm6373_vm5, %v6357_v46, %v6360_v58  ;;  %v14568_v35 = vpop.f32.mrb[21].mxu0 }
 0x81b   : > { %v6309_v3 = vsub.s32 32, %v6308_v21  ;;  %v6313_v7 = vsub.s32 4294967266, %v6308_v21  ;;  %v8372_v22 = vadd.s32 4294967169, %v6553_v25  ;;  %v6379_v8 = vsel %vm6375_vm1, %v6363_v26, %v6378_v9 }
 0x81c   : > { %v6508_v54 = vshll.u32 %v14533_v19, 30  ;;  %v14545_v32 = vmul.u32.u64.low %v14433_v5, %v6388_v61  ;;  %v14546_v23 = vmul.u32.u64.high %v14433_v5, %v6388_v61, %v14545_v32  ;;  %v6656_v24 = vand.u32 2139095040, %v14441_v27 }
 0x81d   : > { %v6314_v11 = vadd.s32 127, %v6313_v7  ;;  %v14549_v4 = vmul.u32.u64.low %v14433_v5, %v6384_v50  ;;  %v14550_v34 = vmul.u32.u64.high %v14433_v5, %v6384_v50, %v14549_v4  ;;  %v6311_v38 = vshrl.u32 %v6293_v49, %v6309_v3 }
 0x81e   : > { %v14554_v58 = vsub.s32 %v6505_v33, %v6508_v54  ;;  %v6559_v31 = vadd.s32 1, %v8372_v22  ;;  %v6380_v26 = vsel %vm6374_vm3, %v6377_v16, %v6379_v8  ;;  %v6556_v0 = vand.u32 8388607, %v16079_v57 }
 0x81f   : > { %v6315_v15 = vshll.u32 %v6314_v11, 23  ;;  %v6310_v30 = vshll.u32 %v14483_v20, %v6308_v21  ;;  %vm6398_vm14 = vc.u32 %v14546_v23, %v14549_v4  ;;  %v6399_v55 = vadd.s32 1, %v14550_v34 }
 0x820   : > { %v6511_v41 = vsub.s32 0, %v14554_v58  ;;  %vm6560_vm8 = vcmp.gt.s32.totalorder %v6559_v31, 0  ;;  %v6653_v49 = vand.u32 2147483647, %v14441_v27  ;;  %v6657_v33 = vshrl.u32 %v6656_v24, 23 }
 0x821   : > { %v6312_v63 = vor.u32 %v6311_v38, %v6310_v30  ;;  %v6396_v17 = vmul.u32 %v14433_v5, %v6380_v26  ;;  %v6561_v28 = vsel %vm6560_vm8, %v6559_v31, 0  ;;  %v6316_v20 = vor.u32 4788187, %v6315_v15 }
 0x822   : > { %v8369_v52 = vmin.u32 %v6511_v41, %v14554_v58  ;;  %v6400_v46 = vsel %vm6398_vm14, %v6399_v55, %v14550_v34  ;;  %v6557_v42 = vor.u32 8388608, %v6556_v0  ;;  %v6563_v53 = vand.u32 31, %v6561_v28 }
 0x823   : > { %v6401_v47 = vadd.s32 %v6400_v46, %v6396_v17  ;;  %v6501_v25 = vadd.s32 %v14478_v6, %v14491_v45  ;;  %v6319_v50 = vcvt.s32.f32 %v6312_v63  ;;  %v8376_v7 = vadd.s32 4294967169, %v6657_v33 }
 0x824   : > { %v6513_v9 = vclz %v8369_v52  ;;  %v6564_v21 = vsub.s32 32, %v6563_v53  ;;  %v6317_v16 = vand.u32 2147483647, %v6316_v20  ;;  %v14574_v22 = vshll.u32 %v6557_v42, 8 }
 0x825   : > { %v6402_v3 = vadd.s32 536870912, %v6401_v47  ;;  %v14578_v54 = vand.u32 8388607, %v6653_v49  ;;  %v6562_v11 = vshrl.u32 %v6561_v28, 5  ;;  %v6566_v34 = vshll.u32 %v16550_v40, %v6563_v53 }
 0x826   : > { %v8370_v61 = vadd.s32 4294967294, %v6513_v9  ;;  %v6567_v5 = vshrl.u32 %v16551_v62, %v6564_v21  ;;  %v6570_v32 = vshrl.u32 %v16552_v13, %v6564_v21  ;;  %v6573_v6 = vshrl.u32 %v16553_v39, %v6564_v21 }
 0x827   : > { %v14580_v8 = vshrl.u32 %v6402_v3, 30  ;;  %v6576_v24 = vshrl.u32 %v16401_v1, %v6564_v21  ;;  %v6569_v15 = vshll.u32 %v16551_v62, %v6563_v53  ;;  %v6572_v26 = vshll.u32 %v16552_v13, %v6563_v53 }
 0x828   : > { %vm8371_vm0 = vcmp.lt.s32.totalorder %v8370_v61, 0  ;;  %v6568_v30 = vor.u32 %v6567_v5, %v6566_v34  ;;  %v6575_v41 = vshll.u32 %v16553_v39, %v6563_v53  ;;  %v6663_v55 = vadd.s32 1, %v8376_v7 }
 0x829   : > { %v6516_v45 = vsel %vm8371_vm0, 0, %v8370_v61  ;;  %v6404_v0 = vshll.u32 %v14580_v8, 30  ;;  %v6571_v52 = vor.u32 %v6570_v32, %v6569_v15  ;;  %v6574_v17 = vor.u32 %v6573_v6, %v6572_v26 }
 0x82a   : > { %v6517_v38 = vsub.s32 32, %v6516_v45  ;;  %v6521_v31 = vsub.s32 4294967266, %v6516_v45  ;;  %v6577_v20 = vor.u32 %v6576_v24, %v6575_v41  ;;  %v6578_v46 = vshll.u32 %v16401_v1, %v6563_v53 }
 0x82b   : > { %v14590_v28 = vsub.s32 %v6401_v47, %v6404_v0  ;;  %v6579_v42 = vshrl.u32 %v16402_v2, %v6564_v21  ;;  %v6320_v9 = vmul.f32 %v6319_v50, %v6317_v16  ;;  %v6518_v61 = vshll.u32 %v14554_v58, %v6516_v45 }
 0x82c   : > { %v6519_v33 = vshrl.u32 %v6501_v25, %v6517_v38  ;;  %v6522_v63 = vadd.s32 127, %v6521_v31  ;;  %v6565_v5 = vshrl.u32 %v16550_v40, %v6564_v21  ;;  %vm6581_vm7 = vcmp.lt.s32.totalorder %v6562_v11, 1 }
 0x82d   : > { %v6407_v34 = vsub.s32 0, %v14590_v28  ;;  %v6580_v7 = vor.u32 %v6579_v42, %v6578_v46  ;;  %vm6582_vm6 = vcmp.lt.s32.totalorder %v6562_v11, 2  ;;  %vm6583_vm13 = vcmp.lt.s32.totalorder %v6562_v11, 3 }
 0x82e   : > { %v6523_v3 = vshll.u32 %v6522_v63, 23  ;;  %v6520_v25 = vor.u32 %v6519_v33, %v6518_v61  ;;  %vm6584_vm4 = vcmp.lt.s32.totalorder %v6562_v11, 4  ;;  %v6589_v47 = vsel %vm6581_vm7, %v6568_v30, %v6571_v52 }
 0x82f   : > { %v8365_v32 = vmin.u32 %v6407_v34, %v14590_v28  ;;  %v6586_v53 = vsel %vm6584_vm4, %v6574_v17, 2102212464  ;;  %v6590_v6 = vsel %vm6584_vm4, %v6577_v20, 920167782  ;;  %v6593_v24 = vsel %vm6581_vm7, %v6571_v52, %v6574_v17 }
 0x830   : > { %v6524_v50 = vor.u32 4788187, %v6523_v3  ;;  %v6585_v16 = vsel %vm6581_vm7, %v6565_v5, %v6568_v30  ;;  %v6591_v58 = vsel %vm6583_vm13, %v6574_v17, %v6590_v6  ;;  %v6594_v45 = vsel %vm6584_vm4, %v6580_v7, 1326507024 }
 0x831   : > { %v6409_v38 = vclz %v8365_v32  ;;  %v6592_v21 = vsel %vm6582_vm6, %v6589_v47, %v6591_v58  ;;  %v6595_v31 = vsel %vm6583_vm13, %v6577_v20, %v6594_v45  ;;  %vm6664_vm2 = vcmp.gt.s32.totalorder %v6663_v55, 0 }
 0x832   : > { %v6587_v15 = vsel %vm6583_vm13, %v6571_v52, %v6586_v53  ;;  %v6596_v26 = vsel %vm6582_vm6, %v6593_v24, %v6595_v31  ;;  %v14601_v0 = vmul.u32.u64.low %v14574_v22, %v6592_v21  ;;  %v14602_v41 = vmul.u32.u64.high %v14574_v22, %v6592_v21, %v14601_v0  ;;  %v14610_v52 = vpop.f32.mrb[21].mxu1 }
 0x833   : > { %v8366_v33 = vadd.s32 4294967294, %v6409_v38  ;;  %v14606_v63 = vmul.u32.u64.low %v14574_v22, %v6596_v26  ;;  %v14607_v46 = vmul.u32.u64.high %v14574_v22, %v6596_v26, %v14606_v63  ;;  %v6665_v30 = vsel %vm6664_vm2, %v6663_v55, 0 }
 0x834   : > { %v6667_v17 = vand.u32 31, %v6665_v30  ;;  %v6321_v42 = vxor.u32 2147483648, %v6320_v9  ;;  %v6525_v61 = vand.u32 2147483647, %v6524_v50  ;;  %v6588_v20 = vsel %vm6582_vm6, %v6585_v16, %v6587_v15 }
 0x835   : > { %vm8367_vm10 = vcmp.lt.s32.totalorder %v8366_v33, 0  ;;  %v6607_v5 = vadd.s32 1, %v14602_v41  ;;  %v6661_v34 = vor.u32 8388608, %v14578_v54  ;;  %vm6239_vm9 = vcmp.lt.s32.totalorder %v14375_v60, 0 }
 0x836   : > { %v6412_v3 = vsel %vm8367_vm10, 0, %v8366_v33  ;;  %v6668_v7 = vsub.s32 32, %v6667_v17  ;;  %v6527_v47 = vcvt.s32.f32 %v6520_v25  ;;  %v14617_v55 = vadd.f32 %v14385_v29, %v14429_v48 }
 0x837   : > { %v6417_v32 = vsub.s32 4294967266, %v6412_v3  ;;  %v6323_v53 = vsub.s32 4, %v14469_v36  ;;  %v6397_v11 = vadd.s32 %v14549_v4, %v14546_v23  ;;  %v6604_v6 = vmul.u32 %v14574_v22, %v6588_v20 }
 0x838   : > { %vm6606_vm5 = vc.u32 %v14607_v46, %v14601_v0  ;;  %v14627_v54 = vsel %vm6239_vm9, %v6321_v42, %v6320_v9  ;;  %v14629_v25 = vmul.f32 %v6527_v47, %v6525_v61  ;;  %v6666_v16 = vshrl.u32 %v6665_v30, 5 }
 0x839   : > { %v6418_v24 = vadd.s32 127, %v6417_v32  ;;  %v6608_v29 = vsel %vm6606_vm5, %v6607_v5, %v14602_v41  ;;  %v6671_v58 = vshrl.u32 %v16551_v62, %v6668_v7  ;;  %v14633_v45 = vshll.u32 %v6661_v34, 8 }
 0x83a   : > { %v6609_v50 = vadd.s32 %v6608_v29, %v6604_v6  ;;  %v6413_v23 = vsub.s32 32, %v6412_v3  ;;  %v6670_v4 = vshll.u32 %v16550_v40, %v6667_v17  ;;  %v6673_v22 = vshll.u32 %v16551_v62, %v6667_v17 }
 0x83b   : > { %v6674_v38 = vshrl.u32 %v16552_v13, %v6668_v7  ;;  %v6419_v9 = vshll.u32 %v6418_v24, 23  ;;  %v6676_v31 = vshll.u32 %v16552_v13, %v6667_v17  ;;  %v6677_v15 = vshrl.u32 %v16553_v39, %v6668_v7 }
 0x83c   : > { %v6610_v21 = vadd.s32 536870912, %v6609_v50  ;;  %v6672_v26 = vor.u32 %v6671_v58, %v6670_v4  ;;  %v6679_v33 = vshll.u32 %v16553_v39, %v6667_v17  ;;  %v6680_v63 = vshrl.u32 %v16401_v1, %v6668_v7 }
 0x83d   : > { %v6675_v41 = vor.u32 %v6674_v38, %v6673_v22  ;;  %v6678_v42 = vor.u32 %v6677_v15, %v6676_v31  ;;  %v6682_v61 = vshll.u32 %v16401_v1, %v6667_v17  ;;  %v6683_v20 = vshrl.u32 %v16402_v2, %v6668_v7 }
 0x83e   : > { %v14642_v30 = vshrl.u32 %v6610_v21, 30  ;;  %v6414_v5 = vshll.u32 %v14590_v28, %v6412_v3  ;;  %v6669_v34 = vshrl.u32 %v16550_v40, %v6668_v7  ;;  %v6681_v47 = vor.u32 %v6680_v63, %v6679_v33 }
 0x83f   : > { %v14650_v32 = vadd.f32 %v14399_v44, %v14429_v48  ;;  %vm14654_vm11 = vcmp.le.f32.partialorder %v6237_v37, 0.7853982  ;;  %v6684_v17 = vor.u32 %v6683_v20, %v6682_v61  ;;  %vm6685_vm3 = vcmp.lt.s32.totalorder %v6666_v16, 1 }
 0x840   : > { %16556 = vst [vmem:[#allocation32_spill] sm:$0xff] %v14642_v30  ;;  %v6612_v24 = vshll.u32 %v14642_v30, 30  ;;  %vm6688_vm1 = vcmp.lt.s32.totalorder %v6666_v16, 4  ;;  %v6415_v29 = vshrl.u32 %v6397_v11, %v6413_v23  ;;  %v6420_v28 = vor.u32 4788187, %v6419_v9 }
 0x841   : > { %16557 = vst [vmem:[#allocation25_spill] sm:$0xff] %v14650_v32  ;;  %v6690_v3 = vsel %vm6688_vm1, %v6678_v42, 2102212464  ;;  %v6693_v7 = vsel %vm6685_vm3, %v6672_v26, %v6675_v41  ;;  %vm6687_vm12 = vcmp.lt.s32.totalorder %v6666_v16, 3  ;;  %v6694_v44 = vsel %vm6688_vm1, %v6681_v47, 920167782 }
 0x842   : > { %v14659_v58 = vsub.s32 %v6609_v50, %v6612_v24  ;;  %v6697_v4 = vsel %vm6685_vm3, %v6675_v41, %v6678_v42  ;;  %vm6686_vm15 = vcmp.lt.s32.totalorder %v6666_v16, 2  ;;  %v6689_v22 = vsel %vm6685_vm3, %v6669_v34, %v6672_v26 }
 0x843   : > { %v6695_v37 = vsel %vm6687_vm12, %v6678_v42, %v6694_v44  ;;  %v6698_v38 = vsel %vm6688_vm1, %v6684_v17, 1326507024  ;;  %v6691_v31 = vsel %vm6687_vm12, %v6675_v41, %v6690_v3  ;;  %v6416_v63 = vor.u32 %v6415_v29, %v6414_v5 }
 0x844   : > { %v6615_v21 = vsub.s32 0, %v14659_v58  ;;  %v6696_v15 = vsel %vm6686_vm15, %v6693_v7, %v6695_v37  ;;  %v6699_v33 = vsel %vm6687_vm12, %v6681_v47, %v6698_v38  ;;  %v6529_v50 = vxor.u32 2147483648, %v14629_v25 }
 0x845   : > { %v6700_v61 = vsel %vm6686_vm15, %v6697_v4, %v6699_v33  ;;  %v14663_v11 = vmul.u32.u64.low %v14633_v45, %v6696_v15  ;;  %v14664_v23 = vmul.u32.u64.high %v14633_v45, %v6696_v15, %v14663_v11  ;;  %v6421_v42 = vand.u32 2147483647, %v6420_v28 }
 0x846   : > { %v8373_v9 = vmin.u32 %v6615_v21, %v14659_v58  ;;  %v14670_v16 = vmul.u32.u64.low %v14633_v45, %v6700_v61  ;;  %v14671_v26 = vmul.u32.u64.high %v14633_v45, %v6700_v61, %v14670_v16  ;;  %v6692_v20 = vsel %vm6686_vm15, %v6689_v22, %v6691_v31 }
 0x847   : > { %v6864_v41 = vand.u32 2139095040, %v14650_v32  ;;  %v16077_v5 = vand.u32 2147483647, %v14617_v55  ;;  %v6324_v34 = vsel %vm6239_vm9, %v6323_v53, %v14469_v36  ;;  %vm6447_vm14 = vcmp.lt.s32.totalorder %v14391_v56, 0 }
 0x848   : > { %v6531_v47 = vsub.s32 4, %v14533_v19  ;;  %v6617_v24 = vclz %v8373_v9  ;;  %v6325_v17 = vsel %vm14654_vm11, %v14375_v60, %v14627_v54  ;;  %v6423_v29 = vcvt.s32.f32 %v6416_v63  ;;  %v14716_v63 = vpop.f32.mrb[22].mxu0 }
 0x849   : > { %v6711_v28 = vadd.s32 1, %v14664_v23  ;;  %v6865_v3 = vshrl.u32 %v6864_v41, 23  ;;  %v6530_v7 = vsel %vm6447_vm14, %v6529_v50, %v14629_v25  ;;  %v6708_v36 = vmul.u32 %v14633_v45, %v6692_v20 }
 0x84a   : > { %v8374_v44 = vadd.s32 4294967294, %v6617_v24  ;;  %vm6710_vm8 = vc.u32 %v14671_v26, %v14663_v11  ;;  %v6424_v53 = vmul.f32 %v6423_v29, %v6421_v42  ;;  %v16078_v22 = vand.u32 2147483647, %v14650_v32 }
 0x84b   : > { %v6712_v4 = vsel %vm6710_vm8, %v6711_v28, %v14664_v23  ;;  %v8384_v54 = vadd.s32 4294967169, %v6865_v3  ;;  %v6760_v38 = vand.u32 2139095040, %v14617_v55  ;;  %v6326_v21 = vsel %vm14654_vm11, 0, %v6324_v34 }
 0x84c   : > { %vm8375_vm0 = vcmp.lt.s32.totalorder %v8374_v44, 0  ;;  %v6713_v37 = vadd.s32 %v6712_v4, %v6708_v36  ;;  %vm14700_vm7 = vcmp.le.f32.partialorder %v6445_v10, 0.7853982  ;;  %8998 = vcosq.f32 %v6325_v17 }
 0x84d   : > { %v14704_v45 = vsel %vm8375_vm0, 0, %v8374_v44  ;;  %v6871_v31 = vadd.s32 1, %v8384_v54  ;;  %v14709_v15 = vsel %vm6447_vm14, %v6531_v47, %v14533_v19  ;;  %v14714_v6 = vsel %vm14700_vm7, %v14391_v56, %v6530_v7 }
 0x84e   : > { %v6714_v33 = vadd.s32 536870912, %v6713_v37  ;;  %v6425_v10 = vxor.u32 2147483648, %v6424_v53  ;;  %v6868_v61 = vand.u32 8388607, %v16078_v22  ;;  %v14722_v23 = vand.u32 8388607, %v16077_v5 }
 0x84f   : > { %vm6872_vm6 = vcmp.gt.s32.totalorder %v6871_v31, 0  ;;  %v6625_v19 = vsub.s32 4294967266, %v14704_v45  ;;  %v6761_v16 = vshrl.u32 %v6760_v38, 23  ;;  %9000 = vsinq.f32 %v6325_v17 }
 0x850   : > { %v14725_v50 = vshrl.u32 %v6714_v33, 30  ;;  %v6873_v9 = vsel %vm6872_vm6, %v6871_v31, 0  ;;  %v14727_v42 = vadd.s32 3, %v6326_v21  ;;  %vm6343_vm13 = vcmp.lt.s32.totalorder %v14378_v43, 0 }
 0x851   : > { %v6875_v20 = vand.u32 31, %v6873_v9  ;;  %v6534_v41 = vsel %vm14700_vm7, 0, %v14709_v15  ;;  %9002 = vcosq.f32 %v14714_v6  ;;  %v6605_v34 = vadd.s32 %v14601_v0, %v14607_v46 }
 0x852   : > { %16562 = vst [vmem:[#allocation18_spill] sm:$0xff] %v14727_v42  ;;  %v6716_v47 = vshll.u32 %v14725_v50, 30  ;;  %v14739_v24 = vsel %vm6343_vm13, %v6425_v10, %v6424_v53  ;;  %v6869_v17 = vor.u32 8388608, %v6868_v61  ;;  %v6621_v3 = vsub.s32 32, %v14704_v45 }
 0x853   : > { %v6876_v29 = vsub.s32 32, %v6875_v20  ;;  %v6626_v7 = vadd.s32 127, %v6625_v19  ;;  %v8380_v36 = vadd.s32 4294967169, %v6761_v16  ;;  %v6878_v4 = vshll.u32 %v16550_v40, %v6875_v20 }
 0x854   : > { %v14743_v44 = vsub.s32 %v6713_v37, %v6716_v47  ;;  %v6881_v46 = vshll.u32 %v16551_v62, %v6875_v20  ;;  %v6874_v38 = vshrl.u32 %v6873_v9, 5  ;;  %v6884_v21 = vshll.u32 %v16552_v13, %v6875_v20 }
 0x855   : > { %v6879_v0 = vshrl.u32 %v16551_v62, %v6876_v29  ;;  %v6882_v54 = vshrl.u32 %v16552_v13, %v6876_v29  ;;  %v6885_v31 = vshrl.u32 %v16553_v39, %v6876_v29  ;;  %v6887_v37 = vshll.u32 %v16553_v39, %v6875_v20 }
 0x856   : > { %v6719_v53 = vsub.s32 0, %v14743_v44  ;;  %v6888_v61 = vshrl.u32 %v16401_v1, %v6876_v29  ;;  %v14754_v19 = vpop.eup %8998  ;;  %v6627_v16 = vshll.u32 %v6626_v7, 23  ;;  %v14757_v5 = vshll.u32 %v6869_v17, 8 }
 0x857   : > { %v6880_v33 = vor.u32 %v6879_v0, %v6878_v4  ;;  %v6883_v10 = vor.u32 %v6882_v54, %v6881_v46  ;;  %16563 = vst [vmem:[#allocation34_spill] sm:$0xff] %v14754_v19  ;;  %v14761_v9 = vadd.f32 %v14401_v12, %v14429_v48  ;;  %v6886_v22 = vor.u32 %v6885_v31, %v6884_v21 }
 0x858   : > { %v8377_v47 = vmin.u32 %v6719_v53, %v14743_v44  ;;  %v6889_v57 = vor.u32 %v6888_v61, %v6887_v37  ;;  %v6890_v4 = vshll.u32 %v16401_v1, %v6875_v20  ;;  %v6891_v0 = vshrl.u32 %v16402_v2, %v6876_v29 }
 0x859   : > { %v6622_v46 = vshll.u32 %v14659_v58, %v14704_v45  ;;  %vm6655_vm4 = vcmp.lt.s32.totalorder %v14441_v27, 0  ;;  %vm6893_vm2 = vcmp.lt.s32.totalorder %v6874_v38, 1  ;;  %v6767_v54 = vadd.s32 1, %v8380_v36  ;;  %v14768_v17 = vpop.eup %9000 }
 0x85a   : > { %v6721_v7 = vclz %v8377_v47  ;;  %16564 = vst [vmem:[#allocation11_spill] sm:$0xff] %v14768_v17  ;;  %vm14772_vm10 = vcmp.le.f32.partialorder %v6341_v59, 0.7853982  ;;  %v6623_v48 = vshrl.u32 %v6605_v34, %v6621_v3  ;;  %v6892_v20 = vor.u32 %v6891_v0, %v6890_v4  ;;  %v14789_v47 = vpop.f32.mrb[22].mxu1 }
 0x85b   : > { %vm6896_vm9 = vcmp.lt.s32.totalorder %v6874_v38, 4  ;;  %v6901_v53 = vsel %vm6893_vm2, %v6880_v33, %v6883_v10  ;;  %v14777_v21 = vpop.eup %9002  ;;  %v6628_v58 = vor.u32 4788187, %v6627_v16  ;;  %vm6895_vm5 = vcmp.lt.s32.totalorder %v6874_v38, 3  ;;  %v14950_v17 = vpop.f32.mrb[23].mxu1 }
 0x85c   : > { %16567 = vst [vmem:[#allocation6_spill] sm:$0xff] %v14777_v21  ;;  %v8378_v45 = vadd.s32 4294967294, %v6721_v7  ;;  %v6902_v31 = vsel %vm6896_vm9, %v6889_v57, 920167782  ;;  %vm14781_vm11 = vcmp.le.f32.partialorder %v6653_v49, 0.7853982  ;;  %v6905_v3 = vsel %vm6893_vm2, %v6883_v10, %v6886_v22 }
 0x85d   : > { %vm6894_vm3 = vcmp.lt.s32.totalorder %v6874_v38, 2  ;;  %v6898_v59 = vsel %vm6896_vm9, %v6886_v22, 2102212464  ;;  %v6903_v34 = vsel %vm6895_vm5, %v6886_v22, %v6902_v31  ;;  %v6877_v37 = vshrl.u32 %v16550_v40, %v6876_v29 }
 0x85e   : > { %vm8379_vm1 = vcmp.lt.s32.totalorder %v8378_v45, 0  ;;  %v6904_v61 = vsel %vm6894_vm3, %v6901_v53, %v6903_v34  ;;  %v6906_v16 = vsel %vm6896_vm9, %v6892_v20, 1326507024  ;;  %v6624_v4 = vor.u32 %v6623_v48, %v6622_v46 }
 0x85f   : > { %v6739_v49 = vsub.s32 4, %v14725_v50  ;;  %v6907_v0 = vsel %vm6895_vm5, %v6889_v57, %v6906_v16  ;;  %vm6768_vm12 = vcmp.gt.s32.totalorder %v6767_v54, 0  ;;  %v14793_v7 = vsel %vm8379_vm1, 0, %v8378_v45 }
 0x860   : > { %v6897_v31 = vsel %vm6893_vm2, %v6877_v37, %v6880_v33  ;;  %v6899_v22 = vsel %vm6895_vm5, %v6883_v10, %v6898_v59  ;;  %v6908_v28 = vsel %vm6894_vm3, %v6905_v3, %v6907_v0  ;;  %9004 = vsinq.f32 %v14714_v6 }
 0x861   : > { %v14799_v29 = vmul.u32.u64.low %v14757_v5, %v6908_v28  ;;  %v14800_v53 = vmul.u32.u64.high %v14757_v5, %v6908_v28, %v14799_v29  ;;  %v14803_v20 = vmul.u32.u64.low %v14757_v5, %v6904_v61  ;;  %v14804_v46 = vmul.u32.u64.high %v14757_v5, %v6904_v61, %v14803_v20 }
 0x862   : > { %v14812_v57 = vadd.s32 3, %v6534_v41  ;;  %v6629_v33 = vand.u32 2147483647, %v6628_v58  ;;  %v6769_v10 = vsel %vm6768_vm12, %v6767_v54, 0  ;;  %v6729_v48 = vsub.s32 4294967266, %v14793_v7 }
 0x863   : > { %v14818_v28 = vsel %vm6655_vm4, %v6739_v49, %v14725_v50  ;;  %v6900_v45 = vsel %vm6894_vm3, %v6897_v31, %v6899_v22  ;;  %v6771_v59 = vand.u32 31, %v6769_v10  ;;  %v14825_v25 = vsel %vm14772_vm10, %v14378_v43, %v14739_v24 }
 0x864   : > { %16570 = vst [vmem:[#allocation24_spill] sm:$0xff] %v14812_v57  ;;  %v6631_v15 = vcvt.s32.f32 %v6624_v4  ;;  %v6709_v6 = vadd.s32 %v14663_v11, %v14671_v26  ;;  %v16571_v41 = vor.u32 8388608, %v14722_v23  ;;  %vm6918_vm15 = vc.u32 %v14800_v53, %v14803_v20 }
 0x865   : > { %v6919_v50 = vadd.s32 1, %v14804_v46  ;;  %v6772_v38 = vsub.s32 32, %v6771_v59  ;;  %v6725_v24 = vsub.s32 32, %v14793_v7  ;;  %v6742_v11 = vsel %vm14781_vm11, 0, %v14818_v28 }
 0x866   : > { %v14831_v54 = vshll.u32 %v16571_v41, 8  ;;  %v14837_v34 = vmul.f32 %v6631_v15, %v6629_v33  ;;  %v6916_v26 = vmul.u32 %v14757_v5, %v6900_v45  ;;  %v6730_v23 = vadd.s32 127, %v6729_v48 }
 0x867   : > { %v6920_v3 = vsel %vm6918_vm15, %v6919_v50, %v14804_v46  ;;  %v6775_v37 = vshrl.u32 %v16551_v62, %v6772_v38  ;;  %v6778_v61 = vshrl.u32 %v16552_v13, %v6772_v38  ;;  %v6774_v4 = vshll.u32 %v16550_v40, %v6771_v59 }
 0x868   : > { %v6921_v16 = vadd.s32 %v6920_v3, %v6916_v26  ;;  %v6777_v49 = vshll.u32 %v16551_v62, %v6771_v59  ;;  %v6781_v0 = vshrl.u32 %v16553_v39, %v6772_v38  ;;  %v6770_v31 = vshrl.u32 %v6769_v10, 5  ;;  %v14858_v10 = vpop.permute.xlu0 %6039 }
 0x869   : > { %v6780_v22 = vshll.u32 %v16552_v13, %v6771_v59  ;;  %v6783_v29 = vshll.u32 %v16553_v39, %v6771_v59  ;;  %v6784_v5 = vshrl.u32 %v16401_v1, %v6772_v38  ;;  %v6776_v46 = vor.u32 %v6775_v37, %v6774_v4 }
 0x86a   : > { %v6922_v33 = vadd.s32 536870912, %v6921_v16  ;;  %v6779_v48 = vor.u32 %v6778_v61, %v6777_v49  ;;  %v6968_v28 = vand.u32 2139095040, %v14761_v9  ;;  %v6786_v41 = vshll.u32 %v16401_v1, %v6771_v59  ;;  %v14856_v26 = vpop.eup %9004 }
 0x86b   : > { %v6782_v45 = vor.u32 %v6781_v0, %v6780_v22  ;;  %v6785_v15 = vor.u32 %v6784_v5, %v6783_v29  ;;  %v6787_v50 = vshrl.u32 %v16402_v2, %v6772_v38  ;;  %16572 = vst [vmem:[#allocation31_spill] sm:$0xff] %v14856_v26  ;;  %v6633_v3 = vxor.u32 2147483648, %v14837_v34 }
 0x86c   : > { %v6726_v58 = vshll.u32 %v14743_v44, %v14793_v7  ;;  %v6727_v56 = vshrl.u32 %v6709_v6, %v6725_v24  ;;  %v14863_v37 = vshrl.u32 %v6922_v33, 30  ;;  %vm16121_vm14 = vcmp.lt.s32.totalorder %v14437_v18, 0 }
 0x86d   : > { %v6731_v61 = vshll.u32 %v6730_v23, 23  ;;  %v6788_v4 = vor.u32 %v6787_v50, %v6786_v41  ;;  %vm6789_vm8 = vcmp.lt.s32.totalorder %v6770_v31, 1  ;;  %v14868_v59 = vadd.f32 %v14418_v51, %v14858_v10 }
 0x86e   : > { %v6924_v49 = vshll.u32 %v14863_v37, 30  ;;  %vm6792_vm0 = vcmp.lt.s32.totalorder %v6770_v31, 4  ;;  %v6797_v0 = vsel %vm6789_vm8, %v6776_v46, %v6779_v48  ;;  %v6969_v22 = vshrl.u32 %v6968_v28, 23 }
 0x86f   : > { %16573 = vst [vmem:[#allocation5_spill] sm:$0xff] %v14868_v59  ;;  %v6773_v44 = vshrl.u32 %v16550_v40, %v6772_v38  ;;  %vm6791_vm7 = vcmp.lt.s32.totalorder %v6770_v31, 3  ;;  %v6794_v7 = vsel %vm6792_vm0, %v6782_v45, 2102212464  ;;  %v6798_v6 = vsel %vm6792_vm0, %v6785_v15, 920167782 }
 0x870   : > { %v14873_v24 = vsub.s32 %v6921_v16, %v6924_v49  ;;  %vm6790_vm6 = vcmp.lt.s32.totalorder %v6770_v31, 2  ;;  %v6799_v23 = vsel %vm6791_vm7, %v6782_v45, %v6798_v6  ;;  %v6801_v29 = vsel %vm6789_vm8, %v6779_v48, %v6782_v45 }
 0x871   : > { %v6728_v5 = vor.u32 %v6727_v56, %v6726_v58  ;;  %v6732_v51 = vor.u32 4788187, %v6731_v61  ;;  %v6800_v33 = vsel %vm6790_vm6, %v6797_v0, %v6799_v23  ;;  %v6802_v41 = vsel %vm6792_vm0, %v6788_v4, 1326507024  ;;  %v14891_v61 = vpop.f32.mrb[23].mxu0 }
 0x872   : > { %v6927_v50 = vsub.s32 0, %v14873_v24  ;;  %v6793_v28 = vsel %vm6789_vm8, %v6773_v44, %v6776_v46  ;;  %v6795_v21 = vsel %vm6791_vm7, %v6779_v48, %v6794_v7  ;;  %v6803_v38 = vsel %vm6791_vm7, %v6785_v15, %v6802_v41 }
 0x873   : > { %v6804_v26 = vsel %vm6790_vm6, %v6801_v29, %v6803_v38  ;;  %v14881_v16 = vmul.u32.u64.low %v14831_v54, %v6800_v33  ;;  %v14882_v49 = vmul.u32.u64.high %v14831_v54, %v6800_v33, %v14881_v16  ;;  %v8388_v6 = vadd.s32 4294967169, %v6969_v22 }
 0x874   : > { %9006 = vcosq.f32 %v14825_v25  ;;  %v8385_v56 = vmin.u32 %v6927_v50, %v14873_v24  ;;  %v14888_v58 = vmul.u32.u64.low %v14831_v54, %v6804_v26  ;;  %v14889_v45 = vmul.u32.u64.high %v14831_v54, %v6804_v26, %v14888_v58 }
 0x875   : > { %9008 = vsinq.f32 %v14825_v25  ;;  %v14894_v46 = vadd.s32 3, %v6742_v11  ;;  %v6796_v48 = vsel %vm6790_vm6, %v6793_v28, %v6795_v21  ;;  %v6975_v15 = vadd.s32 1, %v8388_v6 }
 0x876   : > { %v14900_v4 = vsel %vm16121_vm14, %v6633_v3, %v14837_v34  ;;  %v6733_v0 = vand.u32 2147483647, %v6732_v51  ;;  %v6929_v22 = vclz %v8385_v56  ;;  %v16575_v44 = vand.u32 2147483647, %v14761_v9 }
 0x877   : > { %16574 = vst [vmem:[#allocation26_spill] sm:$0xff] %v14894_v46  ;;  %v6735_v7 = vcvt.s32.f32 %v6728_v5  ;;  %v6815_v23 = vadd.s32 1, %v14882_v49  ;;  %vm6976_vm2 = vcmp.gt.s32.totalorder %v6975_v15, 0  ;;  %v7072_v25 = vand.u32 2139095040, %v14868_v59 }
 0x878   : > { %v6972_v26 = vand.u32 8388607, %v16575_v44  ;;  %v8386_v11 = vadd.s32 4294967294, %v6929_v22  ;;  %v6812_v21 = vmul.u32 %v14831_v54, %v6796_v48  ;;  %vm6814_vm9 = vc.u32 %v14889_v45, %v14881_v16 }
 0x879   : > { %v6977_v31 = vsel %vm6976_vm2, %v6975_v15, 0  ;;  %v6917_v34 = vadd.s32 %v14803_v20, %v14800_v53  ;;  %v6816_v3 = vsel %vm6814_vm9, %v6815_v23, %v14882_v49  ;;  %v14914_v5 = vadd.f32 %v14466_v14, %v14858_v10 }
 0x87a   : > { %v6979_v29 = vand.u32 31, %v6977_v31  ;;  %v14916_v51 = vmul.f32 %v6735_v7, %v6733_v0  ;;  %vm8387_vm5 = vcmp.lt.s32.totalorder %v8386_v11, 0  ;;  %v6817_v33 = vadd.s32 %v6816_v3, %v6812_v21 }
 0x87b   : > { %16576 = vst [vmem:[#allocation33_spill] sm:$0xff] %v14914_v5  ;;  %v6973_v41 = vor.u32 8388608, %v6972_v26  ;;  %v6932_v54 = vsel %vm8387_vm5, 0, %v8386_v11  ;;  %v7073_v38 = vshrl.u32 %v7072_v25, 23  ;;  %v6978_v20 = vshrl.u32 %v6977_v31, 5 }
 0x87c   : > { %v6980_v50 = vsub.s32 32, %v6979_v29  ;;  %v6933_v6 = vsub.s32 32, %v6932_v54  ;;  %v6937_v56 = vsub.s32 4294967266, %v6932_v54  ;;  %v6818_v53 = vadd.s32 536870912, %v6817_v33 }
 0x87d   : > { %v6982_v49 = vshll.u32 %v16550_v40, %v6979_v29  ;;  %v6985_v14 = vshll.u32 %v16551_v62, %v6979_v29  ;;  %v6988_v44 = vshll.u32 %v16552_v13, %v6979_v29  ;;  %v6991_v11 = vshll.u32 %v16553_v39, %v6979_v29 }
 0x87e   : > { %v6983_v58 = vshrl.u32 %v16551_v62, %v6980_v50  ;;  %v6986_v48 = vshrl.u32 %v16552_v13, %v6980_v50  ;;  %v14923_v15 = vpop.eup %9006  ;;  %v6938_v0 = vadd.s32 127, %v6937_v56  ;;  %v14925_v22 = vshrl.u32 %v6818_v53, 30 }
 0x87f   : > { %v6989_v26 = vshrl.u32 %v16553_v39, %v6980_v50  ;;  %v14929_v7 = vpop.eup %9008  ;;  %v6935_v23 = vshrl.u32 %v6917_v34, %v6933_v6  ;;  %v6992_v21 = vshrl.u32 %v16401_v1, %v6980_v50  ;;  %v6994_v53 = vshll.u32 %v16401_v1, %v6979_v29 }
 0x880   : > { %v6984_v25 = vor.u32 %v6983_v58, %v6982_v49  ;;  %v6939_v31 = vshll.u32 %v6938_v0, 23  ;;  %v6820_v3 = vshll.u32 %v14925_v22, 30  ;;  %v6987_v28 = vor.u32 %v6986_v48, %v6985_v14 }
 0x881   : > { %v6990_v57 = vor.u32 %v6989_v26, %v6988_v44  ;;  %v6993_v56 = vor.u32 %v6992_v21, %v6991_v11  ;;  %v6995_v46 = vshrl.u32 %v16402_v2, %v6980_v50  ;;  %v14936_v19 = vshll.u32 %v6973_v41, 8 }
 0x882   : > { %v16577_v60 = vand.u32 2147483647, %v14437_v18  ;;  %v16578_v34 = vmov 0  ;;  %v6934_v6 = vshll.u32 %v14873_v24, %v6932_v54  ;;  %v14945_v49 = vsub.s32 %v6817_v33, %v6820_v3 }
 0x883   : > { %v6981_v58 = vshrl.u32 %v16550_v40, %v6980_v50  ;;  %v8392_v14 = vadd.s32 4294967169, %v7073_v38  ;;  %v6940_v48 = vor.u32 4788187, %v6939_v31  ;;  %v6996_v0 = vor.u32 %v6995_v46, %v6994_v53 }
 0x884   : > { %vm14940_vm3 = vcmp.le.f32.partialorder %v16577_v60, 0.7853982  ;;  %vm6997_vm1 = vcmp.lt.s32.totalorder %v6978_v20, 1  ;;  %vm7000_vm12 = vcmp.lt.s32.totalorder %v6978_v20, 4  ;;  %v6936_v29 = vor.u32 %v6935_v23, %v6934_v6 }
 0x885   : > { %v16579_v34 = vsel %vm14940_vm3, 4294967295, %v16578_v34  ;;  %v6823_v41 = vsub.s32 0, %v14945_v49  ;;  %v7002_v44 = vsel %vm7000_vm12, %v6990_v57, 2102212464  ;;  %v7005_v26 = vsel %vm6997_vm1, %v6984_v25, %v6987_v28 }
 0x886   : > { %16580 = vst [vmem:[#allocation36_spill] sm:$0xff] %v16579_v34  ;;  %vm6999_vm15 = vcmp.lt.s32.totalorder %v6978_v20, 3  ;;  %v7006_v60 = vsel %vm7000_vm12, %v6993_v56, 920167782  ;;  %v7009_v11 = vsel %vm6997_vm1, %v6987_v28, %v6990_v57  ;;  %v7010_v21 = vsel %vm7000_vm12, %v6996_v0, 1326507024 }
 0x887   : > { %v8381_v24 = vmin.u32 %v6823_v41, %v14945_v49  ;;  %vm6998_vm8 = vcmp.lt.s32.totalorder %v6978_v20, 2  ;;  %v7001_v33 = vsel %vm6997_vm1, %v6981_v58, %v6984_v25  ;;  %v7007_v54 = vsel %vm6999_vm15, %v6990_v57, %v7006_v60 }
 0x888   : > { %v6941_v50 = vand.u32 2147483647, %v6940_v48  ;;  %v7003_v38 = vsel %vm6999_vm15, %v6987_v28, %v7002_v44  ;;  %v7008_v31 = vsel %vm6998_vm8, %v7005_v26, %v7007_v54  ;;  %v7011_v46 = vsel %vm6999_vm15, %v6993_v56, %v7010_v21 }
 0x889   : > { %v6943_v3 = vcvt.s32.f32 %v6936_v29  ;;  %v6825_v53 = vclz %v8381_v24  ;;  %v7012_v23 = vsel %vm6998_vm8, %v7009_v11, %v7011_v46  ;;  %v7079_v6 = vadd.s32 1, %v8392_v14 }
 0x88a   : > { %v14953_v42 = vmul.u32.u64.low %v14936_v19, %v7012_v23  ;;  %v14954_v30 = vmul.u32.u64.high %v14936_v19, %v7012_v23, %v14953_v42  ;;  %v14957_v0 = vmul.u32.u64.low %v14936_v19, %v7008_v31  ;;  %v14958_v41 = vmul.u32.u64.high %v14936_v19, %v7008_v31, %v14957_v0 }
 0x88b   : > { %v8382_v57 = vadd.s32 4294967294, %v6825_v53  ;;  %v7004_v20 = vsel %vm6998_vm8, %v7001_v33, %v7003_v38  ;;  %v16581_v28 = vand.u32 2147483647, %v14868_v59  ;;  %vm7080_vm0 = vcmp.gt.s32.totalorder %v7079_v6, 0 }
 0x88c   : > { %v14967_v56 = vsel %vm14940_vm3, %v14437_v18, %v14900_v4  ;;  %v14970_v42 = vmul.f32 %v6943_v3, %v6941_v50  ;;  %v7081_v14 = vsel %vm7080_vm0, %v7079_v6, 0  ;;  %v6813_v26 = vadd.s32 %v14881_v16, %v14889_v45 }
 0x88d   : > { %v7076_v25 = vand.u32 8388607, %v16581_v28  ;;  %vm8383_vm7 = vcmp.lt.s32.totalorder %v8382_v57, 0  ;;  %v7083_v29 = vand.u32 31, %v7081_v14  ;;  %v7020_v11 = vmul.u32 %v14936_v19, %v7004_v20 }
 0x88e   : > { %v6828_v60 = vsel %vm8383_vm7, 0, %v8382_v57  ;;  %vm7022_vm6 = vc.u32 %v14954_v30, %v14957_v0  ;;  %v7023_v24 = vadd.s32 1, %v14958_v41  ;;  %v6945_v54 = vxor.u32 2147483648, %v14970_v42 }
 0x88f   : > { %v6829_v4 = vsub.s32 32, %v6828_v60  ;;  %v6833_v21 = vsub.s32 4294967266, %v6828_v60  ;;  %v7077_v33 = vor.u32 8388608, %v7076_v25  ;;  %v7082_v50 = vshrl.u32 %v7081_v14, 5 }
 0x890   : > { %v7084_v38 = vsub.s32 32, %v7083_v29  ;;  %v7086_v31 = vshll.u32 %v16550_v40, %v7083_v29  ;;  %v7024_v16 = vsel %vm7022_vm6, %v7023_v24, %v14958_v41  ;;  %v7089_v45 = vshll.u32 %v16551_v62, %v7083_v29 }
 0x891   : > { %v6834_v46 = vadd.s32 127, %v6833_v21  ;;  %v7092_v19 = vshll.u32 %v16552_v13, %v7083_v29  ;;  %v6831_v3 = vshrl.u32 %v6813_v26, %v6829_v4  ;;  %v7025_v53 = vadd.s32 %v7024_v16, %v7020_v11 }
 0x892   : > { %v7087_v23 = vshrl.u32 %v16551_v62, %v7084_v38  ;;  %v7090_v6 = vshrl.u32 %v16552_v13, %v7084_v38  ;;  %v7093_v20 = vshrl.u32 %v16553_v39, %v7084_v38  ;;  %v7095_v28 = vshll.u32 %v16553_v39, %v7083_v29 }
 0x893   : > { %v6835_v57 = vshll.u32 %v6834_v46, 23  ;;  %v7096_v25 = vshrl.u32 %v16401_v1, %v7084_v38  ;;  %v7026_v14 = vadd.s32 536870912, %v7025_v53  ;;  %v14990_v24 = vshll.u32 %v7077_v33, 8 }
 0x894   : > { %v7088_v21 = vor.u32 %v7087_v23, %v7086_v31  ;;  %v7091_v41 = vor.u32 %v7090_v6, %v7089_v45  ;;  %v6830_v44 = vshll.u32 %v14945_v49, %v6828_v60  ;;  %v7094_v26 = vor.u32 %v7093_v20, %v7092_v19 }
 0x895   : > { %v7097_v11 = vor.u32 %v7096_v25, %v7095_v28  ;;  %v7280_v4 = vand.u32 2139095040, %v14914_v5  ;;  %vm6863_vm2 = vcmp.lt.s32.totalorder %v14650_v32, 0  ;;  %v6836_v46 = vor.u32 4788187, %v6835_v57 }
 0x896   : > { %v14995_v16 = vshrl.u32 %v7026_v14, 30  ;;  %v7098_v48 = vshll.u32 %v16401_v1, %v7083_v29  ;;  %v7099_v58 = vshrl.u32 %v16402_v2, %v7084_v38  ;;  %v6832_v34 = vor.u32 %v6831_v3, %v6830_v44 }
 0x897   : > { %v7085_v31 = vshrl.u32 %v16550_v40, %v7084_v38  ;;  %vm7101_vm9 = vcmp.lt.s32.totalorder %v7082_v50, 1  ;;  %vm7104_vm5 = vcmp.lt.s32.totalorder %v7082_v50, 4  ;;  %v16583_v19 = vand.u32 2147483647, %v14650_v32 }
 0x898   : > { %16582 = vst [vmem:[#allocation38_spill] sm:$0xff] %v14995_v16  ;;  %v7028_v49 = vshll.u32 %v14995_v16, 30  ;;  %v7100_v60 = vor.u32 %v7099_v58, %v7098_v48  ;;  %v7106_v33 = vsel %vm7104_vm5, %v7094_v26, 2102212464  ;;  %v7109_v45 = vsel %vm7101_vm9, %v7088_v21, %v7091_v41 }
 0x899   : > { %vm15003_vm1 = vcmp.le.f32.partialorder %v16583_v19, 0.7853982  ;;  %vm7102_vm12 = vcmp.lt.s32.totalorder %v7082_v50, 2  ;;  %vm7103_vm15 = vcmp.lt.s32.totalorder %v7082_v50, 3  ;;  %v7110_v29 = vsel %vm7104_vm5, %v7097_v11, 920167782 }
 0x89a   : > { %v7113_v6 = vsel %vm7101_vm9, %v7091_v41, %v7094_v26  ;;  %v6837_v44 = vand.u32 2147483647, %v6836_v46  ;;  %v15007_v3 = vsub.s32 %v7025_v53, %v7028_v49  ;;  %v7111_v38 = vsel %vm7103_vm15, %v7094_v26, %v7110_v29 }
 0x89b   : > { %v7114_v57 = vsel %vm7104_vm5, %v7100_v60, 1326507024  ;;  %v7105_v20 = vsel %vm7101_vm9, %v7085_v31, %v7088_v21  ;;  %v7107_v28 = vsel %vm7103_vm15, %v7091_v41, %v7106_v33  ;;  %v7112_v58 = vsel %vm7102_vm12, %v7109_v45, %v7111_v38 }
 0x89c   : > { %v7115_v48 = vsel %vm7103_vm15, %v7097_v11, %v7114_v57  ;;  %v7031_v25 = vsub.s32 0, %v15007_v3  ;;  %v15013_v19 = vmul.u32.u64.low %v14990_v24, %v7112_v58  ;;  %v15014_v16 = vmul.u32.u64.high %v14990_v24, %v7112_v58, %v15013_v19 }
 0x89d   : > { %v7116_v14 = vsel %vm7102_vm12, %v7113_v6, %v7115_v48  ;;  %v6839_v18 = vcvt.s32.f32 %v6832_v34  ;;  %v7281_v26 = vshrl.u32 %v7280_v4, 23  ;;  %9010 = vcosq.f32 %v14967_v56 }
 0x89e   : > { %v15018_v53 = vmul.u32.u64.low %v14990_v24, %v7116_v14  ;;  %v15019_v46 = vmul.u32.u64.high %v14990_v24, %v7116_v14, %v15018_v53  ;;  %v16586_v21 = vxor.u32 2147483648, %v14916_v51  ;;  %v8389_v11 = vmin.u32 %v7031_v25, %v15007_v3 }
 0x89f   : > { %v7108_v31 = vsel %vm7102_vm12, %v7105_v20, %v7107_v28  ;;  %v6946_v34 = vsel %vm6863_vm2, %v6945_v54, %v14970_v42  ;;  %v16587_v49 = vsub.s32 4, %v14863_v37  ;;  %vm6759_vm8 = vcmp.lt.s32.totalorder %v14617_v55, 0 }
 0x8a0   : > { %v6738_v41 = vsel %vm6655_vm4, %v16586_v21, %v14916_v51  ;;  %v6840_v60 = vmul.f32 %v6839_v18, %v6837_v44  ;;  %v8400_v33 = vadd.s32 4294967169, %v7281_v26  ;;  %v7033_v45 = vclz %v8389_v11 }
 0x8a1   : > { %v6948_v4 = vsel %vm6863_vm2, %v16587_v49, %v14863_v37  ;;  %v7127_v51 = vadd.s32 1, %v15014_v16  ;;  %v16588_v50 = vand.u32 2147483647, %v14914_v5  ;;  %v15043_v6 = vadd.f32 %v14568_v35, %v14858_v10 }
 0x8a2   : > { %9012 = vsinq.f32 %v14967_v56  ;;  %v7124_v42 = vmul.u32 %v14990_v24, %v7108_v31  ;;  %vm7126_vm4 = vc.u32 %v15019_v46, %v15013_v19  ;;  %v7287_v37 = vadd.s32 1, %v8400_v33 }
 0x8a3   : > { %v7284_v29 = vand.u32 8388607, %v16588_v50  ;;  %v6741_v18 = vsel %vm14781_vm11, %v14441_v27, %v6738_v41  ;;  %v6950_v54 = vsel %vm15003_vm1, 0, %v6948_v4  ;;  %v8390_v44 = vadd.s32 4294967294, %v7033_v45 }
 0x8a4   : > { %v7128_v38 = vsel %vm7126_vm4, %v7127_v51, %v15014_v16  ;;  %v15058_v35 = vsel %vm15003_vm1, %v14650_v32, %v6946_v34  ;;  %v6841_v56 = vxor.u32 2147483648, %v6840_v60  ;;  %vm7288_vm0 = vcmp.gt.s32.totalorder %v7287_v37, 0 }
 0x8a5   : > { %v7129_v24 = vadd.s32 %v7128_v38, %v7124_v42  ;;  %vm8391_vm7 = vcmp.lt.s32.totalorder %v8390_v44, 0  ;;  %v7285_v57 = vor.u32 8388608, %v7284_v29  ;;  %v7289_v20 = vsel %vm7288_vm0, %v7287_v37, 0 }
 0x8a6   : > { %v7176_v36 = vand.u32 2139095040, %v15043_v6  ;;  %9014 = vcosq.f32 %v6741_v18  ;;  %v7036_v28 = vsel %vm8391_vm7, 0, %v8390_v44  ;;  %v7291_v48 = vand.u32 31, %v7289_v20 }
 0x8a7   : > { %v7130_v58 = vadd.s32 536870912, %v7129_v24  ;;  %9016 = vsinq.f32 %v6741_v18  ;;  %v15061_v25 = vadd.s32 3, %v6950_v54  ;;  %v7037_v16 = vsub.s32 32, %v7036_v28  ;;  %v15068_v21 = vpop.eup %9010 }
 0x8a8   : > { %v7041_v14 = vsub.s32 4294967266, %v7036_v28  ;;  %9018 = vcosq.f32 %v15058_v35  ;;  %v7021_v23 = vadd.s32 %v14957_v0, %v14954_v30  ;;  %v7292_v26 = vsub.s32 32, %v7291_v48 }
 0x8a9   : > { %16589 = vst [vmem:[#allocation8_spill] sm:$0xff] %v15061_v25  ;;  %v15066_v53 = vshrl.u32 %v7130_v58, 30  ;;  %v15072_v41 = vsel %vm6759_vm8, %v6841_v56, %v6840_v60  ;;  %v15074_v31 = vshll.u32 %v7285_v57, 8  ;;  %v7177_v34 = vshrl.u32 %v7176_v36, 23 }
 0x8aa   : > { %v7042_v11 = vadd.s32 127, %v7041_v14  ;;  %v7294_v4 = vshll.u32 %v16550_v40, %v7291_v48  ;;  %v7295_v33 = vshrl.u32 %v16551_v62, %v7292_v26  ;;  %v7297_v30 = vshll.u32 %v16551_v62, %v7291_v48 }
 0x8ab   : > { %v7132_v49 = vshll.u32 %v15066_v53, 30  ;;  %v7039_v0 = vshrl.u32 %v7021_v23, %v7037_v16  ;;  %v7298_v51 = vshrl.u32 %v16552_v13, %v7292_v26  ;;  %v7301_v50 = vshrl.u32 %v16553_v39, %v7292_v26 }
 0x8ac   : > { %v7043_v45 = vshll.u32 %v7042_v11, 23  ;;  %v15082_v60 = vpop.eup %9012  ;;  %v7300_v42 = vshll.u32 %v16552_v13, %v7291_v48  ;;  %v7303_v37 = vshll.u32 %v16553_v39, %v7291_v48  ;;  %v7304_v18 = vshrl.u32 %v16401_v1, %v7292_v26 }
 0x8ad   : > { %v15084_v29 = vsub.s32 %v7129_v24, %v7132_v49  ;;  %v7038_v54 = vshll.u32 %v15007_v3, %v7036_v28  ;;  %v7290_v38 = vshrl.u32 %v7289_v20, 5  ;;  %v7296_v56 = vor.u32 %v7295_v33, %v7294_v4 }
 0x8ae   : > { %v7044_v44 = vor.u32 4788187, %v7043_v45  ;;  %vm7071_vm11 = vcmp.lt.s32.totalorder %v14868_v59, 0  ;;  %v7299_v36 = vor.u32 %v7298_v51, %v7297_v30  ;;  %v7302_v58 = vor.u32 %v7301_v50, %v7300_v42 }
 0x8af   : > { %v7135_v57 = vsub.s32 0, %v15084_v29  ;;  %v7305_v16 = vor.u32 %v7304_v18, %v7303_v37  ;;  %v7040_v24 = vor.u32 %v7039_v0, %v7038_v54  ;;  %v7306_v14 = vshll.u32 %v16401_v1, %v7291_v48 }
 0x8b0   : > { %v7307_v23 = vshrl.u32 %v16402_v2, %v7292_v26  ;;  %v8396_v11 = vadd.s32 4294967169, %v7177_v34  ;;  %v15094_v49 = vpop.eup %9014  ;;  %v16591_v3 = vand.u32 2147483647, %v14617_v55  ;;  %v7045_v28 = vand.u32 2147483647, %v7044_v44 }
 0x8b1   : > { %16590 = vst [vmem:[#allocation14_spill] sm:$0xff] %v15094_v49  ;;  %v8393_v4 = vmin.u32 %v7135_v57, %v15084_v29  ;;  %v7155_v33 = vsub.s32 4, %v15066_v53  ;;  %v7293_v30 = vshrl.u32 %v16550_v40, %v7292_v26  ;;  %v15105_v0 = vpop.eup %9016  ;;  %vm7309_vm2 = vcmp.lt.s32.totalorder %v7290_v38, 1 }
 0x8b2   : > { %vm15098_vm6 = vcmp.le.f32.partialorder %v16591_v3, 0.7853982  ;;  %16594 = vst [vmem:[#allocation13_spill] sm:$0xff] %v15105_v0  ;;  %v7308_v48 = vor.u32 %v7307_v23, %v7306_v14  ;;  %vm7311_vm9 = vcmp.lt.s32.totalorder %v7290_v38, 3  ;;  %vm7312_vm5 = vcmp.lt.s32.totalorder %v7290_v38, 4  ;;  %v15107_v34 = vpop.eup %9018 }
 0x8b3   : > { %16595 = vst [vmem:[#allocation17_spill] sm:$0xff] %v15107_v34  ;;  %v7137_v45 = vclz %v8393_v4  ;;  %v7314_v51 = vsel %vm7312_vm5, %v7302_v58, 2102212464  ;;  %v7317_v50 = vsel %vm7309_vm2, %v7296_v56, %v7299_v36  ;;  %v7318_v42 = vsel %vm7312_vm5, %v7305_v16, 920167782 }
 0x8b4   : > { %v7047_v37 = vcvt.s32.f32 %v7040_v24  ;;  %vm7310_vm1 = vcmp.lt.s32.totalorder %v7290_v38, 2  ;;  %v7319_v18 = vsel %vm7311_vm9, %v7302_v58, %v7318_v42  ;;  %v7321_v54 = vsel %vm7309_vm2, %v7299_v36, %v7302_v58 }
 0x8b5   : > { %v8394_v44 = vadd.s32 4294967294, %v7137_v45  ;;  %v7313_v57 = vsel %vm7309_vm2, %v7293_v30, %v7296_v56  ;;  %v7320_v26 = vsel %vm7310_vm1, %v7317_v50, %v7319_v18  ;;  %v7322_v3 = vsel %vm7312_vm5, %v7308_v48, 1326507024 }
 0x8b6   : > { %vm16119_vm12 = vcmp.lt.s32.totalorder %v14761_v9, 0  ;;  %v7315_v14 = vsel %vm7311_vm9, %v7299_v36, %v7314_v51  ;;  %v7323_v23 = vsel %vm7311_vm9, %v7305_v16, %v7322_v3  ;;  %v7048_v24 = vmul.f32 %v7047_v37, %v7045_v28 }
 0x8b7   : > { %v15115_v4 = vmul.u32.u64.low %v15074_v31, %v7320_v26  ;;  %v15116_v32 = vmul.u32.u64.high %v15074_v31, %v7320_v26, %v15115_v4  ;;  %vm8395_vm15 = vcmp.lt.s32.totalorder %v8394_v44, 0  ;;  %v7324_v58 = vsel %vm7310_vm1, %v7321_v54, %v7323_v23 }
 0x8b8   : > { %v16096_v56 = vand.u32 2147483647, %v15043_v6  ;;  %v7140_v30 = vsel %vm8395_vm15, 0, %v8394_v44  ;;  %v7156_v48 = vsel %vm7071_vm11, %v7155_v33, %v15066_v53  ;;  %9020 = vsinq.f32 %v15058_v35 }
 0x8b9   : > { %v15125_v36 = vmul.u32.u64.low %v15074_v31, %v7324_v58  ;;  %v15126_v45 = vmul.u32.u64.high %v15074_v31, %v7324_v58, %v15125_v36  ;;  %v16596_v16 = vand.u32 2147483647, %v14868_v59  ;;  %v7145_v51 = vsub.s32 4294967266, %v7140_v30 }
 0x8ba   : > { %v7316_v50 = vsel %vm7310_vm1, %v7313_v57, %v7315_v14  ;;  %v6845_v53 = vsel %vm15098_vm6, %v14617_v55, %v15072_v41  ;;  %v7335_v33 = vadd.s32 1, %v15116_v32  ;;  %v7183_v42 = vadd.s32 1, %v8396_v11  ;;  %v15152_v41 = vpop.permute.xlu1 %6044 }
 0x8bb   : > { %vm15131_vm4 = vcmp.le.f32.partialorder %v16596_v16, 0.7853982  ;;  %v15143_v35 = vadd.f32 %v14610_v52, %v14858_v10  ;;  %v7049_v37 = vxor.u32 2147483648, %v7048_v24  ;;  %v7146_v18 = vadd.s32 127, %v7145_v51  ;;  %v16649_v10 = vld [vmem:[#allocation34_spill] sm:$0xff] }
 0x8bc   : > { %v7158_v54 = vsel %vm15131_vm4, 0, %v7156_v48  ;;  %v7180_v38 = vand.u32 8388607, %v16096_v56  ;;  %v7141_v44 = vsub.s32 32, %v7140_v30  ;;  %v7332_v57 = vmul.u32 %v15074_v31, %v7316_v50 }
 0x8bd   : > { %vm7334_vm0 = vc.u32 %v15126_v45, %v15115_v4  ;;  %vm7184_vm7 = vcmp.gt.s32.totalorder %v7183_v42, 0  ;;  %9022 = vcosq.f32 %v6845_v53  ;;  %v16599_v52 = vand.u32 2147483647, %v14761_v9 }
 0x8be   : > { %v7147_v11 = vshll.u32 %v7146_v18, 23  ;;  %v7336_v26 = vsel %vm7334_vm0, %v7335_v33, %v15116_v32  ;;  %v7185_v3 = vsel %vm7184_vm7, %v7183_v42, 0  ;;  %v7125_v31 = vadd.s32 %v15013_v19, %v15019_v46 }
 0x8bf   : > { %vm15156_vm2 = vcmp.le.f32.partialorder %v16599_v52, 0.7853982  ;;  %v7337_v14 = vadd.s32 %v7336_v26, %v7332_v57  ;;  %v7187_v23 = vand.u32 31, %v7185_v3  ;;  %v15165_v58 = vadd.f32 %v14716_v63, %v15152_v41 }
 0x8c0   : > { %9024 = vsinq.f32 %v6845_v53  ;;  %v7050_v48 = vsel %vm16119_vm12, %v7049_v37, %v7048_v24  ;;  %v15169_v36 = vadd.s32 3, %v7158_v54  ;;  %v7143_v51 = vshrl.u32 %v7125_v31, %v7141_v44 }
 0x8c1   : > { %v7338_v32 = vadd.s32 536870912, %v7337_v14  ;;  %v7181_v50 = vor.u32 8388608, %v7180_v38  ;;  %v7188_v33 = vsub.s32 32, %v7187_v23  ;;  %v7142_v19 = vshll.u32 %v15084_v29, %v7140_v30 }
 0x8c2   : > { %16602 = vst [vmem:[#allocation39_spill] sm:$0xff] %v15169_v36  ;;  %v7148_v46 = vor.u32 4788187, %v7147_v11  ;;  %v7190_v42 = vshll.u32 %v16550_v40, %v7187_v23  ;;  %v7384_v63 = vand.u32 2139095040, %v15143_v35  ;;  %v7193_v24 = vshll.u32 %v16551_v62, %v7187_v23  ;;  %v15180_v54 = vpop.eup %9020 }
 0x8c3   : > { %v15175_v18 = vshrl.u32 %v7338_v32, 30  ;;  %v7191_v53 = vshrl.u32 %v16551_v62, %v7188_v33  ;;  %v7194_v37 = vshrl.u32 %v16552_v13, %v7188_v33  ;;  %16603 = vst [vmem:[#allocation7_spill] sm:$0xff] %v15180_v54  ;;  %v7197_v38 = vshrl.u32 %v16553_v39, %v7188_v33 }
 0x8c4   : > { %v7199_v44 = vshll.u32 %v16553_v39, %v7187_v23  ;;  %v7200_v29 = vshrl.u32 %v16401_v1, %v7188_v33  ;;  %v7203_v30 = vshrl.u32 %v16402_v2, %v7188_v33  ;;  %v7144_v57 = vor.u32 %v7143_v51, %v7142_v19 }
 0x8c5   : > { %v7340_v52 = vshll.u32 %v15175_v18, 30  ;;  %v7186_v11 = vshrl.u32 %v7185_v3, 5  ;;  %v7196_v26 = vshll.u32 %v16552_v13, %v7187_v23  ;;  %v7192_v31 = vor.u32 %v7191_v53, %v7190_v42 }
 0x8c6   : > { %v7195_v32 = vor.u32 %v7194_v37, %v7193_v24  ;;  %v7201_v56 = vor.u32 %v7200_v29, %v7199_v44  ;;  %v7202_v16 = vshll.u32 %v16401_v1, %v7187_v23  ;;  %v7053_v36 = vsel %vm15156_vm2, %v14761_v9, %v7050_v48 }
 0x8c7   : > { %v15192_v34 = vsub.s32 %v7337_v14, %v7340_v52  ;;  %v7198_v54 = vor.u32 %v7197_v38, %v7196_v26  ;;  %v15194_v25 = vshll.u32 %v7181_v50, 8  ;;  %v15196_v51 = vpop.eup %9022  ;;  %v7149_v19 = vand.u32 2147483647, %v7148_v46 }
 0x8c8   : > { %v7204_v3 = vor.u32 %v7203_v30, %v7202_v16  ;;  %v7385_v49 = vshrl.u32 %v7384_v63, 23  ;;  %v16604_v42 = vand.u32 2147483647, %v15143_v35  ;;  %v7151_v24 = vcvt.s32.f32 %v7144_v57 }
 0x8c9   : > { %v7343_v23 = vsub.s32 0, %v15192_v34  ;;  %vm7205_vm9 = vcmp.lt.s32.totalorder %v7186_v11, 1  ;;  %vm7208_vm5 = vcmp.lt.s32.totalorder %v7186_v11, 4  ;;  %v7189_v14 = vshrl.u32 %v16550_v40, %v7188_v33 }
 0x8ca   : > { %v7388_v53 = vand.u32 8388607, %v16604_v42  ;;  %v15201_v37 = vpop.eup %9024  ;;  %vm7207_vm1 = vcmp.lt.s32.totalorder %v7186_v11, 3  ;;  %v7213_v48 = vsel %vm7205_vm9, %v7192_v31, %v7195_v32  ;;  %v7214_v50 = vsel %vm7208_vm5, %v7201_v56, 920167782 }
 0x8cb   : > { %vm7279_vm15 = vcmp.lt.s32.totalorder %v14914_v5, 0  ;;  %v8401_v16 = vmin.u32 %v7343_v23, %v15192_v34  ;;  %vm7206_vm0 = vcmp.lt.s32.totalorder %v7186_v11, 2  ;;  %v7210_v46 = vsel %vm7208_vm5, %v7198_v54, 2102212464 }
 0x8cc   : > { %v7215_v63 = vsel %vm7207_vm1, %v7198_v54, %v7214_v50  ;;  %v7152_v38 = vmul.f32 %v7151_v24, %v7149_v19  ;;  %v7217_v29 = vsel %vm7205_vm9, %v7195_v32, %v7198_v54  ;;  %v7218_v30 = vsel %vm7208_vm5, %v7204_v3, 1326507024 }
 0x8cd   : > { %v7216_v44 = vsel %vm7206_vm0, %v7213_v48, %v7215_v63  ;;  %v7345_v57 = vclz %v8401_v16  ;;  %v7219_v33 = vsel %vm7207_vm1, %v7201_v56, %v7218_v30  ;;  %v7209_v42 = vsel %vm7205_vm9, %v7189_v14, %v7192_v31 }
 0x8ce   : > { %v15212_v52 = vmul.u32.u64.low %v15194_v25, %v7216_v44  ;;  %v15213_v26 = vmul.u32.u64.high %v15194_v25, %v7216_v44, %v15212_v52  ;;  %v7211_v23 = vsel %vm7207_vm1, %v7195_v32, %v7210_v46  ;;  %v7220_v50 = vsel %vm7206_vm0, %v7217_v29, %v7219_v33 }
 0x8cf   : > { %v8404_v19 = vadd.s32 4294967169, %v7385_v49  ;;  %9026 = vcosq.f32 %v7053_v36  ;;  %v8402_v24 = vadd.s32 4294967294, %v7345_v57  ;;  %v7363_v56 = vsub.s32 4, %v15175_v18 }
 0x8d0   : > { %v15220_v54 = vmul.u32.u64.low %v15194_v25, %v7220_v50  ;;  %v15221_v3 = vmul.u32.u64.high %v15194_v25, %v7220_v50, %v15220_v54  ;;  %9028 = vsinq.f32 %v7053_v36  ;;  %v7488_v16 = vand.u32 2139095040, %v15165_v58 }
 0x8d1   : > { %v7391_v48 = vadd.s32 1, %v8404_v19  ;;  %v7333_v31 = vadd.s32 %v15115_v4, %v15126_v45  ;;  %vm8403_vm7 = vcmp.lt.s32.totalorder %v8402_v24, 0  ;;  %v7212_v32 = vsel %vm7206_vm0, %v7209_v42, %v7211_v23 }
 0x8d2   : > { %v7231_v49 = vadd.s32 1, %v15213_v26  ;;  %v7153_v14 = vxor.u32 2147483648, %v7152_v38  ;;  %v7348_v46 = vsel %vm8403_vm7, 0, %v8402_v24  ;;  %v7389_v63 = vor.u32 8388608, %v7388_v53 }
 0x8d3   : > { %vm7392_vm9 = vcmp.gt.s32.totalorder %v7391_v48, 0  ;;  %v7349_v44 = vsub.s32 32, %v7348_v46  ;;  %v7353_v29 = vsub.s32 4294967266, %v7348_v46  ;;  %v16100_v36 = vand.u32 2147483647, %v15165_v58 }
 0x8d4   : > { %v7489_v30 = vshrl.u32 %v7488_v16, 23  ;;  %v15233_v57 = vsel %vm7279_vm15, %v7363_v56, %v15175_v18  ;;  %v7228_v4 = vmul.u32 %v15194_v25, %v7212_v32  ;;  %vm7230_vm5 = vc.u32 %v15221_v3, %v15212_v52 }
 0x8d5   : > { %v7393_v45 = vsel %vm7392_vm9, %v7391_v48, 0  ;;  %v7351_v11 = vshrl.u32 %v7333_v31, %v7349_v44  ;;  %v7354_v33 = vadd.s32 127, %v7353_v29  ;;  %v7232_v53 = vsel %vm7230_vm5, %v7231_v49, %v15213_v26 }
 0x8d6   : > { %v15239_v42 = vshrl.u32 %v7393_v45, 5  ;;  %v7154_v23 = vsel %vm7071_vm11, %v7153_v14, %v7152_v38  ;;  %v7350_v50 = vshll.u32 %v15192_v34, %v7348_v46  ;;  %v7233_v19 = vadd.s32 %v7232_v53, %v7228_v4 }
 0x8d7   : > { %v7395_v18 = vand.u32 31, %v7393_v45  ;;  %v7355_v24 = vshll.u32 %v7354_v33, 23  ;;  %v15244_v54 = vshll.u32 %v7389_v63, 8  ;;  %v8408_v25 = vadd.s32 4294967169, %v7489_v30 }
 0x8d8   : > { %v15248_v56 = vand.u32 8388607, %v16100_v36  ;;  %v7352_v48 = vor.u32 %v7351_v11, %v7350_v50  ;;  %v7234_v16 = vadd.s32 536870912, %v7233_v19  ;;  %vm7413_vm1 = vcmp.lt.s32.totalorder %v15239_v42, 1 }
 0x8d9   : > { %v7396_v26 = vsub.s32 32, %v7395_v18  ;;  %v15251_v31 = vpop.eup %9026  ;;  %v7356_v38 = vor.u32 4788187, %v7355_v24  ;;  %v7398_v34 = vshll.u32 %v16550_v40, %v7395_v18  ;;  %v7401_v32 = vshll.u32 %v16551_v62, %v7395_v18 }
 0x8da   : > { %16605 = vst [vmem:[#allocation12_spill] sm:$0xff] %v15251_v31  ;;  %v7404_v49 = vshll.u32 %v16552_v13, %v7395_v18  ;;  %v15256_v14 = vpop.eup %9028  ;;  %v15258_v46 = vshrl.u32 %v7234_v16, 30  ;;  %v7407_v29 = vshll.u32 %v16553_v39, %v7395_v18  ;;  %v7410_v11 = vshll.u32 %v16401_v1, %v7395_v18 }
 0x8db   : > { %16606 = vst [vmem:[#allocation41_spill] sm:$0xff] %v15256_v14  ;;  %v7399_v63 = vshrl.u32 %v16551_v62, %v7396_v26  ;;  %v7402_v44 = vshrl.u32 %v16552_v13, %v7396_v26  ;;  %v7357_v30 = vand.u32 2147483647, %v7356_v38  ;;  %v7405_v4 = vshrl.u32 %v16553_v39, %v7396_v26 }
 0x8dc   : > { %16607 = vst [vmem:[#allocation40_spill] sm:$0xff] %v15258_v46  ;;  %v7408_v45 = vshrl.u32 %v16401_v1, %v7396_v26  ;;  %v16608_v33 = vand.u32 2147483647, %v14914_v5  ;;  %v7236_v50 = vshll.u32 %v15258_v46, 30  ;;  %v7411_v36 = vshrl.u32 %v16402_v2, %v7396_v26 }
 0x8dd   : > { %v7400_v24 = vor.u32 %v7399_v63, %v7398_v34  ;;  %v7403_v16 = vor.u32 %v7402_v44, %v7401_v32  ;;  %v7359_v27 = vcvt.s32.f32 %v7352_v48  ;;  %v7406_v38 = vor.u32 %v7405_v4, %v7404_v49 }
 0x8de   : > { %vm15268_vm11 = vcmp.le.f32.partialorder %v16608_v33, 0.7853982  ;;  %v7409_v0 = vor.u32 %v7408_v45, %v7407_v29  ;;  %vm7414_vm0 = vcmp.lt.s32.totalorder %v15239_v42, 2  ;;  %v15275_v31 = vsub.s32 %v7233_v19, %v7236_v50 }
 0x8df   : > { %v7397_v18 = vshrl.u32 %v16550_v40, %v7396_v26  ;;  %v7412_v14 = vor.u32 %v7411_v36, %v7410_v11  ;;  %vm7416_vm7 = vcmp.lt.s32.totalorder %v15239_v42, 4  ;;  %vm7415_vm9 = vcmp.lt.s32.totalorder %v15239_v42, 3 }
 0x8e0   : > { %v7418_v33 = vsel %vm7416_vm7, %v7406_v38, 2102212464  ;;  %v7421_v34 = vsel %vm7413_vm1, %v7400_v24, %v7403_v16  ;;  %v7422_v32 = vsel %vm7416_vm7, %v7409_v0, 920167782  ;;  %v7360_v63 = vmul.f32 %v7359_v27, %v7357_v30 }
 0x8e1   : > { %v7239_v48 = vsub.s32 0, %v15275_v31  ;;  %v7423_v49 = vsel %vm7415_vm9, %v7406_v38, %v7422_v32  ;;  %v7425_v19 = vsel %vm7413_vm1, %v7403_v16, %v7406_v38  ;;  %v7426_v36 = vsel %vm7416_vm7, %v7412_v14, 1326507024 }
 0x8e2   : > { %v7424_v26 = vsel %vm7414_vm0, %v7421_v34, %v7423_v49  ;;  %v7495_v44 = vadd.s32 1, %v8408_v25  ;;  %v15289_v29 = vadd.f32 %v14789_v47, %v15152_v41  ;;  %v7417_v27 = vsel %vm7413_vm1, %v7397_v18, %v7400_v24 }
 0x8e3   : > { %v8397_v4 = vmin.u32 %v7239_v48, %v15275_v31  ;;  %v7419_v30 = vsel %vm7415_vm9, %v7403_v16, %v7418_v33  ;;  %v7427_v45 = vsel %vm7415_vm9, %v7409_v0, %v7426_v36  ;;  %v7493_v25 = vor.u32 8388608, %v15248_v56 }
 0x8e4   : > { %v7428_v11 = vsel %vm7414_vm0, %v7425_v19, %v7427_v45  ;;  %v15297_v50 = vmul.u32.u64.low %v15244_v54, %v7424_v26  ;;  %v15298_v38 = vmul.u32.u64.high %v15244_v54, %v7424_v26, %v15297_v50  ;;  %v7361_v14 = vxor.u32 2147483648, %v7360_v63 }
 0x8e5   : > { %v7241_v47 = vclz %v8397_v4  ;;  %v15303_v34 = vmul.u32.u64.low %v15244_v54, %v7428_v11  ;;  %v15304_v32 = vmul.u32.u64.high %v15244_v54, %v7428_v11, %v15303_v34  ;;  %v15309_v0 = vsel %vm15131_vm4, %v14868_v59, %v7154_v23 }
 0x8e6   : > { %v7420_v16 = vsel %vm7414_vm0, %v7417_v27, %v7419_v30  ;;  %vm7496_vm5 = vcmp.gt.s32.totalorder %v7495_v44, 0  ;;  %v7229_v56 = vadd.s32 %v15212_v52, %v15221_v3  ;;  %v15320_v48 = vadd.f32 %v14891_v61, %v15152_v41 }
 0x8e7   : > { %v8398_v18 = vadd.s32 4294967294, %v7241_v47  ;;  %v7497_v33 = vsel %vm7496_vm5, %v7495_v44, 0  ;;  %v7439_v28 = vadd.s32 1, %v15298_v38  ;;  %v15323_v49 = vshll.u32 %v7493_v25, 8 }
 0x8e8   : > { %v7499_v23 = vand.u32 31, %v7497_v33  ;;  %v16110_v19 = vand.u32 2147483647, %v15289_v29  ;;  %v15328_v42 = vsel %vm7279_vm15, %v7361_v14, %v7360_v63  ;;  %v7436_v52 = vmul.u32 %v15244_v54, %v7420_v16 }
 0x8e9   : > { %vm8399_vm4 = vcmp.lt.s32.totalorder %v8398_v18, 0  ;;  %vm7438_vm1 = vc.u32 %v15304_v32, %v15297_v50  ;;  %v7696_v36 = vand.u32 2139095040, %v15289_v29  ;;  %v7498_v30 = vshrl.u32 %v7497_v33, 5 }
 0x8ea   : > { %v7244_v3 = vsel %vm8399_vm4, 0, %v8398_v18  ;;  %v7440_v61 = vsel %vm7438_vm1, %v7439_v28, %v15298_v38  ;;  %v7500_v26 = vsub.s32 32, %v7499_v23  ;;  %v7502_v63 = vshll.u32 %v16550_v40, %v7499_v23 }
 0x8eb   : > { %v7245_v44 = vsub.s32 32, %v7244_v3  ;;  %v7249_v4 = vsub.s32 4294967266, %v7244_v3  ;;  %v7441_v27 = vadd.s32 %v7440_v61, %v7436_v52  ;;  %v7246_v45 = vshll.u32 %v15275_v31, %v7244_v3 }
 0x8ec   : > { %v7503_v11 = vshrl.u32 %v16551_v62, %v7500_v26  ;;  %v7506_v54 = vshrl.u32 %v16552_v13, %v7500_v26  ;;  %v7505_v38 = vshll.u32 %v16551_v62, %v7499_v23  ;;  %v7508_v16 = vshll.u32 %v16552_v13, %v7499_v23 }
 0x8ed   : > { %v7247_v25 = vshrl.u32 %v7229_v56, %v7245_v44  ;;  %v7250_v14 = vadd.s32 127, %v7249_v4  ;;  %v7442_v47 = vadd.s32 536870912, %v7441_v27  ;;  %v7509_v18 = vshrl.u32 %v16553_v39, %v7500_v26 }
 0x8ee   : > { %v7504_v34 = vor.u32 %v7503_v11, %v7502_v63  ;;  %v7511_v33 = vshll.u32 %v16553_v39, %v7499_v23  ;;  %v7512_v3 = vshrl.u32 %v16401_v1, %v7500_v26  ;;  %v7507_v61 = vor.u32 %v7506_v54, %v7505_v38 }
 0x8ef   : > { %v7248_v28 = vor.u32 %v7247_v25, %v7246_v45  ;;  %v7251_v31 = vshll.u32 %v7250_v14, 23  ;;  %v15343_v52 = vshrl.u32 %v7442_v47, 30  ;;  %v7510_v24 = vor.u32 %v7509_v18, %v7508_v16 }
 0x8f0   : > { %v7514_v56 = vshll.u32 %v16401_v1, %v7499_v23  ;;  %v7515_v44 = vshrl.u32 %v16402_v2, %v7500_v26  ;;  %v7513_v11 = vor.u32 %v7512_v3, %v7511_v33  ;;  %v7700_v59 = vand.u32 8388607, %v16110_v19 }
 0x8f1   : > { %16611 = vst [vmem:[#allocation22_spill] sm:$0xff] %v15343_v52  ;;  %v7252_v4 = vor.u32 4788187, %v7251_v31  ;;  %v7444_v63 = vshll.u32 %v15343_v52, 30  ;;  %v7501_v45 = vshrl.u32 %v16550_v40, %v7500_v26  ;;  %vm7517_vm15 = vcmp.lt.s32.totalorder %v7498_v30, 1 }
 0x8f2   : > { %v7516_v25 = vor.u32 %v7515_v44, %v7514_v56  ;;  %v7697_v14 = vshrl.u32 %v7696_v36, 23  ;;  %v7255_v46 = vcvt.s32.f32 %v7248_v28  ;;  %vm7520_vm0 = vcmp.lt.s32.totalorder %v7498_v30, 4 }
 0x8f3   : > { %v7253_v47 = vand.u32 2147483647, %v7252_v4  ;;  %v15352_v54 = vsub.s32 %v7441_v27, %v7444_v63  ;;  %vm7519_vm7 = vcmp.lt.s32.totalorder %v7498_v30, 3  ;;  %v7522_v23 = vsel %vm7520_vm0, %v7510_v24, 2102212464 }
 0x8f4   : > { %v7525_v38 = vsel %vm7517_vm15, %v7504_v34, %v7507_v61  ;;  %v7526_v16 = vsel %vm7520_vm0, %v7513_v11, 920167782  ;;  %vm7518_vm9 = vcmp.lt.s32.totalorder %v7498_v30, 2  ;;  %v7529_v31 = vsel %vm7517_vm15, %v7507_v61, %v7510_v24 }
 0x8f5   : > { %v7447_v18 = vsub.s32 0, %v15352_v54  ;;  %v7527_v33 = vsel %vm7519_vm7, %v7510_v24, %v7526_v16  ;;  %vm16116_vm5 = vcmp.lt.s32.totalorder %v15043_v6, 0  ;;  %v7521_v26 = vsel %vm7517_vm15, %v7501_v45, %v7504_v34 }
 0x8f6   : > { %v7528_v36 = vsel %vm7518_vm9, %v7525_v38, %v7527_v33  ;;  %v7530_v3 = vsel %vm7520_vm0, %v7516_v25, 1326507024  ;;  %v8416_v28 = vadd.s32 4294967169, %v7697_v14  ;;  %v7256_v27 = vmul.f32 %v7255_v46, %v7253_v47 }
 0x8f7   : > { %v8405_v56 = vmin.u32 %v7447_v18, %v15352_v54  ;;  %v7523_v44 = vsel %vm7519_vm7, %v7507_v61, %v7522_v23  ;;  %v7531_v4 = vsel %vm7519_vm7, %v7513_v11, %v7530_v3  ;;  %v15371_v34 = vsel %vm15268_vm11, %v14914_v5, %v15328_v42 }
 0x8f8   : > { %v7532_v63 = vsel %vm7518_vm9, %v7529_v31, %v7531_v4  ;;  %v15363_v19 = vmul.u32.u64.low %v15323_v49, %v7528_v36  ;;  %v15364_v16 = vmul.u32.u64.high %v15323_v49, %v7528_v36, %v15363_v19  ;;  %v7703_v24 = vadd.s32 1, %v8416_v28  ;;  %v16667_v31 = vld [vmem:[#allocation22_spill] sm:$0xff] }
 0x8f9   : > { %v7449_v46 = vclz %v8405_v56  ;;  %v15374_v45 = vmul.u32.u64.low %v15323_v49, %v7532_v63  ;;  %v15375_v61 = vmul.u32.u64.high %v15323_v49, %v7532_v63, %v15374_v45  ;;  %9030 = vcosq.f32 %v15309_v0 }
 0x8fa   : > { %v7524_v11 = vsel %vm7518_vm9, %v7521_v26, %v7523_v44  ;;  %v7701_v25 = vor.u32 8388608, %v7700_v59  ;;  %vm7704_vm4 = vcmp.gt.s32.totalorder %v7703_v24, 0  ;;  %9032 = vsinq.f32 %v15309_v0 }
 0x8fb   : > { %v7257_v14 = vxor.u32 2147483648, %v7256_v27  ;;  %v8406_v47 = vadd.s32 4294967294, %v7449_v46  ;;  %v7705_v23 = vsel %vm7704_vm4, %v7703_v24, 0  ;;  %9034 = vcosq.f32 %v15371_v34 }
 0x8fc   : > { %v7543_v42 = vadd.s32 1, %v15364_v16  ;;  %v7707_v38 = vand.u32 31, %v7705_v23  ;;  %v16612_v33 = vand.u32 2147483647, %v15043_v6  ;;  %v7437_v59 = vadd.s32 %v15297_v50, %v15304_v32 }
 0x8fd   : > { %vm8407_vm15 = vcmp.lt.s32.totalorder %v8406_v47, 0  ;;  %v7540_v0 = vmul.u32 %v15323_v49, %v7524_v11  ;;  %vm7542_vm0 = vc.u32 %v15375_v61, %v15363_v19  ;;  %v15395_v3 = vshll.u32 %v7701_v25, 8 }
 0x8fe   : > { %vm15385_vm1 = vcmp.le.f32.partialorder %v16612_v33, 0.7853982  ;;  %v7452_v30 = vsel %vm8407_vm15, 0, %v8406_v47  ;;  %v7544_v26 = vsel %vm7542_vm0, %v7543_v42, %v15364_v16  ;;  %v7708_v36 = vsub.s32 32, %v7707_v38 }
 0x8ff   : > { %v7258_v28 = vsel %vm16116_vm5, %v7257_v14, %v7256_v27  ;;  %v7453_v56 = vsub.s32 32, %v7452_v30  ;;  %v7457_v44 = vsub.s32 4294967266, %v7452_v30  ;;  %v7545_v4 = vadd.s32 %v7544_v26, %v7540_v0 }
 0x900   : > { %v7454_v50 = vshll.u32 %v15352_v54, %v7452_v30  ;;  %v15400_v32 = vshrl.u32 %v7705_v23, 5  ;;  %v7711_v49 = vshrl.u32 %v16551_v62, %v7708_v36  ;;  %v7592_v63 = vand.u32 2139095040, %v15320_v48 }
 0x901   : > { %v7455_v24 = vshrl.u32 %v7437_v59, %v7453_v56  ;;  %v7458_v46 = vadd.s32 127, %v7457_v44  ;;  %v7546_v16 = vadd.s32 536870912, %v7545_v4  ;;  %v7714_v45 = vshrl.u32 %v16552_v13, %v7708_v36 }
 0x902   : > { %v7710_v11 = vshll.u32 %v16550_v40, %v7707_v38  ;;  %v7713_v27 = vshll.u32 %v16551_v62, %v7707_v38  ;;  %v7716_v25 = vshll.u32 %v16552_v13, %v7707_v38  ;;  %v7717_v14 = vshrl.u32 %v16553_v39, %v7708_v36 }
 0x903   : > { %v7456_v54 = vor.u32 %v7455_v24, %v7454_v50  ;;  %v7459_v47 = vshll.u32 %v7458_v46, 23  ;;  %v15409_v23 = vshrl.u32 %v7546_v16, 30  ;;  %v7720_v42 = vshrl.u32 %v16401_v1, %v7708_v36  ;;  %v15412_v33 = vpop.eup %9030 }
 0x904   : > { %16615 = vst [vmem:[#allocation29_spill] sm:$0xff] %v15412_v33  ;;  %vm16118_vm7 = vcmp.lt.s32.totalorder %v15143_v35, 0  ;;  %v7712_v59 = vor.u32 %v7711_v49, %v7710_v11  ;;  %v7719_v0 = vshll.u32 %v16553_v39, %v7707_v38  ;;  %v7722_v30 = vshll.u32 %v16401_v1, %v7707_v38  ;;  %v15418_v56 = vpop.eup %9032 }
 0x905   : > { %v7723_v26 = vshrl.u32 %v16402_v2, %v7708_v36  ;;  %16616 = vst [vmem:[#allocation42_spill] sm:$0xff] %v15418_v56  ;;  %v7460_v44 = vor.u32 4788187, %v7459_v47  ;;  %v7548_v50 = vshll.u32 %v15409_v23, 30  ;;  %v7715_v24 = vor.u32 %v7714_v45, %v7713_v27  ;;  %v15421_v16 = vpop.eup %9034 }
 0x906   : > { %v7718_v46 = vor.u32 %v7717_v14, %v7716_v25  ;;  %16617 = vst [vmem:[#allocation30_spill] sm:$0xff] %v15421_v16  ;;  %v7261_v18 = vsel %vm15385_vm1, %v15043_v6, %v7258_v28  ;;  %v7721_v49 = vor.u32 %v7720_v42, %v7719_v0  ;;  %v7593_v5 = vshrl.u32 %v7592_v63, 23 }
 0x907   : > { %v7724_v11 = vor.u32 %v7723_v26, %v7722_v30  ;;  %v16618_v38 = vand.u32 2147483647, %v15143_v35  ;;  %v16619_v33 = vmov 0  ;;  %v7461_v47 = vand.u32 2147483647, %v7460_v44 }
 0x908   : > { %v7463_v56 = vcvt.s32.f32 %v7456_v54  ;;  %v15432_v52 = vsub.s32 %v7545_v4, %v7548_v50  ;;  %v7709_v45 = vshrl.u32 %v16550_v40, %v7708_v36  ;;  %vm7725_vm4 = vcmp.lt.s32.totalorder %v15400_v32, 1 }
 0x909   : > { %vm15428_vm9 = vcmp.le.f32.partialorder %v16618_v38, 0.7853982  ;;  %vm7726_vm15 = vcmp.lt.s32.totalorder %v15400_v32, 2  ;;  %vm7727_vm0 = vcmp.lt.s32.totalorder %v15400_v32, 3  ;;  %vm7728_vm5 = vcmp.lt.s32.totalorder %v15400_v32, 4 }
 0x90a   : > { %v16620_v33 = vsel %vm15428_vm9, 4294967295, %v16619_v33  ;;  %v7464_v28 = vmul.f32 %v7463_v56, %v7461_v47  ;;  %v7551_v63 = vsub.s32 0, %v15432_v52  ;;  %v7730_v27 = vsel %vm7728_vm5, %v7718_v46, 2102212464 }
 0x90b   : > { %16621 = vst [vmem:[#allocation15_spill] sm:$0xff] %v16620_v33  ;;  %v7733_v25 = vsel %vm7725_vm4, %v7712_v59, %v7715_v24  ;;  %v7729_v14 = vsel %vm7725_vm4, %v7709_v45, %v7712_v59  ;;  %v7734_v42 = vsel %vm7728_vm5, %v7721_v49, 920167782  ;;  %v7737_v54 = vsel %vm7725_vm4, %v7715_v24, %v7718_v46 }
 0x90c   : > { %v7738_v4 = vsel %vm7728_vm5, %v7724_v11, 1326507024  ;;  %v7465_v0 = vxor.u32 2147483648, %v7464_v28  ;;  %v8409_v36 = vmin.u32 %v7551_v63, %v15432_v52  ;;  %v7735_v30 = vsel %vm7727_vm0, %v7718_v46, %v7734_v42 }
 0x90d   : > { %v7739_v26 = vsel %vm7727_vm0, %v7721_v49, %v7738_v4  ;;  %v7731_v44 = vsel %vm7727_vm0, %v7715_v24, %v7730_v27  ;;  %v7736_v50 = vsel %vm7726_vm15, %v7733_v25, %v7735_v30  ;;  %v8412_v38 = vadd.s32 4294967169, %v7593_v5 }
 0x90e   : > { %v7740_v56 = vsel %vm7726_vm15, %v7737_v54, %v7739_v26  ;;  %v7466_v47 = vsel %vm16118_vm7, %v7465_v0, %v7464_v28  ;;  %v7553_v59 = vclz %v8409_v36  ;;  %9036 = vsinq.f32 %v15371_v34 }
 0x90f   : > { %v15448_v45 = vmul.u32.u64.low %v15395_v3, %v7740_v56  ;;  %v15449_v11 = vmul.u32.u64.high %v15395_v3, %v7740_v56, %v15448_v45  ;;  %v16622_v24 = vsel %vm15268_vm11, 0, %v15233_v57  ;;  %9038 = vcosq.f32 %v7261_v18 }
 0x910   : > { %v15456_v46 = vadd.s32 3, %v16622_v24  ;;  %v15459_v49 = vmul.u32.u64.low %v15395_v3, %v7736_v50  ;;  %v15460_v63 = vmul.u32.u64.high %v15395_v3, %v7736_v50, %v15459_v49  ;;  %v8410_v5 = vadd.s32 4294967294, %v7553_v59 }
 0x911   : > { %v7571_v28 = vsub.s32 4, %v15409_v23  ;;  %v7599_v27 = vadd.s32 1, %v8412_v38  ;;  %9040 = vsinq.f32 %v7261_v18  ;;  %v15467_v34 = vsel %vm15428_vm9, %v15143_v35, %v7466_v47 }
 0x912   : > { %16623 = vst [vmem:[#allocation10_spill] sm:$0xff] %v15456_v46  ;;  %vm7487_vm11 = vcmp.lt.s32.totalorder %v15165_v58, 0  ;;  %v7732_v57 = vsel %vm7726_vm15, %v7729_v14, %v7731_v44  ;;  %vm8411_vm5 = vcmp.lt.s32.totalorder %v8410_v5, 0  ;;  %vm7750_vm4 = vc.u32 %v15449_v11, %v15459_v49 }
 0x913   : > { %v16624_v53 = vand.u32 2147483647, %v15320_v48  ;;  %vm7600_vm0 = vcmp.gt.s32.totalorder %v7599_v27, 0  ;;  %v7541_v18 = vadd.s32 %v15363_v19, %v15375_v61  ;;  %v7556_v42 = vsel %vm8411_vm5, 0, %v8410_v5 }
 0x914   : > { %v7751_v54 = vadd.s32 1, %v15460_v63  ;;  %v7601_v4 = vsel %vm7600_vm0, %v7599_v27, 0  ;;  %v7557_v0 = vsub.s32 32, %v7556_v42  ;;  %v7561_v36 = vsub.s32 4294967266, %v7556_v42 }
 0x915   : > { %v7596_v25 = vand.u32 8388607, %v16624_v53  ;;  %v15482_v32 = vsel %vm7487_vm11, %v7571_v28, %v15409_v23  ;;  %v7748_v14 = vmul.u32 %v15395_v3, %v7732_v57  ;;  %9042 = vcosq.f32 %v15467_v34 }
 0x916   : > { %v7752_v30 = vsel %vm7750_vm4, %v7751_v54, %v15460_v63  ;;  %v7603_v26 = vand.u32 31, %v7601_v4  ;;  %v15489_v19 = vadd.f32 %v14950_v17, %v15152_v41  ;;  %v7559_v61 = vshrl.u32 %v7541_v18, %v7557_v0 }
 0x917   : > { %v7562_v44 = vadd.s32 127, %v7561_v36  ;;  %v7753_v50 = vadd.s32 %v7752_v30, %v7748_v14  ;;  %v7597_v56 = vor.u32 8388608, %v7596_v25  ;;  %v7558_v38 = vshll.u32 %v15432_v52, %v7556_v42  ;;  %v16673_v36 = vld [vmem:[#allocation29_spill] sm:$0xff] }
 0x918   : > { %v7602_v47 = vshrl.u32 %v7601_v4, 5  ;;  %v7604_v23 = vsub.s32 32, %v7603_v26  ;;  %v7606_v24 = vshll.u32 %v16550_v40, %v7603_v26  ;;  %v7612_v63 = vshll.u32 %v16552_v13, %v7603_v26  ;;  %v15495_v5 = vpop.eup %9036 }
 0x919   : > { %v7563_v3 = vshll.u32 %v7562_v44, 23  ;;  %v7754_v45 = vadd.s32 536870912, %v7753_v50  ;;  %16625 = vst [vmem:[#allocation35_spill] sm:$0xff] %v15495_v5  ;;  %v7560_v17 = vor.u32 %v7559_v61, %v7558_v38  ;;  %v15500_v52 = vpop.eup %9038  ;;  %vm7695_vm15 = vcmp.lt.s32.totalorder %v15289_v29, 0 }
 0x91a   : > { %v7607_v41 = vshrl.u32 %v16551_v62, %v7604_v23  ;;  %v7610_v28 = vshrl.u32 %v16552_v13, %v7604_v23  ;;  %v7613_v27 = vshrl.u32 %v16553_v39, %v7604_v23  ;;  %v7609_v25 = vshll.u32 %v16551_v62, %v7603_v26 }
 0x91b   : > { %v7564_v57 = vor.u32 4788187, %v7563_v3  ;;  %v7755_v53 = vshrl.u32 %v7754_v45, 30  ;;  %v7616_v18 = vshrl.u32 %v16401_v1, %v7604_v23  ;;  %v15505_v42 = vpop.eup %9040  ;;  %v7615_v4 = vshll.u32 %v16553_v39, %v7603_v26 }
 0x91c   : > { %v7614_v54 = vor.u32 %v7613_v27, %v7612_v63  ;;  %v15508_v0 = vshll.u32 %v7597_v56, 8  ;;  %v16626_v14 = vand.u32 2147483647, %v15165_v58  ;;  %v7608_v38 = vor.u32 %v7607_v41, %v7606_v24 }
 0x91d   : > { %v7565_v61 = vand.u32 2147483647, %v7564_v57  ;;  %v7756_v44 = vshll.u32 %v7755_v53, 30  ;;  %v7611_v3 = vor.u32 %v7610_v28, %v7609_v25  ;;  %v7567_v45 = vcvt.s32.f32 %v7560_v17 }
 0x91e   : > { %vm15513_vm5 = vcmp.le.f32.partialorder %v16626_v14, 0.7853982  ;;  %v7617_v59 = vor.u32 %v7616_v18, %v7615_v4  ;;  %v7618_v63 = vshll.u32 %v16401_v1, %v7603_v26  ;;  %v7619_v27 = vshrl.u32 %v16402_v2, %v7604_v23 }
 0x91f   : > { %v16629_v56 = vand.u32 2147483647, %v15289_v29  ;;  %v15525_v14 = vsub.s32 %v7753_v50, %v7756_v44  ;;  %v7605_v16 = vshrl.u32 %v16550_v40, %v7604_v23  ;;  %vm7621_vm0 = vcmp.lt.s32.totalorder %v7602_v47, 1  ;;  %v15528_v24 = vpop.eup %9042 }
 0x920   : > { %vm7624_vm7 = vcmp.lt.s32.totalorder %v7602_v47, 4  ;;  %16632 = vst [vmem:[#allocation19_spill] sm:$0xff] %v15528_v24  ;;  %v7568_v17 = vmul.f32 %v7567_v45, %v7565_v61  ;;  %v7779_v41 = vsub.s32 4, %v7755_v53  ;;  %v7620_v28 = vor.u32 %v7619_v27, %v7618_v63 }
 0x921   : > { %vm15521_vm4 = vcmp.le.f32.partialorder %v16629_v56, 0.7853982  ;;  %v7626_v26 = vsel %vm7624_vm7, %v7614_v54, 2102212464  ;;  %v7759_v57 = vsub.s32 0, %v15525_v14  ;;  %vm7623_vm12 = vcmp.lt.s32.totalorder %v7602_v47, 3 }
 0x922   : > { %v7625_v25 = vsel %vm7621_vm0, %v7605_v16, %v7608_v38  ;;  %v7629_v18 = vsel %vm7621_vm0, %v7608_v38, %v7611_v3  ;;  %v7627_v4 = vsel %vm7623_vm12, %v7611_v3, %v7626_v26  ;;  %v7630_v56 = vsel %vm7624_vm7, %v7617_v59, 920167782 }
 0x923   : > { %v7633_v5 = vsel %vm7621_vm0, %v7611_v3, %v7614_v54  ;;  %v7634_v50 = vsel %vm7624_vm7, %v7620_v28, 1326507024  ;;  %v8417_v44 = vmin.u32 %v7759_v57, %v15525_v14  ;;  %vm7622_vm14 = vcmp.lt.s32.totalorder %v7602_v47, 2 }
 0x924   : > { %v7631_v23 = vsel %vm7623_vm12, %v7614_v54, %v7630_v56  ;;  %v7635_v46 = vsel %vm7623_vm12, %v7617_v59, %v7634_v50  ;;  %v7569_v33 = vxor.u32 2147483648, %v7568_v17  ;;  %v15534_v61 = vsel %vm7695_vm15, %v7779_v41, %v7755_v53 }
 0x925   : > { %v7632_v45 = vsel %vm7622_vm14, %v7629_v18, %v7631_v23  ;;  %v7636_v63 = vsel %vm7622_vm14, %v7633_v5, %v7635_v46  ;;  %v7761_v27 = vclz %v8417_v44  ;;  %v7628_v24 = vsel %vm7622_vm14, %v7625_v25, %v7627_v4 }
 0x926   : > { %v15537_v16 = vmul.u32.u64.low %v15508_v0, %v7636_v63  ;;  %v15538_v38 = vmul.u32.u64.high %v15508_v0, %v7636_v63, %v15537_v16  ;;  %9044 = vsinq.f32 %v15467_v34  ;;  %v7574_v47 = vsel %vm15513_vm5, 0, %v15482_v32 }
 0x927   : > { %v15545_v59 = vmul.u32.u64.low %v15508_v0, %v7632_v45  ;;  %v15546_v54 = vmul.u32.u64.high %v15508_v0, %v7632_v45, %v15545_v59  ;;  %v7749_v53 = vadd.s32 %v15459_v49, %v15449_v11  ;;  %v8418_v46 = vadd.s32 4294967294, %v7761_v27 }
 0x928   : > { %v7800_v5 = vand.u32 2139095040, %v15489_v19  ;;  %v16633_v3 = vsub.s32 4, %v14580_v8  ;;  %v7570_v41 = vsel %vm7487_vm11, %v7569_v33, %v7568_v17  ;;  %v7782_v28 = vsel %vm15521_vm4, 0, %v15534_v61 }
 0x929   : > { %v7644_v26 = vmul.u32 %v15508_v0, %v7628_v24  ;;  %vm8419_vm14 = vcmp.lt.s32.totalorder %v8418_v46, 0  ;;  %vm7646_vm12 = vc.u32 %v15538_v38, %v15545_v59  ;;  %v16634_v57 = vand.u32 2147483647, %v15489_v19 }
 0x92a   : > { %v6428_v34 = vsel %vm6343_vm13, %v16633_v3, %v14580_v8  ;;  %v7801_v49 = vshrl.u32 %v7800_v5, 23  ;;  %v7764_v8 = vsel %vm8419_vm14, 0, %v8418_v46  ;;  %v7647_v18 = vadd.s32 1, %v15546_v54 }
 0x92b   : > { %v6430_v11 = vsel %vm14772_vm10, 0, %v6428_v34  ;;  %v7804_v25 = vand.u32 8388607, %v16634_v57  ;;  %v6843_v17 = vsub.s32 4, %v14925_v22  ;;  %v7765_v4 = vsub.s32 32, %v7764_v8 }
 0x92c   : > { %v6434_v33 = vadd.s32 3, %v6430_v11  ;;  %v7769_v56 = vsub.s32 4294967266, %v7764_v8  ;;  %v8420_v50 = vadd.s32 4294967169, %v7801_v49  ;;  %v6438_v0 = vxor.u32 2147483648, %v14929_v7 }
 0x92d   : > { %v7766_v12 = vshll.u32 %v15525_v14, %v7764_v8  ;;  %v7648_v24 = vsel %vm7646_vm12, %v7647_v18, %v15546_v54  ;;  %v6441_v23 = vxor.u32 2147483648, %v14923_v15  ;;  %v7767_v45 = vshrl.u32 %v7749_v53, %v7765_v4 }
 0x92e   : > { %v6435_v44 = vand.u32 3, %v6434_v33  ;;  %v7770_v63 = vadd.s32 127, %v7769_v56  ;;  %v7649_v27 = vadd.s32 %v7648_v24, %v7644_v26  ;;  %v7807_v16 = vadd.s32 1, %v8420_v50 }
 0x92f   : > { %v7805_v46 = vor.u32 8388608, %v7804_v25  ;;  %v6844_v5 = vsel %vm6759_vm8, %v6843_v17, %v14925_v22  ;;  %v7768_v3 = vor.u32 %v7767_v45, %v7766_v12  ;;  %v15581_v54 = vsel %vm15513_vm5, %v15165_v58, %v7570_v41 }
 0x930   : > { %vm6437_vm13 = vcmp.eq.s32.totalorder %v6435_v44, 0  ;;  %vm6440_vm10 = vcmp.eq.s32.totalorder %v6435_v44, 2  ;;  %v7771_v34 = vshll.u32 %v7770_v63, 23  ;;  %v7650_v11 = vadd.s32 536870912, %v7649_v27  ;;  %v15576_v14 = vpop.eup %9044 }
 0x931   : > { %vm7808_vm7 = vcmp.gt.s32.totalorder %v7807_v16, 0  ;;  %v6439_v26 = vsel %vm6437_vm13, %v14923_v15, %v6438_v0  ;;  %v6442_v49 = vsel %vm6440_vm10, %v6441_v23, %v14929_v7  ;;  %v15586_v25 = vadd.s32 %v15545_v59, %v15538_v38 }
 0x932   : > { %v7809_v53 = vsel %vm7808_vm7, %v7807_v16, 0  ;;  %v7772_v57 = vor.u32 4788187, %v7771_v34  ;;  %v15588_v22 = vshrl.u32 %v7650_v11, 30  ;;  %v6846_v8 = vsel %vm15098_vm6, 0, %v6844_v5 }
 0x933   : > { %v7775_v18 = vcvt.s32.f32 %v7768_v3  ;;  %v7811_v33 = vand.u32 31, %v7809_v53  ;;  %v15592_v17 = vshll.u32 %v7805_v46, 8  ;;  %vm6436_vm8 = vcmp.lt.s32.totalorder %v6435_v44, 2 }
 0x934   : > { %v7773_v41 = vand.u32 2147483647, %v7772_v57  ;;  %v7652_v4 = vshll.u32 %v15588_v22, 30  ;;  %v7810_v15 = vshrl.u32 %v7809_v53, 5  ;;  %v15595_v56 = vsel %vm6436_vm8, %v6439_v26, %v6442_v49 }
 0x935   : > { %v7812_v7 = vsub.s32 32, %v7811_v33  ;;  %v7814_v38 = vshll.u32 %v16550_v40, %v7811_v33  ;;  %v6850_v59 = vadd.s32 3, %v6846_v8  ;;  %v6854_v50 = vxor.u32 2147483648, %v15201_v37 }
 0x936   : > { %v7776_v0 = vmul.f32 %v7775_v18, %v7773_v41  ;;  %v15599_v20 = vsub.s32 %v7649_v27, %v7652_v4  ;;  %v7817_v12 = vshll.u32 %v16551_v62, %v7811_v33  ;;  %v7820_v24 = vshll.u32 %v16552_v13, %v7811_v33 }
 0x937   : > { %v7815_v44 = vshrl.u32 %v16551_v62, %v7812_v7  ;;  %v7818_v23 = vshrl.u32 %v16552_v13, %v7812_v7  ;;  %v7821_v45 = vshrl.u32 %v16553_v39, %v7812_v7  ;;  %v7823_v63 = vshll.u32 %v16553_v39, %v7811_v33 }
 0x938   : > { %v7655_v16 = vsub.s32 0, %v15599_v20  ;;  %v7824_v46 = vshrl.u32 %v16401_v1, %v7812_v7  ;;  %v7826_v5 = vshll.u32 %v16401_v1, %v7811_v33  ;;  %v7827_v27 = vshrl.u32 %v16402_v2, %v7812_v7 }
 0x939   : > { %v7813_v3 = vshrl.u32 %v16550_v40, %v7812_v7  ;;  %v7816_v34 = vor.u32 %v7815_v44, %v7814_v38  ;;  %v7819_v11 = vor.u32 %v7818_v23, %v7817_v12  ;;  %v7822_v53 = vor.u32 %v7821_v45, %v7820_v24 }
 0x93a   : > { %v8413_v62 = vmin.u32 %v7655_v16, %v15599_v20  ;;  %v7825_v13 = vor.u32 %v7824_v46, %v7823_v63  ;;  %v7828_v26 = vor.u32 %v7827_v27, %v7826_v5  ;;  %vm7829_vm6 = vcmp.lt.s32.totalorder %v7810_v15, 1 }
 0x93b   : > { %v7777_v49 = vxor.u32 2147483648, %v7776_v0  ;;  %vm7832_vm11 = vcmp.lt.s32.totalorder %v7810_v15, 4  ;;  %v7833_v39 = vsel %vm7829_vm6, %v7813_v3, %v7816_v34  ;;  %v7837_v57 = vsel %vm7829_vm6, %v7816_v34, %v7819_v11 }
 0x93c   : > { %v7657_v8 = vclz %v8413_v62  ;;  %vm7831_vm0 = vcmp.lt.s32.totalorder %v7810_v15, 3  ;;  %v7834_v1 = vsel %vm7832_vm11, %v7822_v53, 2102212464  ;;  %v7838_v2 = vsel %vm7832_vm11, %v7825_v13, 920167782 }
 0x93d   : > { %vm6433_vm14 = vweird.f32 %v14378_v43  ;;  %vm7830_vm12 = vcmp.lt.s32.totalorder %v7810_v15, 2  ;;  %v7835_v40 = vsel %vm7831_vm0, %v7819_v11, %v7834_v1  ;;  %v7839_v18 = vsel %vm7831_vm0, %v7822_v53, %v7838_v2 }
 0x93e   : > { %v7841_v33 = vsel %vm7829_vm6, %v7819_v11, %v7822_v53  ;;  %vm6849_vm13 = vweird.f32 %v14617_v55  ;;  %v8414_v41 = vadd.s32 4294967294, %v7657_v8  ;;  %v7836_v4 = vsel %vm7830_vm12, %v7833_v39, %v7835_v40  ;;  %v16635_v53 = vld [vmem:[#allocation32_spill] sm:$0xff] }
 0x93f   : > { %v7840_v7 = vsel %vm7830_vm12, %v7837_v57, %v7839_v18  ;;  %v7842_v38 = vsel %vm7832_vm11, %v7828_v26, 1326507024  ;;  %v7778_v12 = vsel %vm7695_vm15, %v7777_v49, %v7776_v0  ;;  %v7852_v63 = vmul.u32 %v15592_v17, %v7836_v4  ;;  %v16636_v39 = vld [vmem:[#allocation44_spill] sm:$0xff] }
 0x940   : > { %v7843_v24 = vsel %vm7831_vm0, %v7825_v13, %v7842_v38  ;;  %v15621_v44 = vmul.u32.u64.low %v15592_v17, %v7840_v7  ;;  %v15622_v23 = vmul.u32.u64.high %v15592_v17, %v7840_v7, %v15621_v44  ;;  %vm8415_vm10 = vcmp.lt.s32.totalorder %v8414_v41, 0 }
 0x941   : > { %v7844_v45 = vsel %vm7830_vm12, %v7841_v33, %v7843_v24  ;;  %v6851_v16 = vand.u32 3, %v6850_v59  ;;  %v7660_v46 = vsel %vm8415_vm10, 0, %v8414_v41  ;;  %v6857_v15 = vxor.u32 2147483648, %v15196_v51 }
 0x942   : > { %v15626_v5 = vmul.u32.u64.low %v15592_v17, %v7844_v45  ;;  %v15627_v27 = vmul.u32.u64.high %v15592_v17, %v7844_v45, %v15626_v5  ;;  %v7661_v3 = vsub.s32 32, %v7660_v46  ;;  %v7662_v0 = vshll.u32 %v15599_v20, %v7660_v46 }
 0x943   : > { %v7665_v34 = vsub.s32 4294967266, %v7660_v46  ;;  %vm6852_vm15 = vcmp.lt.s32.totalorder %v6851_v16, 2  ;;  %v7855_v11 = vadd.s32 1, %v15622_v23  ;;  %vm6853_vm7 = vcmp.eq.s32.totalorder %v6851_v16, 0  ;;  %v16644_v46 = vld [vmem:[#allocation18_spill] sm:$0xff] }
 0x944   : > { %vm6856_vm8 = vcmp.eq.s32.totalorder %v6851_v16, 2  ;;  %v6635_v62 = vsub.s32 4, %v16635_v53  ;;  %v7663_v59 = vshrl.u32 %v15586_v25, %v7661_v3  ;;  %v6855_v26 = vsel %vm6853_vm7, %v15196_v51, %v6854_v50 }
 0x945   : > { %v7666_v13 = vadd.s32 127, %v7665_v34  ;;  %v6858_v17 = vsel %vm6856_vm8, %v6857_v15, %v15201_v37  ;;  %vm7854_vm6 = vc.u32 %v15627_v27, %v15621_v44  ;;  %v6444_v20 = vsel %vm6433_vm14, nan, %v15595_v56 }
 0x946   : > { %v6859_v49 = vsel %vm6852_vm15, %v6855_v26, %v6858_v17  ;;  %vm16637_vm11 = vcmp.lt.s32.totalorder %v16636_v39, 0  ;;  %v7664_v8 = vor.u32 %v7663_v59, %v7662_v0  ;;  %v7856_v25 = vsel %vm7854_vm6, %v7855_v11, %v15622_v23  ;;  %v16645_v59 = vld [vmem:[#allocation41_spill] sm:$0xff]  ;;  %v16646_v26 = vld [vmem:[#allocation12_spill] sm:$0xff] }
 0x947   : > { %v6636_v57 = vsel %vm16637_vm11, %v6635_v62, %v16635_v53  ;;  %v7667_v1 = vshll.u32 %v7666_v13, 23  ;;  %v6860_v51 = vsel %vm6849_vm13, nan, %v6859_v49  ;;  %9046 = vcosq.f32 %v15581_v54 }
 0x948   : > { %vm7591_vm0 = vcmp.lt.s32.totalorder %v15320_v48, 0  ;;  %v7857_v37 = vadd.s32 %v7856_v25, %v7852_v63  ;;  %v8480_v50 = vpack.c.bf16 %v6860_v51, %v6444_v20  ;;  %v6638_v56 = vsel %vm14940_vm3, 0, %v6636_v57  ;;  %v16647_v20 = vld [vmem:[#allocation11_spill] sm:$0xff] }
 0x949   : > { %9048 = vsinq.f32 %v15581_v54  ;;  %v15654_v2 = vsel %vm15521_vm4, %v15289_v29, %v7778_v12  ;;  %v7668_v40 = vor.u32 4788187, %v7667_v1  ;;  %v6642_v18 = vadd.s32 3, %v6638_v56  ;;  %v16642_v54 = vld [vmem:[#allocation38_spill] sm:$0xff]  ;;  %v16648_v57 = vld [vmem:[#allocation27_spill] sm:$0xff] }
 0x94a   : > { %v16639_v55 = vand.u32 2147483647, %v15320_v48  ;;  %v7858_v41 = vadd.s32 536870912, %v7857_v37  ;;  %8481 = vmatprep.subr.bf16.mxu0 %v8480_v50  ;;  %v6646_v4 = vxor.u32 2147483648, %v15082_v60  ;;  %v6649_v7 = vxor.u32 2147483648, %v15068_v21 }
 0x94b   : > { %v7051_v38 = vsub.s32 4, %v16642_v54  ;;  %v7669_v24 = vand.u32 2147483647, %v7668_v40  ;;  %v7671_v23 = vcvt.s32.f32 %v7664_v8  ;;  %v15666_v12 = vadd.s32 %v15621_v44, %v15627_v27 }
 0x94c   : > { %vm15658_vm14 = vcmp.le.f32.partialorder %v16639_v55, 0.7853982  ;;  %v6643_v45 = vand.u32 3, %v6642_v18  ;;  %v15668_v63 = vshrl.u32 %v7858_v41, 30  ;;  %vm6641_vm3 = vweird.f32 %v16636_v39  ;;  %v16650_v41 = vld [vmem:[#allocation26_spill] sm:$0xff] }
 0x94d   : > { %vm16643_vm12 = vcmp.lt.s32.totalorder %v14761_v9, 0  ;;  %v6331_v5 = vand.u32 3, %v16644_v46  ;;  %v7672_v15 = vmul.f32 %v7671_v23, %v7669_v24  ;;  %vm7057_vm7 = vweird.f32 %v14761_v9  ;;  %v16652_v23 = vld [vmem:[#allocation28_spill] sm:$0xff] }
 0x94e   : > { %v7052_v16 = vsel %vm16643_vm12, %v7051_v38, %v16642_v54  ;;  %vm6644_vm13 = vcmp.lt.s32.totalorder %v6643_v45, 2  ;;  %vm6645_vm10 = vcmp.eq.s32.totalorder %v6643_v45, 0  ;;  %vm6648_vm15 = vcmp.eq.s32.totalorder %v6643_v45, 2  ;;  %v16653_v45 = vld [vmem:[#allocation14_spill] sm:$0xff]  ;;  %v16654_v9 = vld [vmem:[#allocation24_spill] sm:$0xff] }
 0x94f   : > { %v7860_v3 = vshll.u32 %v15668_v63, 30  ;;  %v6647_v44 = vsel %vm6645_vm10, %v15068_v21, %v6646_v4  ;;  %v6650_v27 = vsel %vm6648_vm15, %v6649_v7, %v15082_v60  ;;  %v7054_v0 = vsel %vm15156_vm2, 0, %v7052_v16  ;;  %v16651_v7 = vld [vmem:[#allocation13_spill] sm:$0xff] }
 0x950   : > { %v7673_v34 = vxor.u32 2147483648, %v7672_v15  ;;  %v6651_v11 = vsel %vm6644_vm13, %v6647_v44, %v6650_v27  ;;  %v7058_v53 = vadd.s32 3, %v7054_v0  ;;  %v7062_v13 = vxor.u32 2147483648, %v16645_v59 }
 0x951   : > { %v15681_v62 = vsub.s32 %v7857_v37, %v7860_v3  ;;  %v7065_v17 = vxor.u32 2147483648, %v16646_v26  ;;  %v6334_v49 = vxor.u32 2147483648, %v16647_v20  ;;  %vm6329_vm8 = vweird.f32 %v16648_v57  ;;  %v15690_v1 = vpop.eup %9046 }
 0x952   : > { %v7674_v21 = vsel %vm7591_vm0, %v7673_v34, %v7672_v15  ;;  %v7059_v60 = vand.u32 3, %v7058_v53  ;;  %vm6332_vm2 = vcmp.lt.s32.totalorder %v6331_v5, 2  ;;  %v6337_v8 = vxor.u32 2147483648, %v16649_v10  ;;  %v16655_v34 = vld [vmem:[#allocation31_spill] sm:$0xff] }
 0x953   : > { %v7863_v25 = vsub.s32 0, %v15681_v62  ;;  %v6652_v51 = vsel %vm6641_vm3, nan, %v6651_v11  ;;  %vm6333_vm6 = vcmp.eq.s32.totalorder %v6331_v5, 0  ;;  %vm6336_vm11 = vcmp.eq.s32.totalorder %v6331_v5, 2  ;;  %v15695_v37 = vpop.eup %9048 }
 0x954   : > { %v7677_v50 = vsel %vm15658_vm14, %v15320_v48, %v7674_v21  ;;  %vm7061_vm12 = vcmp.eq.s32.totalorder %v7059_v60, 0  ;;  %vm7064_vm13 = vcmp.eq.s32.totalorder %v7059_v60, 2  ;;  %v6335_v43 = vsel %vm6333_vm6, %v16649_v10, %v6334_v49  ;;  %v16658_v49 = vld [vmem:[#allocation8_spill] sm:$0xff] }
 0x955   : > { %v8421_v56 = vmin.u32 %v7863_v25, %v15681_v62  ;;  %vm7060_vm10 = vcmp.lt.s32.totalorder %v7059_v60, 2  ;;  %v7063_v40 = vsel %vm7061_vm12, %v16646_v26, %v7062_v13  ;;  %v7066_v39 = vsel %vm7064_vm13, %v7065_v17, %v16645_v59  ;;  %v16656_v59 = vld [vmem:[#allocation6_spill] sm:$0xff] }
 0x956   : > { %v7067_v18 = vsel %vm7060_vm10, %v7063_v40, %v7066_v39  ;;  %v6338_v55 = vsel %vm6336_vm11, %v6337_v8, %v16647_v20  ;;  %v6747_v4 = vand.u32 3, %v16650_v41  ;;  %v6750_v54 = vxor.u32 2147483648, %v16651_v7  ;;  %v16657_v20 = vld [vmem:[#allocation43_spill] sm:$0xff]  ;;  %v16661_v41 = vld [vmem:[#allocation40_spill] sm:$0xff] }
 0x957   : > { %v7865_v38 = vclz %v8421_v56  ;;  %v7068_v24 = vsel %vm7057_vm7, nan, %v7067_v18  ;;  %vm6745_vm3 = vweird.f32 %v16652_v23  ;;  %v6753_v16 = vxor.u32 2147483648, %v16653_v45  ;;  %v16659_v56 = vld [vmem:[#allocation7_spill] sm:$0xff]  ;;  %v16660_v18 = vld [vmem:[#allocation17_spill] sm:$0xff] }
 0x958   : > { %9050 = vcosq.f32 %v7677_v50  ;;  %v8488_v46 = vpack.c.bf16 %v7068_v24, %v6652_v51  ;;  %v6339_v15 = vsel %vm6332_vm2, %v6335_v43, %v6338_v55  ;;  %vm6749_vm15 = vcmp.eq.s32.totalorder %v6747_v4, 0 }
 0x959   : > { %9052 = vsinq.f32 %v7677_v50  ;;  %v8422_v3 = vadd.s32 4294967294, %v7865_v38  ;;  %v6751_v44 = vsel %vm6749_vm15, %v16653_v45, %v6750_v54  ;;  %vm6752_vm6 = vcmp.eq.s32.totalorder %v6747_v4, 2 }
 0x95a   : > { %8489 = vmatprep.subr.bf16.mxu1 %v8488_v46  ;;  %vm6748_vm11 = vcmp.lt.s32.totalorder %v6747_v4, 2  ;;  %v6754_v27 = vsel %vm6752_vm6, %v6753_v16, %v16651_v7  ;;  %v6539_v0 = vand.u32 3, %v16654_v9  ;;  %v6542_v11 = vxor.u32 2147483648, %v16655_v34 }
 0x95b   : > { %vm8423_vm7 = vcmp.lt.s32.totalorder %v8422_v3, 0  ;;  %v6340_v53 = vsel %vm6329_vm8, nan, %v6339_v15  ;;  %v6755_v5 = vsel %vm6748_vm11, %v6751_v44, %v6754_v27  ;;  %v6545_v13 = vxor.u32 2147483648, %v16656_v59 }
 0x95c   : > { %v7868_v26 = vsel %vm8423_vm7, 0, %v8422_v3  ;;  %v6756_v17 = vsel %vm6745_vm3, nan, %v6755_v5  ;;  %vm6537_vm2 = vweird.f32 %v16657_v20  ;;  %v6955_v21 = vand.u32 3, %v16658_v49 }
 0x95d   : > { %v7869_v60 = vsub.s32 32, %v7868_v26  ;;  %v7873_v10 = vsub.s32 4294967266, %v7868_v26  ;;  %v8482_v8 = vpack.c.bf16 %v6756_v17, %v6340_v53  ;;  %vm6541_vm12 = vcmp.eq.s32.totalorder %v6539_v0, 0 }
 0x95e   : > { %v7870_v25 = vshll.u32 %v15681_v62, %v7868_v26  ;;  %vm6540_vm13 = vcmp.lt.s32.totalorder %v6539_v0, 2  ;;  %v6543_v57 = vsel %vm6541_vm12, %v16656_v59, %v6542_v11  ;;  %vm6544_vm8 = vcmp.eq.s32.totalorder %v6539_v0, 2 }
 0x95f   : > { %v7871_v51 = vshrl.u32 %v15666_v12, %v7869_v60  ;;  %v7874_v50 = vadd.s32 127, %v7873_v10  ;;  %8483 = vmatpush1.bf16.msra.mxu0 %v8482_v8  ;;  %v6546_v43 = vsel %vm6544_vm8, %v6545_v13, %v16655_v34  ;;  %v6958_v40 = vxor.u32 2147483648, %v16659_v56  ;;  %v16662_v12 = vld [vmem:[#allocation25_spill] sm:$0xff] }
 0x960   : > { %v6547_v39 = vsel %vm6540_vm13, %v6543_v57, %v6546_v43  ;;  %vm6957_vm10 = vcmp.eq.s32.totalorder %v6955_v21, 0  ;;  %v6961_v55 = vxor.u32 2147483648, %v16660_v18  ;;  %v7259_v4 = vsub.s32 4, %v16661_v41 }
 0x961   : > { %v7872_v7 = vor.u32 %v7871_v51, %v7870_v25  ;;  %v7875_v62 = vshll.u32 %v7874_v50, 23  ;;  %v6959_v54 = vsel %vm6957_vm10, %v16660_v18, %v6958_v40  ;;  %vm6960_vm3 = vcmp.eq.s32.totalorder %v6955_v21, 2 }
 0x962   : > { %v9051_v38 = vpop.eup %9050  ;;  %vm7799_vm15 = vcmp.lt.s32.totalorder %v15489_v19, 0  ;;  %vm6953_vm6 = vweird.f32 %v16662_v12  ;;  %vm6956_vm11 = vcmp.lt.s32.totalorder %v6955_v21, 2  ;;  %v6962_v24 = vsel %vm6960_vm3, %v6961_v55, %v16659_v56 }
 0x963   : > { %vm16663_vm7 = vcmp.lt.s32.totalorder %v15043_v6, 0  ;;  %v9053_v45 = vpop.eup %9052  ;;  %v16664_v16 = vand.u32 2147483647, %v15489_v19  ;;  %v7876_v15 = vor.u32 4788187, %v7875_v62  ;;  %v6548_v3 = vsel %vm6537_vm2, nan, %v6547_v39 }
 0x964   : > { %v7260_v23 = vsel %vm16663_vm7, %v7259_v4, %v16661_v41  ;;  %v6963_v44 = vsel %vm6956_vm11, %v6959_v54, %v6962_v24  ;;  %v7270_v34 = vxor.u32 2147483648, %v15505_v42  ;;  %v7675_v11 = vsub.s32 4, %v15588_v22  ;;  %v16670_v62 = vld [vmem:[#allocation19_spill] sm:$0xff] }
 0x965   : > { %vm15739_vm12 = vcmp.le.f32.partialorder %v16664_v16, 0.7853982  ;;  %v7262_v27 = vsel %vm15385_vm1, 0, %v7260_v23  ;;  %v6964_v9 = vsel %vm6953_vm6, nan, %v6963_v44  ;;  %v7877_v53 = vand.u32 2147483647, %v7876_v15 }
 0x966   : > { %v7266_v0 = vadd.s32 3, %v7262_v27  ;;  %v7879_v5 = vcvt.s32.f32 %v7872_v7  ;;  %v8490_v59 = vpack.c.bf16 %v6964_v9, %v6548_v3  ;;  %v7273_v13 = vxor.u32 2147483648, %v15500_v52  ;;  %v16674_v9 = vld [vmem:[#allocation5_spill] sm:$0xff] }
 0x967   : > { %vm7265_vm13 = vweird.f32 %v15043_v6  ;;  %v7676_v17 = vsel %vm7591_vm0, %v7675_v11, %v15588_v22  ;;  %v7467_v20 = vsub.s32 4, %v16667_v31  ;;  %vm7681_vm1 = vweird.f32 %v15320_v48 }
 0x968   : > { %v7267_v26 = vand.u32 3, %v7266_v0  ;;  %v7880_v49 = vmul.f32 %v7879_v5, %v7877_v53  ;;  %8491 = vmatpush1.bf16.msra.mxu1 %v8490_v59  ;;  %v7678_v21 = vsel %vm15658_vm14, 0, %v7676_v17  ;;  %v7686_v60 = vxor.u32 2147483648, %v9053_v45  ;;  %v16675_v5 = vld [vmem:[#allocation10_spill] sm:$0xff]  ;;  %v16676_v17 = vld [vmem:[#allocation35_spill] sm:$0xff] }
 0x969   : > { %v7682_v10 = vadd.s32 3, %v7678_v21  ;;  %v7689_v8 = vxor.u32 2147483648, %v9051_v38  ;;  %vm16668_vm0 = vcmp.lt.s32.totalorder %v15143_v35, 0  ;;  %v7478_v56 = vxor.u32 2147483648, %v15576_v14 }
 0x96a   : > { %vm7269_vm2 = vcmp.eq.s32.totalorder %v7267_v26, 0  ;;  %vm7272_vm8 = vcmp.eq.s32.totalorder %v7267_v26, 2  ;;  %v7881_v25 = vxor.u32 2147483648, %v7880_v49  ;;  %v7468_v22 = vsel %vm16668_vm0, %v7467_v20, %v16667_v31  ;;  %v16677_v20 = vld [vmem:[#allocation30_spill] sm:$0xff] }
 0x96b   : > { %v7271_v57 = vsel %vm7269_vm2, %v15500_v52, %v7270_v34  ;;  %v7274_v51 = vsel %vm7272_vm8, %v7273_v13, %v15505_v42  ;;  %vm7268_vm10 = vcmp.lt.s32.totalorder %v7267_v26, 2  ;;  %v7683_v50 = vand.u32 3, %v7682_v10 }
 0x96c   : > { %v7470_v43 = vsel %vm15428_vm9, 0, %v7468_v22  ;;  %v7882_v40 = vsel %vm7799_vm15, %v7881_v25, %v7880_v49  ;;  %v7275_v39 = vsel %vm7268_vm10, %v7271_v57, %v7274_v51  ;;  %v7883_v52 = vsub.s32 4, %v15668_v63 }
 0x96d   : > { %v7474_v18 = vadd.s32 3, %v7470_v43  ;;  %v7885_v42 = vsel %vm15739_vm12, %v15489_v19, %v7882_v40  ;;  %vm7684_vm14 = vcmp.lt.s32.totalorder %v7683_v50, 2  ;;  %vm7685_vm3 = vcmp.eq.s32.totalorder %v7683_v50, 0 }
 0x96e   : > { %vm7688_vm6 = vcmp.eq.s32.totalorder %v7683_v50, 2  ;;  %9054 = vcosq.f32 %v7885_v42  ;;  %v7687_v55 = vsel %vm7685_vm3, %v9051_v38, %v7686_v60  ;;  %v7481_v54 = vxor.u32 2147483648, %v16670_v62 }
 0x96f   : > { %v7690_v41 = vsel %vm7688_vm6, %v7689_v8, %v9053_v45  ;;  %v7475_v4 = vand.u32 3, %v7474_v18  ;;  %9056 = vsinq.f32 %v7885_v42  ;;  %v7884_v12 = vsel %vm7799_vm15, %v7883_v52, %v15668_v63 }
 0x970   : > { %v7691_v7 = vsel %vm7684_vm14, %v7687_v55, %v7690_v41  ;;  %v7578_v24 = vadd.s32 3, %v7574_v47  ;;  %9058 = vsinq.f32 %v15654_v2  ;;  %v7276_v38 = vsel %vm7265_vm13, nan, %v7275_v39  ;;  %v16671_v47 = vld [vmem:[#allocation39_spill] sm:$0xff]  ;;  %v7901_v55 = vld [vmem:[%s15886_s9] sm:$0x7] }
 0x971   : > { %v7692_v23 = vsel %vm7681_vm1, nan, %v7691_v7  ;;  %9060 = vcosq.f32 %v15654_v2  ;;  %v7786_v63 = vadd.s32 3, %v7782_v28  ;;  %v7886_v32 = vsel %vm15739_vm12, 0, %v7884_v12  ;;  %v16672_v2 = vld [vmem:[#allocation42_spill] sm:$0xff]  ;;  %v7906_v12 = vpop.permute.xlu0 %7905 }
 0x972   : > { %v8484_v45 = vpack.c.bf16 %v7692_v23, %v7276_v38  ;;  %vm7477_vm9 = vcmp.eq.s32.totalorder %v7475_v4, 0  ;;  %vm7480_vm5 = vcmp.eq.s32.totalorder %v7475_v4, 2  ;;  %v7890_v30 = vadd.s32 3, %v7886_v32 }
 0x973   : > { %v7163_v6 = vand.u32 3, %v16671_v47  ;;  %v7479_v48 = vsel %vm7477_vm9, %v16670_v62, %v7478_v56  ;;  %v7482_v16 = vsel %vm7480_vm5, %v7481_v54, %v15576_v14  ;;  %v7166_v15 = vxor.u32 2147483648, %v16672_v2 }
 0x974   : > { %8485 = vmatprep.subr.bf16.mxu0 %v8484_v45  ;;  %v7169_v3 = vxor.u32 2147483648, %v16673_v36  ;;  %vm7476_vm4 = vcmp.lt.s32.totalorder %v7475_v4, 2  ;;  %v7891_v61 = vand.u32 3, %v7890_v30  ;;  %vm7473_vm7 = vweird.f32 %v15143_v35  ;;  %v16678_v4 = vld [vmem:[#allocation33_spill] sm:$0xff] }
 0x975   : > { %vm7165_vm15 = vcmp.eq.s32.totalorder %v7163_v6, 0  ;;  %vm7168_vm11 = vcmp.eq.s32.totalorder %v7163_v6, 2  ;;  %vm7889_vm12 = vweird.f32 %v15489_v19  ;;  %v7579_v44 = vand.u32 3, %v7578_v24 }
 0x976   : > { %v7167_v28 = vsel %vm7165_vm15, %v16673_v36, %v7166_v15  ;;  %v7170_v46 = vsel %vm7168_vm11, %v7169_v3, %v16672_v2  ;;  %v7582_v27 = vxor.u32 2147483648, %v15695_v37  ;;  %v7483_v14 = vsel %vm7476_vm4, %v7479_v48, %v7482_v16 }
 0x977   : > { %vm7161_vm13 = vweird.f32 %v16674_v9  ;;  %vm7164_vm1 = vcmp.lt.s32.totalorder %v7163_v6, 2  ;;  %vm7577_vm2 = vweird.f32 %v15165_v58  ;;  %vm7892_vm8 = vcmp.lt.s32.totalorder %v7891_v61, 2 }
 0x978   : > { %vm7893_vm0 = vcmp.eq.s32.totalorder %v7891_v61, 0  ;;  %vm7896_vm10 = vcmp.eq.s32.totalorder %v7891_v61, 2  ;;  %vm7581_vm14 = vcmp.eq.s32.totalorder %v7579_v44, 0  ;;  %v9055_v0 = vpop.eup %9054  ;;  %v7171_v34 = vsel %vm7164_vm1, %v7167_v28, %v7170_v46 }
 0x979   : > { %v7583_v11 = vsel %vm7581_vm14, %v15690_v1, %v7582_v27  ;;  %v7585_v53 = vxor.u32 2147483648, %v15690_v1  ;;  %v7371_v59 = vand.u32 3, %v16675_v5  ;;  %v9057_v13 = vpop.eup %9056  ;;  %v7897_v26 = vxor.u32 2147483648, %v9055_v0 }
 0x97a   : > { %vm7584_vm3 = vcmp.eq.s32.totalorder %v7579_v44, 2  ;;  %v7374_v31 = vxor.u32 2147483648, %v16676_v17  ;;  %v7377_v49 = vxor.u32 2147483648, %v16677_v20  ;;  %v9059_v21 = vpop.eup %9058  ;;  %v7894_v60 = vxor.u32 2147483648, %v9057_v13 }
 0x97b   : > { %vm7580_vm6 = vcmp.lt.s32.totalorder %v7579_v44, 2  ;;  %v7586_v10 = vsel %vm7584_vm3, %v7585_v53, %v15695_v37  ;;  %vm7373_vm9 = vcmp.eq.s32.totalorder %v7371_v59, 0  ;;  %v9061_v8 = vpop.eup %9060  ;;  %v7898_v25 = vsel %vm7896_vm10, %v7897_v26, %v9057_v13 }
 0x97c   : > { %v7172_v1 = vsel %vm7161_vm13, nan, %v7171_v34  ;;  %v7587_v57 = vsel %vm7580_vm6, %v7583_v11, %v7586_v10  ;;  %v7375_v51 = vsel %vm7373_vm9, %v16677_v20, %v7374_v31  ;;  %v7895_v22 = vsel %vm7893_vm0, %v9055_v0, %v7894_v60 }
 0x97d   : > { %v7588_v50 = vsel %vm7577_vm2, nan, %v7587_v57  ;;  %vm7376_vm5 = vcmp.eq.s32.totalorder %v7371_v59, 2  ;;  %v7787_v33 = vand.u32 3, %v7786_v63  ;;  %v7899_v43 = vsel %vm7892_vm8, %v7895_v22, %v7898_v25 }
 0x97e   : > { %v8486_v37 = vpack.c.bf16 %v7588_v50, %v7172_v1  ;;  %v7378_v56 = vsel %vm7376_vm5, %v7377_v49, %v16676_v17  ;;  %v7790_v40 = vxor.u32 2147483648, %v9059_v21  ;;  %v7484_v39 = vsel %vm7473_vm7, nan, %v7483_v14 }
 0x97f   : > { %v7900_v18 = vsel %vm7889_vm12, nan, %v7899_v43  ;;  %vm7789_vm4 = vcmp.eq.s32.totalorder %v7787_v33, 0  ;;  %vm7372_vm15 = vcmp.lt.s32.totalorder %v7371_v59, 2  ;;  %v7793_v42 = vxor.u32 2147483648, %v9061_v8 }
 0x980   : > { %v8492_v52 = vpack.c.bf16 %v7900_v18, %v7484_v39  ;;  %8487 = vmatpush1.bf16.msra.mxu0 %v8486_v37  ;;  %v7791_v58 = vsel %vm7789_vm4, %v9061_v8, %v7790_v40  ;;  %v7379_v41 = vsel %vm7372_vm15, %v7375_v51, %v7378_v56  ;;  %vm7792_vm11 = vcmp.eq.s32.totalorder %v7787_v33, 2 }
 0x981   : > { %vm7788_vm13 = vcmp.lt.s32.totalorder %v7787_v33, 2  ;;  %v7794_v35 = vsel %vm7792_vm11, %v7793_v42, %v9059_v21  ;;  %vm7369_vm7 = vweird.f32 %v16678_v4  ;;  %vm7785_vm12 = vweird.f32 %v15289_v29 }
 0x982   : > { %8493 = vmatprep.subr.bf16.mxu1 %v8492_v52  ;;  %v7795_v19 = vsel %vm7788_vm13, %v7791_v58, %v7794_v35  ;;  %vm16679_vm1 = vcmask 261120   ;;  %v7380_v7 = vsel %vm7369_vm7, nan, %v7379_v41 }
 0x983   : > { %8424 = vmatmul.mubr.msk.f32.vlgmr.msra.gmra.mrb[24].mxu0 %vm16679_vm1, %v7901_v55  ;;  %v7796_v62 = vsel %vm7785_vm12, nan, %v7795_v19  ;;  %vm16680_vm2 = vmmov %vm16679_vm1 }
 0x984   : > { %v8494_v54 = vpack.c.bf16 %v7796_v62, %v7380_v7 }
 0x986   : > { %8495 = vmatpush1.bf16.msra.mxu1 %v8494_v54 }
 0x989   : > { %8425 = vmatmul.mubr.msk.f32.vlgmr.msra.gmra.mrb[24].mxu1 %vm16680_vm2, %v7901_v55 }
 0xa56   : > { %v7977_v24 = vpop.f32.mrb[24].mxu0 }
 0xa57   : > { %v7978_v38 = vadd.f32 %v7977_v24, %v7906_v12  ;;  %v7979_v23 = vpop.f32.mrb[25].mxu0 }
 0xa58   : > { %v7980_v63 = vadd.f32 %v7979_v23, %v7906_v12 }
 0xa5a   : > { %v8057_v45 = vcombine.low %v7978_v38, %v7980_v63 }
 0xa5c   : > { %8061 = vst [vmem:[%s380_s15] sm:$0x77] %v8057_v45  ;;  %v8048_v29 = vpop.f32.mrb[24].mxu1 }
 0xa5d   : > { %v8049_v32 = vadd.f32 %v8048_v29, %v7906_v12  ;;  %v8050_v30 = vpop.f32.mrb[25].mxu1 }
 0xa5e   : > { %v8051_v47 = vadd.f32 %v8050_v30, %v7906_v12 }
 0xa60   : > { %v8058_v6 = vcombine.low %v8049_v32, %v8051_v47 }
 0xa62   : > { %8062 = vst [vmem:[%s380_s15 + $0x8] sm:$0x77] %v8058_v6 }
 0xa63   : > { %9075 = shalt.err (!%p9072_p3)
}
 0xa64   : > { %s9076_s13 = scalar_lea.hbm %s15835_s29, 256  ;;  %s9080_s24 = scalar_lea.hbm %s15888_s11, 512 }
 0xa65   : > { %p9077_p4 = scmp.ne.s32.totalorder %s15835_s29, %s9076_s13  ;;  %p9081_p9 = scmp.lt.u32.totalorder %s15835_s29, %s15888_s11 }
 0xa66   : > { %p9082_p10 = scmp.lt.u32.totalorder %s9080_s24, %s9076_s13  ;;  %p9084_p12 = scmp.lt.u32.totalorder %s9076_s13, %s15835_s29 }
 0xa67   : > { %p9078_p7 = pnand %p9077_p4, %p9234_p5 }
 0xa68   : > { %p9083_p11 = por %p9082_p10, %p9081_p9 }
 0xa69   : > { %p9079_p8 = pneg %p9078_p7 }
 0xa6a   : > { %p9085_p13 = por %p9084_p12, %p9083_p11 }
 0xa6c   : > { %p9086_p0 = pnand %p9085_p13, %p9079_p8 }
 0xa6e   : > { %9089 = shalt.err (!%p9086_p0)
}
 0xa6f   : > { %8752 = dma.vmem_to_hbm [thread:$0]  (%p9234_p5), %s15837_s22, 256, %s15835_s29, %s8064_s30  }
 0xa70 PF: > { %p8758_p1 = scmp.ge.s32.totalorder %s9124_s20, 2  ;;  %s8090_s0 = sand.u32 1, %s9112_s17  }
 0xa71   : > { %s8091_s12 = scalar_lea.sflag [#allocation3], %s8090_s0 }
 0xa72   : > { %p8755_p2 = pnand %p8758_p1, %p9238_p6 }
 0xa74   : > { %9107 = dma.done.wait (!%p8755_p2), %s8091_s12, 256  }
 0xa75   : > { %9109 = vsyncadd (!%p8755_p2), %s8091_s12, 4294967040  ;;  %p21_p3 = scmp.ge.s32.totalorder %s9221_s23, 4   ;;  %s16681_s17 = smov %s9116_s18 }
 0xa76   : > { %s16682_s18 = smov %s9120_s19  ;;  %s16683_s19 = smov %s9232_s26 }
 0xa77   : > { %s16684_s20 = smov %s9221_s23  ;;  %23 = sbr.rel (!%p21_p3) target bundleno = 5 (0x5), region = 99 }
 0xa7e   :  { %8096 = vsyncpa [#allocation3], 1 }
 0xa7f   :  { %8098 = vsyncpa [#allocation3 + $0x1], 1 }

</bundles_post_ra>
